<compile_context>
chip_gen: v7x
topology: tpu7x:2x2x1
jax: 0.10.0
libtpu: 0.0.40
codegen_flags: <defaults>
</compile_context>

<pallas_src>
import functools

import jax
import jax.numpy as jnp
from jax.experimental import pallas as pl
from jax.experimental.pallas import tpu as pltpu

IN_DIM = 1024
H1_DIM = 512
H2_DIM = 256
OUT_DIM = 1
OUT_PAD = 128   # lane-dense padded width for the last layer


def _discriminator_kernel(x_ref, w1_ref, b1_ref, w2_ref, b2_ref, w3_ref, b3_ref,
                          o_ref):
    # Fused 3-layer MLP. Weights are one full block each (resident across the
    # whole grid); x/o are tiled along the batch.
    x = x_ref[...]                                                # [tb, 1024]
    h1 = jnp.dot(x, w1_ref[...], preferred_element_type=jnp.float32)
    h1 = jnp.maximum(h1 + b1_ref[...], 0.0)                       # [tb, 512] f32
    h1 = h1.astype(w2_ref.dtype)                                  # back to MXU dtype
    h2 = jnp.dot(h1, w2_ref[...], preferred_element_type=jnp.float32)
    h2 = jnp.maximum(h2 + b2_ref[...], 0.0)                       # [tb, 256] f32
    h2 = h2.astype(w3_ref.dtype)
    logits = jnp.dot(h2, w3_ref[...], preferred_element_type=jnp.float32)
    logits = logits + b3_ref[...]                                 # [tb, 128] (col 0 is real)
    o_ref[...] = jax.nn.sigmoid(logits).astype(o_ref.dtype)


@functools.partial(jax.jit, static_argnames=("block_b", "use_bf16"))
def discriminator_forward(x, params, block_b=512, use_bf16=True):
    w1, b1, w2, b2, w3, b3 = params
    orig_dtype = x.dtype
    B = x.shape[0]

    # Pad the final layer to 128 output lanes (zeros), slice col 0 afterwards.
    w3p = jnp.pad(w3, ((0, 0), (0, OUT_PAD - OUT_DIM)))
    b3p = jnp.pad(b3, ((0, 0), (0, OUT_PAD - OUT_DIM)))

    # Pad the batch to a multiple of block_b (tail rows are sliced off below).
    num_tiles = pl.cdiv(B, block_b)
    Bp = num_tiles * block_b
    if Bp != B:
        x = jnp.pad(x, ((0, Bp - B), (0, 0)))

    # bf16 MXU inputs (halves x HBM traffic & weight VMEM); f32 epilogue.
    mxu_dtype = jnp.bfloat16 if use_bf16 else x.dtype
    xk = x.astype(mxu_dtype)
    w1k = w1.astype(mxu_dtype)
    w2k = w2.astype(mxu_dtype)
    w3k = w3p.astype(mxu_dtype)
    b1k = b1.astype(jnp.float32)
    b2k = b2.astype(jnp.float32)
    b3k = b3p.astype(jnp.float32)

    full = lambda i: (0, 0)  # weights/biases: single block reused every step

    flops = 2 * Bp * (IN_DIM * H1_DIM + H1_DIM * H2_DIM + H2_DIM * OUT_PAD)
    bytes_accessed = (
        xk.size * xk.dtype.itemsize
        + w1k.size * w1k.dtype.itemsize
        + w2k.size * w2k.dtype.itemsize
        + w3k.size * w3k.dtype.itemsize
        + (b1k.size + b2k.size + b3k.size) * 4
        + Bp * OUT_PAD * 4)

    out = pl.pallas_call(
        _discriminator_kernel,
        out_shape=jax.ShapeDtypeStruct((Bp, OUT_PAD), jnp.float32),
        grid_spec=pltpu.PrefetchScalarGridSpec(
            num_scalar_prefetch=0,
            grid=(num_tiles,),
            in_specs=[
                pl.BlockSpec((block_b, IN_DIM), lambda i: (i, 0)),   # x tile
                pl.BlockSpec((IN_DIM, H1_DIM), full),                # W1
                pl.BlockSpec((1, H1_DIM), full),                     # b1
                pl.BlockSpec((H1_DIM, H2_DIM), full),                # W2
                pl.BlockSpec((1, H2_DIM), full),                     # b2
                pl.BlockSpec((H2_DIM, OUT_PAD), full),               # W3 (padded)
                pl.BlockSpec((1, OUT_PAD), full),                    # b3 (padded)
            ],
            out_specs=pl.BlockSpec((block_b, OUT_PAD), lambda i: (i, 0)),
        ),
        compiler_params=pltpu.CompilerParams(
            dimension_semantics=("parallel",)),   # megacore sharding on v7x
        cost_estimate=pl.CostEstimate(
            flops=flops,
            transcendentals=Bp * OUT_PAD,
            bytes_accessed=bytes_accessed),
    )(xk, w1k, b1k, w2k, b2k, w3k, b3k)

    return out[:B, :OUT_DIM].astype(orig_dtype)


def init_params(key, dtype=jnp.float32):
    """Mimics PyTorch nn.Linear default init: U(-1/sqrt(fan_in), 1/sqrt(fan_in)).
    Weights stored as [in_features, out_features] (transposed vs PyTorch)."""
    dims = [(IN_DIM, H1_DIM), (H1_DIM, H2_DIM), (H2_DIM, OUT_DIM)]
    params = []
    for fan_in, fan_out in dims:
        key, kw, kb = jax.random.split(key, 3)
        bound = 1.0 / (fan_in ** 0.5)
        w = jax.random.uniform(kw, (fan_in, fan_out), dtype, -bound, bound)
        b = jax.random.uniform(kb, (1, fan_out), dtype, -bound, bound)
        params.extend([w, b])
    return tuple(params)


def reference_forward_f32(x, params):
    w1, b1, w2, b2, w3, b3 = params
    h1 = jnp.maximum(x @ w1 + b1, 0.0)
    h2 = jnp.maximum(h1 @ w2 + b2, 0.0)
    return jax.nn.sigmoid(h2 @ w3 + b3)


def reference_forward_matched(x, params, use_bf16=True):
    """Same bf16-in / f32-accum numerics as the kernel, in plain JAX."""
    w1, b1, w2, b2, w3, b3 = params
    dt = jnp.bfloat16 if use_bf16 else x.dtype
    h1 = jnp.dot(x.astype(dt), w1.astype(dt), preferred_element_type=jnp.float32)
    h1 = jnp.maximum(h1 + b1, 0.0)
    h2 = jnp.dot(h1.astype(dt), w2.astype(dt), preferred_element_type=jnp.float32)
    h2 = jnp.maximum(h2 + b2, 0.0)
    logits = jnp.dot(h2.astype(dt), w3.astype(dt),
                     preferred_element_type=jnp.float32) + b3
    return jax.nn.sigmoid(logits)


if __name__ == "__main__":
    key = jax.random.PRNGKey(0)
    key, kx = jax.random.split(key)

    B = 64  # deliberately NOT a multiple of block_b -> exercises batch padding
    x = jax.random.normal(kx, (B, IN_DIM), jnp.float32)
    params = init_params(key)

    out = discriminator_forward(x, params)
    out = jax.block_until_ready(out)
    assert out.shape == (B, OUT_DIM), out.shape

    ref_matched = reference_forward_matched(x, params)
    ref_f32 = reference_forward_f32(x, params)
    assert jnp.allclose(out, ref_matched, atol=3e-3, rtol=0), "mismatch vs bf16 reference"
    assert jnp.allclose(out, ref_f32, atol=2e-2, rtol=0), "mismatch vs f32 reference"

    print("KERNEL_OK")
</pallas_src>

<mosaic_0001>
module attributes {stable_mosaic.version = 11 : i64} {
  func.func @_discriminator_kernel(%arg0: i32, %arg1: memref<512x1024xbf16, #tpu.memory_space<vmem>>, %arg2: memref<1024x512xbf16, #tpu.memory_space<vmem>>, %arg3: memref<1x512xf32, #tpu.memory_space<vmem>>, %arg4: memref<512x256xbf16, #tpu.memory_space<vmem>>, %arg5: memref<1x256xf32, #tpu.memory_space<vmem>>, %arg6: memref<256x128xbf16, #tpu.memory_space<vmem>>, %arg7: memref<1x128xf32, #tpu.memory_space<vmem>>, %arg8: memref<512x128xf32, #tpu.memory_space<vmem>>) attributes {dimension_semantics = [#tpu.dimension_semantics<parallel>], iteration_bounds = array<i64: 1>, scalar_prefetch = 0 : i64, scratch_operands = 0 : i64, tpu.core_type = #tpu.core_type<tc>, window_params = [{transform_indices = @transform_0, window_bounds = array<i64: 512, 1024>}, {pipeline_mode = #tpu.pipeline_mode<synchronous>, transform_indices = @transform_1, window_bounds = array<i64: 1024, 512>}, {pipeline_mode = #tpu.pipeline_mode<synchronous>, transform_indices = @transform_2, window_bounds = array<i64: 1, 512>}, {pipeline_mode = #tpu.pipeline_mode<synchronous>, transform_indices = @transform_3, window_bounds = array<i64: 512, 256>}, {pipeline_mode = #tpu.pipeline_mode<synchronous>, transform_indices = @transform_4, window_bounds = array<i64: 1, 256>}, {pipeline_mode = #tpu.pipeline_mode<synchronous>, transform_indices = @transform_5, window_bounds = array<i64: 256, 128>}, {pipeline_mode = #tpu.pipeline_mode<synchronous>, transform_indices = @transform_6, window_bounds = array<i64: 1, 128>}, {transform_indices = @transform_7, window_bounds = array<i64: 512, 128>}]} {
    %c0 = arith.constant 0 : index
    %c0_0 = arith.constant 0 : index
    %0 = vector.load %arg1[%c0, %c0_0] : memref<512x1024xbf16, #tpu.memory_space<vmem>>, vector<512x1024xbf16>
    %c0_1 = arith.constant 0 : index
    %c0_2 = arith.constant 0 : index
    %1 = vector.load %arg2[%c0_1, %c0_2] : memref<1024x512xbf16, #tpu.memory_space<vmem>>, vector<1024x512xbf16>
    %cst = arith.constant dense<0.000000e+00> : vector<512x512xf32>
    %2 = tpu.matmul %0, %1, %cst {dimension_numbers = #tpu.dot_dimension_numbers<[1], [0], [0], [1], [0, 0, 1, 1], [], []>} : vector<512x1024xbf16>, vector<1024x512xbf16>, vector<512x512xf32> -> vector<512x512xf32>
    %c0_3 = arith.constant 0 : index
    %c0_4 = arith.constant 0 : index
    %3 = vector.load %arg3[%c0_3, %c0_4] : memref<1x512xf32, #tpu.memory_space<vmem>>, vector<1x512xf32>
    %4 = vector.broadcast %3 : vector<1x512xf32> to vector<512x512xf32>
    %5 = arith.addf %2, %4 : vector<512x512xf32>
    %cst_5 = arith.constant 0.000000e+00 : f32
    %6 = vector.broadcast %cst_5 : f32 to vector<512x512xf32>
    %7 = arith.maximumf %5, %6 : vector<512x512xf32>
    %8 = arith.truncf %7 : vector<512x512xf32> to vector<512x512xbf16>
    %c0_6 = arith.constant 0 : index
    %c0_7 = arith.constant 0 : index
    %9 = vector.load %arg4[%c0_6, %c0_7] : memref<512x256xbf16, #tpu.memory_space<vmem>>, vector<512x256xbf16>
    %cst_8 = arith.constant dense<0.000000e+00> : vector<512x256xf32>
    %10 = tpu.matmul %8, %9, %cst_8 {dimension_numbers = #tpu.dot_dimension_numbers<[1], [0], [0], [1], [0, 0, 1, 1], [], []>} : vector<512x512xbf16>, vector<512x256xbf16>, vector<512x256xf32> -> vector<512x256xf32>
    %c0_9 = arith.constant 0 : index
    %c0_10 = arith.constant 0 : index
    %11 = vector.load %arg5[%c0_9, %c0_10] : memref<1x256xf32, #tpu.memory_space<vmem>>, vector<1x256xf32>
    %12 = vector.broadcast %11 : vector<1x256xf32> to vector<512x256xf32>
    %13 = arith.addf %10, %12 : vector<512x256xf32>
    %cst_11 = arith.constant 0.000000e+00 : f32
    %14 = vector.broadcast %cst_11 : f32 to vector<512x256xf32>
    %15 = arith.maximumf %13, %14 : vector<512x256xf32>
    %16 = arith.truncf %15 : vector<512x256xf32> to vector<512x256xbf16>
    %c0_12 = arith.constant 0 : index
    %c0_13 = arith.constant 0 : index
    %17 = vector.load %arg6[%c0_12, %c0_13] : memref<256x128xbf16, #tpu.memory_space<vmem>>, vector<256x128xbf16>
    %cst_14 = arith.constant dense<0.000000e+00> : vector<512x128xf32>
    %18 = tpu.matmul %16, %17, %cst_14 {dimension_numbers = #tpu.dot_dimension_numbers<[1], [0], [0], [1], [0, 0, 1, 1], [], []>} : vector<512x256xbf16>, vector<256x128xbf16>, vector<512x128xf32> -> vector<512x128xf32>
    %c0_15 = arith.constant 0 : index
    %c0_16 = arith.constant 0 : index
    %19 = vector.load %arg7[%c0_15, %c0_16] : memref<1x128xf32, #tpu.memory_space<vmem>>, vector<1x128xf32>
    %20 = vector.broadcast %19 : vector<1x128xf32> to vector<512x128xf32>
    %21 = arith.addf %18, %20 : vector<512x128xf32>
    %22 = arith.negf %21 : vector<512x128xf32>
    %23 = math.exp %22 : vector<512x128xf32>
    %cst_17 = arith.constant 1.000000e+00 : f32
    %24 = vector.broadcast %cst_17 : f32 to vector<512x128xf32>
    %25 = arith.addf %24, %23 : vector<512x128xf32>
    %26 = arith.divf %24, %25 : vector<512x128xf32>
    %c0_18 = arith.constant 0 : index
    %c0_19 = arith.constant 0 : index
    %27 = vector.load %arg8[%c0_18, %c0_19] : memref<512x128xf32, #tpu.memory_space<vmem>>, vector<512x128xf32>
    tpu.vector_store %arg8[%c0_18, %c0_19], %26 {strides = array<i32>} : memref<512x128xf32, #tpu.memory_space<vmem>>, vector<512x128xf32>,
    return
  }
  func.func @transform_0(%arg0: i32) -> (i32, i32) {
    %c0_i32 = arith.constant 0 : i32
    %c0_i32_0 = arith.constant 0 : i32
    return %arg0, %c0_i32 : i32, i32
  }
  func.func @transform_1(%arg0: i32) -> (i32, i32) {
    %c0_i32 = arith.constant 0 : i32
    %c0_i32_0 = arith.constant 0 : i32
    %c0_i32_1 = arith.constant 0 : i32
    return %c0_i32, %c0_i32_0 : i32, i32
  }
  func.func @transform_2(%arg0: i32) -> (i32, i32) {
    %c0_i32 = arith.constant 0 : i32
    %c0_i32_0 = arith.constant 0 : i32
    %c0_i32_1 = arith.constant 0 : i32
    return %c0_i32, %c0_i32_0 : i32, i32
  }
  func.func @transform_3(%arg0: i32) -> (i32, i32) {
    %c0_i32 = arith.constant 0 : i32
    %c0_i32_0 = arith.constant 0 : i32
    %c0_i32_1 = arith.constant 0 : i32
    return %c0_i32, %c0_i32_0 : i32, i32
  }
  func.func @transform_4(%arg0: i32) -> (i32, i32) {
    %c0_i32 = arith.constant 0 : i32
    %c0_i32_0 = arith.constant 0 : i32
    %c0_i32_1 = arith.constant 0 : i32
    return %c0_i32, %c0_i32_0 : i32, i32
  }
  func.func @transform_5(%arg0: i32) -> (i32, i32) {
    %c0_i32 = arith.constant 0 : i32
    %c0_i32_0 = arith.constant 0 : i32
    %c0_i32_1 = arith.constant 0 : i32
    return %c0_i32, %c0_i32_0 : i32, i32
  }
  func.func @transform_6(%arg0: i32) -> (i32, i32) {
    %c0_i32 = arith.constant 0 : i32
    %c0_i32_0 = arith.constant 0 : i32
    %c0_i32_1 = arith.constant 0 : i32
    return %c0_i32, %c0_i32_0 : i32, i32
  }
  func.func @transform_7(%arg0: i32) -> (i32, i32) {
    %c0_i32 = arith.constant 0 : i32
    %c0_i32_0 = arith.constant 0 : i32
    return %arg0, %c0_i32 : i32, i32
  }
}

</mosaic_0001>

<bundles_post_ra>
// kernel: discriminator_forward.1
= control target key start
LH: loop header
LB: loop body
LE: loop exit
PB: predicated region body
PF: predicated region fallthrough
CT: control target
= control target key end

     0   :  { %s15324_s1 = inlined_call_operand.vmem [shape: bf16[1024,512], index: 1, kind: input, shape index: {}]   ;;  %s15325_s0 = inlined_call_operand.vmem [shape: bf16[512,1024], index: 0, kind: input, shape index: {}]   ;;  %s15326_s3 = inlined_call_operand.vmem [shape: bf16[512,256], index: 3, kind: input, shape index: {}]   ;;  %s15327_s2 = inlined_call_operand.vmem [shape: f32[1,512], index: 2, kind: input, shape index: {}]   ;;  %s15328_s5 = inlined_call_operand.vmem [shape: bf16[256,128], index: 5, kind: input, shape index: {}]   ;;  %s15329_s4 = inlined_call_operand.vmem [shape: f32[1,256], index: 4, kind: input, shape index: {}]   ;;  %s15330_s6 = inlined_call_operand.vmem [shape: f32[1,128], index: 6, kind: input, shape index: {}]   ;;  %s15331_s7 = inlined_call_operand.vmem [shape: f32[512,128], index: 7, kind: output, shape index: {}]  }
   0x1   :  { %v10469_v0 = vld [vmem:[%s15324_s1 + $0x4] ss:$16 sps:$4 sm:$0xff]   ;;  %v10471_v1 = vld [vmem:[%s15324_s1] ss:$16 sps:$4 sm:$0xff]   ;;  %v10534_v42 = vld [vmem:[%s15324_s1 + $0xc] ss:$16 sps:$4 sm:$0xff]  }
   0x2   :  { %3121 = vmatprep.subr.bf16.mxu0 %v10469_v0  ;;  %9156 = vmatprep.subr.bf16.mxu1 %v10469_v0  ;;  %v10472_v2 = vld [vmem:[%s15324_s1 + $0x24] ss:$16 sps:$4 sm:$0xff]   ;;  %v10474_v3 = vld [vmem:[%s15324_s1 + $0x20] ss:$16 sps:$4 sm:$0xff]   ;;  %v10532_v51 = vld [vmem:[%s15324_s1 + $0x8] ss:$16 sps:$4 sm:$0xff]  }
   0x3   :  { %3122 = vmatpush1.bf16.msra.mxu0 %v10471_v1  ;;  %9172 = vmatpush1.bf16.msra.mxu1 %v10471_v1  ;;  %v10475_v4 = vld [vmem:[%s15324_s1 + $0x44] ss:$16 sps:$4 sm:$0xff]   ;;  %v10477_v5 = vld [vmem:[%s15324_s1 + $0x40] ss:$16 sps:$4 sm:$0xff]   ;;  %v10540_v54 = vld [vmem:[%s15324_s1 + $0x2c] ss:$16 sps:$4 sm:$0xff]  }
   0x4   :  { %3123 = vmatprep.subr.bf16.mxu0 %v10472_v2  ;;  %9157 = vmatprep.subr.bf16.mxu1 %v10472_v2  ;;  %v10478_v6 = vld [vmem:[%s15324_s1 + $0x64] ss:$16 sps:$4 sm:$0xff]   ;;  %v10480_v7 = vld [vmem:[%s15324_s1 + $0x60] ss:$16 sps:$4 sm:$0xff]   ;;  %v10538_v58 = vld [vmem:[%s15324_s1 + $0x28] ss:$16 sps:$4 sm:$0xff]  }
   0x5   :  { %v10481_v8 = vld [vmem:[%s15324_s1 + $0x84] ss:$16 sps:$4 sm:$0xff]   ;;  %v10483_v9 = vld [vmem:[%s15324_s1 + $0x80] ss:$16 sps:$4 sm:$0xff]   ;;  %v10546_v1 = vld [vmem:[%s15324_s1 + $0x4c] ss:$16 sps:$4 sm:$0xff]  }
   0x6   :  { %v10484_v10 = vld [vmem:[%s15324_s1 + $0xa4] ss:$16 sps:$4 sm:$0xff]   ;;  %v10486_v11 = vld [vmem:[%s15324_s1 + $0xa0] ss:$16 sps:$4 sm:$0xff]   ;;  %v10544_v2 = vld [vmem:[%s15324_s1 + $0x48] ss:$16 sps:$4 sm:$0xff]  }
   0x7   :  { %3124 = vmatpush1.bf16.msra.mxu0 %v10474_v3  ;;  %9173 = vmatpush1.bf16.msra.mxu1 %v10474_v3  ;;  %v10487_v12 = vld [vmem:[%s15324_s1 + $0xc4] ss:$16 sps:$4 sm:$0xff]   ;;  %v10489_v18 = vld [vmem:[%s15324_s1 + $0xc0] ss:$16 sps:$4 sm:$0xff]  }
   0x8   :  { %3125 = vmatprep.subr.bf16.mxu0 %v10475_v4  ;;  %9158 = vmatprep.subr.bf16.mxu1 %v10475_v4  ;;  %v11306_v13 = vld [vmem:[%s15325_s0] sm:$0xff] }
   0x9   :  { %v11311_v14 = vld [vmem:[%s15325_s0 + $0x20] sm:$0xff] }
   0xa   :  { %v11315_v15 = vcombine.high %v11306_v13, %v11311_v14  ;;  %v11320_v16 = vld [vmem:[%s15325_s0 + $0x400] sm:$0xff]  ;;  %v11410_v44 = vcombine.low %v11306_v13, %v11311_v14 }
   0xb   :  { %3126 = vmatpush1.bf16.msra.mxu0 %v10477_v5  ;;  %9174 = vmatpush1.bf16.msra.mxu1 %v10477_v5  ;;  %v11325_v17 = vld [vmem:[%s15325_s0 + $0x420] sm:$0xff]  ;;  %v10552_v5 = vld [vmem:[%s15324_s1 + $0x6c] ss:$16 sps:$4 sm:$0xff]  }
   0xc   :  { %3127 = vmatprep.subr.bf16.mxu0 %v10478_v6  ;;  %9159 = vmatprep.subr.bf16.mxu1 %v10478_v6  ;;  %v11332_v19 = vcombine.high %v11320_v16, %v11325_v17  ;;  %v10490_v20 = vld [vmem:[%s15324_s1 + $0xe4] ss:$16 sps:$4 sm:$0xff]   ;;  %v10492_v21 = vld [vmem:[%s15324_s1 + $0xe0] ss:$16 sps:$4 sm:$0xff]   ;;  %v11414_v45 = vcombine.low %v11320_v16, %v11325_v17 }
   0xd   :  { %3153 = vmatprep.mubr.bf16.mxu0 %v11315_v15  ;;  %v10493_v22 = vld [vmem:[%s15324_s1 + $0x104] ss:$16 sps:$4 sm:$0xff]   ;;  %v10495_v23 = vld [vmem:[%s15324_s1 + $0x100] ss:$16 sps:$4 sm:$0xff]  }
   0xe   :  { %3313 = vmatprep.mubr.bf16.mxu1 %v11332_v19  ;;  %v10496_v24 = vld [vmem:[%s15324_s1 + $0x124] ss:$16 sps:$4 sm:$0xff]   ;;  %v10498_v25 = vld [vmem:[%s15324_s1 + $0x120] ss:$16 sps:$4 sm:$0xff]  }
   0xf   :  { %3128 = vmatpush1.bf16.msra.mxu0 %v10480_v7  ;;  %9175 = vmatpush1.bf16.msra.mxu1 %v10480_v7  ;;  %v10499_v26 = vld [vmem:[%s15324_s1 + $0x144] ss:$16 sps:$4 sm:$0xff]   ;;  %v10501_v27 = vld [vmem:[%s15324_s1 + $0x140] ss:$16 sps:$4 sm:$0xff]  }
  0x10   :  { %3129 = vmatprep.subr.bf16.mxu0 %v10481_v8  ;;  %9160 = vmatprep.subr.bf16.mxu1 %v10481_v8  ;;  %v10502_v28 = vld [vmem:[%s15324_s1 + $0x164] ss:$16 sps:$4 sm:$0xff]   ;;  %v10504_v29 = vld [vmem:[%s15324_s1 + $0x160] ss:$16 sps:$4 sm:$0xff]  }
  0x11   :  { %v10505_v30 = vld [vmem:[%s15324_s1 + $0x184] ss:$16 sps:$4 sm:$0xff]   ;;  %v10507_v31 = vld [vmem:[%s15324_s1 + $0x180] ss:$16 sps:$4 sm:$0xff]  }
  0x12   :  { %v10508_v32 = vld [vmem:[%s15324_s1 + $0x1a4] ss:$16 sps:$4 sm:$0xff]   ;;  %v10510_v33 = vld [vmem:[%s15324_s1 + $0x1a0] ss:$16 sps:$4 sm:$0xff]  }
  0x13   :  { %3130 = vmatpush1.bf16.msra.mxu0 %v10483_v9  ;;  %9176 = vmatpush1.bf16.msra.mxu1 %v10483_v9  ;;  %v10511_v34 = vld [vmem:[%s15324_s1 + $0x1c4] ss:$16 sps:$4 sm:$0xff]   ;;  %v10513_v35 = vld [vmem:[%s15324_s1 + $0x1c0] ss:$16 sps:$4 sm:$0xff]  }
  0x14   :  { %3131 = vmatprep.subr.bf16.mxu0 %v10484_v10  ;;  %9161 = vmatprep.subr.bf16.mxu1 %v10484_v10  ;;  %v10514_v36 = vld [vmem:[%s15324_s1 + $0x1e4] ss:$16 sps:$4 sm:$0xff]   ;;  %v10516_v37 = vld [vmem:[%s15324_s1 + $0x1e0] ss:$16 sps:$4 sm:$0xff]   ;;  %v10550_v10 = vld [vmem:[%s15324_s1 + $0x68] ss:$16 sps:$4 sm:$0xff]  }
  0x15   :  { %v10519_v38 = vld [vmem:[%s15324_s1 + $0x204] ss:$16 sps:$4 sm:$0xff]   ;;  %v10517_v46 = vld [vmem:[%s15324_s1 + $0x200] ss:$16 sps:$4 sm:$0xff]  }
  0x16   :  { %v35_v39 = vld [vmem:[%s15325_s0 + $0x40] sm:$0xff] }
  0x17   :  { %3132 = vmatpush1.bf16.msra.mxu0 %v10486_v11  ;;  %9177 = vmatpush1.bf16.msra.mxu1 %v10486_v11  ;;  %v39_v40 = vld [vmem:[%s15325_s0 + $0x60] sm:$0xff] }
  0x18   :  { %3133 = vmatprep.subr.bf16.mxu0 %v10487_v12  ;;  %9162 = vmatprep.subr.bf16.mxu1 %v10487_v12  ;;  %v163_v41 = vld [vmem:[%s15325_s0 + $0x440] sm:$0xff]  ;;  %v11419_v47 = vcombine.high %v35_v39, %v39_v40  ;;  %v11457_v59 = vcombine.low %v35_v39, %v39_v40 }
  0x19   :  { %v167_v43 = vld [vmem:[%s15325_s0 + $0x460] sm:$0xff] }
  0x1a   :  { %v11421_v48 = vcombine.high %v163_v41, %v167_v43  ;;  %v10522_v49 = vld [vmem:[%s15324_s1 + $0x224] ss:$16 sps:$4 sm:$0xff]   ;;  %v10520_v50 = vld [vmem:[%s15324_s1 + $0x220] ss:$16 sps:$4 sm:$0xff]   ;;  %v11459_v60 = vcombine.low %v163_v41, %v167_v43 }
  0x1b   :  { %3134 = vmatpush1.bf16.msra.mxu0 %v10489_v18  ;;  %9178 = vmatpush1.bf16.msra.mxu1 %v10489_v18  ;;  %v43_v52 = vld [vmem:[%s15325_s0 + $0x80] sm:$0xff]  ;;  %v10558_v18 = vld [vmem:[%s15324_s1 + $0x8c] ss:$16 sps:$4 sm:$0xff]  }
  0x1c   :  { %3135 = vmatprep.subr.bf16.mxu0 %v10490_v20  ;;  %9163 = vmatprep.subr.bf16.mxu1 %v10490_v20  ;;  %v47_v53 = vld [vmem:[%s15325_s0 + $0xa0] sm:$0xff]  ;;  %v10556_v20 = vld [vmem:[%s15324_s1 + $0x88] ss:$16 sps:$4 sm:$0xff]  }
  0x1d   :  { %v171_v55 = vld [vmem:[%s15325_s0 + $0x480] sm:$0xff]  ;;  %v11461_v61 = vcombine.high %v43_v52, %v47_v53  ;;  %v11505_v11 = vcombine.low %v43_v52, %v47_v53  ;;  %v10582_v52 = vld [vmem:[%s15324_s1 + $0x10c] ss:$16 sps:$4 sm:$0xff]  }
  0x1e   :  { %v175_v56 = vld [vmem:[%s15325_s0 + $0x4a0] sm:$0xff] }
  0x1f   :  { %3136 = vmatpush1.bf16.msra.mxu0 %v10492_v21  ;;  %9179 = vmatpush1.bf16.msra.mxu1 %v10492_v21  ;;  %v10525_v57 = vld [vmem:[%s15324_s1 + $0x244] ss:$16 sps:$4 sm:$0xff]   ;;  %v11463_v62 = vcombine.high %v171_v55, %v175_v56  ;;  %v10523_v63 = vld [vmem:[%s15324_s1 + $0x240] ss:$16 sps:$4 sm:$0xff]   ;;  %v11507_v12 = vcombine.low %v171_v55, %v175_v56  ;;  %v10580_v56 = vld [vmem:[%s15324_s1 + $0x108] ss:$16 sps:$4 sm:$0xff]  }
  0x20   :  { %3137 = vmatprep.subr.bf16.mxu0 %v10493_v22  ;;  %9164 = vmatprep.subr.bf16.mxu1 %v10493_v22  ;;  %v10528_v0 = vld [vmem:[%s15324_s1 + $0x264] ss:$16 sps:$4 sm:$0xff]   ;;  %v10526_v8 = vld [vmem:[%s15324_s1 + $0x260] ss:$16 sps:$4 sm:$0xff]  }
  0x21   :  { %v51_v3 = vld [vmem:[%s15325_s0 + $0xc0] sm:$0xff] }
  0x22   :  { %v55_v4 = vld [vmem:[%s15325_s0 + $0xe0] sm:$0xff] }
  0x23   :  { %3138 = vmatpush1.bf16.msra.mxu0 %v10495_v23  ;;  %9180 = vmatpush1.bf16.msra.mxu1 %v10495_v23  ;;  %v179_v6 = vld [vmem:[%s15325_s0 + $0x4c0] sm:$0xff]  ;;  %v11509_v13 = vcombine.high %v51_v3, %v55_v4  ;;  %v10564_v23 = vld [vmem:[%s15324_s1 + $0xac] ss:$16 sps:$4 sm:$0xff]  }
  0x24   :  { %3139 = vmatprep.subr.bf16.mxu0 %v10496_v24  ;;  %9165 = vmatprep.subr.bf16.mxu1 %v10496_v24  ;;  %v183_v7 = vld [vmem:[%s15325_s0 + $0x4e0] sm:$0xff] }
  0x25   :  { %v10531_v9 = vld [vmem:[%s15324_s1 + $0x284] ss:$16 sps:$4 sm:$0xff]   ;;  %v11511_v14 = vcombine.high %v179_v6, %v183_v7  ;;  %v10529_v16 = vld [vmem:[%s15324_s1 + $0x280] ss:$16 sps:$4 sm:$0xff]  }
  0x26   :  { %v10537_v17 = vld [vmem:[%s15324_s1 + $0x2a4] ss:$16 sps:$4 sm:$0xff]   ;;  %v10547_v41 = vld [vmem:[%s15324_s1 + $0x2e0] ss:$16 sps:$4 sm:$0xff]  }
  0x27   :  { %3140 = vmatpush1.bf16.msra.mxu0 %v10498_v25  ;;  %9181 = vmatpush1.bf16.msra.mxu1 %v10498_v25  ;;  %v59_v21 = vld [vmem:[%s15325_s0 + $0x100] sm:$0xff] }
  0x28   :  { %3141 = vmatprep.subr.bf16.mxu0 %v10499_v26  ;;  %9166 = vmatprep.subr.bf16.mxu1 %v10499_v26  ;;  %v63_v22 = vld [vmem:[%s15325_s0 + $0x120] sm:$0xff] }
  0x29   :  { %v187_v24 = vld [vmem:[%s15325_s0 + $0x500] sm:$0xff] }
  0x2a   :  { %v191_v25 = vld [vmem:[%s15325_s0 + $0x520] sm:$0xff] }
  0x2b   :  { %3142 = vmatpush1.bf16.msra.mxu0 %v10501_v27  ;;  %9182 = vmatpush1.bf16.msra.mxu1 %v10501_v27  ;;  %v10535_v26 = vld [vmem:[%s15324_s1 + $0x2a0] ss:$16 sps:$4 sm:$0xff]   ;;  %v10543_v27 = vld [vmem:[%s15324_s1 + $0x2c4] ss:$16 sps:$4 sm:$0xff]  }
  0x2c   :  { %3143 = vmatprep.subr.bf16.mxu0 %v10502_v28  ;;  %9167 = vmatprep.subr.bf16.mxu1 %v10502_v28  ;;  %v10562_v28 = vld [vmem:[%s15324_s1 + $0xa8] ss:$16 sps:$4 sm:$0xff]   ;;  %v195_v39 = vld [vmem:[%s15325_s0 + $0x540] sm:$0xff] }
  0x2d   :  { %v199_v40 = vld [vmem:[%s15325_s0 + $0x560] sm:$0xff] }
  0x2e   :  { %v10555_v43 = vld [vmem:[%s15324_s1 + $0x304] ss:$16 sps:$4 sm:$0xff]  }
  0x2f   :  { %3144 = vmatpush1.bf16.msra.mxu0 %v10504_v29  ;;  %9183 = vmatpush1.bf16.msra.mxu1 %v10504_v29  ;;  %v11553_v29 = vcombine.low %v51_v3, %v55_v4  ;;  %v10561_v55 = vld [vmem:[%s15324_s1 + $0x324] ss:$16 sps:$4 sm:$0xff]   ;;  %v10583_v4 = vld [vmem:[%s15324_s1 + $0x128] ss:$16 sps:$4 sm:$0xff]  }
  0x30   :  { %3145 = vmatprep.subr.bf16.mxu0 %v10505_v30  ;;  %9168 = vmatprep.subr.bf16.mxu1 %v10505_v30  ;;  %v11555_v30 = vcombine.low %v179_v6, %v183_v7  ;;  %v10567_v3 = vld [vmem:[%s15324_s1 + $0x344] ss:$16 sps:$4 sm:$0xff]   ;;  %v11651_v6 = vcombine.low %v195_v39, %v199_v40  ;;  %v10565_v7 = vld [vmem:[%s15324_s1 + $0x340] ss:$16 sps:$4 sm:$0xff]  }
  0x33   :  { %3146 = vmatpush1.bf16.msra.mxu0 %v10507_v31  ;;  %9184 = vmatpush1.bf16.msra.mxu1 %v10507_v31  ;;  %v11557_v31 = vcombine.high %v59_v21, %v63_v22 }
  0x34   :  { %3147 = vmatprep.subr.bf16.mxu0 %v10508_v32  ;;  %9169 = vmatprep.subr.bf16.mxu1 %v10508_v32  ;;  %v11559_v32 = vcombine.high %v187_v24, %v191_v25 }
  0x37   :  { %3148 = vmatpush1.bf16.msra.mxu0 %v10510_v33  ;;  %9185 = vmatpush1.bf16.msra.mxu1 %v10510_v33  ;;  %v10541_v33 = vld [vmem:[%s15324_s1 + $0x2c0] ss:$16 sps:$4 sm:$0xff]  }
  0x38   :  { %3149 = vmatprep.subr.bf16.mxu0 %v10511_v34  ;;  %9170 = vmatprep.subr.bf16.mxu1 %v10511_v34  ;;  %v10570_v34 = vld [vmem:[%s15324_s1 + $0xcc] ss:$16 sps:$4 sm:$0xff]  }
  0x3b   :  { %3150 = vmatpush1.bf16.msra.mxu0 %v10513_v35  ;;  %9186 = vmatpush1.bf16.msra.mxu1 %v10513_v35  ;;  %v10549_v35 = vld [vmem:[%s15324_s1 + $0x2e4] ss:$16 sps:$4 sm:$0xff]  }
  0x3c   :  { %3151 = vmatprep.subr.bf16.mxu0 %v10514_v36  ;;  %9171 = vmatprep.subr.bf16.mxu1 %v10514_v36  ;;  %v10568_v36 = vld [vmem:[%s15324_s1 + $0xc8] ss:$16 sps:$4 sm:$0xff]  }
  0x3f   :  { %3152 = vmatpush1.bf16.msra.mxu0 %v10516_v37  ;;  %9187 = vmatpush1.bf16.msra.mxu1 %v10516_v37  ;;  %v67_v37 = vld [vmem:[%s15325_s0 + $0x140] sm:$0xff] }
  0x40   :  { %3474 = vmatprep.subr.bf16.mxu0 %v10519_v38  ;;  %4533 = vmatprep.subr.bf16.mxu1 %v10534_v42  ;;  %v71_v38 = vld [vmem:[%s15325_s0 + $0x160] sm:$0xff]  ;;  %v10576_v42 = vld [vmem:[%s15324_s1 + $0xec] ss:$16 sps:$4 sm:$0xff]  }
  0x41   :  { %v11611_v53 = vcombine.high %v67_v37, %v71_v38 }
  0x42   :  { %3154 = vmatmul.mubr.bf16.vlgmr.msra.gmra.mrb[0].mxu0 %v11410_v44  ;;  %3314 = vmatmul.mubr.bf16.vlgmr.msra.gmra.mrb[0].mxu1 %v11414_v45 }
  0x43   :  { %3475 = vmatpush1.bf16.msra.mxu0 %v10517_v46  ;;  %3163 = vmatprep.mubr.bf16.mxu0 %v11419_v47  ;;  %v10574_v46 = vld [vmem:[%s15324_s1 + $0xe8] ss:$16 sps:$4 sm:$0xff]  }
  0x44   :  { %3323 = vmatprep.mubr.bf16.mxu1 %v11421_v48  ;;  %3476 = vmatprep.subr.bf16.mxu0 %v10522_v49  ;;  %v11601_v49 = vcombine.low %v59_v21, %v63_v22  ;;  %v211_v21 = vld [vmem:[%s15325_s0 + $0x5c0] sm:$0xff] }
  0x45   :  { %4534 = vmatpush1.bf16.msra.mxu1 %v10532_v51  ;;  %v10553_v51 = vld [vmem:[%s15324_s1 + $0x300] ss:$16 sps:$4 sm:$0xff]  }
  0x46   :  { %4535 = vmatprep.subr.bf16.mxu1 %v10540_v54  ;;  %v11613_v54 = vcombine.high %v195_v39, %v199_v40  ;;  %v215_v22 = vld [vmem:[%s15325_s0 + $0x5e0] sm:$0xff] }
  0x47   :  { %3477 = vmatpush1.bf16.msra.mxu0 %v10520_v50  ;;  %v11603_v50 = vcombine.low %v187_v24, %v191_v25  ;;  %v10594_v24 = vld [vmem:[%s15324_s1 + $0x16c] ss:$16 sps:$4 sm:$0xff]   ;;  %v10579_v25 = vld [vmem:[%s15324_s1 + $0x384] ss:$16 sps:$4 sm:$0xff]  }
  0x48   :  { %3478 = vmatprep.subr.bf16.mxu0 %v10525_v57  ;;  %v75_v57 = vld [vmem:[%s15325_s0 + $0x180] sm:$0xff] }
  0x49   :  { %4536 = vmatpush1.bf16.msra.mxu1 %v10538_v58  ;;  %v79_v58 = vld [vmem:[%s15325_s0 + $0x1a0] sm:$0xff] }
  0x4a   :  { %3164 = vmatmul.mubr.bf16.gmra.mrb[4].mxu0 %v11457_v59  ;;  %3324 = vmatmul.mubr.bf16.gmra.mrb[4].mxu1 %v11459_v60  ;;  %v91_v39 = vld [vmem:[%s15325_s0 + $0x200] sm:$0xff] }
  0x4b   :  { %3173 = vmatprep.mubr.bf16.mxu0 %v11461_v61  ;;  %3333 = vmatprep.mubr.bf16.mxu1 %v11463_v62  ;;  %v95_v40 = vld [vmem:[%s15325_s0 + $0x220] sm:$0xff] }
  0x4c   :  { %3479 = vmatpush1.bf16.msra.mxu0 %v10523_v63  ;;  %4537 = vmatprep.subr.bf16.mxu1 %v10546_v1  ;;  %v203_v63 = vld [vmem:[%s15325_s0 + $0x580] sm:$0xff]  ;;  %v10585_v1 = vld [vmem:[%s15324_s1 + $0x12c] ss:$16 sps:$4 sm:$0xff]  }
  0x4d   :  { %3480 = vmatprep.subr.bf16.mxu0 %v10528_v0  ;;  %4538 = vmatpush1.bf16.msra.mxu1 %v10544_v2  ;;  %v207_v0 = vld [vmem:[%s15325_s0 + $0x5a0] sm:$0xff] }
  0x4e   :  { %4539 = vmatprep.subr.bf16.mxu1 %v10552_v5  ;;  %v10559_v2 = vld [vmem:[%s15324_s1 + $0x320] ss:$16 sps:$4 sm:$0xff]   ;;  %v11649_v5 = vcombine.low %v67_v37, %v71_v38  ;;  %v10588_v37 = vld [vmem:[%s15324_s1 + $0x3a4] ss:$16 sps:$4 sm:$0xff]   ;;  %v10598_v38 = vld [vmem:[%s15324_s1 + $0x188] ss:$16 sps:$4 sm:$0xff]  }
  0x50   :  { %3481 = vmatpush1.bf16.msra.mxu0 %v10526_v8  ;;  %v10591_v8 = vld [vmem:[%s15324_s1 + $0x14c] ss:$16 sps:$4 sm:$0xff]  }
  0x51   :  { %3482 = vmatprep.subr.bf16.mxu0 %v10531_v9  ;;  %4540 = vmatpush1.bf16.msra.mxu1 %v10550_v10  ;;  %v11659_v9 = vcombine.high %v75_v57, %v79_v58  ;;  %v11661_v10 = vcombine.high %v203_v63, %v207_v0 }
  0x52   :  { %3174 = vmatmul.mubr.bf16.gmra.mrb[8].mxu0 %v11505_v11  ;;  %3334 = vmatmul.mubr.bf16.gmra.mrb[8].mxu1 %v11507_v12 }
  0x53   :  { %3183 = vmatprep.mubr.bf16.mxu0 %v11509_v13  ;;  %3343 = vmatprep.mubr.bf16.mxu1 %v11511_v14 }
  0x54   :  { %3483 = vmatpush1.bf16.msra.mxu0 %v10529_v16  ;;  %4541 = vmatprep.subr.bf16.mxu1 %v10558_v18  ;;  %v10573_v16 = vld [vmem:[%s15324_s1 + $0x364] ss:$16 sps:$4 sm:$0xff]  }
  0x55   :  { %3484 = vmatprep.subr.bf16.mxu0 %v10537_v17  ;;  %4542 = vmatpush1.bf16.msra.mxu1 %v10556_v20  ;;  %v10589_v17 = vld [vmem:[%s15324_s1 + $0x148] ss:$16 sps:$4 sm:$0xff]   ;;  %v83_v18 = vld [vmem:[%s15325_s0 + $0x1c0] sm:$0xff] }
  0x56   :  { %4543 = vmatprep.subr.bf16.mxu1 %v10564_v23  ;;  %v87_v20 = vld [vmem:[%s15325_s0 + $0x1e0] sm:$0xff] }
  0x57   :  { %v10571_v23 = vld [vmem:[%s15324_s1 + $0x360] ss:$16 sps:$4 sm:$0xff]  }
  0x58   :  { %3485 = vmatpush1.bf16.msra.mxu0 %v10535_v26  ;;  %v10592_v26 = vld [vmem:[%s15324_s1 + $0x168] ss:$16 sps:$4 sm:$0xff]  }
  0x59   :  { %3486 = vmatprep.subr.bf16.mxu0 %v10543_v27  ;;  %4544 = vmatpush1.bf16.msra.mxu1 %v10562_v28  ;;  %v11697_v27 = vcombine.low %v75_v57, %v79_v58  ;;  %v11699_v28 = vcombine.low %v203_v63, %v207_v0  ;;  %v10595_v57 = vld [vmem:[%s15324_s1 + $0x3c0] ss:$16 sps:$4 sm:$0xff]   ;;  %v10609_v58 = vld [vmem:[%s15324_s1 + $0x1cc] ss:$16 sps:$4 sm:$0xff]   ;;  %v11755_v63 = vcombine.high %v91_v39, %v95_v40 }
  0x5a   :  { %3184 = vmatmul.mubr.bf16.gmra.mrb[12].mxu0 %v11553_v29  ;;  %3344 = vmatmul.mubr.bf16.gmra.mrb[12].mxu1 %v11555_v30 }
  0x5b   :  { %3193 = vmatprep.mubr.bf16.mxu0 %v11557_v31  ;;  %3353 = vmatprep.mubr.bf16.mxu1 %v11559_v32 }
  0x5c   :  { %3487 = vmatpush1.bf16.msra.mxu0 %v10541_v33  ;;  %4545 = vmatprep.subr.bf16.mxu1 %v10570_v34  ;;  %v10577_v33 = vld [vmem:[%s15324_s1 + $0x380] ss:$16 sps:$4 sm:$0xff]   ;;  %v10600_v34 = vld [vmem:[%s15324_s1 + $0x18c] ss:$16 sps:$4 sm:$0xff]  }
  0x5d   :  { %3488 = vmatprep.subr.bf16.mxu0 %v10549_v35  ;;  %4546 = vmatpush1.bf16.msra.mxu1 %v10568_v36  ;;  %v11707_v35 = vcombine.high %v83_v18, %v87_v20  ;;  %v11709_v36 = vcombine.high %v211_v21, %v215_v22 }
  0x5e   :  { %4547 = vmatprep.subr.bf16.mxu1 %v10576_v42  ;;  %v223_v42 = vld [vmem:[%s15325_s0 + $0x620] sm:$0xff] }
  0x60   :  { %3489 = vmatpush1.bf16.msra.mxu0 %v10547_v41  ;;  %v219_v41 = vld [vmem:[%s15325_s0 + $0x600] sm:$0xff] }
  0x61   :  { %3490 = vmatprep.subr.bf16.mxu0 %v10555_v43  ;;  %4548 = vmatpush1.bf16.msra.mxu1 %v10574_v46  ;;  %v10603_v43 = vld [vmem:[%s15324_s1 + $0x1ac] ss:$16 sps:$4 sm:$0xff]   ;;  %v10586_v46 = vld [vmem:[%s15324_s1 + $0x3a0] ss:$16 sps:$4 sm:$0xff]   ;;  %v11757_v0 = vcombine.high %v219_v41, %v223_v42 }
  0x62   :  { %3194 = vmatmul.mubr.bf16.gmra.mrb[16].mxu0 %v11601_v49  ;;  %3354 = vmatmul.mubr.bf16.gmra.mrb[16].mxu1 %v11603_v50 }
  0x63   :  { %3203 = vmatprep.mubr.bf16.mxu0 %v11611_v53  ;;  %3363 = vmatprep.mubr.bf16.mxu1 %v11613_v54 }
  0x64   :  { %3491 = vmatpush1.bf16.msra.mxu0 %v10553_v51  ;;  %4549 = vmatprep.subr.bf16.mxu1 %v10582_v52  ;;  %v10597_v51 = vld [vmem:[%s15324_s1 + $0x3c4] ss:$16 sps:$4 sm:$0xff]   ;;  %v10601_v52 = vld [vmem:[%s15324_s1 + $0x1a8] ss:$16 sps:$4 sm:$0xff]  }
  0x65   :  { %3492 = vmatprep.subr.bf16.mxu0 %v10561_v55  ;;  %4550 = vmatpush1.bf16.msra.mxu1 %v10580_v56  ;;  %v11745_v55 = vcombine.low %v83_v18, %v87_v20  ;;  %v11747_v56 = vcombine.low %v211_v21, %v215_v22  ;;  %v10610_v18 = vld [vmem:[%s15324_s1 + $0x1e8] ss:$16 sps:$4 sm:$0xff]   ;;  %v10615_v20 = vld [vmem:[%s15324_s1 + $0x404] ss:$16 sps:$4 sm:$0xff]   ;;  %v11793_v21 = vcombine.low %v91_v39, %v95_v40 }
  0x66   :  { %4551 = vmatprep.subr.bf16.mxu1 %v10585_v1  ;;  %v10606_v1 = vld [vmem:[%s15324_s1 + $0x3e4] ss:$16 sps:$4 sm:$0xff]   ;;  %v11795_v22 = vcombine.low %v219_v41, %v223_v42 }
  0x67   :  { %v115_v42 = vld [vmem:[%s15325_s0 + $0x2c0] sm:$0xff] }
  0x68   :  { %3493 = vmatpush1.bf16.msra.mxu0 %v10559_v2  ;;  %v10607_v2 = vld [vmem:[%s15324_s1 + $0x1c8] ss:$16 sps:$4 sm:$0xff]  }
  0x69   :  { %3494 = vmatprep.subr.bf16.mxu0 %v10567_v3  ;;  %4552 = vmatpush1.bf16.msra.mxu1 %v10583_v4  ;;  %v99_v3 = vld [vmem:[%s15325_s0 + $0x240] sm:$0xff] }
  0x6a   :  { %3204 = vmatmul.mubr.bf16.gmra.mrb[20].mxu0 %v11649_v5  ;;  %3364 = vmatmul.mubr.bf16.gmra.mrb[20].mxu1 %v11651_v6  ;;  %v103_v4 = vld [vmem:[%s15325_s0 + $0x260] sm:$0xff] }
  0x6b   :  { %3213 = vmatprep.mubr.bf16.mxu0 %v11659_v9  ;;  %3373 = vmatprep.mubr.bf16.mxu1 %v11661_v10 }
  0x6c   :  { %3495 = vmatpush1.bf16.msra.mxu0 %v10565_v7  ;;  %4553 = vmatprep.subr.bf16.mxu1 %v10591_v8  ;;  %v227_v7 = vld [vmem:[%s15325_s0 + $0x640] sm:$0xff] }
  0x6d   :  { %3496 = vmatprep.subr.bf16.mxu0 %v10573_v16  ;;  %4554 = vmatpush1.bf16.msra.mxu1 %v10589_v17  ;;  %v231_v8 = vld [vmem:[%s15325_s0 + $0x660] sm:$0xff]  ;;  %v10612_v17 = vld [vmem:[%s15324_s1 + $0x1ec] ss:$16 sps:$4 sm:$0xff]  }
  0x6e   :  { %4555 = vmatprep.subr.bf16.mxu1 %v10594_v24  ;;  %v10604_v16 = vld [vmem:[%s15324_s1 + $0x3e0] ss:$16 sps:$4 sm:$0xff]   ;;  %v11800_v24 = vcombine.high %v99_v3, %v103_v4  ;;  %v11822_v39 = vcombine.low %v227_v7, %v231_v8 }
  0x70   :  { %3497 = vmatpush1.bf16.msra.mxu0 %v10571_v23  ;;  %v10624_v23 = vld [vmem:[%s15324_s1 + $0x20c] ss:$16 sps:$4 sm:$0xff]  }
  0x71   :  { %3498 = vmatprep.subr.bf16.mxu0 %v10579_v25  ;;  %4556 = vmatpush1.bf16.msra.mxu1 %v10592_v26  ;;  %v11802_v25 = vcombine.high %v227_v7, %v231_v8  ;;  %v107_v26 = vld [vmem:[%s15325_s0 + $0x280] sm:$0xff] }
  0x72   :  { %3214 = vmatmul.mubr.bf16.gmra.mrb[24].mxu0 %v11697_v27  ;;  %3374 = vmatmul.mubr.bf16.gmra.mrb[24].mxu1 %v11699_v28  ;;  %v255_v7 = vld [vmem:[%s15325_s0 + $0x720] sm:$0xff] }
  0x73   :  { %3223 = vmatprep.mubr.bf16.mxu0 %v11707_v35  ;;  %3383 = vmatprep.mubr.bf16.mxu1 %v11709_v36 }
  0x74   :  { %3499 = vmatpush1.bf16.msra.mxu0 %v10577_v33  ;;  %4557 = vmatprep.subr.bf16.mxu1 %v10600_v34  ;;  %v111_v33 = vld [vmem:[%s15325_s0 + $0x2a0] sm:$0xff] }
  0x75   :  { %3500 = vmatprep.subr.bf16.mxu0 %v10588_v37  ;;  %4558 = vmatpush1.bf16.msra.mxu1 %v10598_v38  ;;  %v235_v34 = vld [vmem:[%s15325_s0 + $0x680] sm:$0xff]  ;;  %v11820_v38 = vcombine.low %v99_v3, %v103_v4  ;;  %v11824_v40 = vcombine.high %v107_v26, %v111_v33 }
  0x76   :  { %4559 = vmatprep.subr.bf16.mxu1 %v10603_v43  ;;  %v239_v37 = vld [vmem:[%s15325_s0 + $0x6a0] sm:$0xff] }
  0x77   :  { %v11826_v41 = vcombine.high %v235_v34, %v239_v37  ;;  %v119_v43 = vld [vmem:[%s15325_s0 + $0x2e0] sm:$0xff] }
  0x78   :  { %3501 = vmatpush1.bf16.msra.mxu0 %v10586_v46  ;;  %v243_v46 = vld [vmem:[%s15325_s0 + $0x6c0] sm:$0xff]  ;;  %v11868_v8 = vcombine.low %v115_v42, %v119_v43 }
  0x79   :  { %3502 = vmatprep.subr.bf16.mxu0 %v10597_v51  ;;  %4560 = vmatpush1.bf16.msra.mxu1 %v10601_v52  ;;  %v247_v51 = vld [vmem:[%s15325_s0 + $0x6e0] sm:$0xff]  ;;  %v11844_v52 = vcombine.low %v107_v26, %v111_v33 }
  0x7a   :  { %3224 = vmatmul.mubr.bf16.gmra.mrb[28].mxu0 %v11745_v55  ;;  %3384 = vmatmul.mubr.bf16.gmra.mrb[28].mxu1 %v11747_v56  ;;  %v127_v3 = vld [vmem:[%s15325_s0 + $0x320] sm:$0xff] }
  0x7b   :  { %3233 = vmatprep.mubr.bf16.mxu0 %v11755_v63  ;;  %3393 = vmatprep.mubr.bf16.mxu1 %v11757_v0  ;;  %v251_v4 = vld [vmem:[%s15325_s0 + $0x700] sm:$0xff] }
  0x7c   :  { %3503 = vmatpush1.bf16.msra.mxu0 %v10595_v57  ;;  %4561 = vmatprep.subr.bf16.mxu1 %v10609_v58  ;;  %v11846_v57 = vcombine.low %v235_v34, %v239_v37  ;;  %v11848_v58 = vcombine.high %v115_v42, %v119_v43  ;;  %v259_v26 = vld [vmem:[%s15325_s0 + $0x740] sm:$0xff]  ;;  %v11894_v37 = vcombine.low %v251_v4, %v255_v7 }
  0x7d   :  { %3504 = vmatprep.subr.bf16.mxu0 %v10606_v1  ;;  %4562 = vmatpush1.bf16.msra.mxu1 %v10607_v2  ;;  %v11850_v1 = vcombine.high %v243_v46, %v247_v51  ;;  %v123_v2 = vld [vmem:[%s15325_s0 + $0x300] sm:$0xff] }
  0x7e   :  { %4563 = vmatprep.subr.bf16.mxu1 %v10612_v17  ;;  %v11872_v17 = vcombine.high %v123_v2, %v127_v3  ;;  %v263_v33 = vld [vmem:[%s15325_s0 + $0x760] sm:$0xff]  ;;  %v11892_v34 = vcombine.low %v123_v2, %v127_v3  ;;  %15402 = vst [vmem:[#allocation5_spill] sm:$0xff] %v11894_v37 }
  0x7f   :  { %15399 = vst [vmem:[#allocation2_spill] sm:$0xff] %v11850_v1  ;;  %v11898_v43 = vcombine.high %v259_v26, %v263_v33  ;;  %v267_v2 = vld [vmem:[%s15325_s0 + $0x780] sm:$0xff] }
  0x80   :  { %3505 = vmatpush1.bf16.msra.mxu0 %v10604_v16  ;;  %v11870_v16 = vcombine.low %v243_v46, %v247_v51  ;;  %v139_v46 = vld [vmem:[%s15325_s0 + $0x380] sm:$0xff] }
  0x81   :  { %4564 = vmatpush1.bf16.msra.mxu1 %v10610_v18  ;;  %3827 = vmatprep.subr.bf16.mxu0 %v10615_v20  ;;  %v11874_v18 = vcombine.high %v251_v4, %v255_v7  ;;  %v131_v20 = vld [vmem:[%s15325_s0 + $0x340] sm:$0xff]  ;;  %15403 = vst [vmem:[#allocation6_spill] sm:$0xff] %v11898_v43  ;;  %v11918_v7 = vcombine.low %v259_v26, %v263_v33 }
  0x82   :  { %3234 = vmatmul.mubr.bf16.gmra.mrb[32].mxu0 %v11793_v21  ;;  %3394 = vmatmul.mubr.bf16.gmra.mrb[32].mxu1 %v11795_v22  ;;  %15400 = vst [vmem:[#allocation3_spill] sm:$0xff] %v11870_v16  ;;  %v143_v51 = vld [vmem:[%s15325_s0 + $0x3a0] sm:$0xff] }
  0x83   :  { %3243 = vmatprep.mubr.bf16.mxu0 %v11800_v24  ;;  %3403 = vmatprep.mubr.bf16.mxu1 %v11802_v25  ;;  %15401 = vst [vmem:[#allocation4_spill] sm:$0xff] %v11874_v18  ;;  %v271_v3 = vld [vmem:[%s15325_s0 + $0x7a0] sm:$0xff]  ;;  %15404 = vst [vmem:[#allocation7_spill] sm:$0xff] %v11918_v7  ;;  %v11940_v33 = vcombine.low %v139_v46, %v143_v51 }
  0x84   :  { %4886 = vmatprep.subr.bf16.mxu1 %v10624_v23  ;;  %v135_v23 = vld [vmem:[%s15325_s0 + $0x360] sm:$0xff] }
  0x85   :  { %v11896_v42 = vcombine.high %v131_v20, %v135_v23  ;;  %v11916_v4 = vcombine.low %v131_v20, %v135_v23  ;;  %v151_v20 = vld [vmem:[%s15325_s0 + $0x3e0] sm:$0xff] }
  0x86   :  { %v275_v23 = vld [vmem:[%s15325_s0 + $0x7c0] sm:$0xff] }
  0x87   :  { %v279_v26 = vld [vmem:[%s15325_s0 + $0x7e0] sm:$0xff] }
  0x8a   :  { %3244 = vmatmul.mubr.bf16.gmra.mrb[36].mxu0 %v11820_v38  ;;  %3404 = vmatmul.mubr.bf16.gmra.mrb[36].mxu1 %v11822_v39 }
  0x8b   :  { %3253 = vmatprep.mubr.bf16.mxu0 %v11824_v40  ;;  %3413 = vmatprep.mubr.bf16.mxu1 %v11826_v41 }
  0x92   :  { %3254 = vmatmul.mubr.bf16.gmra.mrb[40].mxu0 %v11844_v52  ;;  %3414 = vmatmul.mubr.bf16.gmra.mrb[40].mxu1 %v11846_v57 }
  0x93   :  { %3263 = vmatprep.mubr.bf16.mxu0 %v11848_v58  ;;  %3423 = vmatprep.mubr.bf16.mxu1 %v11850_v1  ;;  %v28_v1 = vld [vmem:[%s15325_s0 + $0x8] sm:$0xff] }
  0x9a   :  { %3264 = vmatmul.mubr.bf16.gmra.mrb[44].mxu0 %v11868_v8  ;;  %3424 = vmatmul.mubr.bf16.gmra.mrb[44].mxu1 %v11870_v16  ;;  %v11946_v16 = vcombine.high %v275_v23, %v279_v26 }
  0x9b   :  { %3273 = vmatprep.mubr.bf16.mxu0 %v11872_v17  ;;  %3433 = vmatprep.mubr.bf16.mxu1 %v11874_v18  ;;  %v147_v18 = vld [vmem:[%s15325_s0 + $0x3c0] sm:$0xff] }
  0x9c   :  { %15407 = vst [vmem:[#allocation10_spill] sm:$0xff] %v11946_v16 }
  0xa2   :  { %3274 = vmatmul.mubr.bf16.gmra.mrb[48].mxu0 %v11892_v34  ;;  %3434 = vmatmul.mubr.bf16.gmra.mrb[48].mxu1 %v11894_v37  ;;  %v11922_v37 = vcombine.high %v267_v2, %v271_v3 }
  0xa3   :  { %3283 = vmatprep.mubr.bf16.mxu0 %v11896_v42  ;;  %3443 = vmatprep.mubr.bf16.mxu1 %v11898_v43  ;;  %v11920_v43 = vcombine.high %v139_v46, %v143_v51  ;;  %v32_v46 = vld [vmem:[%s15325_s0 + $0x28] sm:$0xff]  ;;  %v11958_v51 = vcombine.low %v147_v18, %v151_v20 }
  0xa4   :  { %15405 = vst [vmem:[#allocation8_spill] sm:$0xff] %v11922_v37 }
  0xaa   :  { %3284 = vmatmul.mubr.bf16.gmra.mrb[52].mxu0 %v11916_v4  ;;  %3444 = vmatmul.mubr.bf16.gmra.mrb[52].mxu1 %v11918_v7  ;;  %v11942_v7 = vcombine.low %v267_v2, %v271_v3  ;;  %v11960_v2 = vcombine.low %v275_v23, %v279_v26  ;;  %v11962_v3 = vcombine.high %v28_v1, %v32_v46  ;;  %v10613_v23 = vld [vmem:[%s15324_s1 + $0x400] ss:$16 sps:$4 sm:$0xff]  }
  0xab   :  { %3293 = vmatprep.mubr.bf16.mxu0 %v11920_v43  ;;  %3453 = vmatprep.mubr.bf16.mxu1 %v11922_v37  ;;  %v11944_v37 = vcombine.high %v147_v18, %v151_v20  ;;  %v40_v18 = vld [vmem:[%s15325_s0 + $0x68] sm:$0xff]  ;;  %v11974_v20 = vcombine.low %v28_v1, %v32_v46  ;;  %v10616_v46 = vld [vmem:[%s15324_s1 + $0x420] ss:$16 sps:$4 sm:$0xff]  }
  0xac   :  { %15406 = vst [vmem:[#allocation9_spill] sm:$0xff] %v11942_v7  ;;  %15408 = vst [vmem:[#allocation11_spill] sm:$0xff] %v11960_v2  ;;  %v10630_v1 = vld [vmem:[%s15324_s1 + $0x22c] ss:$16 sps:$4 sm:$0xff]  }
  0xad   :  { %15409 = vst [vmem:[#allocation12_spill] sm:$0xff] %v11962_v3  ;;  %15410 = vst [vmem:[#allocation13_spill] sm:$0xff] %v11974_v20 }
  0xb2   :  { %3294 = vmatmul.mubr.bf16.gmra.mrb[56].mxu0 %v11940_v33  ;;  %3454 = vmatmul.mubr.bf16.gmra.mrb[56].mxu1 %v11942_v7  ;;  %v10619_v7 = vld [vmem:[%s15324_s1 + $0x440] ss:$16 sps:$4 sm:$0xff]  }
  0xb3   :  { %3303 = vmatprep.mubr.bf16.mxu0 %v11944_v37  ;;  %3463 = vmatprep.mubr.bf16.mxu1 %v11946_v16  ;;  %v36_v16 = vld [vmem:[%s15325_s0 + $0x48] sm:$0xff] }
  0xb4   :  { %v11979_v26 = vcombine.high %v36_v16, %v40_v18 }
  0xb6   :  { %15411 = vst [vmem:[#allocation14_spill] sm:$0xff] %v11979_v26 }
  0xba   :  { %3304 = vmatmul.mubr.bf16.gmra.mrb[60].mxu0 %v11958_v51  ;;  %3464 = vmatmul.mubr.bf16.gmra.mrb[60].mxu1 %v11960_v2  ;;  %v44_v2 = vld [vmem:[%s15325_s0 + $0x88] sm:$0xff] }
  0xbb   :  { %3506 = vmatprep.mubr.bf16.mxu0 %v11962_v3  ;;  %4565 = vmatprep.mubr.bf16.mxu1 %v11315_v15  ;;  %v10618_v15 = vld [vmem:[%s15324_s1 + $0x424] ss:$16 sps:$4 sm:$0xff]   ;;  %v10622_v3 = vld [vmem:[%s15324_s1 + $0x208] ss:$16 sps:$4 sm:$0xff]  }
  0xc2   :  { %3507 = vmatmul.mubr.bf16.vlgmr.msra.gmra.mrb[0].mxu0 %v11974_v20  ;;  %4566 = vmatmul.mubr.bf16.vlgmr.msra.gmra.mrb[64].mxu1 %v11410_v44  ;;  %v48_v44 = vld [vmem:[%s15325_s0 + $0xa8] sm:$0xff]  ;;  %v12009_v20 = vcombine.low %v36_v16, %v40_v18 }
  0xc3   :  { %3828 = vmatpush1.bf16.msra.mxu0 %v10613_v23  ;;  %3516 = vmatprep.mubr.bf16.mxu0 %v11979_v26  ;;  %v10621_v23 = vld [vmem:[%s15324_s1 + $0x444] ss:$16 sps:$4 sm:$0xff]   ;;  %v10628_v26 = vld [vmem:[%s15324_s1 + $0x228] ss:$16 sps:$4 sm:$0xff]   ;;  %v10642_v18 = vld [vmem:[%s15324_s1 + $0x26c] ss:$16 sps:$4 sm:$0xff]  }
  0xc4   :  { %4575 = vmatprep.mubr.bf16.mxu1 %v11419_v47  ;;  %3829 = vmatprep.subr.bf16.mxu0 %v10618_v15  ;;  %v12011_v47 = vcombine.high %v44_v2, %v48_v44  ;;  %v10636_v15 = vld [vmem:[%s15324_s1 + $0x24c] ss:$16 sps:$4 sm:$0xff]   ;;  %v10634_v16 = vld [vmem:[%s15324_s1 + $0x248] ss:$16 sps:$4 sm:$0xff]  }
  0xc5   :  { %4887 = vmatpush1.bf16.msra.mxu1 %v10622_v3  ;;  %v10627_v3 = vld [vmem:[%s15324_s1 + $0x464] ss:$16 sps:$4 sm:$0xff]  }
  0xc6   :  { %4888 = vmatprep.subr.bf16.mxu1 %v10630_v1  ;;  %15412 = vst [vmem:[#allocation15_spill] sm:$0xff] %v12011_v47  ;;  %v56_v1 = vld [vmem:[%s15325_s0 + $0xe8] sm:$0xff] }
  0xc7   :  { %3830 = vmatpush1.bf16.msra.mxu0 %v10616_v46  ;;  %v10633_v46 = vld [vmem:[%s15324_s1 + $0x484] ss:$16 sps:$4 sm:$0xff]  }
  0xc8   :  { %3831 = vmatprep.subr.bf16.mxu0 %v10621_v23  ;;  %v12047_v23 = vcombine.low %v44_v2, %v48_v44  ;;  %v10646_v2 = vld [vmem:[%s15324_s1 + $0x288] ss:$16 sps:$4 sm:$0xff]   ;;  %v10654_v44 = vld [vmem:[%s15324_s1 + $0x2ac] ss:$16 sps:$4 sm:$0xff]  }
  0xc9   :  { %4889 = vmatpush1.bf16.msra.mxu1 %v10628_v26  ;;  %v52_v26 = vld [vmem:[%s15325_s0 + $0xc8] sm:$0xff] }
  0xca   :  { %3517 = vmatmul.mubr.bf16.gmra.mrb[4].mxu0 %v12009_v20  ;;  %4576 = vmatmul.mubr.bf16.gmra.mrb[68].mxu1 %v11457_v59  ;;  %v10625_v59 = vld [vmem:[%s15324_s1 + $0x460] ss:$16 sps:$4 sm:$0xff]  }
  0xcb   :  { %3526 = vmatprep.mubr.bf16.mxu0 %v12011_v47  ;;  %4585 = vmatprep.mubr.bf16.mxu1 %v11461_v61  ;;  %v10640_v61 = vld [vmem:[%s15324_s1 + $0x268] ss:$16 sps:$4 sm:$0xff]   ;;  %v12049_v47 = vcombine.high %v52_v26, %v56_v1 }
  0xcc   :  { %3832 = vmatpush1.bf16.msra.mxu0 %v10619_v7  ;;  %4890 = vmatprep.subr.bf16.mxu1 %v10636_v15  ;;  %v10631_v7 = vld [vmem:[%s15324_s1 + $0x480] ss:$16 sps:$4 sm:$0xff]   ;;  %v10648_v15 = vld [vmem:[%s15324_s1 + $0x28c] ss:$16 sps:$4 sm:$0xff]  }
  0xcd   :  { %3833 = vmatprep.subr.bf16.mxu0 %v10627_v3  ;;  %4891 = vmatpush1.bf16.msra.mxu1 %v10634_v16  ;;  %v10639_v3 = vld [vmem:[%s15324_s1 + $0x4a4] ss:$16 sps:$4 sm:$0xff]   ;;  %v60_v16 = vld [vmem:[%s15325_s0 + $0x108] sm:$0xff] }
  0xce   :  { %4892 = vmatprep.subr.bf16.mxu1 %v10642_v18  ;;  %v64_v18 = vld [vmem:[%s15325_s0 + $0x128] sm:$0xff] }
  0xd0   :  { %3834 = vmatpush1.bf16.msra.mxu0 %v10625_v59  ;;  %v10645_v59 = vld [vmem:[%s15324_s1 + $0x4c4] ss:$16 sps:$4 sm:$0xff]  }
  0xd1   :  { %3835 = vmatprep.subr.bf16.mxu0 %v10633_v46  ;;  %4893 = vmatpush1.bf16.msra.mxu1 %v10640_v61  ;;  %v12085_v46 = vcombine.low %v52_v26, %v56_v1  ;;  %v12087_v61 = vcombine.high %v60_v16, %v64_v18  ;;  %v10658_v26 = vld [vmem:[%s15324_s1 + $0x2c8] ss:$16 sps:$4 sm:$0xff]   ;;  %v10666_v1 = vld [vmem:[%s15324_s1 + $0x2ec] ss:$16 sps:$4 sm:$0xff]  }
  0xd2   :  { %3527 = vmatmul.mubr.bf16.gmra.mrb[8].mxu0 %v12047_v23  ;;  %4586 = vmatmul.mubr.bf16.gmra.mrb[72].mxu1 %v11505_v11  ;;  %v10637_v11 = vld [vmem:[%s15324_s1 + $0x4a0] ss:$16 sps:$4 sm:$0xff]  }
  0xd3   :  { %3536 = vmatprep.mubr.bf16.mxu0 %v12049_v47  ;;  %4595 = vmatprep.mubr.bf16.mxu1 %v11509_v13  ;;  %v10652_v13 = vld [vmem:[%s15324_s1 + $0x2a8] ss:$16 sps:$4 sm:$0xff]  }
  0xd4   :  { %3836 = vmatpush1.bf16.msra.mxu0 %v10631_v7  ;;  %4894 = vmatprep.subr.bf16.mxu1 %v10648_v15  ;;  %v10643_v7 = vld [vmem:[%s15324_s1 + $0x4c0] ss:$16 sps:$4 sm:$0xff]   ;;  %v10660_v15 = vld [vmem:[%s15324_s1 + $0x2cc] ss:$16 sps:$4 sm:$0xff]  }
  0xd5   :  { %3837 = vmatprep.subr.bf16.mxu0 %v10639_v3  ;;  %4895 = vmatpush1.bf16.msra.mxu1 %v10646_v2  ;;  %v10651_v3 = vld [vmem:[%s15324_s1 + $0x4e4] ss:$16 sps:$4 sm:$0xff]   ;;  %v68_v2 = vld [vmem:[%s15325_s0 + $0x148] sm:$0xff] }
  0xd6   :  { %4896 = vmatprep.subr.bf16.mxu1 %v10654_v44  ;;  %v72_v44 = vld [vmem:[%s15325_s0 + $0x168] sm:$0xff] }
  0xd8   :  { %3838 = vmatpush1.bf16.msra.mxu0 %v10637_v11  ;;  %v10657_v11 = vld [vmem:[%s15324_s1 + $0x504] ss:$16 sps:$4 sm:$0xff]  }
  0xd9   :  { %3839 = vmatprep.subr.bf16.mxu0 %v10645_v59  ;;  %4897 = vmatpush1.bf16.msra.mxu1 %v10652_v13  ;;  %v12123_v59 = vcombine.low %v60_v16, %v64_v18  ;;  %v12125_v13 = vcombine.high %v68_v2, %v72_v44  ;;  %v10670_v16 = vld [vmem:[%s15324_s1 + $0x308] ss:$16 sps:$4 sm:$0xff]   ;;  %v10672_v18 = vld [vmem:[%s15324_s1 + $0x30c] ss:$16 sps:$4 sm:$0xff]  }
  0xda   :  { %3537 = vmatmul.mubr.bf16.gmra.mrb[12].mxu0 %v12085_v46  ;;  %4596 = vmatmul.mubr.bf16.gmra.mrb[76].mxu1 %v11553_v29  ;;  %v10649_v29 = vld [vmem:[%s15324_s1 + $0x4e0] ss:$16 sps:$4 sm:$0xff]  }
  0xdb   :  { %3546 = vmatprep.mubr.bf16.mxu0 %v12087_v61  ;;  %4605 = vmatprep.mubr.bf16.mxu1 %v11557_v31  ;;  %v10664_v31 = vld [vmem:[%s15324_s1 + $0x2e8] ss:$16 sps:$4 sm:$0xff]  }
  0xdc   :  { %3840 = vmatpush1.bf16.msra.mxu0 %v10643_v7  ;;  %4898 = vmatprep.subr.bf16.mxu1 %v10660_v15  ;;  %v10655_v7 = vld [vmem:[%s15324_s1 + $0x500] ss:$16 sps:$4 sm:$0xff]   ;;  %v10663_v15 = vld [vmem:[%s15324_s1 + $0x524] ss:$16 sps:$4 sm:$0xff]  }
  0xdd   :  { %3841 = vmatprep.subr.bf16.mxu0 %v10651_v3  ;;  %4899 = vmatpush1.bf16.msra.mxu1 %v10658_v26  ;;  %v76_v3 = vld [vmem:[%s15325_s0 + $0x188] sm:$0xff]  ;;  %v10661_v26 = vld [vmem:[%s15324_s1 + $0x520] ss:$16 sps:$4 sm:$0xff]  }
  0xde   :  { %4900 = vmatprep.subr.bf16.mxu1 %v10666_v1  ;;  %v12155_v1 = vcombine.low %v68_v2, %v72_v44  ;;  %v84_v2 = vld [vmem:[%s15325_s0 + $0x1c8] sm:$0xff] }
  0xdf   :  { %v88_v44 = vld [vmem:[%s15325_s0 + $0x1e8] sm:$0xff] }
  0xe0   :  { %3842 = vmatpush1.bf16.msra.mxu0 %v10649_v29 }
  0xe1   :  { %3843 = vmatprep.subr.bf16.mxu0 %v10657_v11  ;;  %4901 = vmatpush1.bf16.msra.mxu1 %v10664_v31  ;;  %v10667_v11 = vld [vmem:[%s15324_s1 + $0x540] ss:$16 sps:$4 sm:$0xff]  }
  0xe2   :  { %3547 = vmatmul.mubr.bf16.gmra.mrb[16].mxu0 %v12123_v59  ;;  %4606 = vmatmul.mubr.bf16.gmra.mrb[80].mxu1 %v11601_v49  ;;  %v80_v49 = vld [vmem:[%s15325_s0 + $0x1a8] sm:$0xff] }
  0xe3   :  { %3556 = vmatprep.mubr.bf16.mxu0 %v12125_v13  ;;  %4615 = vmatprep.mubr.bf16.mxu1 %v11611_v53  ;;  %v10669_v53 = vld [vmem:[%s15324_s1 + $0x544] ss:$16 sps:$4 sm:$0xff]   ;;  %v12157_v29 = vcombine.high %v76_v3, %v80_v49  ;;  %v12172_v31 = vcombine.low %v76_v3, %v80_v49  ;;  %v12198_v3 = vcombine.low %v84_v2, %v88_v44 }
  0xe4   :  { %3844 = vmatpush1.bf16.msra.mxu0 %v10655_v7  ;;  %4902 = vmatprep.subr.bf16.mxu1 %v10672_v18  ;;  %v12174_v7 = vcombine.high %v84_v2, %v88_v44  ;;  %v96_v18 = vld [vmem:[%s15325_s0 + $0x228] sm:$0xff] }
  0xe5   :  { %3845 = vmatprep.subr.bf16.mxu0 %v10663_v15  ;;  %4903 = vmatpush1.bf16.msra.mxu1 %v10670_v16  ;;  %v10676_v15 = vld [vmem:[%s15324_s1 + $0x328] ss:$16 sps:$4 sm:$0xff]  }
  0xe6   :  { %v92_v16 = vld [vmem:[%s15325_s0 + $0x208] sm:$0xff] }
  0xe7   :  { %v12200_v49 = vcombine.high %v92_v16, %v96_v18  ;;  %v10682_v2 = vld [vmem:[%s15324_s1 + $0x348] ss:$16 sps:$4 sm:$0xff]  }
  0xe8   :  { %3846 = vmatpush1.bf16.msra.mxu0 %v10661_v26  ;;  %v104_v26 = vld [vmem:[%s15325_s0 + $0x268] sm:$0xff] }
  0xe9   :  { %3847 = vmatprep.subr.bf16.mxu0 %v10669_v53  ;;  %v12212_v53 = vcombine.low %v92_v16, %v96_v18  ;;  %v108_v44 = vld [vmem:[%s15325_s0 + $0x288] sm:$0xff] }
  0xea   :  { %3557 = vmatmul.mubr.bf16.gmra.mrb[20].mxu0 %v12155_v1  ;;  %4616 = vmatmul.mubr.bf16.gmra.mrb[84].mxu1 %v11649_v5  ;;  %v10673_v5 = vld [vmem:[%s15324_s1 + $0x560] ss:$16 sps:$4 sm:$0xff]  }
  0xeb   :  { %3566 = vmatprep.mubr.bf16.mxu0 %v12157_v29  ;;  %4625 = vmatprep.mubr.bf16.mxu1 %v11659_v9  ;;  %v10675_v9 = vld [vmem:[%s15324_s1 + $0x564] ss:$16 sps:$4 sm:$0xff]  }
  0xec   :  { %3848 = vmatpush1.bf16.msra.mxu0 %v10667_v11 }
  0xed   :  { %3849 = vmatprep.subr.bf16.mxu0 %v10675_v9 }
  0xf0   :  { %3850 = vmatpush1.bf16.msra.mxu0 %v10673_v5  ;;  %v112_v5 = vld [vmem:[%s15325_s0 + $0x2a8] sm:$0xff] }
  0xf1   :  { %v12252_v16 = vcombine.low %v108_v44, %v112_v5 }
  0xf2   :  { %3567 = vmatmul.mubr.bf16.gmra.mrb[24].mxu0 %v12172_v31  ;;  %4626 = vmatmul.mubr.bf16.gmra.mrb[88].mxu1 %v11697_v27  ;;  %v10678_v27 = vld [vmem:[%s15324_s1 + $0x32c] ss:$16 sps:$4 sm:$0xff]  }
  0xf3   :  { %3576 = vmatprep.mubr.bf16.mxu0 %v12174_v7  ;;  %4635 = vmatprep.mubr.bf16.mxu1 %v11707_v35  ;;  %v100_v35 = vld [vmem:[%s15325_s0 + $0x248] sm:$0xff] }
  0xf4   :  { %4904 = vmatprep.subr.bf16.mxu1 %v10678_v27  ;;  %v12214_v11 = vcombine.high %v100_v35, %v104_v26  ;;  %v12238_v9 = vcombine.low %v100_v35, %v104_v26  ;;  %v120_v27 = vld [vmem:[%s15325_s0 + $0x2e8] sm:$0xff] }
  0xf5   :  { %4905 = vmatpush1.bf16.msra.mxu1 %v10676_v15  ;;  %v12240_v15 = vcombine.high %v108_v44, %v112_v5  ;;  %v10688_v35 = vld [vmem:[%s15324_s1 + $0x368] ss:$16 sps:$4 sm:$0xff]  }
  0xf6   :  { %v124_v26 = vld [vmem:[%s15325_s0 + $0x308] sm:$0xff] }
  0xfa   :  { %3577 = vmatmul.mubr.bf16.gmra.mrb[28].mxu0 %v12198_v3  ;;  %4636 = vmatmul.mubr.bf16.gmra.mrb[92].mxu1 %v11745_v55  ;;  %v10679_v55 = vld [vmem:[%s15324_s1 + $0x580] ss:$16 sps:$4 sm:$0xff]  }
  0xfb   :  { %3586 = vmatprep.mubr.bf16.mxu0 %v12200_v49  ;;  %4645 = vmatprep.mubr.bf16.mxu1 %v11755_v63  ;;  %v10681_v63 = vld [vmem:[%s15324_s1 + $0x584] ss:$16 sps:$4 sm:$0xff]  }
  0xfc   :  { %3851 = vmatprep.subr.bf16.mxu0 %v10681_v63 }
  0xfd   :  { %3852 = vmatpush1.bf16.msra.mxu0 %v10679_v55  ;;  %v128_v55 = vld [vmem:[%s15325_s0 + $0x328] sm:$0xff] }
 0x102   :  { %3587 = vmatmul.mubr.bf16.gmra.mrb[32].mxu0 %v12212_v53  ;;  %4646 = vmatmul.mubr.bf16.gmra.mrb[96].mxu1 %v11793_v21  ;;  %v10684_v21 = vld [vmem:[%s15324_s1 + $0x34c] ss:$16 sps:$4 sm:$0xff]  }
 0x103   :  { %3596 = vmatprep.mubr.bf16.mxu0 %v12214_v11  ;;  %4655 = vmatprep.mubr.bf16.mxu1 %v11800_v24  ;;  %v116_v24 = vld [vmem:[%s15325_s0 + $0x2c8] sm:$0xff] }
 0x104   :  { %4906 = vmatprep.subr.bf16.mxu1 %v10684_v21  ;;  %v12254_v18 = vcombine.high %v116_v24, %v120_v27  ;;  %v12284_v21 = vcombine.high %v124_v26, %v128_v55 }
 0x105   :  { %4907 = vmatpush1.bf16.msra.mxu1 %v10682_v2  ;;  %v12280_v2 = vcombine.low %v116_v24, %v120_v27  ;;  %v132_v24 = vld [vmem:[%s15325_s0 + $0x348] sm:$0xff] }
 0x106   :  { %v136_v27 = vld [vmem:[%s15325_s0 + $0x368] sm:$0xff] }
 0x10a   :  { %3597 = vmatmul.mubr.bf16.gmra.mrb[36].mxu0 %v12238_v9  ;;  %4656 = vmatmul.mubr.bf16.gmra.mrb[100].mxu1 %v11820_v38  ;;  %v10685_v38 = vld [vmem:[%s15324_s1 + $0x5a0] ss:$16 sps:$4 sm:$0xff]  }
 0x10b   :  { %3606 = vmatprep.mubr.bf16.mxu0 %v12240_v15  ;;  %4665 = vmatprep.mubr.bf16.mxu1 %v11824_v40  ;;  %v10687_v40 = vld [vmem:[%s15324_s1 + $0x5a4] ss:$16 sps:$4 sm:$0xff]  }
 0x10c   :  { %3853 = vmatprep.subr.bf16.mxu0 %v10687_v40  ;;  %v12302_v40 = vcombine.low %v124_v26, %v128_v55  ;;  %v10693_v26 = vld [vmem:[%s15324_s1 + $0x5c4] ss:$16 sps:$4 sm:$0xff]   ;;  %v10694_v55 = vld [vmem:[%s15324_s1 + $0x388] ss:$16 sps:$4 sm:$0xff]  }
 0x10d   :  { %3854 = vmatpush1.bf16.msra.mxu0 %v10685_v38 }
 0x10e   :  { %3855 = vmatprep.subr.bf16.mxu0 %v10693_v26 }
 0x112   :  { %3607 = vmatmul.mubr.bf16.gmra.mrb[40].mxu0 %v12252_v16  ;;  %4666 = vmatmul.mubr.bf16.gmra.mrb[104].mxu1 %v11844_v52  ;;  %v10690_v52 = vld [vmem:[%s15324_s1 + $0x36c] ss:$16 sps:$4 sm:$0xff]  }
 0x113   :  { %3616 = vmatprep.mubr.bf16.mxu0 %v12254_v18  ;;  %4675 = vmatprep.mubr.bf16.mxu1 %v11848_v58 }
 0x114   :  { %4908 = vmatprep.subr.bf16.mxu1 %v10690_v52  ;;  %v12306_v52 = vcombine.high %v132_v24, %v136_v27 }
 0x115   :  { %v12278_v63 = vpop.f32.mrb[0].mxu1  ;;  %4909 = vmatpush1.bf16.msra.mxu1 %v10688_v35 }
 0x116   :  { %15413 = vst [vmem:[#allocation16_spill] sm:$0xff] %v12278_v63  ;;  %v12282_v58 = vpop.f32.mrb[1].mxu1 }
 0x117   :  { %15414 = vst [vmem:[#allocation17_spill] sm:$0xff] %v12282_v58  ;;  %v12286_v44 = vpop.f32.mrb[2].mxu1 }
 0x118   :  { %15415 = vst [vmem:[#allocation18_spill] sm:$0xff] %v12286_v44  ;;  %v12288_v5 = vpop.f32.mrb[3].mxu1 }
 0x119   :  { %15416 = vst [vmem:[#allocation19_spill] sm:$0xff] %v12288_v5 }
 0x11a   :  { %3617 = vmatmul.mubr.bf16.gmra.mrb[44].mxu0 %v12280_v2  ;;  %4676 = vmatmul.mubr.bf16.gmra.mrb[108].mxu1 %v11868_v8 }
 0x11b   :  { %3626 = vmatprep.mubr.bf16.mxu0 %v12284_v21  ;;  %4685 = vmatprep.mubr.bf16.mxu1 %v11872_v17  ;;  %v10691_v17 = vld [vmem:[%s15324_s1 + $0x5c0] ss:$16 sps:$4 sm:$0xff]  }
 0x11c   :  { %3856 = vmatpush1.bf16.msra.mxu0 %v10691_v17 }
 0x11d   :  { %v12300_v38 = vpop.f32.mrb[4].mxu1 }
 0x11e   :  { %15417 = vst [vmem:[#allocation20_spill] sm:$0xff] %v12300_v38  ;;  %v12304_v35 = vpop.f32.mrb[5].mxu1  ;;  %v12336_v38 = vcombine.low %v132_v24, %v136_v27  ;;  %v148_v24 = vld [vmem:[%s15325_s0 + $0x3c8] sm:$0xff] }
 0x11f   :  { %15418 = vst [vmem:[#allocation21_spill] sm:$0xff] %v12304_v35  ;;  %v12308_v8 = vpop.f32.mrb[6].mxu1  ;;  %v152_v27 = vld [vmem:[%s15325_s0 + $0x3e8] sm:$0xff] }
 0x120   :  { %15419 = vst [vmem:[#allocation22_spill] sm:$0xff] %v12308_v8  ;;  %v12310_v5 = vpop.f32.mrb[7].mxu1  ;;  %v144_v8 = vld [vmem:[%s15325_s0 + $0x3a8] sm:$0xff] }
 0x121   :  { %15420 = vst [vmem:[#allocation23_spill] sm:$0xff] %v12310_v5  ;;  %v140_v5 = vld [vmem:[%s15325_s0 + $0x388] sm:$0xff] }
 0x122   :  { %3627 = vmatmul.mubr.bf16.gmra.mrb[48].mxu0 %v12302_v40  ;;  %4686 = vmatmul.mubr.bf16.gmra.mrb[112].mxu1 %v11892_v34  ;;  %v10696_v34 = vld [vmem:[%s15324_s1 + $0x38c] ss:$16 sps:$4 sm:$0xff]   ;;  %v12340_v44 = vcombine.high %v140_v5, %v144_v8  ;;  %v12358_v26 = vcombine.low %v140_v5, %v144_v8  ;;  %v10699_v5 = vld [vmem:[%s15324_s1 + $0x5e4] ss:$16 sps:$4 sm:$0xff]   ;;  %v10700_v8 = vld [vmem:[%s15324_s1 + $0x3a8] ss:$16 sps:$4 sm:$0xff]  }
 0x123   :  { %3636 = vmatprep.mubr.bf16.mxu0 %v12306_v52  ;;  %4695 = vmatprep.mubr.bf16.mxu1 %v11896_v42 }
 0x124   :  { %4910 = vmatprep.subr.bf16.mxu1 %v10696_v34  ;;  %v12362_v34 = vcombine.high %v148_v24, %v152_v27  ;;  %3857 = vmatprep.subr.bf16.mxu0 %v10699_v5  ;;  %v168_v5 = vld [vmem:[%s15325_s0 + $0x468] sm:$0xff] }
 0x125   :  { %v12334_v35 = vpop.f32.mrb[8].mxu1  ;;  %4911 = vmatpush1.bf16.msra.mxu1 %v10694_v55 }
 0x126   :  { %15421 = vst [vmem:[#allocation24_spill] sm:$0xff] %v12334_v35  ;;  %v12338_v42 = vpop.f32.mrb[9].mxu1  ;;  %15427 = vst [vmem:[#allocation30_spill] sm:$0xff] %v12362_v34 }
 0x127   :  { %15422 = vst [vmem:[#allocation25_spill] sm:$0xff] %v12338_v42  ;;  %v12342_v58 = vpop.f32.mrb[10].mxu1 }
 0x128   :  { %15423 = vst [vmem:[#allocation26_spill] sm:$0xff] %v12342_v58  ;;  %v12344_v63 = vpop.f32.mrb[11].mxu1 }
 0x129   :  { %15424 = vst [vmem:[#allocation27_spill] sm:$0xff] %v12344_v63 }
 0x12a   :  { %3637 = vmatmul.mubr.bf16.gmra.mrb[52].mxu0 %v12336_v38  ;;  %4696 = vmatmul.mubr.bf16.gmra.mrb[116].mxu1 %v11916_v4 }
 0x12b   :  { %3646 = vmatprep.mubr.bf16.mxu0 %v12340_v44  ;;  %4705 = vmatprep.mubr.bf16.mxu1 %v11920_v43  ;;  %v10697_v43 = vld [vmem:[%s15324_s1 + $0x5e0] ss:$16 sps:$4 sm:$0xff]  }
 0x12c   :  { %3858 = vmatpush1.bf16.msra.mxu0 %v10697_v43  ;;  %v10703_v43 = vld [vmem:[%s15324_s1 + $0x3c8] ss:$16 sps:$4 sm:$0xff]  }
 0x12d   :  { %v12356_v17 = vpop.f32.mrb[12].mxu1 }
 0x12e   :  { %15425 = vst [vmem:[#allocation28_spill] sm:$0xff] %v12356_v17  ;;  %v12360_v55 = vpop.f32.mrb[13].mxu1  ;;  %v12392_v17 = vcombine.low %v148_v24, %v152_v27  ;;  %v10708_v24 = vld [vmem:[%s15324_s1 + $0x3ec] ss:$16 sps:$4 sm:$0xff]  }
 0x12f   :  { %15426 = vst [vmem:[#allocation29_spill] sm:$0xff] %v12360_v55  ;;  %v12364_v4 = vpop.f32.mrb[14].mxu1  ;;  %v164_v27 = vld [vmem:[%s15325_s0 + $0x448] sm:$0xff] }
 0x130   :  { %15428 = vst [vmem:[#allocation31_spill] sm:$0xff] %v12364_v4  ;;  %v12366_v63 = vpop.f32.mrb[15].mxu1  ;;  %v160_v4 = vld [vmem:[%s15325_s0 + $0x428] sm:$0xff] }
 0x131   :  { %15429 = vst [vmem:[#allocation32_spill] sm:$0xff] %v12366_v63  ;;  %v156_v63 = vld [vmem:[%s15325_s0 + $0x408] sm:$0xff] }
 0x132   :  { %3647 = vmatmul.mubr.bf16.gmra.mrb[56].mxu0 %v12358_v26  ;;  %4706 = vmatmul.mubr.bf16.gmra.mrb[120].mxu1 %v11940_v33  ;;  %v10702_v33 = vld [vmem:[%s15324_s1 + $0x3ac] ss:$16 sps:$4 sm:$0xff]   ;;  %v12396_v58 = vcombine.high %v156_v63, %v160_v4 }
 0x133   :  { %3656 = vmatprep.mubr.bf16.mxu0 %v12362_v34  ;;  %4715 = vmatprep.mubr.bf16.mxu1 %v11944_v37  ;;  %v10705_v34 = vld [vmem:[%s15324_s1 + $0x3cc] ss:$16 sps:$4 sm:$0xff]  }
 0x134   :  { %4912 = vmatprep.subr.bf16.mxu1 %v10702_v33  ;;  %v12426_v33 = vcombine.low %v156_v63, %v160_v4  ;;  %v172_v63 = vld [vmem:[%s15325_s0 + $0x488] sm:$0xff] }
 0x135   :  { %v12390_v55 = vpop.f32.mrb[16].mxu1  ;;  %4913 = vmatpush1.bf16.msra.mxu1 %v10700_v8  ;;  %v176_v4 = vld [vmem:[%s15325_s0 + $0x4a8] sm:$0xff] }
 0x136   :  { %15430 = vst [vmem:[#allocation33_spill] sm:$0xff] %v12390_v55  ;;  %v12394_v37 = vpop.f32.mrb[17].mxu1  ;;  %4914 = vmatprep.subr.bf16.mxu1 %v10705_v34  ;;  %v10711_v34 = vld [vmem:[%s15324_s1 + $0x604] ss:$16 sps:$4 sm:$0xff]   ;;  %v280_v55 = vld [vmem:[%s15325_s0 + $0x7e8] sm:$0xff] }
 0x137   :  { %15431 = vst [vmem:[#allocation34_spill] sm:$0xff] %v12394_v37  ;;  %v12398_v42 = vpop.f32.mrb[18].mxu1  ;;  %4180 = vmatprep.subr.bf16.mxu0 %v10711_v34 }
 0x138   :  { %15432 = vst [vmem:[#allocation35_spill] sm:$0xff] %v12398_v42  ;;  %v12400_v35 = vpop.f32.mrb[19].mxu1 }
 0x139   :  { %15433 = vst [vmem:[#allocation36_spill] sm:$0xff] %v12400_v35  ;;  %4915 = vmatpush1.bf16.msra.mxu1 %v10703_v43 }
 0x13a   :  { %3657 = vmatmul.mubr.bf16.gmra.mrb[60].mxu0 %v12392_v17  ;;  %4716 = vmatmul.mubr.bf16.gmra.mrb[124].mxu1 %v11958_v51  ;;  %v10706_v51 = vld [vmem:[%s15324_s1 + $0x3e8] ss:$16 sps:$4 sm:$0xff]  }
 0x13b   :  { %3666 = vmatprep.mubr.bf16.mxu0 %v12396_v58  ;;  %4725 = vmatprep.mubr.bf16.mxu1 %v11332_v19  ;;  %v12430_v19 = vcombine.high %v164_v27, %v168_v5 }
 0x13c   :  { %4916 = vmatprep.subr.bf16.mxu1 %v10708_v24 }
 0x13d   :  { %v12421_v8 = vpop.f32.mrb[20].mxu1  ;;  %4917 = vmatpush1.bf16.msra.mxu1 %v10706_v51  ;;  %v12455_v51 = vcombine.high %v172_v63, %v176_v4 }
 0x13e   :  { %15434 = vst [vmem:[#allocation37_spill] sm:$0xff] %v12421_v8  ;;  %v12428_v35 = vpop.f32.mrb[21].mxu1  ;;  %v15488_v8 = vld [vmem:[#allocation7_spill] sm:$0xff] }
 0x13f   :  { %15435 = vst [vmem:[#allocation38_spill] sm:$0xff] %v12428_v35  ;;  %v12432_v42 = vpop.f32.mrb[22].mxu1  ;;  %v272_v35 = vld [vmem:[%s15325_s0 + $0x7a8] sm:$0xff] }
 0x140   :  { %15436 = vst [vmem:[#allocation39_spill] sm:$0xff] %v12432_v42  ;;  %v12434_v37 = vpop.f32.mrb[23].mxu1  ;;  %v15484_v42 = vld [vmem:[#allocation5_spill] sm:$0xff] }
 0x141   :  { %15437 = vst [vmem:[#allocation40_spill] sm:$0xff] %v12434_v37 }
 0x142   :  { %3667 = vmatmul.mubr.bf16.gmra.mrb[64].mxu0 %v12426_v33  ;;  %4726 = vmatmul.mubr.bf16.gmra.mrb[128].mxu1 %v11414_v45  ;;  %v12451_v45 = vcombine.low %v164_v27, %v168_v5  ;;  %v180_v27 = vld [vmem:[%s15325_s0 + $0x4c8] sm:$0xff] }
 0x143   :  { %3676 = vmatprep.mubr.bf16.mxu0 %v12430_v19  ;;  %4735 = vmatprep.mubr.bf16.mxu1 %v11421_v48  ;;  %v184_v5 = vld [vmem:[%s15325_s0 + $0x4e8] sm:$0xff] }
 0x145   :  { %v12449_v43 = vpop.f32.mrb[24].mxu1 }
 0x146   :  { %15438 = vst [vmem:[#allocation41_spill] sm:$0xff] %v12449_v43  ;;  %v12453_v24 = vpop.f32.mrb[25].mxu1 }
 0x147   :  { %15439 = vst [vmem:[#allocation42_spill] sm:$0xff] %v12453_v24  ;;  %v12457_v37 = vpop.f32.mrb[26].mxu1  ;;  %v12477_v24 = vcombine.high %v180_v27, %v184_v5 }
 0x148   :  { %15440 = vst [vmem:[#allocation43_spill] sm:$0xff] %v12457_v37  ;;  %v12459_v48 = vpop.f32.mrb[27].mxu1  ;;  %v12473_v37 = vcombine.low %v172_v63, %v176_v4  ;;  %v192_v63 = vld [vmem:[%s15325_s0 + $0x528] sm:$0xff] }
 0x149   :  { %15441 = vst [vmem:[#allocation44_spill] sm:$0xff] %v12459_v48 }
 0x14a   :  { %3677 = vmatmul.mubr.bf16.gmra.mrb[68].mxu0 %v12451_v45  ;;  %4736 = vmatmul.mubr.bf16.gmra.mrb[132].mxu1 %v11459_v60 }
 0x14b   :  { %3686 = vmatprep.mubr.bf16.mxu0 %v12455_v51  ;;  %4745 = vmatprep.mubr.bf16.mxu1 %v11463_v62  ;;  %v188_v62 = vld [vmem:[%s15325_s0 + $0x508] sm:$0xff] }
 0x14d   :  { %v12471_v34 = vpop.f32.mrb[28].mxu1 }
 0x14e   :  { %15442 = vst [vmem:[#allocation45_spill] sm:$0xff] %v12471_v34  ;;  %v12475_v48 = vpop.f32.mrb[29].mxu1 }
 0x14f   :  { %15443 = vst [vmem:[#allocation46_spill] sm:$0xff] %v12475_v48  ;;  %v12479_v60 = vpop.f32.mrb[30].mxu1  ;;  %v12499_v48 = vcombine.high %v188_v62, %v192_v63 }
 0x150   :  { %15444 = vst [vmem:[#allocation47_spill] sm:$0xff] %v12479_v60  ;;  %v12481_v43 = vpop.f32.mrb[31].mxu1  ;;  %v12495_v60 = vcombine.low %v180_v27, %v184_v5  ;;  %v200_v27 = vld [vmem:[%s15325_s0 + $0x568] sm:$0xff] }
 0x151   :  { %15445 = vst [vmem:[#allocation48_spill] sm:$0xff] %v12481_v43 }
 0x152   :  { %3687 = vmatmul.mubr.bf16.gmra.mrb[72].mxu0 %v12473_v37  ;;  %4746 = vmatmul.mubr.bf16.gmra.mrb[136].mxu1 %v11507_v12 }
 0x153   :  { %3696 = vmatprep.mubr.bf16.mxu0 %v12477_v24  ;;  %4755 = vmatprep.mubr.bf16.mxu1 %v11511_v14  ;;  %v196_v14 = vld [vmem:[%s15325_s0 + $0x548] sm:$0xff] }
 0x155   :  { %v12493_v4 = vpop.f32.mrb[32].mxu1 }
 0x156   :  { %15446 = vst [vmem:[#allocation49_spill] sm:$0xff] %v12493_v4  ;;  %v12497_v43 = vpop.f32.mrb[33].mxu1 }
 0x157   :  { %15447 = vst [vmem:[#allocation50_spill] sm:$0xff] %v12497_v43  ;;  %v12501_v12 = vpop.f32.mrb[34].mxu1  ;;  %v12521_v43 = vcombine.high %v196_v14, %v200_v27 }
 0x158   :  { %15448 = vst [vmem:[#allocation51_spill] sm:$0xff] %v12501_v12  ;;  %v12503_v34 = vpop.f32.mrb[35].mxu1  ;;  %v12517_v12 = vcombine.low %v188_v62, %v192_v63  ;;  %v204_v62 = vld [vmem:[%s15325_s0 + $0x588] sm:$0xff] }
 0x159   :  { %15449 = vst [vmem:[#allocation52_spill] sm:$0xff] %v12503_v34  ;;  %v208_v63 = vld [vmem:[%s15325_s0 + $0x5a8] sm:$0xff] }
 0x15a   :  { %3697 = vmatmul.mubr.bf16.gmra.mrb[76].mxu0 %v12495_v60  ;;  %4756 = vmatmul.mubr.bf16.gmra.mrb[140].mxu1 %v11555_v30 }
 0x15b   :  { %3706 = vmatprep.mubr.bf16.mxu0 %v12499_v48  ;;  %4765 = vmatprep.mubr.bf16.mxu1 %v11559_v32  ;;  %v10720_v32 = vld [vmem:[%s15324_s1 + $0x40c] ss:$16 sps:$4 sm:$0xff]  }
 0x15c   :  { %5239 = vmatprep.subr.bf16.mxu1 %v10720_v32 }
 0x15d   :  { %v12515_v5 = vpop.f32.mrb[36].mxu1 }
 0x15e   :  { %15450 = vst [vmem:[#allocation53_spill] sm:$0xff] %v12515_v5  ;;  %v12519_v34 = vpop.f32.mrb[37].mxu1 }
 0x15f   :  { %15451 = vst [vmem:[#allocation54_spill] sm:$0xff] %v12519_v34  ;;  %v12523_v30 = vpop.f32.mrb[38].mxu1 }
 0x160   :  { %15452 = vst [vmem:[#allocation55_spill] sm:$0xff] %v12523_v30  ;;  %v12525_v4 = vpop.f32.mrb[39].mxu1 }
 0x161   :  { %15453 = vst [vmem:[#allocation56_spill] sm:$0xff] %v12525_v4 }
 0x162   :  { %3707 = vmatmul.mubr.bf16.gmra.mrb[80].mxu0 %v12517_v12  ;;  %4766 = vmatmul.mubr.bf16.gmra.mrb[144].mxu1 %v11603_v50  ;;  %v12542_v50 = vcombine.low %v196_v14, %v200_v27  ;;  %v212_v14 = vld [vmem:[%s15325_s0 + $0x5c8] sm:$0xff] }
 0x163   :  { %3716 = vmatprep.mubr.bf16.mxu0 %v12521_v43  ;;  %4775 = vmatprep.mubr.bf16.mxu1 %v11613_v54  ;;  %v12546_v54 = vcombine.high %v204_v62, %v208_v63  ;;  %v216_v27 = vld [vmem:[%s15325_s0 + $0x5e8] sm:$0xff] }
 0x165   :  { %v12540_v4 = vpop.f32.mrb[40].mxu1 }
 0x166   :  { %15454 = vst [vmem:[#allocation57_spill] sm:$0xff] %v12540_v4  ;;  %v12544_v30 = vpop.f32.mrb[41].mxu1 }
 0x167   :  { %15455 = vst [vmem:[#allocation58_spill] sm:$0xff] %v12544_v30  ;;  %v12548_v34 = vpop.f32.mrb[42].mxu1  ;;  %v12568_v30 = vcombine.high %v212_v14, %v216_v27 }
 0x168   :  { %15456 = vst [vmem:[#allocation59_spill] sm:$0xff] %v12548_v34  ;;  %v12550_v5 = vpop.f32.mrb[43].mxu1  ;;  %v12564_v34 = vcombine.low %v204_v62, %v208_v63  ;;  %v224_v62 = vld [vmem:[%s15325_s0 + $0x628] sm:$0xff] }
 0x169   :  { %15457 = vst [vmem:[#allocation60_spill] sm:$0xff] %v12550_v5 }
 0x16a   :  { %3717 = vmatmul.mubr.bf16.gmra.mrb[84].mxu0 %v12542_v50  ;;  %4776 = vmatmul.mubr.bf16.gmra.mrb[148].mxu1 %v11651_v6 }
 0x16b   :  { %3726 = vmatprep.mubr.bf16.mxu0 %v12546_v54  ;;  %4785 = vmatprep.mubr.bf16.mxu1 %v11661_v10  ;;  %v220_v10 = vld [vmem:[%s15325_s0 + $0x608] sm:$0xff] }
 0x16d   :  { %v12562_v32 = vpop.f32.mrb[44].mxu1 }
 0x16e   :  { %15458 = vst [vmem:[#allocation61_spill] sm:$0xff] %v12562_v32  ;;  %v12566_v5 = vpop.f32.mrb[45].mxu1 }
 0x16f   :  { %15459 = vst [vmem:[#allocation62_spill] sm:$0xff] %v12566_v5  ;;  %v12570_v6 = vpop.f32.mrb[46].mxu1  ;;  %v12590_v5 = vcombine.high %v220_v10, %v224_v62 }
 0x170   :  { %15460 = vst [vmem:[#allocation63_spill] sm:$0xff] %v12570_v6  ;;  %v12572_v4 = vpop.f32.mrb[47].mxu1  ;;  %v12586_v6 = vcombine.low %v212_v14, %v216_v27  ;;  %v232_v14 = vld [vmem:[%s15325_s0 + $0x668] sm:$0xff] }
 0x171   :  { %15461 = vst [vmem:[#allocation64_spill] sm:$0xff] %v12572_v4 }
 0x172   :  { %3727 = vmatmul.mubr.bf16.gmra.mrb[88].mxu0 %v12564_v34  ;;  %4786 = vmatmul.mubr.bf16.gmra.mrb[152].mxu1 %v11699_v28 }
 0x173   :  { %3736 = vmatprep.mubr.bf16.mxu0 %v12568_v30  ;;  %4795 = vmatprep.mubr.bf16.mxu1 %v11709_v36  ;;  %v228_v36 = vld [vmem:[%s15325_s0 + $0x648] sm:$0xff] }
 0x175   :  { %v12584_v63 = vpop.f32.mrb[48].mxu1 }
 0x176   :  { %15462 = vst [vmem:[#allocation65_spill] sm:$0xff] %v12584_v63  ;;  %v12588_v4 = vpop.f32.mrb[49].mxu1 }
 0x177   :  { %15463 = vst [vmem:[#allocation66_spill] sm:$0xff] %v12588_v4  ;;  %v12592_v28 = vpop.f32.mrb[50].mxu1  ;;  %v12612_v4 = vcombine.high %v228_v36, %v232_v14 }
 0x178   :  { %15464 = vst [vmem:[#allocation67_spill] sm:$0xff] %v12592_v28  ;;  %v12594_v32 = vpop.f32.mrb[51].mxu1  ;;  %v12608_v28 = vcombine.low %v220_v10, %v224_v62  ;;  %v240_v10 = vld [vmem:[%s15325_s0 + $0x6a8] sm:$0xff] }
 0x179   :  { %15465 = vst [vmem:[#allocation68_spill] sm:$0xff] %v12594_v32 }
 0x17a   :  { %3737 = vmatmul.mubr.bf16.gmra.mrb[92].mxu0 %v12586_v6  ;;  %4796 = vmatmul.mubr.bf16.gmra.mrb[156].mxu1 %v11747_v56 }
 0x17b   :  { %3746 = vmatprep.mubr.bf16.mxu0 %v12590_v5  ;;  %4805 = vmatprep.mubr.bf16.mxu1 %v11757_v0  ;;  %v236_v0 = vld [vmem:[%s15325_s0 + $0x688] sm:$0xff] }
 0x17d   :  { %v12606_v27 = vpop.f32.mrb[52].mxu1 }
 0x17e   :  { %15466 = vst [vmem:[#allocation69_spill] sm:$0xff] %v12606_v27  ;;  %v12610_v32 = vpop.f32.mrb[53].mxu1 }
 0x17f   :  { %15467 = vst [vmem:[#allocation70_spill] sm:$0xff] %v12610_v32  ;;  %v12614_v56 = vpop.f32.mrb[54].mxu1  ;;  %v12634_v32 = vcombine.high %v236_v0, %v240_v10 }
 0x180   :  { %15468 = vst [vmem:[#allocation71_spill] sm:$0xff] %v12614_v56  ;;  %v12616_v63 = vpop.f32.mrb[55].mxu1  ;;  %v12630_v56 = vcombine.low %v228_v36, %v232_v14  ;;  %v248_v36 = vld [vmem:[%s15325_s0 + $0x6e8] sm:$0xff] }
 0x181   :  { %15469 = vst [vmem:[#allocation72_spill] sm:$0xff] %v12616_v63 }
 0x182   :  { %3747 = vmatmul.mubr.bf16.gmra.mrb[96].mxu0 %v12608_v28  ;;  %4806 = vmatmul.mubr.bf16.gmra.mrb[160].mxu1 %v11795_v22 }
 0x183   :  { %3756 = vmatprep.mubr.bf16.mxu0 %v12612_v4  ;;  %4815 = vmatprep.mubr.bf16.mxu1 %v11802_v25  ;;  %v244_v25 = vld [vmem:[%s15325_s0 + $0x6c8] sm:$0xff] }
 0x185   :  { %v12628_v62 = vpop.f32.mrb[56].mxu1 }
 0x186   :  { %15470 = vst [vmem:[#allocation73_spill] sm:$0xff] %v12628_v62  ;;  %v12632_v63 = vpop.f32.mrb[57].mxu1 }
 0x187   :  { %15471 = vst [vmem:[#allocation74_spill] sm:$0xff] %v12632_v63  ;;  %v12636_v22 = vpop.f32.mrb[58].mxu1  ;;  %v12656_v63 = vcombine.high %v244_v25, %v248_v36 }
 0x188   :  { %15472 = vst [vmem:[#allocation75_spill] sm:$0xff] %v12636_v22  ;;  %v12638_v27 = vpop.f32.mrb[59].mxu1  ;;  %v12652_v22 = vcombine.low %v236_v0, %v240_v10  ;;  %v252_v0 = vld [vmem:[%s15325_s0 + $0x708] sm:$0xff] }
 0x189   :  { %15473 = vst [vmem:[#allocation76_spill] sm:$0xff] %v12638_v27  ;;  %v256_v10 = vld [vmem:[%s15325_s0 + $0x728] sm:$0xff] }
 0x18a   :  { %3757 = vmatmul.mubr.bf16.gmra.mrb[100].mxu0 %v12630_v56  ;;  %4816 = vmatmul.mubr.bf16.gmra.mrb[164].mxu1 %v11822_v39 }
 0x18b   :  { %3766 = vmatprep.mubr.bf16.mxu0 %v12634_v32  ;;  %4825 = vmatprep.mubr.bf16.mxu1 %v11826_v41  ;;  %v15478_v41 = vld [vmem:[#allocation2_spill] sm:$0xff] }
 0x18d   :  { %v12650_v14 = vpop.f32.mrb[60].mxu1 }
 0x18e   :  { %15474 = vst [vmem:[#allocation77_spill] sm:$0xff] %v12650_v14  ;;  %v12654_v27 = vpop.f32.mrb[61].mxu1  ;;  %v264_v14 = vld [vmem:[%s15325_s0 + $0x768] sm:$0xff] }
 0x18f   :  { %15475 = vst [vmem:[#allocation78_spill] sm:$0xff] %v12654_v27  ;;  %v12658_v39 = vpop.f32.mrb[62].mxu1  ;;  %v12672_v27 = vcombine.low %v244_v25, %v248_v36  ;;  %v12686_v25 = vcombine.low %v252_v0, %v256_v10 }
 0x190   :  { %15476 = vst [vmem:[#allocation79_spill] sm:$0xff] %v12658_v39  ;;  %v12660_v62 = vpop.f32.mrb[63].mxu1  ;;  %v12674_v39 = vcombine.high %v252_v0, %v256_v10 }
 0x191   :  { %15477 = vst [vmem:[#allocation80_spill] sm:$0xff] %v12660_v62  ;;  %v15480_v62 = vld [vmem:[#allocation3_spill] sm:$0xff] }
 0x192   :  { %3767 = vmatmul.mubr.bf16.gmra.mrb[104].mxu0 %v12652_v22  ;;  %4826 = vmatmul.mubr.bf16.gmra.mrb[168].mxu1 %v11846_v57  ;;  %15479 = vst [vmem:[#allocation2_spill] sm:$0xff] %v12674_v39  ;;  %v15481_v57 = vld [vmem:[#allocation4_spill] sm:$0xff]  ;;  %15482 = vst [vmem:[#allocation3_spill] sm:$0xff] %v12686_v25 }
 0x193   :  { %3776 = vmatprep.mubr.bf16.mxu0 %v12656_v63  ;;  %4835 = vmatprep.mubr.bf16.mxu1 %v15478_v41  ;;  %v260_v41 = vld [vmem:[%s15325_s0 + $0x748] sm:$0xff] }
 0x194   :  { %v12688_v36 = vcombine.high %v260_v41, %v264_v14  ;;  %v12700_v0 = vcombine.low %v260_v41, %v264_v14 }
 0x196   :  { %15483 = vst [vmem:[#allocation4_spill] sm:$0xff] %v12688_v36  ;;  %15486 = vst [vmem:[#allocation5_spill] sm:$0xff] %v12700_v0 }
 0x19a   :  { %3777 = vmatmul.mubr.bf16.gmra.mrb[108].mxu0 %v12672_v27  ;;  %4836 = vmatmul.mubr.bf16.gmra.mrb[172].mxu1 %v15480_v62  ;;  %v15485_v62 = vld [vmem:[#allocation6_spill] sm:$0xff] }
 0x19b   :  { %3786 = vmatprep.mubr.bf16.mxu0 %v12674_v39  ;;  %4845 = vmatprep.mubr.bf16.mxu1 %v15481_v57  ;;  %v268_v57 = vld [vmem:[%s15325_s0 + $0x788] sm:$0xff]  ;;  %v10715_v39 = vld [vmem:[%s15324_s1 + $0x640] ss:$16 sps:$4 sm:$0xff]  }
 0x19c   :  { %v12702_v10 = vcombine.high %v268_v57, %v272_v35  ;;  %v12714_v14 = vcombine.low %v268_v57, %v272_v35 }
 0x19e   :  { %15487 = vst [vmem:[#allocation6_spill] sm:$0xff] %v12702_v10  ;;  %15490 = vst [vmem:[#allocation7_spill] sm:$0xff] %v12714_v14 }
 0x1a2   :  { %3787 = vmatmul.mubr.bf16.gmra.mrb[112].mxu0 %v12686_v25  ;;  %4846 = vmatmul.mubr.bf16.gmra.mrb[176].mxu1 %v15484_v42  ;;  %v15489_v42 = vld [vmem:[#allocation8_spill] sm:$0xff] }
 0x1a3   :  { %3796 = vmatprep.mubr.bf16.mxu0 %v12688_v36  ;;  %4855 = vmatprep.mubr.bf16.mxu1 %v15485_v62  ;;  %v276_v62 = vld [vmem:[%s15325_s0 + $0x7c8] sm:$0xff]  ;;  %v15501_v36 = vld [vmem:[#allocation14_spill] sm:$0xff]  ;;  %v45_v25 = vld [vmem:[%s15325_s0 + $0x90] sm:$0xff] }
 0x1a4   :  { %v12716_v41 = vcombine.high %v276_v62, %v280_v55  ;;  %v12728_v35 = vcombine.low %v276_v62, %v280_v55  ;;  %v10709_v62 = vld [vmem:[%s15324_s1 + $0x600] ss:$16 sps:$4 sm:$0xff]  }
 0x1a6   :  { %15491 = vst [vmem:[#allocation8_spill] sm:$0xff] %v12716_v41 }
 0x1aa   :  { %3797 = vmatmul.mubr.bf16.gmra.mrb[116].mxu0 %v12700_v0  ;;  %4856 = vmatmul.mubr.bf16.gmra.mrb[180].mxu1 %v15488_v8  ;;  %v15492_v0 = vld [vmem:[#allocation9_spill] sm:$0xff]  ;;  %v15493_v8 = vld [vmem:[#allocation10_spill] sm:$0xff] }
 0x1ab   :  { %3806 = vmatprep.mubr.bf16.mxu0 %v12702_v10  ;;  %4865 = vmatprep.mubr.bf16.mxu1 %v15489_v42  ;;  %v29_v42 = vld [vmem:[%s15325_s0 + $0x10] sm:$0xff]  ;;  %15494 = vst [vmem:[#allocation9_spill] sm:$0xff] %v12728_v35 }
 0x1ac   :  { %v33_v10 = vld [vmem:[%s15325_s0 + $0x30] sm:$0xff] }
 0x1ad   :  { %v12730_v57 = vcombine.high %v29_v42, %v33_v10  ;;  %v12742_v55 = vcombine.low %v29_v42, %v33_v10  ;;  %v10726_v10 = vld [vmem:[%s15324_s1 + $0x42c] ss:$16 sps:$4 sm:$0xff]   ;;  %v10712_v42 = vld [vmem:[%s15324_s1 + $0x620] ss:$16 sps:$4 sm:$0xff]  }
 0x1af   :  { %15495 = vst [vmem:[#allocation10_spill] sm:$0xff] %v12730_v57 }
 0x1b2   :  { %3807 = vmatmul.mubr.bf16.gmra.mrb[120].mxu0 %v12714_v14  ;;  %4866 = vmatmul.mubr.bf16.gmra.mrb[184].mxu1 %v15492_v0  ;;  %v15496_v14 = vld [vmem:[#allocation11_spill] sm:$0xff]  ;;  %v15497_v0 = vld [vmem:[#allocation12_spill] sm:$0xff] }
 0x1b3   :  { %3816 = vmatprep.mubr.bf16.mxu0 %v12716_v41  ;;  %4875 = vmatprep.mubr.bf16.mxu1 %v15493_v8  ;;  %v37_v8 = vld [vmem:[%s15325_s0 + $0x50] sm:$0xff]  ;;  %15498 = vst [vmem:[#allocation11_spill] sm:$0xff] %v12742_v55 }
 0x1b4   :  { %v41_v41 = vld [vmem:[%s15325_s0 + $0x70] sm:$0xff] }
 0x1ba   :  { %3817 = vmatmul.mubr.bf16.gmra.mrb[124].mxu0 %v12728_v35  ;;  %4876 = vmatmul.mubr.bf16.gmra.mrb[188].mxu1 %v15496_v14  ;;  %v12747_v35 = vcombine.high %v37_v8, %v41_v41  ;;  %v10714_v14 = vld [vmem:[%s15324_s1 + $0x624] ss:$16 sps:$4 sm:$0xff]  }
 0x1bb   :  { %3859 = vmatprep.mubr.bf16.mxu0 %v12730_v57  ;;  %4918 = vmatprep.mubr.bf16.mxu1 %v15497_v0  ;;  %v10718_v0 = vld [vmem:[%s15324_s1 + $0x408] ss:$16 sps:$4 sm:$0xff]  }
 0x1bc   :  { %15499 = vst [vmem:[#allocation12_spill] sm:$0xff] %v12747_v35  ;;  %v15500_v57 = vld [vmem:[#allocation13_spill] sm:$0xff] }
 0x1c2   :  { %3860 = vmatmul.mubr.bf16.vlgmr.msra.gmra.mrb[0].mxu0 %v12742_v55  ;;  %4919 = vmatmul.mubr.bf16.vlgmr.msra.gmra.mrb[64].mxu1 %v15500_v57  ;;  %v49_v57 = vld [vmem:[%s15325_s0 + $0xb0] sm:$0xff]  ;;  %v12777_v55 = vcombine.low %v37_v8, %v41_v41  ;;  %v10730_v41 = vld [vmem:[%s15324_s1 + $0x448] ss:$16 sps:$4 sm:$0xff]   ;;  %v10738_v8 = vld [vmem:[%s15324_s1 + $0x46c] ss:$16 sps:$4 sm:$0xff]  }
 0x1c3   :  { %4181 = vmatpush1.bf16.msra.mxu0 %v10709_v62  ;;  %3869 = vmatprep.mubr.bf16.mxu0 %v12747_v35  ;;  %v10717_v62 = vld [vmem:[%s15324_s1 + $0x644] ss:$16 sps:$4 sm:$0xff]   ;;  %v10724_v35 = vld [vmem:[%s15324_s1 + $0x428] ss:$16 sps:$4 sm:$0xff]  }
 0x1c4   :  { %4928 = vmatprep.mubr.bf16.mxu1 %v15501_v36  ;;  %4182 = vmatprep.subr.bf16.mxu0 %v10714_v14  ;;  %15502 = vst [vmem:[#allocation13_spill] sm:$0xff] %v12777_v55  ;;  %v12779_v36 = vcombine.high %v45_v25, %v49_v57  ;;  %v10732_v14 = vld [vmem:[%s15324_s1 + $0x44c] ss:$16 sps:$4 sm:$0xff]  }
 0x1c5   :  { %5240 = vmatpush1.bf16.msra.mxu1 %v10718_v0  ;;  %v10723_v0 = vld [vmem:[%s15324_s1 + $0x664] ss:$16 sps:$4 sm:$0xff]  }
 0x1c6   :  { %5241 = vmatprep.subr.bf16.mxu1 %v10726_v10  ;;  %15503 = vst [vmem:[#allocation14_spill] sm:$0xff] %v12779_v36  ;;  %v15504_v10 = vld [vmem:[#allocation15_spill] sm:$0xff] }
 0x1c7   :  { %4183 = vmatpush1.bf16.msra.mxu0 %v10712_v42  ;;  %v57_v42 = vld [vmem:[%s15325_s0 + $0xf0] sm:$0xff] }
 0x1c8   :  { %4184 = vmatprep.subr.bf16.mxu0 %v10717_v62  ;;  %v10729_v62 = vld [vmem:[%s15324_s1 + $0x684] ss:$16 sps:$4 sm:$0xff]  }
 0x1c9   :  { %5242 = vmatpush1.bf16.msra.mxu1 %v10724_v35  ;;  %v53_v35 = vld [vmem:[%s15325_s0 + $0xd0] sm:$0xff] }
 0x1ca   :  { %3870 = vmatmul.mubr.bf16.gmra.mrb[4].mxu0 %v12777_v55  ;;  %4929 = vmatmul.mubr.bf16.gmra.mrb[68].mxu1 %v12009_v20  ;;  %v10721_v20 = vld [vmem:[%s15324_s1 + $0x660] ss:$16 sps:$4 sm:$0xff]   ;;  %v12817_v55 = vcombine.high %v53_v35, %v57_v42 }
 0x1cb   :  { %3879 = vmatprep.mubr.bf16.mxu0 %v12779_v36  ;;  %4938 = vmatprep.mubr.bf16.mxu1 %v15504_v10  ;;  %v10736_v10 = vld [vmem:[%s15324_s1 + $0x468] ss:$16 sps:$4 sm:$0xff]   ;;  %v12815_v36 = vcombine.low %v45_v25, %v49_v57  ;;  %v10750_v57 = vld [vmem:[%s15324_s1 + $0x4ac] ss:$16 sps:$4 sm:$0xff]  }
 0x1cc   :  { %4185 = vmatpush1.bf16.msra.mxu0 %v10715_v39  ;;  %5243 = vmatprep.subr.bf16.mxu1 %v10732_v14  ;;  %v10727_v39 = vld [vmem:[%s15324_s1 + $0x680] ss:$16 sps:$4 sm:$0xff]   ;;  %v10744_v14 = vld [vmem:[%s15324_s1 + $0x48c] ss:$16 sps:$4 sm:$0xff]   ;;  %v10742_v25 = vld [vmem:[%s15324_s1 + $0x488] ss:$16 sps:$4 sm:$0xff]  }
 0x1cd   :  { %4186 = vmatprep.subr.bf16.mxu0 %v10723_v0  ;;  %5244 = vmatpush1.bf16.msra.mxu1 %v10730_v41  ;;  %v10735_v0 = vld [vmem:[%s15324_s1 + $0x6a4] ss:$16 sps:$4 sm:$0xff]  }
 0x1ce   :  { %5245 = vmatprep.subr.bf16.mxu1 %v10738_v8  ;;  %v61_v41 = vld [vmem:[%s15325_s0 + $0x110] sm:$0xff] }
 0x1cf   :  { %v65_v8 = vld [vmem:[%s15325_s0 + $0x130] sm:$0xff] }
 0x1d0   :  { %4187 = vmatpush1.bf16.msra.mxu0 %v10721_v20  ;;  %v10741_v20 = vld [vmem:[%s15324_s1 + $0x6c4] ss:$16 sps:$4 sm:$0xff]  }
 0x1d1   :  { %4188 = vmatprep.subr.bf16.mxu0 %v10729_v62  ;;  %5246 = vmatpush1.bf16.msra.mxu1 %v10736_v10  ;;  %v12853_v62 = vcombine.low %v53_v35, %v57_v42  ;;  %v12855_v10 = vcombine.high %v61_v41, %v65_v8  ;;  %v10754_v35 = vld [vmem:[%s15324_s1 + $0x4c8] ss:$16 sps:$4 sm:$0xff]   ;;  %v10762_v42 = vld [vmem:[%s15324_s1 + $0x4ec] ss:$16 sps:$4 sm:$0xff]  }
 0x1d2   :  { %3880 = vmatmul.mubr.bf16.gmra.mrb[8].mxu0 %v12815_v36  ;;  %4939 = vmatmul.mubr.bf16.gmra.mrb[72].mxu1 %v12047_v23  ;;  %v10733_v23 = vld [vmem:[%s15324_s1 + $0x6a0] ss:$16 sps:$4 sm:$0xff]  }
 0x1d3   :  { %3889 = vmatprep.mubr.bf16.mxu0 %v12817_v55  ;;  %4948 = vmatprep.mubr.bf16.mxu1 %v12049_v47  ;;  %v10748_v47 = vld [vmem:[%s15324_s1 + $0x4a8] ss:$16 sps:$4 sm:$0xff]  }
 0x1d4   :  { %4189 = vmatpush1.bf16.msra.mxu0 %v10727_v39  ;;  %5247 = vmatprep.subr.bf16.mxu1 %v10744_v14  ;;  %v10739_v39 = vld [vmem:[%s15324_s1 + $0x6c0] ss:$16 sps:$4 sm:$0xff]   ;;  %v10756_v14 = vld [vmem:[%s15324_s1 + $0x4cc] ss:$16 sps:$4 sm:$0xff]  }
 0x1d5   :  { %4190 = vmatprep.subr.bf16.mxu0 %v10735_v0  ;;  %5248 = vmatpush1.bf16.msra.mxu1 %v10742_v25  ;;  %v10747_v0 = vld [vmem:[%s15324_s1 + $0x6e4] ss:$16 sps:$4 sm:$0xff]  }
 0x1d6   :  { %5249 = vmatprep.subr.bf16.mxu1 %v10750_v57  ;;  %v69_v25 = vld [vmem:[%s15325_s0 + $0x150] sm:$0xff] }
 0x1d7   :  { %v73_v57 = vld [vmem:[%s15325_s0 + $0x170] sm:$0xff] }
 0x1d8   :  { %4191 = vmatpush1.bf16.msra.mxu0 %v10733_v23  ;;  %v10753_v23 = vld [vmem:[%s15324_s1 + $0x704] ss:$16 sps:$4 sm:$0xff]  }
 0x1d9   :  { %4192 = vmatprep.subr.bf16.mxu0 %v10741_v20  ;;  %5250 = vmatpush1.bf16.msra.mxu1 %v10748_v47  ;;  %v12891_v20 = vcombine.low %v61_v41, %v65_v8  ;;  %v12893_v47 = vcombine.high %v69_v25, %v73_v57  ;;  %v10766_v41 = vld [vmem:[%s15324_s1 + $0x508] ss:$16 sps:$4 sm:$0xff]   ;;  %v10768_v8 = vld [vmem:[%s15324_s1 + $0x50c] ss:$16 sps:$4 sm:$0xff]  }
 0x1da   :  { %3890 = vmatmul.mubr.bf16.gmra.mrb[12].mxu0 %v12853_v62  ;;  %4949 = vmatmul.mubr.bf16.gmra.mrb[76].mxu1 %v12085_v46  ;;  %v10745_v46 = vld [vmem:[%s15324_s1 + $0x6e0] ss:$16 sps:$4 sm:$0xff]  }
 0x1db   :  { %3899 = vmatprep.mubr.bf16.mxu0 %v12855_v10  ;;  %4958 = vmatprep.mubr.bf16.mxu1 %v12087_v61  ;;  %v10760_v61 = vld [vmem:[%s15324_s1 + $0x4e8] ss:$16 sps:$4 sm:$0xff]  }
 0x1dc   :  { %4193 = vmatpush1.bf16.msra.mxu0 %v10739_v39  ;;  %5251 = vmatprep.subr.bf16.mxu1 %v10756_v14  ;;  %v10751_v39 = vld [vmem:[%s15324_s1 + $0x700] ss:$16 sps:$4 sm:$0xff]   ;;  %v10759_v14 = vld [vmem:[%s15324_s1 + $0x724] ss:$16 sps:$4 sm:$0xff]  }
 0x1dd   :  { %4194 = vmatprep.subr.bf16.mxu0 %v10747_v0  ;;  %5252 = vmatpush1.bf16.msra.mxu1 %v10754_v35  ;;  %v77_v0 = vld [vmem:[%s15325_s0 + $0x190] sm:$0xff] }
 0x1de   :  { %5253 = vmatprep.subr.bf16.mxu1 %v10762_v42  ;;  %v10757_v35 = vld [vmem:[%s15324_s1 + $0x720] ss:$16 sps:$4 sm:$0xff]   ;;  %v12923_v42 = vcombine.low %v69_v25, %v73_v57 }
 0x1df   :  { %v85_v25 = vld [vmem:[%s15325_s0 + $0x1d0] sm:$0xff] }
 0x1e0   :  { %4195 = vmatpush1.bf16.msra.mxu0 %v10745_v46  ;;  %v89_v57 = vld [vmem:[%s15325_s0 + $0x1f0] sm:$0xff] }
 0x1e1   :  { %4196 = vmatprep.subr.bf16.mxu0 %v10753_v23  ;;  %5254 = vmatpush1.bf16.msra.mxu1 %v10760_v61  ;;  %v10763_v23 = vld [vmem:[%s15324_s1 + $0x740] ss:$16 sps:$4 sm:$0xff]  }
 0x1e2   :  { %3900 = vmatmul.mubr.bf16.gmra.mrb[16].mxu0 %v12891_v20  ;;  %4959 = vmatmul.mubr.bf16.gmra.mrb[80].mxu1 %v12123_v59  ;;  %v81_v59 = vld [vmem:[%s15325_s0 + $0x1b0] sm:$0xff] }
 0x1e3   :  { %3909 = vmatprep.mubr.bf16.mxu0 %v12893_v47  ;;  %4968 = vmatprep.mubr.bf16.mxu1 %v12125_v13  ;;  %v10765_v13 = vld [vmem:[%s15324_s1 + $0x744] ss:$16 sps:$4 sm:$0xff]   ;;  %v12925_v46 = vcombine.high %v77_v0, %v81_v59  ;;  %v12940_v61 = vcombine.low %v77_v0, %v81_v59  ;;  %v12966_v0 = vcombine.low %v85_v25, %v89_v57 }
 0x1e4   :  { %4197 = vmatpush1.bf16.msra.mxu0 %v10751_v39  ;;  %5255 = vmatprep.subr.bf16.mxu1 %v10768_v8  ;;  %v12942_v39 = vcombine.high %v85_v25, %v89_v57  ;;  %v97_v8 = vld [vmem:[%s15325_s0 + $0x230] sm:$0xff]  ;;  %v10778_v25 = vld [vmem:[%s15324_s1 + $0x548] ss:$16 sps:$4 sm:$0xff]  }
 0x1e5   :  { %4198 = vmatprep.subr.bf16.mxu0 %v10759_v14  ;;  %5256 = vmatpush1.bf16.msra.mxu1 %v10766_v41  ;;  %v10772_v14 = vld [vmem:[%s15324_s1 + $0x528] ss:$16 sps:$4 sm:$0xff]   ;;  %v93_v41 = vld [vmem:[%s15325_s0 + $0x210] sm:$0xff] }
 0x1e6   :  { %v12968_v59 = vcombine.high %v93_v41, %v97_v8  ;;  %v109_v57 = vld [vmem:[%s15325_s0 + $0x290] sm:$0xff] }
 0x1e8   :  { %4199 = vmatpush1.bf16.msra.mxu0 %v10757_v35  ;;  %v105_v35 = vld [vmem:[%s15325_s0 + $0x270] sm:$0xff] }
 0x1e9   :  { %4200 = vmatprep.subr.bf16.mxu0 %v10765_v13  ;;  %v12980_v13 = vcombine.low %v93_v41, %v97_v8 }
 0x1ea   :  { %3910 = vmatmul.mubr.bf16.gmra.mrb[20].mxu0 %v12923_v42  ;;  %4969 = vmatmul.mubr.bf16.gmra.mrb[84].mxu1 %v12155_v1  ;;  %v10769_v1 = vld [vmem:[%s15324_s1 + $0x760] ss:$16 sps:$4 sm:$0xff]  }
 0x1eb   :  { %3919 = vmatprep.mubr.bf16.mxu0 %v12925_v46  ;;  %4978 = vmatprep.mubr.bf16.mxu1 %v12157_v29  ;;  %v10771_v29 = vld [vmem:[%s15324_s1 + $0x764] ss:$16 sps:$4 sm:$0xff]  }
 0x1ec   :  { %4201 = vmatpush1.bf16.msra.mxu0 %v10763_v23 }
 0x1ed   :  { %4202 = vmatprep.subr.bf16.mxu0 %v10771_v29 }
 0x1f0   :  { %4203 = vmatpush1.bf16.msra.mxu0 %v10769_v1  ;;  %v113_v1 = vld [vmem:[%s15325_s0 + $0x2b0] sm:$0xff] }
 0x1f1   :  { %v13020_v41 = vcombine.low %v109_v57, %v113_v1 }
 0x1f2   :  { %3920 = vmatmul.mubr.bf16.gmra.mrb[24].mxu0 %v12940_v61  ;;  %4979 = vmatmul.mubr.bf16.gmra.mrb[88].mxu1 %v12172_v31  ;;  %v10774_v31 = vld [vmem:[%s15324_s1 + $0x52c] ss:$16 sps:$4 sm:$0xff]  }
 0x1f3   :  { %3929 = vmatprep.mubr.bf16.mxu0 %v12942_v39  ;;  %4988 = vmatprep.mubr.bf16.mxu1 %v12174_v7  ;;  %v101_v7 = vld [vmem:[%s15325_s0 + $0x250] sm:$0xff] }
 0x1f4   :  { %5257 = vmatprep.subr.bf16.mxu1 %v10774_v31  ;;  %v12982_v23 = vcombine.high %v101_v7, %v105_v35  ;;  %v13006_v29 = vcombine.low %v101_v7, %v105_v35  ;;  %v121_v31 = vld [vmem:[%s15325_s0 + $0x2f0] sm:$0xff]  ;;  %v10784_v7 = vld [vmem:[%s15324_s1 + $0x568] ss:$16 sps:$4 sm:$0xff]  }
 0x1f5   :  { %5258 = vmatpush1.bf16.msra.mxu1 %v10772_v14  ;;  %v13008_v14 = vcombine.high %v109_v57, %v113_v1  ;;  %v125_v35 = vld [vmem:[%s15325_s0 + $0x310] sm:$0xff] }
 0x1fa   :  { %3930 = vmatmul.mubr.bf16.gmra.mrb[28].mxu0 %v12966_v0  ;;  %4989 = vmatmul.mubr.bf16.gmra.mrb[92].mxu1 %v12198_v3  ;;  %v10775_v3 = vld [vmem:[%s15324_s1 + $0x780] ss:$16 sps:$4 sm:$0xff]  }
 0x1fb   :  { %3939 = vmatprep.mubr.bf16.mxu0 %v12968_v59  ;;  %4998 = vmatprep.mubr.bf16.mxu1 %v12200_v49  ;;  %v10777_v49 = vld [vmem:[%s15324_s1 + $0x784] ss:$16 sps:$4 sm:$0xff]  }
 0x1fc   :  { %4204 = vmatprep.subr.bf16.mxu0 %v10777_v49 }
 0x1fd   :  { %4205 = vmatpush1.bf16.msra.mxu0 %v10775_v3  ;;  %v129_v3 = vld [vmem:[%s15325_s0 + $0x330] sm:$0xff] }
 0x1fe   :  { %v13060_v57 = vcombine.low %v125_v35, %v129_v3 }
 0x202   :  { %3940 = vmatmul.mubr.bf16.gmra.mrb[32].mxu0 %v12980_v13  ;;  %4999 = vmatmul.mubr.bf16.gmra.mrb[96].mxu1 %v12212_v53  ;;  %v10780_v53 = vld [vmem:[%s15324_s1 + $0x54c] ss:$16 sps:$4 sm:$0xff]  }
 0x203   :  { %3949 = vmatprep.mubr.bf16.mxu0 %v12982_v23  ;;  %5008 = vmatprep.mubr.bf16.mxu1 %v12214_v11  ;;  %v117_v11 = vld [vmem:[%s15325_s0 + $0x2d0] sm:$0xff] }
 0x204   :  { %5259 = vmatprep.subr.bf16.mxu1 %v10780_v53  ;;  %v13022_v8 = vcombine.high %v117_v11, %v121_v31  ;;  %v13046_v49 = vcombine.low %v117_v11, %v121_v31  ;;  %v137_v53 = vld [vmem:[%s15325_s0 + $0x370] sm:$0xff]  ;;  %v10790_v11 = vld [vmem:[%s15324_s1 + $0x588] ss:$16 sps:$4 sm:$0xff]  }
 0x205   :  { %5260 = vmatpush1.bf16.msra.mxu1 %v10778_v25  ;;  %v13048_v25 = vcombine.high %v125_v35, %v129_v3  ;;  %v141_v31 = vld [vmem:[%s15325_s0 + $0x390] sm:$0xff] }
 0x20a   :  { %3950 = vmatmul.mubr.bf16.gmra.mrb[36].mxu0 %v13006_v29  ;;  %5009 = vmatmul.mubr.bf16.gmra.mrb[100].mxu1 %v12238_v9  ;;  %v10781_v9 = vld [vmem:[%s15324_s1 + $0x7a0] ss:$16 sps:$4 sm:$0xff]  }
 0x20b   :  { %3959 = vmatprep.mubr.bf16.mxu0 %v13008_v14  ;;  %5018 = vmatprep.mubr.bf16.mxu1 %v12240_v15  ;;  %v10783_v15 = vld [vmem:[%s15324_s1 + $0x7a4] ss:$16 sps:$4 sm:$0xff]  }
 0x20c   :  { %4206 = vmatprep.subr.bf16.mxu0 %v10783_v15 }
 0x20d   :  { %4207 = vmatpush1.bf16.msra.mxu0 %v10781_v9  ;;  %v145_v9 = vld [vmem:[%s15325_s0 + $0x3b0] sm:$0xff] }
 0x20e   :  { %v13100_v35 = vcombine.low %v141_v31, %v145_v9 }
 0x212   :  { %3960 = vmatmul.mubr.bf16.gmra.mrb[40].mxu0 %v13020_v41  ;;  %5019 = vmatmul.mubr.bf16.gmra.mrb[104].mxu1 %v12252_v16  ;;  %v10786_v16 = vld [vmem:[%s15324_s1 + $0x56c] ss:$16 sps:$4 sm:$0xff]  }
 0x213   :  { %3969 = vmatprep.mubr.bf16.mxu0 %v13022_v8  ;;  %5028 = vmatprep.mubr.bf16.mxu1 %v12254_v18  ;;  %v133_v18 = vld [vmem:[%s15325_s0 + $0x350] sm:$0xff] }
 0x214   :  { %5261 = vmatprep.subr.bf16.mxu1 %v10786_v16  ;;  %v13062_v1 = vcombine.high %v133_v18, %v137_v53  ;;  %v13086_v15 = vcombine.low %v133_v18, %v137_v53  ;;  %v153_v16 = vld [vmem:[%s15325_s0 + $0x3f0] sm:$0xff]  ;;  %v10796_v18 = vld [vmem:[%s15324_s1 + $0x5a8] ss:$16 sps:$4 sm:$0xff]   ;;  %v15505_v53 = vld [vmem:[#allocation30_spill] sm:$0xff] }
 0x215   :  { %5262 = vmatpush1.bf16.msra.mxu1 %v10784_v7  ;;  %v13088_v7 = vcombine.high %v141_v31, %v145_v9  ;;  %v10801_v31 = vld [vmem:[%s15324_s1 + $0x5cc] ss:$16 sps:$4 sm:$0xff]   ;;  %v10799_v9 = vld [vmem:[%s15324_s1 + $0x5c8] ss:$16 sps:$4 sm:$0xff]  }
 0x21a   :  { %3970 = vmatmul.mubr.bf16.gmra.mrb[44].mxu0 %v13046_v49  ;;  %5029 = vmatmul.mubr.bf16.gmra.mrb[108].mxu1 %v12280_v2  ;;  %v10787_v2 = vld [vmem:[%s15324_s1 + $0x7c0] ss:$16 sps:$4 sm:$0xff]  }
 0x21b   :  { %3979 = vmatprep.mubr.bf16.mxu0 %v13048_v25  ;;  %5038 = vmatprep.mubr.bf16.mxu1 %v12284_v21  ;;  %v10789_v21 = vld [vmem:[%s15324_s1 + $0x7c4] ss:$16 sps:$4 sm:$0xff]  }
 0x21c   :  { %4208 = vmatprep.subr.bf16.mxu0 %v10789_v21  ;;  %v161_v21 = vld [vmem:[%s15325_s0 + $0x430] sm:$0xff] }
 0x21d   :  { %4209 = vmatpush1.bf16.msra.mxu0 %v10787_v2  ;;  %v157_v2 = vld [vmem:[%s15325_s0 + $0x410] sm:$0xff] }
 0x222   :  { %3980 = vmatmul.mubr.bf16.gmra.mrb[48].mxu0 %v13060_v57  ;;  %5039 = vmatmul.mubr.bf16.gmra.mrb[112].mxu1 %v12302_v40  ;;  %v10792_v40 = vld [vmem:[%s15324_s1 + $0x58c] ss:$16 sps:$4 sm:$0xff]  }
 0x223   :  { %3989 = vmatprep.mubr.bf16.mxu0 %v13062_v1  ;;  %5048 = vmatprep.mubr.bf16.mxu1 %v12306_v52  ;;  %v149_v52 = vld [vmem:[%s15325_s0 + $0x3d0] sm:$0xff] }
 0x224   :  { %5263 = vmatprep.subr.bf16.mxu1 %v10792_v40  ;;  %v13102_v3 = vcombine.high %v149_v52, %v153_v16  ;;  %v13128_v40 = vcombine.high %v157_v2, %v161_v21 }
 0x225   :  { %5264 = vmatpush1.bf16.msra.mxu1 %v10790_v11  ;;  %v13126_v11 = vcombine.low %v149_v52, %v153_v16  ;;  %v10804_v52 = vld [vmem:[%s15324_s1 + $0x5ec] ss:$16 sps:$4 sm:$0xff]   ;;  %v165_v16 = vld [vmem:[%s15325_s0 + $0x450] sm:$0xff] }
 0x22a   :  { %3990 = vmatmul.mubr.bf16.gmra.mrb[52].mxu0 %v13086_v15  ;;  %5049 = vmatmul.mubr.bf16.gmra.mrb[116].mxu1 %v12336_v38  ;;  %v10795_v38 = vld [vmem:[%s15324_s1 + $0x7e4] ss:$16 sps:$4 sm:$0xff]  }
 0x22b   :  { %3999 = vmatprep.mubr.bf16.mxu0 %v13088_v7  ;;  %5058 = vmatprep.mubr.bf16.mxu1 %v12340_v44  ;;  %v10793_v44 = vld [vmem:[%s15324_s1 + $0x7e0] ss:$16 sps:$4 sm:$0xff]  }
 0x22c   :  { %4210 = vmatprep.subr.bf16.mxu0 %v10795_v38  ;;  %v13152_v38 = vcombine.low %v157_v2, %v161_v21  ;;  %v185_v21 = vld [vmem:[%s15325_s0 + $0x4f0] sm:$0xff] }
 0x22d   :  { %4211 = vmatpush1.bf16.msra.mxu0 %v10793_v44  ;;  %v169_v44 = vld [vmem:[%s15325_s0 + $0x470] sm:$0xff] }
 0x22e   :  { %v13169_v2 = vcombine.low %v165_v16, %v169_v44 }
 0x232   :  { %4000 = vmatmul.mubr.bf16.gmra.mrb[56].mxu0 %v13100_v35  ;;  %5059 = vmatmul.mubr.bf16.gmra.mrb[120].mxu1 %v12358_v26  ;;  %v10798_v26 = vld [vmem:[%s15324_s1 + $0x5ac] ss:$16 sps:$4 sm:$0xff]  }
 0x233   :  { %4009 = vmatprep.mubr.bf16.mxu0 %v13102_v3  ;;  %5068 = vmatprep.mubr.bf16.mxu1 %v15505_v53  ;;  %v177_v53 = vld [vmem:[%s15325_s0 + $0x4b0] sm:$0xff] }
 0x234   :  { %5265 = vmatprep.subr.bf16.mxu1 %v10798_v26  ;;  %v10807_v26 = vld [vmem:[%s15326_s3 + $0x4] ss:$8 sps:$4 sm:$0xff]  }
 0x235   :  { %5266 = vmatpush1.bf16.msra.mxu1 %v10796_v18  ;;  %v13154_v18 = vcombine.high %v165_v16, %v169_v44  ;;  %6725 = vmatprep.subr.bf16.mxu0 %v10807_v26  ;;  %v217_v26 = vld [vmem:[%s15325_s0 + $0x5f0] sm:$0xff] }
 0x236   :  { %5267 = vmatprep.subr.bf16.mxu1 %v10801_v31 }
 0x239   :  { %5268 = vmatpush1.bf16.msra.mxu1 %v10799_v9 }
 0x23a   :  { %4010 = vmatmul.mubr.bf16.gmra.mrb[60].mxu0 %v13126_v11  ;;  %5069 = vmatmul.mubr.bf16.gmra.mrb[124].mxu1 %v12392_v17  ;;  %v10802_v17 = vld [vmem:[%s15324_s1 + $0x5e8] ss:$16 sps:$4 sm:$0xff]  }
 0x23b   :  { %4019 = vmatprep.mubr.bf16.mxu0 %v13128_v40  ;;  %5078 = vmatprep.mubr.bf16.mxu1 %v12396_v58  ;;  %v173_v58 = vld [vmem:[%s15325_s0 + $0x490] sm:$0xff] }
 0x23c   :  { %5269 = vmatprep.subr.bf16.mxu1 %v10804_v52  ;;  %v13183_v31 = vcombine.low %v173_v58, %v177_v53 }
 0x23d   :  { %5270 = vmatpush1.bf16.msra.mxu1 %v10802_v17 }
 0x242   :  { %4020 = vmatmul.mubr.bf16.gmra.mrb[64].mxu0 %v13152_v38  ;;  %5079 = vmatmul.mubr.bf16.gmra.mrb[128].mxu1 %v12426_v33  ;;  %v13171_v33 = vcombine.high %v173_v58, %v177_v53  ;;  %v209_v58 = vld [vmem:[%s15325_s0 + $0x5b0] sm:$0xff] }
 0x243   :  { %4029 = vmatprep.mubr.bf16.mxu0 %v13154_v18  ;;  %5088 = vmatprep.mubr.bf16.mxu1 %v12430_v19  ;;  %v181_v19 = vld [vmem:[%s15325_s0 + $0x4d0] sm:$0xff] }
 0x244   :  { %v13185_v9 = vcombine.high %v181_v19, %v185_v21  ;;  %v13197_v52 = vcombine.low %v181_v19, %v185_v21 }
 0x24a   :  { %4030 = vmatmul.mubr.bf16.gmra.mrb[68].mxu0 %v13169_v2  ;;  %5089 = vmatmul.mubr.bf16.gmra.mrb[132].mxu1 %v12451_v45  ;;  %v189_v45 = vld [vmem:[%s15325_s0 + $0x510] sm:$0xff] }
 0x24b   :  { %4039 = vmatprep.mubr.bf16.mxu0 %v13171_v33  ;;  %5098 = vmatprep.mubr.bf16.mxu1 %v12455_v51  ;;  %v193_v51 = vld [vmem:[%s15325_s0 + $0x530] sm:$0xff] }
 0x24c   :  { %v13199_v16 = vcombine.high %v189_v45, %v193_v51  ;;  %v13211_v44 = vcombine.low %v189_v45, %v193_v51 }
 0x252   :  { %4040 = vmatmul.mubr.bf16.gmra.mrb[72].mxu0 %v13183_v31  ;;  %5099 = vmatmul.mubr.bf16.gmra.mrb[136].mxu1 %v12473_v37  ;;  %v197_v37 = vld [vmem:[%s15325_s0 + $0x550] sm:$0xff] }
 0x253   :  { %4049 = vmatprep.mubr.bf16.mxu0 %v13185_v9  ;;  %5108 = vmatprep.mubr.bf16.mxu1 %v12477_v24  ;;  %v201_v24 = vld [vmem:[%s15325_s0 + $0x570] sm:$0xff] }
 0x254   :  { %v13213_v17 = vcombine.high %v197_v37, %v201_v24  ;;  %v13228_v53 = vcombine.low %v197_v37, %v201_v24 }
 0x25a   :  { %4050 = vmatmul.mubr.bf16.gmra.mrb[76].mxu0 %v13197_v52  ;;  %5109 = vmatmul.mubr.bf16.gmra.mrb[140].mxu1 %v12495_v60  ;;  %v205_v60 = vld [vmem:[%s15325_s0 + $0x590] sm:$0xff] }
 0x25b   :  { %4059 = vmatprep.mubr.bf16.mxu0 %v13199_v16  ;;  %5118 = vmatprep.mubr.bf16.mxu1 %v12499_v48  ;;  %v10816_v48 = vld [vmem:[%s15324_s1 + $0x60c] ss:$16 sps:$4 sm:$0xff]   ;;  %v13242_v19 = vcombine.low %v205_v60, %v209_v58 }
 0x25c   :  { %5592 = vmatprep.subr.bf16.mxu1 %v10816_v48 }
 0x262   :  { %4060 = vmatmul.mubr.bf16.gmra.mrb[80].mxu0 %v13211_v44  ;;  %5119 = vmatmul.mubr.bf16.gmra.mrb[144].mxu1 %v12517_v12  ;;  %v13230_v12 = vcombine.high %v205_v60, %v209_v58 }
 0x263   :  { %4069 = vmatprep.mubr.bf16.mxu0 %v13213_v17  ;;  %5128 = vmatprep.mubr.bf16.mxu1 %v12521_v43  ;;  %v213_v43 = vld [vmem:[%s15325_s0 + $0x5d0] sm:$0xff] }
 0x264   :  { %v13244_v21 = vcombine.high %v213_v43, %v217_v26  ;;  %v13256_v45 = vcombine.low %v213_v43, %v217_v26 }
 0x26a   :  { %4070 = vmatmul.mubr.bf16.gmra.mrb[84].mxu0 %v13228_v53  ;;  %5129 = vmatmul.mubr.bf16.gmra.mrb[148].mxu1 %v12542_v50  ;;  %v221_v50 = vld [vmem:[%s15325_s0 + $0x610] sm:$0xff] }
 0x26b   :  { %4079 = vmatprep.mubr.bf16.mxu0 %v13230_v12  ;;  %5138 = vmatprep.mubr.bf16.mxu1 %v12546_v54  ;;  %v225_v54 = vld [vmem:[%s15325_s0 + $0x630] sm:$0xff] }
 0x26c   :  { %v13258_v51 = vcombine.high %v221_v50, %v225_v54  ;;  %v13270_v37 = vcombine.low %v221_v50, %v225_v54  ;;  %v265_v54 = vld [vmem:[%s15325_s0 + $0x770] sm:$0xff] }
 0x272   :  { %4080 = vmatmul.mubr.bf16.gmra.mrb[88].mxu0 %v13242_v19  ;;  %5139 = vmatmul.mubr.bf16.gmra.mrb[152].mxu1 %v12564_v34  ;;  %v229_v34 = vld [vmem:[%s15325_s0 + $0x650] sm:$0xff] }
 0x273   :  { %4089 = vmatprep.mubr.bf16.mxu0 %v13244_v21  ;;  %5148 = vmatprep.mubr.bf16.mxu1 %v12568_v30  ;;  %v233_v30 = vld [vmem:[%s15325_s0 + $0x670] sm:$0xff] }
 0x274   :  { %v13272_v24 = vcombine.high %v229_v34, %v233_v30  ;;  %v13284_v48 = vcombine.low %v229_v34, %v233_v30 }
 0x27a   :  { %4090 = vmatmul.mubr.bf16.gmra.mrb[92].mxu0 %v13256_v45  ;;  %5149 = vmatmul.mubr.bf16.gmra.mrb[156].mxu1 %v12586_v6  ;;  %v241_v6 = vld [vmem:[%s15325_s0 + $0x6b0] sm:$0xff] }
 0x27b   :  { %4099 = vmatprep.mubr.bf16.mxu0 %v13258_v51  ;;  %5158 = vmatprep.mubr.bf16.mxu1 %v12590_v5  ;;  %v237_v5 = vld [vmem:[%s15325_s0 + $0x690] sm:$0xff] }
 0x27c   :  { %v13286_v60 = vcombine.high %v237_v5, %v241_v6  ;;  %v13298_v58 = vcombine.low %v237_v5, %v241_v6  ;;  %v15511_v5 = vld [vmem:[#allocation3_spill] sm:$0xff]  ;;  %v269_v6 = vld [vmem:[%s15325_s0 + $0x790] sm:$0xff] }
 0x282   :  { %4100 = vmatmul.mubr.bf16.gmra.mrb[96].mxu0 %v13270_v37  ;;  %5159 = vmatmul.mubr.bf16.gmra.mrb[160].mxu1 %v12608_v28  ;;  %v249_v28 = vld [vmem:[%s15325_s0 + $0x6f0] sm:$0xff] }
 0x283   :  { %4109 = vmatprep.mubr.bf16.mxu0 %v13272_v24  ;;  %5168 = vmatprep.mubr.bf16.mxu1 %v12612_v4  ;;  %v245_v4 = vld [vmem:[%s15325_s0 + $0x6d0] sm:$0xff] }
 0x284   :  { %v13300_v43 = vcombine.high %v245_v4, %v249_v28  ;;  %v13312_v26 = vcombine.low %v245_v4, %v249_v28  ;;  %v273_v4 = vld [vmem:[%s15325_s0 + $0x7b0] sm:$0xff] }
 0x286   :  { %15506 = vst [vmem:[#allocation15_spill] sm:$0xff] %v13312_v26 }
 0x28a   :  { %4110 = vmatmul.mubr.bf16.gmra.mrb[100].mxu0 %v13284_v48  ;;  %5169 = vmatmul.mubr.bf16.gmra.mrb[164].mxu1 %v12630_v56  ;;  %v257_v56 = vld [vmem:[%s15325_s0 + $0x730] sm:$0xff] }
 0x28b   :  { %4119 = vmatprep.mubr.bf16.mxu0 %v13286_v60  ;;  %5178 = vmatprep.mubr.bf16.mxu1 %v12634_v32  ;;  %v253_v32 = vld [vmem:[%s15325_s0 + $0x710] sm:$0xff] }
 0x28c   :  { %v13314_v50 = vcombine.high %v253_v32, %v257_v56  ;;  %v13326_v34 = vcombine.low %v253_v32, %v257_v56  ;;  %v13342_v32 = vcombine.high %v269_v6, %v273_v4  ;;  %v15515_v56 = vld [vmem:[#allocation5_spill] sm:$0xff] }
 0x28e   :  { %15507 = vst [vmem:[#allocation30_spill] sm:$0xff] %v13314_v50 }
 0x292   :  { %4120 = vmatmul.mubr.bf16.gmra.mrb[104].mxu0 %v13298_v58  ;;  %5179 = vmatmul.mubr.bf16.gmra.mrb[168].mxu1 %v12652_v22  ;;  %v15508_v22 = vld [vmem:[#allocation2_spill] sm:$0xff] }
 0x293   :  { %4129 = vmatprep.mubr.bf16.mxu0 %v13300_v43  ;;  %5188 = vmatprep.mubr.bf16.mxu1 %v12656_v63  ;;  %v261_v63 = vld [vmem:[%s15325_s0 + $0x750] sm:$0xff]  ;;  %15509 = vst [vmem:[#allocation2_spill] sm:$0xff] %v13326_v34 }
 0x294   :  { %v13328_v30 = vcombine.high %v261_v63, %v265_v54  ;;  %v13340_v28 = vcombine.low %v261_v63, %v265_v54  ;;  %v13354_v63 = vcombine.low %v269_v6, %v273_v4 }
 0x296   :  { %15510 = vst [vmem:[#allocation81_spill] sm:$0xff] %v13328_v30  ;;  %15513 = vst [vmem:[#allocation3_spill] sm:$0xff] %v13340_v28 }
 0x297   :  { %15517 = vst [vmem:[#allocation5_spill] sm:$0xff] %v13354_v63 }
 0x29a   :  { %4130 = vmatmul.mubr.bf16.gmra.mrb[108].mxu0 %v13312_v26  ;;  %5189 = vmatmul.mubr.bf16.gmra.mrb[172].mxu1 %v12672_v27  ;;  %v15512_v27 = vld [vmem:[#allocation4_spill] sm:$0xff] }
 0x29b   :  { %4139 = vmatprep.mubr.bf16.mxu0 %v13314_v50  ;;  %5198 = vmatprep.mubr.bf16.mxu1 %v15508_v22  ;;  %15514 = vst [vmem:[#allocation4_spill] sm:$0xff] %v13342_v32  ;;  %v15516_v22 = vld [vmem:[#allocation6_spill] sm:$0xff] }
 0x29c   :  { %v10811_v50 = vld [vmem:[%s15326_s3 + $0x20] ss:$8 sps:$4 sm:$0xff]  }
 0x2a2   :  { %4140 = vmatmul.mubr.bf16.gmra.mrb[112].mxu0 %v13326_v34  ;;  %5199 = vmatmul.mubr.bf16.gmra.mrb[176].mxu1 %v15511_v5  ;;  %v277_v5 = vld [vmem:[%s15325_s0 + $0x7d0] sm:$0xff]  ;;  %v46_v34 = vld [vmem:[%s15325_s0 + $0x98] sm:$0xff] }
 0x2a3   :  { %4149 = vmatprep.mubr.bf16.mxu0 %v13328_v30  ;;  %5208 = vmatprep.mubr.bf16.mxu1 %v15512_v27  ;;  %v281_v27 = vld [vmem:[%s15325_s0 + $0x7f0] sm:$0xff] }
 0x2a4   :  { %v13356_v54 = vcombine.high %v277_v5, %v281_v27  ;;  %v13368_v6 = vcombine.low %v277_v5, %v281_v27  ;;  %v10805_v27 = vld [vmem:[%s15326_s3] ss:$8 sps:$4 sm:$0xff]   ;;  %v15528_v30 = vld [vmem:[#allocation12_spill] sm:$0xff] }
 0x2a6   :  { %15518 = vst [vmem:[#allocation6_spill] sm:$0xff] %v13356_v54 }
 0x2aa   :  { %4150 = vmatmul.mubr.bf16.gmra.mrb[116].mxu0 %v13340_v28  ;;  %5209 = vmatmul.mubr.bf16.gmra.mrb[180].mxu1 %v15515_v56  ;;  %v15519_v28 = vld [vmem:[#allocation7_spill] sm:$0xff]  ;;  %v15520_v56 = vld [vmem:[#allocation8_spill] sm:$0xff] }
 0x2ab   :  { %4159 = vmatprep.mubr.bf16.mxu0 %v13342_v32  ;;  %5218 = vmatprep.mubr.bf16.mxu1 %v15516_v22  ;;  %v30_v22 = vld [vmem:[%s15325_s0 + $0x18] sm:$0xff]  ;;  %15521 = vst [vmem:[#allocation7_spill] sm:$0xff] %v13368_v6 }
 0x2ac   :  { %v34_v32 = vld [vmem:[%s15325_s0 + $0x38] sm:$0xff] }
 0x2ad   :  { %v13370_v4 = vcombine.high %v30_v22, %v34_v32  ;;  %v13382_v5 = vcombine.low %v30_v22, %v34_v32  ;;  %v10822_v32 = vld [vmem:[%s15324_s1 + $0x62c] ss:$16 sps:$4 sm:$0xff]   ;;  %v10808_v22 = vld [vmem:[%s15326_s3 + $0x10] ss:$8 sps:$4 sm:$0xff]  }
 0x2af   :  { %15522 = vst [vmem:[#allocation8_spill] sm:$0xff] %v13370_v4 }
 0x2b2   :  { %4160 = vmatmul.mubr.bf16.gmra.mrb[120].mxu0 %v13354_v63  ;;  %5219 = vmatmul.mubr.bf16.gmra.mrb[184].mxu1 %v15519_v28  ;;  %v15523_v63 = vld [vmem:[#allocation9_spill] sm:$0xff]  ;;  %v15524_v28 = vld [vmem:[#allocation10_spill] sm:$0xff] }
 0x2b3   :  { %4169 = vmatprep.mubr.bf16.mxu0 %v13356_v54  ;;  %5228 = vmatprep.mubr.bf16.mxu1 %v15520_v56  ;;  %v38_v56 = vld [vmem:[%s15325_s0 + $0x58] sm:$0xff]  ;;  %15525 = vst [vmem:[#allocation9_spill] sm:$0xff] %v13382_v5 }
 0x2b4   :  { %v42_v54 = vld [vmem:[%s15325_s0 + $0x78] sm:$0xff] }
 0x2ba   :  { %4170 = vmatmul.mubr.bf16.gmra.mrb[124].mxu0 %v13368_v6  ;;  %5229 = vmatmul.mubr.bf16.gmra.mrb[188].mxu1 %v15523_v63  ;;  %v13387_v6 = vcombine.high %v38_v56, %v42_v54  ;;  %v10810_v63 = vld [vmem:[%s15326_s3 + $0x14] ss:$8 sps:$4 sm:$0xff]  }
 0x2bb   :  { %4212 = vmatprep.mubr.bf16.mxu0 %v13370_v4  ;;  %5271 = vmatprep.mubr.bf16.mxu1 %v15524_v28  ;;  %v10814_v28 = vld [vmem:[%s15324_s1 + $0x608] ss:$16 sps:$4 sm:$0xff]  }
 0x2bc   :  { %15526 = vst [vmem:[#allocation10_spill] sm:$0xff] %v13387_v6  ;;  %v15527_v4 = vld [vmem:[#allocation11_spill] sm:$0xff] }
 0x2c2   :  { %4213 = vmatmul.mubr.bf16.vlgmr.msra.gmra.mrb[0].mxu0 %v13382_v5  ;;  %5272 = vmatmul.mubr.bf16.vlgmr.msra.gmra.mrb[64].mxu1 %v15527_v4  ;;  %v50_v4 = vld [vmem:[%s15325_s0 + $0xb8] sm:$0xff]  ;;  %v13417_v5 = vcombine.low %v38_v56, %v42_v54 }
 0x2c3   :  { %6726 = vmatpush1.bf16.msra.mxu0 %v10805_v27  ;;  %4222 = vmatprep.mubr.bf16.mxu0 %v13387_v6  ;;  %v10813_v27 = vld [vmem:[%s15326_s3 + $0x24] ss:$8 sps:$4 sm:$0xff]   ;;  %v10820_v6 = vld [vmem:[%s15324_s1 + $0x628] ss:$16 sps:$4 sm:$0xff]  }
 0x2c4   :  { %5281 = vmatprep.mubr.bf16.mxu1 %v15528_v30  ;;  %6727 = vmatprep.subr.bf16.mxu0 %v10810_v63  ;;  %15529 = vst [vmem:[#allocation11_spill] sm:$0xff] %v13417_v5  ;;  %v13419_v30 = vcombine.high %v46_v34, %v50_v4  ;;  %v10828_v63 = vld [vmem:[%s15324_s1 + $0x64c] ss:$16 sps:$4 sm:$0xff]   ;;  %v10826_v54 = vld [vmem:[%s15324_s1 + $0x648] ss:$16 sps:$4 sm:$0xff]  }
 0x2c5   :  { %5593 = vmatpush1.bf16.msra.mxu1 %v10814_v28  ;;  %v10819_v28 = vld [vmem:[%s15326_s3 + $0x34] ss:$8 sps:$4 sm:$0xff]  }
 0x2c6   :  { %5594 = vmatprep.subr.bf16.mxu1 %v10822_v32  ;;  %15530 = vst [vmem:[#allocation12_spill] sm:$0xff] %v13419_v30  ;;  %v15531_v56 = vld [vmem:[#allocation13_spill] sm:$0xff] }
 0x2c7   :  { %6728 = vmatpush1.bf16.msra.mxu0 %v10808_v22  ;;  %v10834_v32 = vld [vmem:[%s15324_s1 + $0x66c] ss:$16 sps:$4 sm:$0xff]   ;;  %v15532_v22 = vld [vmem:[#allocation14_spill] sm:$0xff] }
 0x2c8   :  { %6729 = vmatprep.subr.bf16.mxu0 %v10813_v27  ;;  %v58_v27 = vld [vmem:[%s15325_s0 + $0xf8] sm:$0xff] }
 0x2c9   :  { %5595 = vmatpush1.bf16.msra.mxu1 %v10820_v6  ;;  %v54_v6 = vld [vmem:[%s15325_s0 + $0xd8] sm:$0xff] }
 0x2ca   :  { %4223 = vmatmul.mubr.bf16.gmra.mrb[4].mxu0 %v13417_v5  ;;  %5282 = vmatmul.mubr.bf16.gmra.mrb[68].mxu1 %v15531_v56  ;;  %v10817_v56 = vld [vmem:[%s15326_s3 + $0x30] ss:$8 sps:$4 sm:$0xff]   ;;  %v13455_v5 = vcombine.low %v46_v34, %v50_v4  ;;  %v13457_v26 = vcombine.high %v54_v6, %v58_v27  ;;  %v10846_v4 = vld [vmem:[%s15324_s1 + $0x6ac] ss:$16 sps:$4 sm:$0xff]  }
 0x2cb   :  { %4232 = vmatprep.mubr.bf16.mxu0 %v13419_v30  ;;  %5291 = vmatprep.mubr.bf16.mxu1 %v15532_v22  ;;  %v10825_v30 = vld [vmem:[%s15326_s3 + $0x44] ss:$8 sps:$4 sm:$0xff]   ;;  %v10832_v22 = vld [vmem:[%s15324_s1 + $0x668] ss:$16 sps:$4 sm:$0xff]  }
 0x2cc   :  { %6730 = vmatpush1.bf16.msra.mxu0 %v10811_v50  ;;  %5596 = vmatprep.subr.bf16.mxu1 %v10828_v63  ;;  %v10823_v50 = vld [vmem:[%s15326_s3 + $0x40] ss:$8 sps:$4 sm:$0xff]   ;;  %v10840_v63 = vld [vmem:[%s15324_s1 + $0x68c] ss:$16 sps:$4 sm:$0xff]  }
 0x2cd   :  { %6731 = vmatprep.subr.bf16.mxu0 %v10819_v28  ;;  %5597 = vmatpush1.bf16.msra.mxu1 %v10826_v54  ;;  %v10831_v28 = vld [vmem:[%s15326_s3 + $0x54] ss:$8 sps:$4 sm:$0xff]   ;;  %v10838_v34 = vld [vmem:[%s15324_s1 + $0x688] ss:$16 sps:$4 sm:$0xff]  }
 0x2ce   :  { %5598 = vmatprep.subr.bf16.mxu1 %v10834_v32  ;;  %v66_v54 = vld [vmem:[%s15325_s0 + $0x138] sm:$0xff]  ;;  %v10837_v32 = vld [vmem:[%s15326_s3 + $0x64] ss:$8 sps:$4 sm:$0xff]  }
 0x2d0   :  { %6732 = vmatpush1.bf16.msra.mxu0 %v10817_v56  ;;  %v13493_v56 = vcombine.low %v54_v6, %v58_v27  ;;  %v10850_v6 = vld [vmem:[%s15324_s1 + $0x6c8] ss:$16 sps:$4 sm:$0xff]   ;;  %v10858_v27 = vld [vmem:[%s15324_s1 + $0x6ec] ss:$16 sps:$4 sm:$0xff]  }
 0x2d1   :  { %6733 = vmatprep.subr.bf16.mxu0 %v10825_v30  ;;  %5599 = vmatpush1.bf16.msra.mxu1 %v10832_v22  ;;  %v62_v30 = vld [vmem:[%s15325_s0 + $0x118] sm:$0xff] }
 0x2d2   :  { %4233 = vmatmul.mubr.bf16.gmra.mrb[8].mxu0 %v13455_v5  ;;  %5292 = vmatmul.mubr.bf16.gmra.mrb[72].mxu1 %v12815_v36  ;;  %v10829_v36 = vld [vmem:[%s15326_s3 + $0x50] ss:$8 sps:$4 sm:$0xff]   ;;  %v13495_v22 = vcombine.high %v62_v30, %v66_v54 }
 0x2d3   :  { %4242 = vmatprep.mubr.bf16.mxu0 %v13457_v26  ;;  %5301 = vmatprep.mubr.bf16.mxu1 %v12817_v55  ;;  %v10844_v55 = vld [vmem:[%s15324_s1 + $0x6a8] ss:$16 sps:$4 sm:$0xff]  }
 0x2d4   :  { %6734 = vmatpush1.bf16.msra.mxu0 %v10823_v50  ;;  %5600 = vmatprep.subr.bf16.mxu1 %v10840_v63  ;;  %v10835_v50 = vld [vmem:[%s15326_s3 + $0x60] ss:$8 sps:$4 sm:$0xff]   ;;  %v10852_v63 = vld [vmem:[%s15324_s1 + $0x6cc] ss:$16 sps:$4 sm:$0xff]  }
 0x2d5   :  { %6735 = vmatprep.subr.bf16.mxu0 %v10831_v28  ;;  %5601 = vmatpush1.bf16.msra.mxu1 %v10838_v34  ;;  %v10843_v28 = vld [vmem:[%s15326_s3 + $0x74] ss:$8 sps:$4 sm:$0xff]  }
 0x2d6   :  { %5602 = vmatprep.subr.bf16.mxu1 %v10846_v4  ;;  %v70_v34 = vld [vmem:[%s15325_s0 + $0x158] sm:$0xff] }
 0x2d7   :  { %v74_v4 = vld [vmem:[%s15325_s0 + $0x178] sm:$0xff] }
 0x2d8   :  { %6736 = vmatpush1.bf16.msra.mxu0 %v10829_v36  ;;  %v10849_v36 = vld [vmem:[%s15326_s3 + $0x84] ss:$8 sps:$4 sm:$0xff]  }
 0x2d9   :  { %6737 = vmatprep.subr.bf16.mxu0 %v10837_v32  ;;  %5603 = vmatpush1.bf16.msra.mxu1 %v10844_v55  ;;  %v13531_v32 = vcombine.low %v62_v30, %v66_v54  ;;  %v13533_v55 = vcombine.high %v70_v34, %v74_v4  ;;  %v10862_v30 = vld [vmem:[%s15324_s1 + $0x708] ss:$16 sps:$4 sm:$0xff]   ;;  %v10864_v54 = vld [vmem:[%s15324_s1 + $0x70c] ss:$16 sps:$4 sm:$0xff]  }
 0x2da   :  { %4243 = vmatmul.mubr.bf16.gmra.mrb[12].mxu0 %v13493_v56  ;;  %5302 = vmatmul.mubr.bf16.gmra.mrb[76].mxu1 %v12853_v62  ;;  %v10841_v62 = vld [vmem:[%s15326_s3 + $0x70] ss:$8 sps:$4 sm:$0xff]  }
 0x2db   :  { %4252 = vmatprep.mubr.bf16.mxu0 %v13495_v22  ;;  %5311 = vmatprep.mubr.bf16.mxu1 %v12855_v10  ;;  %v10856_v10 = vld [vmem:[%s15324_s1 + $0x6e8] ss:$16 sps:$4 sm:$0xff]  }
 0x2dc   :  { %6738 = vmatpush1.bf16.msra.mxu0 %v10835_v50  ;;  %5604 = vmatprep.subr.bf16.mxu1 %v10852_v63  ;;  %v10847_v50 = vld [vmem:[%s15326_s3 + $0x80] ss:$8 sps:$4 sm:$0xff]   ;;  %v10855_v63 = vld [vmem:[%s15326_s3 + $0x94] ss:$8 sps:$4 sm:$0xff]  }
 0x2dd   :  { %6739 = vmatprep.subr.bf16.mxu0 %v10843_v28  ;;  %5605 = vmatpush1.bf16.msra.mxu1 %v10850_v6  ;;  %v78_v28 = vld [vmem:[%s15325_s0 + $0x198] sm:$0xff] }
 0x2de   :  { %5606 = vmatprep.subr.bf16.mxu1 %v10858_v27  ;;  %v10853_v6 = vld [vmem:[%s15326_s3 + $0x90] ss:$8 sps:$4 sm:$0xff]   ;;  %v13563_v27 = vcombine.low %v70_v34, %v74_v4 }
 0x2df   :  { %v86_v34 = vld [vmem:[%s15325_s0 + $0x1d8] sm:$0xff] }
 0x2e0   :  { %6740 = vmatpush1.bf16.msra.mxu0 %v10841_v62  ;;  %v90_v4 = vld [vmem:[%s15325_s0 + $0x1f8] sm:$0xff] }
 0x2e1   :  { %6741 = vmatprep.subr.bf16.mxu0 %v10849_v36  ;;  %5607 = vmatpush1.bf16.msra.mxu1 %v10856_v10  ;;  %v10859_v36 = vld [vmem:[%s15326_s3 + $0xa0] ss:$8 sps:$4 sm:$0xff]  }
 0x2e2   :  { %4253 = vmatmul.mubr.bf16.gmra.mrb[16].mxu0 %v13531_v32  ;;  %5312 = vmatmul.mubr.bf16.gmra.mrb[80].mxu1 %v12891_v20  ;;  %v82_v20 = vld [vmem:[%s15325_s0 + $0x1b8] sm:$0xff] }
 0x2e3   :  { %4262 = vmatprep.mubr.bf16.mxu0 %v13533_v55  ;;  %5321 = vmatprep.mubr.bf16.mxu1 %v12893_v47  ;;  %v10861_v47 = vld [vmem:[%s15326_s3 + $0xa4] ss:$8 sps:$4 sm:$0xff]   ;;  %v13565_v62 = vcombine.high %v78_v28, %v82_v20  ;;  %v13580_v10 = vcombine.low %v78_v28, %v82_v20  ;;  %v13606_v28 = vcombine.low %v86_v34, %v90_v4 }
 0x2e4   :  { %6742 = vmatpush1.bf16.msra.mxu0 %v10847_v50  ;;  %5608 = vmatprep.subr.bf16.mxu1 %v10864_v54  ;;  %v13582_v50 = vcombine.high %v86_v34, %v90_v4  ;;  %v98_v54 = vld [vmem:[%s15325_s0 + $0x238] sm:$0xff] }
 0x2e5   :  { %6743 = vmatprep.subr.bf16.mxu0 %v10855_v63  ;;  %5609 = vmatpush1.bf16.msra.mxu1 %v10862_v30  ;;  %v10868_v63 = vld [vmem:[%s15324_s1 + $0x728] ss:$16 sps:$4 sm:$0xff]  }
 0x2e6   :  { %v94_v30 = vld [vmem:[%s15325_s0 + $0x218] sm:$0xff] }
 0x2e7   :  { %v13608_v20 = vcombine.high %v94_v30, %v98_v54  ;;  %v10874_v34 = vld [vmem:[%s15324_s1 + $0x748] ss:$16 sps:$4 sm:$0xff]  }
 0x2e8   :  { %6744 = vmatpush1.bf16.msra.mxu0 %v10853_v6  ;;  %v106_v6 = vld [vmem:[%s15325_s0 + $0x278] sm:$0xff] }
 0x2e9   :  { %6745 = vmatprep.subr.bf16.mxu0 %v10861_v47  ;;  %v13620_v47 = vcombine.low %v94_v30, %v98_v54  ;;  %v110_v4 = vld [vmem:[%s15325_s0 + $0x298] sm:$0xff] }
 0x2ea   :  { %4263 = vmatmul.mubr.bf16.gmra.mrb[20].mxu0 %v13563_v27  ;;  %5322 = vmatmul.mubr.bf16.gmra.mrb[84].mxu1 %v12923_v42  ;;  %v10865_v42 = vld [vmem:[%s15326_s3 + $0xb0] ss:$8 sps:$4 sm:$0xff]  }
 0x2eb   :  { %4272 = vmatprep.mubr.bf16.mxu0 %v13565_v62  ;;  %5331 = vmatprep.mubr.bf16.mxu1 %v12925_v46  ;;  %v10867_v46 = vld [vmem:[%s15326_s3 + $0xb4] ss:$8 sps:$4 sm:$0xff]  }
 0x2ec   :  { %6746 = vmatpush1.bf16.msra.mxu0 %v10859_v36 }
 0x2ed   :  { %6747 = vmatprep.subr.bf16.mxu0 %v10867_v46 }
 0x2f0   :  { %6748 = vmatpush1.bf16.msra.mxu0 %v10865_v42  ;;  %v114_v42 = vld [vmem:[%s15325_s0 + $0x2b8] sm:$0xff] }
 0x2f1   :  { %v13660_v30 = vcombine.low %v110_v4, %v114_v42 }
 0x2f2   :  { %4273 = vmatmul.mubr.bf16.gmra.mrb[24].mxu0 %v13580_v10  ;;  %5332 = vmatmul.mubr.bf16.gmra.mrb[88].mxu1 %v12940_v61  ;;  %v10870_v61 = vld [vmem:[%s15324_s1 + $0x72c] ss:$16 sps:$4 sm:$0xff]  }
 0x2f3   :  { %4282 = vmatprep.mubr.bf16.mxu0 %v13582_v50  ;;  %5341 = vmatprep.mubr.bf16.mxu1 %v12942_v39  ;;  %v102_v39 = vld [vmem:[%s15325_s0 + $0x258] sm:$0xff] }
 0x2f4   :  { %5610 = vmatprep.subr.bf16.mxu1 %v10870_v61  ;;  %v13622_v36 = vcombine.high %v102_v39, %v106_v6  ;;  %v13646_v46 = vcombine.low %v102_v39, %v106_v6  ;;  %v122_v61 = vld [vmem:[%s15325_s0 + $0x2f8] sm:$0xff] }
 0x2f5   :  { %5611 = vmatpush1.bf16.msra.mxu1 %v10868_v63  ;;  %v13648_v63 = vcombine.high %v110_v4, %v114_v42  ;;  %v10880_v39 = vld [vmem:[%s15324_s1 + $0x768] ss:$16 sps:$4 sm:$0xff]  }
 0x2f6   :  { %v126_v6 = vld [vmem:[%s15325_s0 + $0x318] sm:$0xff] }
 0x2fa   :  { %4283 = vmatmul.mubr.bf16.gmra.mrb[28].mxu0 %v13606_v28  ;;  %5342 = vmatmul.mubr.bf16.gmra.mrb[92].mxu1 %v12966_v0  ;;  %v10871_v0 = vld [vmem:[%s15326_s3 + $0xc0] ss:$8 sps:$4 sm:$0xff]  }
 0x2fb   :  { %4292 = vmatprep.mubr.bf16.mxu0 %v13608_v20  ;;  %5351 = vmatprep.mubr.bf16.mxu1 %v12968_v59  ;;  %v10873_v59 = vld [vmem:[%s15326_s3 + $0xc4] ss:$8 sps:$4 sm:$0xff]  }
 0x2fc   :  { %6749 = vmatprep.subr.bf16.mxu0 %v10873_v59 }
 0x2fd   :  { %6750 = vmatpush1.bf16.msra.mxu0 %v10871_v0  ;;  %v130_v0 = vld [vmem:[%s15325_s0 + $0x338] sm:$0xff] }
 0x2fe   :  { %v13700_v4 = vcombine.low %v126_v6, %v130_v0 }
 0x302   :  { %4293 = vmatmul.mubr.bf16.gmra.mrb[32].mxu0 %v13620_v47  ;;  %5352 = vmatmul.mubr.bf16.gmra.mrb[96].mxu1 %v12980_v13  ;;  %v10876_v13 = vld [vmem:[%s15324_s1 + $0x74c] ss:$16 sps:$4 sm:$0xff]  }
 0x303   :  { %4302 = vmatprep.mubr.bf16.mxu0 %v13622_v36  ;;  %5361 = vmatprep.mubr.bf16.mxu1 %v12982_v23  ;;  %v118_v23 = vld [vmem:[%s15325_s0 + $0x2d8] sm:$0xff] }
 0x304   :  { %5612 = vmatprep.subr.bf16.mxu1 %v10876_v13  ;;  %v13662_v54 = vcombine.high %v118_v23, %v122_v61  ;;  %v13686_v59 = vcombine.low %v118_v23, %v122_v61  ;;  %v138_v13 = vld [vmem:[%s15325_s0 + $0x378] sm:$0xff]  ;;  %v10883_v23 = vld [vmem:[%s15326_s3 + $0xe0] ss:$8 sps:$4 sm:$0xff]  }
 0x305   :  { %5613 = vmatpush1.bf16.msra.mxu1 %v10874_v34  ;;  %v13688_v34 = vcombine.high %v126_v6, %v130_v0 }
 0x30a   :  { %4303 = vmatmul.mubr.bf16.gmra.mrb[36].mxu0 %v13646_v46  ;;  %5362 = vmatmul.mubr.bf16.gmra.mrb[100].mxu1 %v13006_v29  ;;  %v10877_v29 = vld [vmem:[%s15326_s3 + $0xd0] ss:$8 sps:$4 sm:$0xff]  }
 0x30b   :  { %4312 = vmatprep.mubr.bf16.mxu0 %v13648_v63  ;;  %5371 = vmatprep.mubr.bf16.mxu1 %v13008_v14  ;;  %v10879_v14 = vld [vmem:[%s15326_s3 + $0xd4] ss:$8 sps:$4 sm:$0xff]  }
 0x30c   :  { %6751 = vmatprep.subr.bf16.mxu0 %v10879_v14 }
 0x30d   :  { %6752 = vmatpush1.bf16.msra.mxu0 %v10877_v29  ;;  %v10888_v29 = vld [vmem:[%s15324_s1 + $0x78c] ss:$16 sps:$4 sm:$0xff]  }
 0x312   :  { %4313 = vmatmul.mubr.bf16.gmra.mrb[40].mxu0 %v13660_v30  ;;  %5372 = vmatmul.mubr.bf16.gmra.mrb[104].mxu1 %v13020_v41  ;;  %v10882_v41 = vld [vmem:[%s15324_s1 + $0x76c] ss:$16 sps:$4 sm:$0xff]  }
 0x313   :  { %4322 = vmatprep.mubr.bf16.mxu0 %v13662_v54  ;;  %5381 = vmatprep.mubr.bf16.mxu1 %v13022_v8  ;;  %v134_v8 = vld [vmem:[%s15325_s0 + $0x358] sm:$0xff] }
 0x314   :  { %5614 = vmatprep.subr.bf16.mxu1 %v10882_v41  ;;  %v13702_v42 = vcombine.high %v134_v8, %v138_v13  ;;  %v13723_v61 = vcombine.low %v134_v8, %v138_v13  ;;  %v154_v41 = vld [vmem:[%s15325_s0 + $0x3f8] sm:$0xff] }
 0x315   :  { %5615 = vmatpush1.bf16.msra.mxu1 %v10880_v39  ;;  %v150_v39 = vld [vmem:[%s15325_s0 + $0x3d8] sm:$0xff] }
 0x316   :  { %5616 = vmatprep.subr.bf16.mxu1 %v10888_v29  ;;  %v13742_v0 = vcombine.high %v150_v39, %v154_v41  ;;  %v10894_v8 = vld [vmem:[%s15324_s1 + $0x7ac] ss:$16 sps:$4 sm:$0xff]   ;;  %v10892_v13 = vld [vmem:[%s15324_s1 + $0x7a8] ss:$16 sps:$4 sm:$0xff]  }
 0x317   :  { %v170_v29 = vld [vmem:[%s15325_s0 + $0x478] sm:$0xff] }
 0x31a   :  { %4323 = vmatmul.mubr.bf16.gmra.mrb[44].mxu0 %v13686_v59  ;;  %5382 = vmatmul.mubr.bf16.gmra.mrb[108].mxu1 %v13046_v49  ;;  %v142_v49 = vld [vmem:[%s15325_s0 + $0x398] sm:$0xff] }
 0x31b   :  { %4332 = vmatprep.mubr.bf16.mxu0 %v13688_v34  ;;  %5391 = vmatprep.mubr.bf16.mxu1 %v13048_v25  ;;  %v146_v25 = vld [vmem:[%s15325_s0 + $0x3b8] sm:$0xff] }
 0x31c   :  { %v13728_v14 = vcombine.high %v142_v49, %v146_v25  ;;  %v13740_v6 = vcombine.low %v142_v49, %v146_v25  ;;  %v13766_v49 = vcombine.low %v150_v39, %v154_v41  ;;  %v10900_v39 = vld [vmem:[%s15324_s1 + $0x7ec] ss:$16 sps:$4 sm:$0xff]  }
 0x322   :  { %4333 = vmatmul.mubr.bf16.gmra.mrb[48].mxu0 %v13700_v4  ;;  %5392 = vmatmul.mubr.bf16.gmra.mrb[112].mxu1 %v13060_v57  ;;  %v10885_v57 = vld [vmem:[%s15326_s3 + $0xe4] ss:$8 sps:$4 sm:$0xff]  }
 0x323   :  { %4342 = vmatprep.mubr.bf16.mxu0 %v13702_v42  ;;  %5401 = vmatprep.mubr.bf16.mxu1 %v13062_v1  ;;  %v10886_v1 = vld [vmem:[%s15324_s1 + $0x788] ss:$16 sps:$4 sm:$0xff]  }
 0x324   :  { %6753 = vmatprep.subr.bf16.mxu0 %v10885_v57  ;;  %5617 = vmatpush1.bf16.msra.mxu1 %v10886_v1  ;;  %v10895_v57 = vld [vmem:[%s15324_s1 + $0x7c8] ss:$16 sps:$4 sm:$0xff]  }
 0x325   :  { %6754 = vmatpush1.bf16.msra.mxu0 %v10883_v23  ;;  %5618 = vmatprep.subr.bf16.mxu1 %v10894_v8  ;;  %v10897_v23 = vld [vmem:[%s15324_s1 + $0x7cc] ss:$16 sps:$4 sm:$0xff]  }
 0x326   :  { %v166_v1 = vld [vmem:[%s15325_s0 + $0x458] sm:$0xff] }
 0x327   :  { %v174_v8 = vld [vmem:[%s15325_s0 + $0x498] sm:$0xff] }
 0x328   :  { %5619 = vmatpush1.bf16.msra.mxu1 %v10892_v13 }
 0x329   :  { %5620 = vmatprep.subr.bf16.mxu1 %v10897_v23 }
 0x32a   :  { %4343 = vmatmul.mubr.bf16.gmra.mrb[52].mxu0 %v13723_v61  ;;  %5402 = vmatmul.mubr.bf16.gmra.mrb[116].mxu1 %v13086_v15  ;;  %v158_v15 = vld [vmem:[%s15325_s0 + $0x418] sm:$0xff] }
 0x32b   :  { %4352 = vmatprep.mubr.bf16.mxu0 %v13728_v14  ;;  %5411 = vmatprep.mubr.bf16.mxu1 %v13088_v7  ;;  %v162_v7 = vld [vmem:[%s15325_s0 + $0x438] sm:$0xff] }
 0x32c   :  { %v13768_v25 = vcombine.high %v158_v15, %v162_v7  ;;  %5621 = vmatpush1.bf16.msra.mxu1 %v10895_v57  ;;  %v13792_v41 = vcombine.low %v158_v15, %v162_v7  ;;  %v178_v15 = vld [vmem:[%s15325_s0 + $0x4b8] sm:$0xff]  ;;  %v10903_v7 = vld [vmem:[%s15326_s3 + $0x104] ss:$8 sps:$4 sm:$0xff]  }
 0x32d   :  { %5622 = vmatprep.subr.bf16.mxu1 %v10900_v39  ;;  %v13823_v13 = vcombine.low %v174_v8, %v178_v15 }
 0x332   :  { %4353 = vmatmul.mubr.bf16.gmra.mrb[56].mxu0 %v13740_v6  ;;  %5412 = vmatmul.mubr.bf16.gmra.mrb[120].mxu1 %v13100_v35  ;;  %v10889_v35 = vld [vmem:[%s15326_s3 + $0xf0] ss:$8 sps:$4 sm:$0xff]  }
 0x333   :  { %4362 = vmatprep.mubr.bf16.mxu0 %v13742_v0  ;;  %5421 = vmatprep.mubr.bf16.mxu1 %v13102_v3  ;;  %v10891_v3 = vld [vmem:[%s15326_s3 + $0xf4] ss:$8 sps:$4 sm:$0xff]  }
 0x334   :  { %6755 = vmatprep.subr.bf16.mxu0 %v10891_v3  ;;  %v13811_v3 = vcombine.high %v174_v8, %v178_v15 }
 0x335   :  { %6756 = vmatpush1.bf16.msra.mxu0 %v10889_v35  ;;  %v13809_v35 = vcombine.low %v166_v1, %v170_v29 }
 0x336   :  { %7078 = vmatprep.subr.bf16.mxu0 %v10903_v7 }
 0x33a   :  { %4363 = vmatmul.mubr.bf16.gmra.mrb[60].mxu0 %v13766_v49  ;;  %5422 = vmatmul.mubr.bf16.gmra.mrb[124].mxu1 %v13126_v11  ;;  %v10898_v11 = vld [vmem:[%s15324_s1 + $0x7e8] ss:$16 sps:$4 sm:$0xff]  }
 0x33b   :  { %4372 = vmatprep.mubr.bf16.mxu0 %v13768_v25  ;;  %5431 = vmatprep.mubr.bf16.mxu1 %v13128_v40  ;;  %v13794_v40 = vcombine.high %v166_v1, %v170_v29 }
 0x33c   :  { %5623 = vmatpush1.bf16.msra.mxu1 %v10898_v11 }
 0x342   :  { %4373 = vmatmul.mubr.bf16.gmra.mrb[64].mxu0 %v13792_v41  ;;  %5432 = vmatmul.mubr.bf16.gmra.mrb[128].mxu1 %v13152_v38  ;;  %v182_v38 = vld [vmem:[%s15325_s0 + $0x4d8] sm:$0xff] }
 0x343   :  { %4382 = vmatprep.mubr.bf16.mxu0 %v13794_v40  ;;  %5441 = vmatprep.mubr.bf16.mxu1 %v13154_v18  ;;  %v186_v18 = vld [vmem:[%s15325_s0 + $0x4f8] sm:$0xff] }
 0x344   :  { %v13825_v23 = vcombine.high %v182_v38, %v186_v18  ;;  %v13837_v57 = vcombine.low %v182_v38, %v186_v18 }
 0x34a   :  { %4383 = vmatmul.mubr.bf16.gmra.mrb[68].mxu0 %v13809_v35  ;;  %5442 = vmatmul.mubr.bf16.gmra.mrb[132].mxu1 %v13169_v2  ;;  %v190_v2 = vld [vmem:[%s15325_s0 + $0x518] sm:$0xff] }
 0x34b   :  { %4392 = vmatprep.mubr.bf16.mxu0 %v13811_v3  ;;  %5451 = vmatprep.mubr.bf16.mxu1 %v13171_v33  ;;  %v194_v33 = vld [vmem:[%s15325_s0 + $0x538] sm:$0xff] }
 0x34c   :  { %v13839_v1 = vcombine.high %v190_v2, %v194_v33  ;;  %v13851_v29 = vcombine.low %v190_v2, %v194_v33 }
 0x352   :  { %4393 = vmatmul.mubr.bf16.gmra.mrb[72].mxu0 %v13823_v13  ;;  %5452 = vmatmul.mubr.bf16.gmra.mrb[136].mxu1 %v13183_v31  ;;  %v198_v31 = vld [vmem:[%s15325_s0 + $0x558] sm:$0xff] }
 0x353   :  { %4402 = vmatprep.mubr.bf16.mxu0 %v13825_v23  ;;  %5461 = vmatprep.mubr.bf16.mxu1 %v13185_v9  ;;  %v202_v9 = vld [vmem:[%s15325_s0 + $0x578] sm:$0xff] }
 0x354   :  { %v13853_v39 = vcombine.high %v198_v31, %v202_v9  ;;  %v13865_v11 = vcombine.low %v198_v31, %v202_v9 }
 0x356   :  { %15533 = vst [vmem:[#allocation13_spill] sm:$0xff] %v13853_v39  ;;  %15534 = vst [vmem:[#allocation14_spill] sm:$0xff] %v13865_v11 }
 0x35a   :  { %4403 = vmatmul.mubr.bf16.gmra.mrb[76].mxu0 %v13837_v57  ;;  %5462 = vmatmul.mubr.bf16.gmra.mrb[140].mxu1 %v13197_v52  ;;  %v206_v52 = vld [vmem:[%s15325_s0 + $0x598] sm:$0xff] }
 0x35b   :  { %4412 = vmatprep.mubr.bf16.mxu0 %v13839_v1  ;;  %5471 = vmatprep.mubr.bf16.mxu1 %v13199_v16  ;;  %v210_v16 = vld [vmem:[%s15325_s0 + $0x5b8] sm:$0xff] }
 0x35c   :  { %v13867_v8 = vcombine.high %v206_v52, %v210_v16  ;;  %v13879_v15 = vcombine.low %v206_v52, %v210_v16  ;;  %v541_v52 = vlaneseq  ;;  %v250_v16 = vld [vmem:[%s15325_s0 + $0x6f8] sm:$0xff] }
 0x35e   :  { %15535 = vst [vmem:[#allocation82_spill] sm:$0xff] %v13867_v8  ;;  %15536 = vst [vmem:[#allocation83_spill] sm:$0xff] %v13879_v15 }
 0x362   :  { %4413 = vmatmul.mubr.bf16.gmra.mrb[80].mxu0 %v13851_v29  ;;  %5472 = vmatmul.mubr.bf16.gmra.mrb[144].mxu1 %v13211_v44  ;;  %v214_v44 = vld [vmem:[%s15325_s0 + $0x5d8] sm:$0xff] }
 0x363   :  { %4422 = vmatprep.mubr.bf16.mxu0 %v13853_v39  ;;  %5481 = vmatprep.mubr.bf16.mxu1 %v13213_v17  ;;  %v218_v17 = vld [vmem:[%s15325_s0 + $0x5f8] sm:$0xff] }
 0x364   :  { %v13881_v7 = vcombine.high %v214_v44, %v218_v17  ;;  %v13893_v38 = vcombine.low %v214_v44, %v218_v17 }
 0x366   :  { %15537 = vst [vmem:[#allocation84_spill] sm:$0xff] %v13881_v7  ;;  %15538 = vst [vmem:[#allocation85_spill] sm:$0xff] %v13893_v38 }
 0x36a   :  { %4423 = vmatmul.mubr.bf16.gmra.mrb[84].mxu0 %v13865_v11  ;;  %5482 = vmatmul.mubr.bf16.gmra.mrb[148].mxu1 %v13228_v53  ;;  %v222_v53 = vld [vmem:[%s15325_s0 + $0x618] sm:$0xff] }
 0x36b   :  { %4432 = vmatprep.mubr.bf16.mxu0 %v13867_v8  ;;  %5491 = vmatprep.mubr.bf16.mxu1 %v13230_v12  ;;  %v226_v12 = vld [vmem:[%s15325_s0 + $0x638] sm:$0xff] }
 0x36c   :  { %v13895_v18 = vcombine.high %v222_v53, %v226_v12  ;;  %v13907_v2 = vcombine.low %v222_v53, %v226_v12 }
 0x36e   :  { %15539 = vst [vmem:[#allocation86_spill] sm:$0xff] %v13895_v18  ;;  %15540 = vst [vmem:[#allocation87_spill] sm:$0xff] %v13907_v2 }
 0x372   :  { %4433 = vmatmul.mubr.bf16.gmra.mrb[88].mxu0 %v13879_v15  ;;  %5492 = vmatmul.mubr.bf16.gmra.mrb[152].mxu1 %v13242_v19  ;;  %v230_v19 = vld [vmem:[%s15325_s0 + $0x658] sm:$0xff] }
 0x373   :  { %4442 = vmatprep.mubr.bf16.mxu0 %v13881_v7  ;;  %5501 = vmatprep.mubr.bf16.mxu1 %v13244_v21  ;;  %v234_v21 = vld [vmem:[%s15325_s0 + $0x678] sm:$0xff] }
 0x374   :  { %v13909_v33 = vcombine.high %v230_v19, %v234_v21  ;;  %v13921_v31 = vcombine.low %v230_v19, %v234_v21  ;;  %v254_v19 = vld [vmem:[%s15325_s0 + $0x718] sm:$0xff] }
 0x375   :  { %v258_v21 = vld [vmem:[%s15325_s0 + $0x738] sm:$0xff] }
 0x376   :  { %15541 = vst [vmem:[#allocation88_spill] sm:$0xff] %v13909_v33  ;;  %15542 = vst [vmem:[#allocation89_spill] sm:$0xff] %v13921_v31 }
 0x37a   :  { %4443 = vmatmul.mubr.bf16.gmra.mrb[92].mxu0 %v13893_v38  ;;  %5502 = vmatmul.mubr.bf16.gmra.mrb[156].mxu1 %v13256_v45  ;;  %v238_v45 = vld [vmem:[%s15325_s0 + $0x698] sm:$0xff] }
 0x37b   :  { %4452 = vmatprep.mubr.bf16.mxu0 %v13895_v18  ;;  %5511 = vmatprep.mubr.bf16.mxu1 %v13258_v51  ;;  %v242_v51 = vld [vmem:[%s15325_s0 + $0x6b8] sm:$0xff] }
 0x37c   :  { %v13923_v9 = vcombine.high %v238_v45, %v242_v51  ;;  %v13937_v44 = vcombine.low %v238_v45, %v242_v51 }
 0x37e   :  { %15543 = vst [vmem:[#allocation90_spill] sm:$0xff] %v13923_v9  ;;  %15545 = vst [vmem:[#allocation92_spill] sm:$0xff] %v13937_v44 }
 0x382   :  { %4453 = vmatmul.mubr.bf16.gmra.mrb[96].mxu0 %v13907_v2  ;;  %5512 = vmatmul.mubr.bf16.gmra.mrb[160].mxu1 %v13270_v37  ;;  %v13929_v37 = vshrl.u32 %v541_v52, 7 }
 0x383   :  { %4462 = vmatprep.mubr.bf16.mxu0 %v13909_v33  ;;  %5521 = vmatprep.mubr.bf16.mxu1 %v13272_v24  ;;  %v246_v24 = vld [vmem:[%s15325_s0 + $0x6d8] sm:$0xff] }
 0x384   :  { %15544 = vst [vmem:[#allocation91_spill] sm:$0xff] %v13929_v37  ;;  %v13939_v17 = vcombine.high %v246_v24, %v250_v16  ;;  %v15382_v53 = vsub.s32 1, %v13929_v37  ;;  %v13965_v52 = vcombine.low %v246_v24, %v250_v16  ;;  %v15550_v24 = vld [vmem:[#allocation30_spill] sm:$0xff] }
 0x386   :  { %15546 = vst [vmem:[#allocation93_spill] sm:$0xff] %v13939_v17  ;;  %15547 = vst [vmem:[#allocation94_spill] sm:$0xff] %v13965_v52 }
 0x38a   :  { %4463 = vmatmul.mubr.bf16.gmra.mrb[100].mxu0 %v13921_v31  ;;  %5522 = vmatmul.mubr.bf16.gmra.mrb[164].mxu1 %v13284_v48  ;;  %v15374_v48 = vsub.s32 0, %v13929_v37 }
 0x38b   :  { %4472 = vmatprep.mubr.bf16.mxu0 %v13923_v9  ;;  %5531 = vmatprep.mubr.bf16.mxu1 %v13286_v60  ;;  %v539_v60 = vld [vmem:[%s15327_s2] sm:$0xf] }
 0x38c   :  { %v13952_v12 = vrot.slane %v539_v60, %v15374_v48 }
 0x392   :  { %4473 = vmatmul.mubr.bf16.gmra.mrb[104].mxu0 %v13937_v44  ;;  %5532 = vmatmul.mubr.bf16.gmra.mrb[168].mxu1 %v13298_v58  ;;  %v13962_v58 = vrot.slane %v539_v60, %v15382_v53  ;;  %v13968_v44 = vcombine.high %v254_v19, %v258_v21  ;;  %v15549_v60 = vld [vmem:[#allocation15_spill] sm:$0xff] }
 0x393   :  { %4482 = vmatprep.mubr.bf16.mxu0 %v13939_v17  ;;  %5541 = vmatprep.mubr.bf16.mxu1 %v13300_v43 }
 0x394   :  { %15548 = vst [vmem:[#allocation95_spill] sm:$0xff] %v13968_v44 }
 0x395   :  { %v4214_v45 = vpop.f32.mrb[0].mxu0 }
 0x396   :  { %v9188_v51 = vadd.f32 %v4214_v45, %v13952_v12  ;;  %v4216_v43 = vpop.f32.mrb[1].mxu0 }
 0x397   :  { %v9189_v48 = vadd.f32 %v4216_v43, %v13962_v58  ;;  %v4218_v17 = vpop.f32.mrb[2].mxu0  ;;  %v13987_v43 = vcombine.low %v254_v19, %v258_v21  ;;  %v15554_v19 = vld [vmem:[#allocation81_spill] sm:$0xff] }
 0x398   :  { %v9190_v9 = vadd.f32 %v4218_v17, %v13952_v12  ;;  %v4220_v31 = vpop.f32.mrb[3].mxu0  ;;  %v5945_v2 = vmax.f32 %v9188_v51, 0.0  ;;  %v262_v17 = vld [vmem:[%s15325_s0 + $0x758] sm:$0xff] }
 0x399   :  { %v9191_v33 = vadd.f32 %v4220_v31, %v13962_v58  ;;  %v5946_v45 = vmax.f32 %v9189_v48, 0.0  ;;  %v266_v31 = vld [vmem:[%s15325_s0 + $0x778] sm:$0xff]  ;;  %15551 = vst [vmem:[#allocation15_spill] sm:$0xff] %v13987_v43 }
 0x39a   :  { %v5949_v18 = vmax.f32 %v9190_v9, 0.0  ;;  %4483 = vmatmul.mubr.bf16.gmra.mrb[108].mxu0 %v13965_v52  ;;  %5542 = vmatmul.mubr.bf16.gmra.mrb[172].mxu1 %v15549_v60 }
 0x39b   :  { %v5950_v53 = vmax.f32 %v9191_v33, 0.0  ;;  %4492 = vmatprep.mubr.bf16.mxu0 %v13968_v44  ;;  %5551 = vmatprep.mubr.bf16.mxu1 %v15550_v24 }
 0x39c   :  { %v13976_v16 = vpack.c.bf16 %v5949_v18, %v5945_v2  ;;  %v13990_v2 = vcombine.high %v262_v17, %v266_v31 }
 0x39d   :  { %v13984_v9 = vpack.c.bf16 %v5950_v53, %v5946_v45  ;;  %v4224_v51 = vpop.f32.mrb[4].mxu0  ;;  %v15553_v53 = vld [vmem:[#allocation2_spill] sm:$0xff] }
 0x39e   :  { %v9192_v48 = vadd.f32 %v4224_v51, %v13952_v12  ;;  %v4226_v33 = vpop.f32.mrb[5].mxu0  ;;  %15552 = vst [vmem:[#allocation30_spill] sm:$0xff] %v13990_v2 }
 0x39f   :  { %v9193_v60 = vadd.f32 %v4226_v33, %v13962_v58  ;;  %v4228_v18 = vpop.f32.mrb[6].mxu0  ;;  %v270_v33 = vld [vmem:[%s15325_s0 + $0x798] sm:$0xff] }
 0x3a0   :  { %v9194_v24 = vadd.f32 %v4228_v18, %v13952_v12  ;;  %v4230_v44 = vpop.f32.mrb[7].mxu0  ;;  %v5953_v37 = vmax.f32 %v9192_v48, 0.0 }
 0x3a1   :  { %v9195_v52 = vadd.f32 %v4230_v44, %v13962_v58  ;;  %v5954_v45 = vmax.f32 %v9193_v60, 0.0  ;;  %v274_v44 = vld [vmem:[%s15325_s0 + $0x7b8] sm:$0xff] }
 0x3a2   :  { %v5957_v38 = vmax.f32 %v9194_v24, 0.0  ;;  %4493 = vmatmul.mubr.bf16.gmra.mrb[112].mxu0 %v13987_v43  ;;  %5552 = vmatmul.mubr.bf16.gmra.mrb[176].mxu1 %v15553_v53  ;;  %v14009_v24 = vcombine.low %v262_v17, %v266_v31  ;;  %v15558_v17 = vld [vmem:[#allocation4_spill] sm:$0xff] }
 0x3a3   :  { %v5958_v51 = vmax.f32 %v9195_v52, 0.0  ;;  %4502 = vmatprep.mubr.bf16.mxu0 %v13990_v2  ;;  %5561 = vmatprep.mubr.bf16.mxu1 %v15554_v19 }
 0x3a4   :  { %v13998_v21 = vpack.c.bf16 %v5957_v38, %v5953_v37  ;;  %15555 = vst [vmem:[#allocation2_spill] sm:$0xff] %v14009_v24  ;;  %v14012_v37 = vcombine.high %v270_v33, %v274_v44 }
 0x3a5   :  { %v14006_v48 = vpack.c.bf16 %v5958_v51, %v5954_v45  ;;  %v4234_v18 = vpop.f32.mrb[8].mxu0  ;;  %v15557_v45 = vld [vmem:[#allocation3_spill] sm:$0xff] }
 0x3a6   :  { %v9196_v60 = vadd.f32 %v4234_v18, %v13952_v12  ;;  %v4236_v52 = vpop.f32.mrb[9].mxu0  ;;  %15556 = vst [vmem:[#allocation81_spill] sm:$0xff] %v14012_v37 }
 0x3a7   :  { %v9197_v53 = vadd.f32 %v4236_v52, %v13962_v58  ;;  %v4238_v38 = vpop.f32.mrb[10].mxu0  ;;  %v278_v52 = vld [vmem:[%s15325_s0 + $0x7d8] sm:$0xff] }
 0x3a8   :  { %v9198_v19 = vadd.f32 %v4238_v38, %v13952_v12  ;;  %v4240_v2 = vpop.f32.mrb[11].mxu0  ;;  %v5961_v7 = vmax.f32 %v9196_v60, 0.0 }
 0x3a9   :  { %v9199_v43 = vadd.f32 %v4240_v2, %v13962_v58  ;;  %v5962_v51 = vmax.f32 %v9197_v53, 0.0  ;;  %v282_v2 = vld [vmem:[%s15325_s0 + $0x7f8] sm:$0xff] }
 0x3aa   :  { %v5965_v15 = vmax.f32 %v9198_v19, 0.0  ;;  %4503 = vmatmul.mubr.bf16.gmra.mrb[116].mxu0 %v14009_v24  ;;  %5562 = vmatmul.mubr.bf16.gmra.mrb[180].mxu1 %v15557_v45  ;;  %v14031_v19 = vcombine.low %v270_v33, %v274_v44  ;;  %v15562_v33 = vld [vmem:[#allocation6_spill] sm:$0xff] }
 0x3ab   :  { %v5966_v18 = vmax.f32 %v9199_v43, 0.0  ;;  %4512 = vmatprep.mubr.bf16.mxu0 %v14012_v37  ;;  %5571 = vmatprep.mubr.bf16.mxu1 %v15558_v17 }
 0x3ac   :  { %v14020_v31 = vpack.c.bf16 %v5965_v15, %v5961_v7  ;;  %15559 = vst [vmem:[#allocation3_spill] sm:$0xff] %v14031_v19  ;;  %v14034_v7 = vcombine.high %v278_v52, %v282_v2 }
 0x3ad   :  { %v14028_v60 = vpack.c.bf16 %v5966_v18, %v5962_v51  ;;  %v4244_v38 = vpop.f32.mrb[12].mxu0  ;;  %v15561_v51 = vld [vmem:[#allocation5_spill] sm:$0xff] }
 0x3ae   :  { %v9200_v53 = vadd.f32 %v4244_v38, %v13952_v12  ;;  %v4246_v43 = vpop.f32.mrb[13].mxu0  ;;  %15560 = vst [vmem:[#allocation4_spill] sm:$0xff] %v14034_v7 }
 0x3af   :  { %v9201_v45 = vadd.f32 %v4246_v43, %v13962_v58  ;;  %v4248_v15 = vpop.f32.mrb[14].mxu0 }
 0x3b0   :  { %v9202_v17 = vadd.f32 %v4248_v15, %v13952_v12  ;;  %v4250_v37 = vpop.f32.mrb[15].mxu0  ;;  %v5969_v8 = vmax.f32 %v9200_v53, 0.0  ;;  %v14047_v53 = vcombine.low %v278_v52, %v282_v2  ;;  %v15564_v52 = vld [vmem:[#allocation8_spill] sm:$0xff] }
 0x3b1   :  { %v9203_v24 = vadd.f32 %v4250_v37, %v13962_v58  ;;  %v5970_v18 = vmax.f32 %v9201_v45, 0.0 }
 0x3b2   :  { %v5973_v11 = vmax.f32 %v9202_v17, 0.0  ;;  %4513 = vmatmul.mubr.bf16.gmra.mrb[120].mxu0 %v14031_v19  ;;  %5572 = vmatmul.mubr.bf16.gmra.mrb[184].mxu1 %v15561_v51 }
 0x3b3   :  { %v5974_v38 = vmax.f32 %v9203_v24, 0.0  ;;  %4522 = vmatprep.mubr.bf16.mxu0 %v14034_v7  ;;  %5581 = vmatprep.mubr.bf16.mxu1 %v15562_v33 }
 0x3b4   :  { %v14042_v44 = vpack.c.bf16 %v5973_v11, %v5969_v8  ;;  %v15563_v11 = vld [vmem:[#allocation7_spill] sm:$0xff] }
 0x3b5   :  { %v14044_v43 = vpack.c.bf16 %v5974_v38, %v5970_v18  ;;  %v4254_v15 = vpop.f32.mrb[16].mxu0 }
 0x3b6   :  { %v9204_v39 = vadd.f32 %v4254_v15, %v13952_v12  ;;  %v4256_v37 = vpop.f32.mrb[17].mxu0 }
 0x3b7   :  { %v9205_v17 = vadd.f32 %v4256_v37, %v13962_v58  ;;  %v4258_v19 = vpop.f32.mrb[18].mxu0 }
 0x3b8   :  { %v9206_v45 = vadd.f32 %v4258_v19, %v13952_v12  ;;  %v4260_v24 = vpop.f32.mrb[19].mxu0  ;;  %v5977_v7 = vmax.f32 %v9204_v39, 0.0 }
 0x3b9   :  { %v9207_v51 = vadd.f32 %v4260_v24, %v13962_v58  ;;  %v5978_v8 = vmax.f32 %v9205_v17, 0.0  ;;  %v10901_v17 = vld [vmem:[%s15326_s3 + $0x100] ss:$8 sps:$4 sm:$0xff]  }
 0x3ba   :  { %v5981_v33 = vmax.f32 %v9206_v45, 0.0  ;;  %4523 = vmatmul.mubr.bf16.gmra.mrb[124].mxu0 %v14047_v53  ;;  %5582 = vmatmul.mubr.bf16.gmra.mrb[188].mxu1 %v15563_v11 }
 0x3bb   :  { %v5982_v18 = vmax.f32 %v9207_v51, 0.0  ;;  %6757 = vmatprep.mubr.bf16.mxu0 %v13984_v9  ;;  %5624 = vmatprep.mubr.bf16.mxu1 %v15564_v52 }
 0x3bc   :  { %v14056_v2 = vpack.c.bf16 %v5981_v33, %v5977_v7  ;;  %v10906_v7 = vld [vmem:[%s15326_s3 + $0x114] ss:$8 sps:$4 sm:$0xff]  }
 0x3bd   :  { %v14058_v38 = vpack.c.bf16 %v5982_v18, %v5978_v8  ;;  %v4264_v19 = vpop.f32.mrb[20].mxu0  ;;  %v15565_v8 = vld [vmem:[#allocation9_spill] sm:$0xff] }
 0x3be   :  { %v9208_v15 = vadd.f32 %v4264_v19, %v13952_v12  ;;  %v4266_v37 = vpop.f32.mrb[21].mxu0  ;;  %v10904_v19 = vld [vmem:[%s15326_s3 + $0x110] ss:$8 sps:$4 sm:$0xff]  }
 0x3bf   :  { %v9209_v39 = vadd.f32 %v4266_v37, %v13962_v58  ;;  %v4268_v45 = vpop.f32.mrb[22].mxu0 }
 0x3c0   :  { %v9210_v24 = vadd.f32 %v4268_v45, %v13952_v12  ;;  %v4270_v9 = vpop.f32.mrb[23].mxu0  ;;  %v5985_v33 = vmax.f32 %v9208_v15, 0.0  ;;  %v15566_v45 = vld [vmem:[#allocation10_spill] sm:$0xff] }
 0x3c1   :  { %v9211_v51 = vadd.f32 %v4270_v9, %v13962_v58  ;;  %v5986_v18 = vmax.f32 %v9209_v39, 0.0  ;;  %v10909_v15 = vld [vmem:[%s15326_s3 + $0x124] ss:$8 sps:$4 sm:$0xff]  }
 0x3c2   :  { %v5989_v11 = vmax.f32 %v9210_v24, 0.0  ;;  %5625 = vmatmul.mubr.bf16.vlgmr.msra.gmra.mrb[64].mxu1 %v15565_v8  ;;  %6758 = vmatmul.mubr.bf16.vlgmr.msra.gmra.mrb[128].mxu0 %v13976_v16  ;;  %v10912_v8 = vld [vmem:[%s15326_s3 + $0x134] ss:$8 sps:$4 sm:$0xff]  }
 0x3c3   :  { %v5990_v52 = vmax.f32 %v9211_v51, 0.0  ;;  %6767 = vmatprep.mubr.bf16.mxu0 %v14006_v48  ;;  %7079 = vmatpush1.bf16.msra.mxu0 %v10901_v17 }
 0x3c4   :  { %v14076_v37 = vpack.c.bf16 %v5989_v11, %v5985_v33  ;;  %5634 = vmatprep.mubr.bf16.mxu1 %v15566_v45  ;;  %7080 = vmatprep.subr.bf16.mxu0 %v10906_v7  ;;  %v10907_v7 = vld [vmem:[%s15326_s3 + $0x120] ss:$8 sps:$4 sm:$0xff]  }
 0x3c5   :  { %v14082_v24 = vpack.c.bf16 %v5990_v52, %v5986_v18  ;;  %v4274_v16 = vpop.f32.mrb[24].mxu0  ;;  %v15567_v45 = vld [vmem:[#allocation11_spill] sm:$0xff] }
 0x3c6   :  { %v9212_v39 = vadd.f32 %v4274_v16, %v13952_v12  ;;  %v4276_v48 = vpop.f32.mrb[25].mxu0 }
 0x3c7   :  { %v9213_v17 = vadd.f32 %v4276_v48, %v13962_v58  ;;  %v4278_v9 = vpop.f32.mrb[26].mxu0  ;;  %7081 = vmatpush1.bf16.msra.mxu0 %v10904_v19  ;;  %v15568_v48 = vld [vmem:[#allocation12_spill] sm:$0xff] }
 0x3c8   :  { %v9214_v51 = vadd.f32 %v4278_v9, %v13952_v12  ;;  %v4280_v33 = vpop.f32.mrb[27].mxu0  ;;  %7082 = vmatprep.subr.bf16.mxu0 %v10909_v15  ;;  %v5993_v18 = vmax.f32 %v9212_v39, 0.0  ;;  %v10910_v15 = vld [vmem:[%s15326_s3 + $0x130] ss:$8 sps:$4 sm:$0xff]  }
 0x3c9   :  { %v9215_v11 = vadd.f32 %v4280_v33, %v13962_v58  ;;  %v5994_v19 = vmax.f32 %v9213_v17, 0.0 }
 0x3ca   :  { %v5997_v52 = vmax.f32 %v9214_v51, 0.0  ;;  %5635 = vmatmul.mubr.bf16.gmra.mrb[68].mxu1 %v15567_v45  ;;  %6768 = vmatmul.mubr.bf16.gmra.mrb[132].mxu0 %v13998_v21  ;;  %v10915_v21 = vld [vmem:[%s15326_s3 + $0x144] ss:$8 sps:$4 sm:$0xff]   ;;  %v10918_v45 = vld [vmem:[%s15326_s3 + $0x154] ss:$8 sps:$4 sm:$0xff]  }
 0x3cb   :  { %v5998_v16 = vmax.f32 %v9215_v11, 0.0  ;;  %6777 = vmatprep.mubr.bf16.mxu0 %v14028_v60  ;;  %5644 = vmatprep.mubr.bf16.mxu1 %v15568_v48 }
 0x3cc   :  { %v14098_v9 = vpack.c.bf16 %v5997_v52, %v5993_v18  ;;  %7083 = vmatpush1.bf16.msra.mxu0 %v10907_v7  ;;  %v10913_v52 = vld [vmem:[%s15326_s3 + $0x140] ss:$8 sps:$4 sm:$0xff]  }
 0x3cd   :  { %v14103_v33 = vpack.c.bf16 %v5998_v16, %v5994_v19  ;;  %v4284_v39 = vpop.f32.mrb[28].mxu0  ;;  %7084 = vmatprep.subr.bf16.mxu0 %v10912_v8 }
 0x3ce   :  { %v9216_v17 = vadd.f32 %v4284_v39, %v13952_v12  ;;  %v4286_v60 = vpop.f32.mrb[29].mxu0 }
 0x3cf   :  { %v9217_v51 = vadd.f32 %v4286_v60, %v13962_v58  ;;  %v4288_v11 = vpop.f32.mrb[30].mxu0 }
 0x3d0   :  { %v9218_v7 = vadd.f32 %v4288_v11, %v13952_v12  ;;  %v4290_v18 = vpop.f32.mrb[31].mxu0  ;;  %7085 = vmatpush1.bf16.msra.mxu0 %v10910_v15  ;;  %v6001_v19 = vmax.f32 %v9216_v17, 0.0 }
 0x3d1   :  { %v9219_v8 = vadd.f32 %v4290_v18, %v13962_v58  ;;  %7086 = vmatprep.subr.bf16.mxu0 %v10915_v21  ;;  %v6002_v48 = vmax.f32 %v9217_v51, 0.0  ;;  %v10916_v21 = vld [vmem:[%s15326_s3 + $0x150] ss:$8 sps:$4 sm:$0xff]   ;;  %v10919_v18 = vld [vmem:[%s15326_s3 + $0x160] ss:$8 sps:$4 sm:$0xff]  }
 0x3d2   :  { %v6005_v16 = vmax.f32 %v9218_v7, 0.0  ;;  %5645 = vmatmul.mubr.bf16.gmra.mrb[72].mxu1 %v13455_v5  ;;  %6778 = vmatmul.mubr.bf16.gmra.mrb[136].mxu0 %v14020_v31  ;;  %v10921_v5 = vld [vmem:[%s15326_s3 + $0x164] ss:$8 sps:$4 sm:$0xff]  }
 0x3d3   :  { %v6006_v39 = vmax.f32 %v9219_v8, 0.0  ;;  %6787 = vmatprep.mubr.bf16.mxu0 %v14044_v43  ;;  %5654 = vmatprep.mubr.bf16.mxu1 %v13457_v26  ;;  %v10924_v8 = vld [vmem:[%s15326_s3 + $0x174] ss:$8 sps:$4 sm:$0xff]  }
 0x3d4   :  { %v14122_v15 = vpack.c.bf16 %v6005_v16, %v6001_v19  ;;  %7087 = vmatpush1.bf16.msra.mxu0 %v10913_v52 }
 0x3d5   :  { %v14127_v60 = vpack.c.bf16 %v6006_v39, %v6002_v48  ;;  %v4294_v17 = vpop.f32.mrb[32].mxu0  ;;  %7088 = vmatprep.subr.bf16.mxu0 %v10918_v45 }
 0x3d6   :  { %v9220_v31 = vadd.f32 %v4294_v17, %v13952_v12  ;;  %v4296_v43 = vpop.f32.mrb[33].mxu0 }
 0x3d7   :  { %v9221_v26 = vadd.f32 %v4296_v43, %v13962_v58  ;;  %v4298_v51 = vpop.f32.mrb[34].mxu0 }
 0x3d8   :  { %v9222_v11 = vadd.f32 %v4298_v51, %v13952_v12  ;;  %v4300_v7 = vpop.f32.mrb[35].mxu0  ;;  %7089 = vmatpush1.bf16.msra.mxu0 %v10916_v21  ;;  %v6009_v45 = vmax.f32 %v9220_v31, 0.0  ;;  %v10922_v21 = vld [vmem:[%s15326_s3 + $0x170] ss:$8 sps:$4 sm:$0xff]   ;;  %v10925_v51 = vld [vmem:[%s15326_s3 + $0x180] ss:$8 sps:$4 sm:$0xff]  }
 0x3d9   :  { %v9223_v52 = vadd.f32 %v4300_v7, %v13962_v58  ;;  %7090 = vmatprep.subr.bf16.mxu0 %v10921_v5  ;;  %v6010_v16 = vmax.f32 %v9221_v26, 0.0  ;;  %v10930_v7 = vld [vmem:[%s15326_s3 + $0x194] ss:$8 sps:$4 sm:$0xff]  }
 0x3da   :  { %v6013_v19 = vmax.f32 %v9222_v11, 0.0  ;;  %5655 = vmatmul.mubr.bf16.gmra.mrb[76].mxu1 %v13493_v56  ;;  %6788 = vmatmul.mubr.bf16.gmra.mrb[140].mxu0 %v14042_v44  ;;  %v10927_v56 = vld [vmem:[%s15326_s3 + $0x184] ss:$8 sps:$4 sm:$0xff]  }
 0x3db   :  { %v6014_v48 = vmax.f32 %v9223_v52, 0.0  ;;  %6797 = vmatprep.mubr.bf16.mxu0 %v14058_v38  ;;  %5664 = vmatprep.mubr.bf16.mxu1 %v13495_v22 }
 0x3dc   :  { %v14146_v39 = vpack.c.bf16 %v6013_v19, %v6009_v45  ;;  %7091 = vmatpush1.bf16.msra.mxu0 %v10919_v18 }
 0x3dd   :  { %v14151_v17 = vpack.c.bf16 %v6014_v48, %v6010_v16  ;;  %v4304_v5 = vpop.f32.mrb[36].mxu0  ;;  %7092 = vmatprep.subr.bf16.mxu0 %v10924_v8  ;;  %v10928_v16 = vld [vmem:[%s15326_s3 + $0x190] ss:$8 sps:$4 sm:$0xff]  }
 0x3de   :  { %v9224_v44 = vadd.f32 %v4304_v5, %v13952_v12  ;;  %v4306_v38 = vpop.f32.mrb[37].mxu0 }
 0x3df   :  { %v9225_v22 = vadd.f32 %v4306_v38, %v13962_v58  ;;  %v4308_v31 = vpop.f32.mrb[38].mxu0  ;;  %v10931_v38 = vld [vmem:[%s15326_s3 + $0x1a0] ss:$8 sps:$4 sm:$0xff]  }
 0x3e0   :  { %v9226_v43 = vadd.f32 %v4308_v31, %v13952_v12  ;;  %v4310_v26 = vpop.f32.mrb[39].mxu0  ;;  %7093 = vmatpush1.bf16.msra.mxu0 %v10922_v21  ;;  %v6017_v18 = vmax.f32 %v9224_v44, 0.0 }
 0x3e1   :  { %v9227_v11 = vadd.f32 %v4310_v26, %v13962_v58  ;;  %7094 = vmatprep.subr.bf16.mxu0 %v10927_v56  ;;  %v6018_v8 = vmax.f32 %v9225_v22, 0.0 }
 0x3e2   :  { %v6021_v52 = vmax.f32 %v9226_v43, 0.0  ;;  %5665 = vmatmul.mubr.bf16.gmra.mrb[80].mxu1 %v13531_v32  ;;  %6798 = vmatmul.mubr.bf16.gmra.mrb[144].mxu0 %v14056_v2  ;;  %v10933_v32 = vld [vmem:[%s15326_s3 + $0x1a4] ss:$8 sps:$4 sm:$0xff]  }
 0x3e3   :  { %v6022_v45 = vmax.f32 %v9227_v11, 0.0  ;;  %6807 = vmatprep.mubr.bf16.mxu0 %v14082_v24  ;;  %5674 = vmatprep.mubr.bf16.mxu1 %v13533_v55 }
 0x3e4   :  { %v14170_v19 = vpack.c.bf16 %v6021_v52, %v6017_v18  ;;  %7095 = vmatpush1.bf16.msra.mxu0 %v10925_v51 }
 0x3e5   :  { %v14175_v48 = vpack.c.bf16 %v6022_v45, %v6018_v8  ;;  %v4314_v21 = vpop.f32.mrb[40].mxu0  ;;  %7096 = vmatprep.subr.bf16.mxu0 %v10930_v7 }
 0x3e6   :  { %v9228_v2 = vadd.f32 %v4314_v21, %v13952_v12  ;;  %v4316_v24 = vpop.f32.mrb[41].mxu0 }
 0x3e7   :  { %v9229_v55 = vadd.f32 %v4316_v24, %v13962_v58  ;;  %v4318_v5 = vpop.f32.mrb[42].mxu0 }
 0x3e8   :  { %v9230_v56 = vadd.f32 %v4318_v5, %v13952_v12  ;;  %v4320_v44 = vpop.f32.mrb[43].mxu0  ;;  %7097 = vmatpush1.bf16.msra.mxu0 %v10928_v16  ;;  %v6025_v31 = vmax.f32 %v9228_v2, 0.0 }
 0x3e9   :  { %v9231_v22 = vadd.f32 %v4320_v44, %v13962_v58  ;;  %7098 = vmatprep.subr.bf16.mxu0 %v10933_v32  ;;  %v6026_v26 = vmax.f32 %v9229_v55, 0.0 }
 0x3ea   :  { %v6029_v43 = vmax.f32 %v9230_v56, 0.0  ;;  %5675 = vmatmul.mubr.bf16.gmra.mrb[84].mxu1 %v13563_v27  ;;  %6808 = vmatmul.mubr.bf16.gmra.mrb[148].mxu0 %v14076_v37  ;;  %v10934_v56 = vld [vmem:[%s15326_s3 + $0x1b0] ss:$8 sps:$4 sm:$0xff]  }
 0x3eb   :  { %v6030_v51 = vmax.f32 %v9231_v22, 0.0  ;;  %6817 = vmatprep.mubr.bf16.mxu0 %v14103_v33  ;;  %5684 = vmatprep.mubr.bf16.mxu1 %v13565_v62 }
 0x3ec   :  { %v14191_v11 = vpack.c.bf16 %v6029_v43, %v6025_v31  ;;  %7099 = vmatpush1.bf16.msra.mxu0 %v10931_v38 }
 0x3ed   :  { %v14193_v7 = vpack.c.bf16 %v6030_v51, %v6026_v26  ;;  %v4324_v18 = vpop.f32.mrb[44].mxu0 }
 0x3ee   :  { %v9232_v52 = vadd.f32 %v4324_v18, %v13952_v12  ;;  %v4326_v8 = vpop.f32.mrb[45].mxu0 }
 0x3ef   :  { %v9233_v45 = vadd.f32 %v4326_v8, %v13962_v58  ;;  %v4328_v27 = vpop.f32.mrb[46].mxu0 }
 0x3f0   :  { %v9234_v37 = vadd.f32 %v4328_v27, %v13952_v12  ;;  %v4330_v16 = vpop.f32.mrb[47].mxu0  ;;  %v6033_v33 = vmax.f32 %v9232_v52, 0.0 }
 0x3f1   :  { %v9235_v21 = vadd.f32 %v4330_v16, %v13962_v58  ;;  %v6034_v62 = vmax.f32 %v9233_v45, 0.0 }
 0x3f2   :  { %v6037_v32 = vmax.f32 %v9234_v37, 0.0  ;;  %5685 = vmatmul.mubr.bf16.gmra.mrb[88].mxu1 %v13580_v10  ;;  %6818 = vmatmul.mubr.bf16.gmra.mrb[152].mxu0 %v14098_v9  ;;  %v10936_v10 = vld [vmem:[%s15326_s3 + $0x1b4] ss:$8 sps:$4 sm:$0xff]  }
 0x3f3   :  { %v6038_v2 = vmax.f32 %v9235_v21, 0.0  ;;  %6827 = vmatprep.mubr.bf16.mxu0 %v14127_v60  ;;  %5694 = vmatprep.mubr.bf16.mxu1 %v13582_v50 }
 0x3f4   :  { %v14203_v24 = vpack.c.bf16 %v6037_v32, %v6033_v33  ;;  %7100 = vmatprep.subr.bf16.mxu0 %v10936_v10  ;;  %v10937_v10 = vld [vmem:[%s15326_s3 + $0x1c0] ss:$8 sps:$4 sm:$0xff]  }
 0x3f5   :  { %v14205_v55 = vpack.c.bf16 %v6038_v2, %v6034_v62  ;;  %v4334_v5 = vpop.f32.mrb[48].mxu0  ;;  %7101 = vmatpush1.bf16.msra.mxu0 %v10934_v56 }
 0x3f6   :  { %v9236_v9 = vadd.f32 %v4334_v5, %v13952_v12  ;;  %v4336_v44 = vpop.f32.mrb[49].mxu0 }
 0x3f7   :  { %v9237_v60 = vadd.f32 %v4336_v44, %v13962_v58  ;;  %v4338_v38 = vpop.f32.mrb[50].mxu0 }
 0x3f8   :  { %v9238_v50 = vadd.f32 %v4338_v38, %v13952_v12  ;;  %v4340_v22 = vpop.f32.mrb[51].mxu0  ;;  %v6041_v43 = vmax.f32 %v9236_v9, 0.0 }
 0x3f9   :  { %v9239_v31 = vadd.f32 %v4340_v22, %v13962_v58  ;;  %v6042_v51 = vmax.f32 %v9237_v60, 0.0 }
 0x3fa   :  { %v6045_v26 = vmax.f32 %v9238_v50, 0.0  ;;  %5695 = vmatmul.mubr.bf16.gmra.mrb[92].mxu1 %v13606_v28  ;;  %6828 = vmatmul.mubr.bf16.gmra.mrb[156].mxu0 %v14122_v15 }
 0x3fb   :  { %v6046_v18 = vmax.f32 %v9239_v31, 0.0  ;;  %6837 = vmatprep.mubr.bf16.mxu0 %v14151_v17  ;;  %5704 = vmatprep.mubr.bf16.mxu1 %v13608_v20 }
 0x3fc   :  { %v14221_v52 = vpack.c.bf16 %v6045_v26, %v6041_v43 }
 0x3fd   :  { %v14223_v8 = vpack.c.bf16 %v6046_v18, %v6042_v51  ;;  %v4344_v45 = vpop.f32.mrb[52].mxu0 }
 0x3fe   :  { %v9240_v27 = vadd.f32 %v4344_v45, %v13952_v12  ;;  %v4346_v37 = vpop.f32.mrb[53].mxu0 }
 0x3ff   :  { %v9241_v16 = vadd.f32 %v4346_v37, %v13962_v58  ;;  %v4348_v21 = vpop.f32.mrb[54].mxu0 }
 0x400   :  { %v9242_v28 = vadd.f32 %v4348_v21, %v13952_v12  ;;  %v4350_v15 = vpop.f32.mrb[55].mxu0  ;;  %v6049_v32 = vmax.f32 %v9240_v27, 0.0 }
 0x401   :  { %v9243_v33 = vadd.f32 %v4350_v15, %v13962_v58  ;;  %v6050_v20 = vmax.f32 %v9241_v16, 0.0 }
 0x402   :  { %v6053_v17 = vmax.f32 %v9242_v28, 0.0  ;;  %5705 = vmatmul.mubr.bf16.gmra.mrb[96].mxu1 %v13620_v47  ;;  %6838 = vmatmul.mubr.bf16.gmra.mrb[160].mxu0 %v14146_v39  ;;  %v10939_v47 = vld [vmem:[%s15326_s3 + $0x1c4] ss:$8 sps:$4 sm:$0xff]  }
 0x403   :  { %v6054_v62 = vmax.f32 %v9243_v33, 0.0  ;;  %6847 = vmatprep.mubr.bf16.mxu0 %v14175_v48  ;;  %5714 = vmatprep.mubr.bf16.mxu1 %v13622_v36 }
 0x404   :  { %v14233_v2 = vpack.c.bf16 %v6053_v17, %v6049_v32  ;;  %7102 = vmatprep.subr.bf16.mxu0 %v10939_v47  ;;  %v15569_v32 = vld [vmem:[#allocation16_spill] sm:$0xff]  ;;  %v15571_v47 = vld [vmem:[#allocation18_spill] sm:$0xff] }
 0x405   :  { %v14235_v5 = vpack.c.bf16 %v6054_v62, %v6050_v20  ;;  %v4354_v56 = vpop.f32.mrb[56].mxu0  ;;  %7103 = vmatpush1.bf16.msra.mxu0 %v10937_v10  ;;  %v3316_v17 = vadd.f32 %v15569_v32, %v13952_v12 }
 0x406   :  { %v9244_v39 = vadd.f32 %v4354_v56, %v13952_v12  ;;  %v4356_v9 = vpop.f32.mrb[57].mxu0  ;;  %v15570_v56 = vld [vmem:[#allocation17_spill] sm:$0xff] }
 0x407   :  { %v9245_v48 = vadd.f32 %v4356_v9, %v13962_v58  ;;  %v4358_v44 = vpop.f32.mrb[58].mxu0  ;;  %v3318_v10 = vadd.f32 %v15570_v56, %v13962_v58 }
 0x408   :  { %v9246_v36 = vadd.f32 %v4358_v44, %v13952_v12  ;;  %v4360_v60 = vpop.f32.mrb[59].mxu0  ;;  %v6057_v50 = vmax.f32 %v9244_v39, 0.0  ;;  %v3320_v39 = vadd.f32 %v15571_v47, %v13952_v12  ;;  %v15572_v44 = vld [vmem:[#allocation19_spill] sm:$0xff] }
 0x409   :  { %v9247_v38 = vadd.f32 %v4360_v60, %v13962_v58  ;;  %v6058_v31 = vmax.f32 %v9245_v48, 0.0 }
 0x40a   :  { %v6061_v22 = vmax.f32 %v9246_v36, 0.0  ;;  %5715 = vmatmul.mubr.bf16.gmra.mrb[100].mxu1 %v13646_v46  ;;  %6848 = vmatmul.mubr.bf16.gmra.mrb[164].mxu0 %v14170_v19  ;;  %v3322_v36 = vadd.f32 %v15572_v44, %v13962_v58 }
 0x40b   :  { %v6062_v43 = vmax.f32 %v9247_v38, 0.0  ;;  %6857 = vmatprep.mubr.bf16.mxu0 %v14193_v7  ;;  %5724 = vmatprep.mubr.bf16.mxu1 %v13648_v63 }
 0x40c   :  { %v14251_v26 = vpack.c.bf16 %v6061_v22, %v6057_v50 }
 0x40d   :  { %v14253_v51 = vpack.c.bf16 %v6062_v43, %v6058_v31  ;;  %v4364_v18 = vpop.f32.mrb[60].mxu0 }
 0x40e   :  { %v9248_v45 = vadd.f32 %v4364_v18, %v13952_v12  ;;  %v4366_v27 = vpop.f32.mrb[61].mxu0 }
 0x40f   :  { %v9249_v37 = vadd.f32 %v4366_v27, %v13962_v58  ;;  %v4368_v16 = vpop.f32.mrb[62].mxu0  ;;  %v15573_v27 = vld [vmem:[#allocation20_spill] sm:$0xff] }
 0x410   :  { %v9250_v46 = vadd.f32 %v4368_v16, %v13952_v12  ;;  %v4370_v19 = vpop.f32.mrb[63].mxu0  ;;  %v6065_v28 = vmax.f32 %v9248_v45, 0.0 }
 0x411   :  { %v9251_v21 = vadd.f32 %v4370_v19, %v13962_v58  ;;  %v6066_v63 = vmax.f32 %v9249_v37, 0.0  ;;  %v3326_v37 = vadd.f32 %v15573_v27, %v13952_v12  ;;  %v15574_v19 = vld [vmem:[#allocation21_spill] sm:$0xff] }
 0x412   :  { %v6069_v7 = vmax.f32 %v9250_v46, 0.0  ;;  %5725 = vmatmul.mubr.bf16.gmra.mrb[104].mxu1 %v13660_v30  ;;  %6858 = vmatmul.mubr.bf16.gmra.mrb[168].mxu0 %v14191_v11  ;;  %v10940_v30 = vld [vmem:[%s15326_s3 + $0x1d0] ss:$8 sps:$4 sm:$0xff]   ;;  %v10942_v11 = vld [vmem:[%s15326_s3 + $0x1d4] ss:$8 sps:$4 sm:$0xff]  }
 0x413   :  { %v6070_v15 = vmax.f32 %v9251_v21, 0.0  ;;  %6867 = vmatprep.mubr.bf16.mxu0 %v14205_v55  ;;  %5734 = vmatprep.mubr.bf16.mxu1 %v13662_v54  ;;  %v3328_v21 = vadd.f32 %v15574_v19, %v13962_v58 }
 0x414   :  { %v14263_v33 = vpack.c.bf16 %v6069_v7, %v6065_v28  ;;  %7104 = vmatprep.subr.bf16.mxu0 %v10942_v11 }
 0x415   :  { %v14267_v20 = vpack.c.bf16 %v6070_v15, %v6066_v63  ;;  %v4374_v62 = vpop.f32.mrb[64].mxu0  ;;  %7105 = vmatpush1.bf16.msra.mxu0 %v10940_v30 }
 0x416   :  { %v9253_v54 = vadd.f32 %v4374_v62, %v3316_v17  ;;  %v4376_v55 = vpop.f32.mrb[65].mxu0 }
 0x417   :  { %v9255_v9 = vadd.f32 %v4376_v55, %v3318_v10  ;;  %v4378_v48 = vpop.f32.mrb[66].mxu0  ;;  %v15577_v55 = vld [vmem:[#allocation24_spill] sm:$0xff] }
 0x418   :  { %v9257_v60 = vadd.f32 %v4378_v48, %v3320_v39  ;;  %v4380_v38 = vpop.f32.mrb[67].mxu0  ;;  %v6073_v22 = vmax.f32 %v9253_v54, 0.0  ;;  %v3336_v47 = vadd.f32 %v15577_v55, %v13952_v12  ;;  %v15578_v48 = vld [vmem:[#allocation25_spill] sm:$0xff] }
 0x419   :  { %v9259_v50 = vadd.f32 %v4380_v38, %v3322_v36  ;;  %v6074_v43 = vmax.f32 %v9255_v9, 0.0  ;;  %v3338_v44 = vadd.f32 %v15578_v48, %v13962_v58  ;;  %v15579_v36 = vld [vmem:[#allocation26_spill] sm:$0xff]  ;;  %v11223_v38 = vmov 0  }
 0x41a   :  { %v6077_v31 = vmax.f32 %v9257_v60, 0.0  ;;  %5735 = vmatmul.mubr.bf16.gmra.mrb[108].mxu1 %v13686_v59  ;;  %6868 = vmatmul.mubr.bf16.gmra.mrb[172].mxu0 %v14203_v24  ;;  %v15575_v24 = vld [vmem:[#allocation22_spill] sm:$0xff]  ;;  %v3340_v60 = vadd.f32 %v15579_v36, %v13952_v12 }
 0x41b   :  { %v6078_v18 = vmax.f32 %v9259_v50, 0.0  ;;  %6877 = vmatprep.mubr.bf16.mxu0 %v14223_v8  ;;  %5744 = vmatprep.mubr.bf16.mxu1 %v13688_v34  ;;  %v3330_v7 = vadd.f32 %v15575_v24, %v13952_v12  ;;  %v15576_v34 = vld [vmem:[#allocation23_spill] sm:$0xff]  ;;  %v10943_v50 = vld [vmem:[%s15328_s5] sm:$0xff]  }
 0x41c   :  { %v14285_v45 = vpack.c.bf16 %v6077_v31, %v6073_v22  ;;  %v3332_v15 = vadd.f32 %v15576_v34, %v13962_v58  ;;  %7758 = vmatprep.subr.bf16.mxu1 %v11223_v38 }
 0x41d   :  { %v14289_v16 = vpack.c.bf16 %v6078_v18, %v6074_v43  ;;  %v4384_v46 = vpop.f32.mrb[68].mxu0  ;;  %v15580_v43 = vld [vmem:[#allocation27_spill] sm:$0xff]  ;;  %7759 = vmatpush1.bf16.msra.mxu1 %v10943_v50 }
 0x41e   :  { %v9261_v59 = vadd.f32 %v4384_v46, %v3326_v37  ;;  %v4386_v28 = vpop.f32.mrb[69].mxu0  ;;  %v3342_v18 = vadd.f32 %v15580_v43, %v13962_v58  ;;  %7760 = vmatprep.subr.bf16.mxu1 %v11223_v38 }
 0x41f   :  { %v9263_v63 = vadd.f32 %v4386_v28, %v3328_v21  ;;  %v4388_v8 = vpop.f32.mrb[70].mxu0 }
 0x420   :  { %v9265_v32 = vadd.f32 %v4388_v8, %v3330_v7  ;;  %v4390_v17 = vpop.f32.mrb[71].mxu0  ;;  %v6081_v56 = vmax.f32 %v9261_v59, 0.0  ;;  %v15581_v7 = vld [vmem:[#allocation28_spill] sm:$0xff] }
 0x421   :  { %v9267_v62 = vadd.f32 %v4390_v17, %v3332_v15  ;;  %v6082_v30 = vmax.f32 %v9263_v63, 0.0  ;;  %v3346_v63 = vadd.f32 %v15581_v7, %v13952_v12  ;;  %v15582_v15 = vld [vmem:[#allocation29_spill] sm:$0xff] }
 0x422   :  { %v6085_v10 = vmax.f32 %v9265_v32, 0.0  ;;  %5745 = vmatmul.mubr.bf16.gmra.mrb[112].mxu1 %v13700_v4  ;;  %6878 = vmatmul.mubr.bf16.gmra.mrb[176].mxu0 %v14221_v52  ;;  %v10944_v4 = vld [vmem:[%s15326_s3 + $0x1e0] ss:$8 sps:$4 sm:$0xff]   ;;  %v10946_v52 = vld [vmem:[%s15326_s3 + $0x1e4] ss:$8 sps:$4 sm:$0xff]   ;;  %v3348_v32 = vadd.f32 %v15582_v15, %v13962_v58 }
 0x423   :  { %v6086_v11 = vmax.f32 %v9267_v62, 0.0  ;;  %6887 = vmatprep.mubr.bf16.mxu0 %v14235_v5  ;;  %5754 = vmatprep.mubr.bf16.mxu1 %v13702_v42 }
 0x424   :  { %v14301_v54 = vpack.c.bf16 %v6085_v10, %v6081_v56  ;;  %7106 = vmatprep.subr.bf16.mxu0 %v10946_v52  ;;  %v15585_v52 = vld [vmem:[#allocation33_spill] sm:$0xff] }
 0x425   :  { %v14305_v39 = vpack.c.bf16 %v6086_v11, %v6082_v30  ;;  %v4394_v9 = vpop.f32.mrb[72].mxu0  ;;  %7107 = vmatpush1.bf16.msra.mxu0 %v10944_v4 }
 0x426   :  { %v9269_v42 = vadd.f32 %v4394_v9, %v3336_v47  ;;  %v4396_v5 = vpop.f32.mrb[73].mxu0 }
 0x427   :  { %v9271_v22 = vadd.f32 %v4396_v5, %v3338_v44  ;;  %v4398_v31 = vpop.f32.mrb[74].mxu0 }
 0x428   :  { %v9273_v27 = vadd.f32 %v4398_v31, %v3340_v60  ;;  %v4400_v37 = vpop.f32.mrb[75].mxu0  ;;  %v6089_v19 = vmax.f32 %v9269_v42, 0.0  ;;  %v3356_v42 = vadd.f32 %v15585_v52, %v13952_v12  ;;  %v15586_v60 = vld [vmem:[#allocation34_spill] sm:$0xff]  ;;  %v15587_v31 = vld [vmem:[#allocation35_spill] sm:$0xff] }
 0x429   :  { %v9275_v46 = vadd.f32 %v4400_v37, %v3342_v18  ;;  %v6090_v59 = vmax.f32 %v9271_v22, 0.0  ;;  %v3358_v50 = vadd.f32 %v15586_v60, %v13962_v58  ;;  %v3360_v43 = vadd.f32 %v15587_v31, %v13952_v12  ;;  %v15588_v37 = vld [vmem:[#allocation36_spill] sm:$0xff] }
 0x42a   :  { %v6093_v21 = vmax.f32 %v9273_v27, 0.0  ;;  %5755 = vmatmul.mubr.bf16.gmra.mrb[116].mxu1 %v13723_v61  ;;  %6888 = vmatmul.mubr.bf16.gmra.mrb[180].mxu0 %v14233_v2  ;;  %v15583_v2 = vld [vmem:[#allocation31_spill] sm:$0xff] }
 0x42b   :  { %v6094_v28 = vmax.f32 %v9275_v46, 0.0  ;;  %6897 = vmatprep.mubr.bf16.mxu0 %v14253_v51  ;;  %5764 = vmatprep.mubr.bf16.mxu1 %v13728_v14  ;;  %v3350_v62 = vadd.f32 %v15583_v2, %v13952_v12  ;;  %v15584_v14 = vld [vmem:[#allocation32_spill] sm:$0xff]  ;;  %v3362_v46 = vadd.f32 %v15588_v37, %v13962_v58 }
 0x42c   :  { %v14328_v24 = vpack.c.bf16 %v6093_v21, %v6089_v19  ;;  %v3352_v10 = vadd.f32 %v15584_v14, %v13962_v58 }
 0x42d   :  { %v14332_v8 = vpack.c.bf16 %v6094_v28, %v6090_v59  ;;  %v4404_v34 = vpop.f32.mrb[76].mxu0 }
 0x42e   :  { %v9277_v61 = vadd.f32 %v4404_v34, %v3346_v63  ;;  %v4406_v17 = vpop.f32.mrb[77].mxu0 }
 0x42f   :  { %v9279_v56 = vadd.f32 %v4406_v17, %v3348_v32  ;;  %v4408_v51 = vpop.f32.mrb[78].mxu0  ;;  %v15589_v32 = vld [vmem:[#allocation37_spill] sm:$0xff] }
 0x430   :  { %v9281_v30 = vadd.f32 %v4408_v51, %v3350_v62  ;;  %v4410_v11 = vpop.f32.mrb[79].mxu0  ;;  %v6097_v47 = vmax.f32 %v9277_v61, 0.0  ;;  %v3366_v61 = vadd.f32 %v15589_v32, %v13952_v12  ;;  %v15590_v62 = vld [vmem:[#allocation38_spill] sm:$0xff] }
 0x431   :  { %v9283_v55 = vadd.f32 %v4410_v11, %v3352_v10  ;;  %v6098_v48 = vmax.f32 %v9279_v56, 0.0  ;;  %v3368_v56 = vadd.f32 %v15590_v62, %v13962_v58 }
 0x432   :  { %v6101_v9 = vmax.f32 %v9281_v30, 0.0  ;;  %5765 = vmatmul.mubr.bf16.gmra.mrb[120].mxu1 %v13740_v6  ;;  %6898 = vmatmul.mubr.bf16.gmra.mrb[184].mxu0 %v14251_v26  ;;  %v10947_v6 = vld [vmem:[%s15328_s5 + $0x8] sm:$0xff]   ;;  %v10948_v26 = vld [vmem:[%s15326_s3 + $0x1f0] ss:$8 sps:$4 sm:$0xff]  }
 0x433   :  { %v6102_v44 = vmax.f32 %v9283_v55, 0.0  ;;  %6907 = vmatprep.mubr.bf16.mxu0 %v14267_v20  ;;  %5774 = vmatprep.mubr.bf16.mxu1 %v13742_v0  ;;  %v10950_v0 = vld [vmem:[%s15326_s3 + $0x1f4] ss:$8 sps:$4 sm:$0xff]  }
 0x434   :  { %v14344_v4 = vpack.c.bf16 %v6101_v9, %v6097_v47  ;;  %7761 = vmatpush1.bf16.msra.mxu1 %v10947_v6  ;;  %7108 = vmatprep.subr.bf16.mxu0 %v10950_v0 }
 0x435   :  { %v14348_v5 = vpack.c.bf16 %v6102_v44, %v6098_v48  ;;  %v4414_v36 = vpop.f32.mrb[80].mxu0  ;;  %7109 = vmatpush1.bf16.msra.mxu0 %v10948_v26  ;;  %7762 = vmatprep.subr.bf16.mxu1 %v11223_v38  ;;  %v15594_v26 = vld [vmem:[#allocation42_spill] sm:$0xff] }
 0x436   :  { %v9285_v20 = vadd.f32 %v4414_v36, %v3356_v42  ;;  %v4416_v22 = vpop.f32.mrb[81].mxu0  ;;  %v15593_v36 = vld [vmem:[#allocation41_spill] sm:$0xff]  ;;  %v3378_v0 = vadd.f32 %v15594_v26, %v13962_v58 }
 0x437   :  { %v9287_v18 = vadd.f32 %v4416_v22, %v3358_v50  ;;  %v4418_v27 = vpop.f32.mrb[82].mxu0  ;;  %v3376_v60 = vadd.f32 %v15593_v36, %v13952_v12  ;;  %v15602_v36 = vld [vmem:[#allocation50_spill] sm:$0xff] }
 0x438   :  { %v9289_v19 = vadd.f32 %v4418_v27, %v3360_v43  ;;  %v4420_v21 = vpop.f32.mrb[83].mxu0  ;;  %v6105_v28 = vmax.f32 %v9285_v20, 0.0  ;;  %v15596_v43 = vld [vmem:[#allocation44_spill] sm:$0xff] }
 0x439   :  { %v9291_v59 = vadd.f32 %v4420_v21, %v3362_v46  ;;  %v6106_v63 = vmax.f32 %v9287_v18, 0.0  ;;  %v3382_v18 = vadd.f32 %v15596_v43, %v13962_v58 }
 0x43a   :  { %v6109_v7 = vmax.f32 %v9289_v19, 0.0  ;;  %5775 = vmatmul.mubr.bf16.gmra.mrb[124].mxu1 %v13766_v49  ;;  %6908 = vmatmul.mubr.bf16.gmra.mrb[188].mxu0 %v14263_v33  ;;  %v15591_v33 = vld [vmem:[#allocation39_spill] sm:$0xff] }
 0x43b   :  { %v6110_v34 = vmax.f32 %v9291_v59, 0.0  ;;  %6917 = vmatprep.mubr.bf16.mxu0 %v14289_v16  ;;  %5784 = vmatprep.mubr.bf16.mxu1 %v13768_v25  ;;  %v3370_v14 = vadd.f32 %v15591_v33, %v13952_v12  ;;  %v15592_v25 = vld [vmem:[#allocation40_spill] sm:$0xff] }
 0x43c   :  { %v14370_v15 = vpack.c.bf16 %v6109_v7, %v6105_v28  ;;  %v3372_v30 = vadd.f32 %v15592_v25, %v13962_v58 }
 0x43d   :  { %v14374_v17 = vpack.c.bf16 %v6110_v34, %v6106_v63  ;;  %v4424_v2 = vpop.f32.mrb[84].mxu0  ;;  %v15597_v63 = vld [vmem:[#allocation45_spill] sm:$0xff] }
 0x43e   :  { %v9293_v49 = vadd.f32 %v4424_v2, %v3366_v61  ;;  %v4426_v51 = vpop.f32.mrb[85].mxu0  ;;  %v3386_v34 = vadd.f32 %v15597_v63, %v13952_v12  ;;  %v15598_v2 = vld [vmem:[#allocation46_spill] sm:$0xff] }
 0x43f   :  { %v9295_v10 = vadd.f32 %v4426_v51, %v3368_v56  ;;  %v4428_v16 = vpop.f32.mrb[86].mxu0  ;;  %v3388_v62 = vadd.f32 %v15598_v2, %v13962_v58 }
 0x440   :  { %v9297_v11 = vadd.f32 %v4428_v16, %v3370_v14  ;;  %v4430_v55 = vpop.f32.mrb[87].mxu0  ;;  %v6113_v9 = vmax.f32 %v9293_v49, 0.0 }
 0x441   :  { %v9299_v47 = vadd.f32 %v4430_v55, %v3372_v30  ;;  %v6114_v44 = vmax.f32 %v9295_v10, 0.0 }
 0x442   :  { %v6117_v48 = vmax.f32 %v9297_v11, 0.0  ;;  %5785 = vmatmul.mubr.bf16.gmra.mrb[128].mxu1 %v13792_v41  ;;  %6918 = vmatmul.mubr.bf16.gmra.mrb[192].mxu0 %v14285_v45  ;;  %v10951_v41 = vld [vmem:[%s15328_s5 + $0x10] sm:$0xff]  }
 0x443   :  { %v6118_v52 = vmax.f32 %v9299_v47, 0.0  ;;  %6927 = vmatprep.mubr.bf16.mxu0 %v14305_v39  ;;  %5794 = vmatprep.mubr.bf16.mxu1 %v13794_v40  ;;  %v15595_v39 = vld [vmem:[#allocation43_spill] sm:$0xff] }
 0x444   :  { %v14386_v42 = vpack.c.bf16 %v6117_v48, %v6113_v9  ;;  %v3380_v40 = vadd.f32 %v15595_v39, %v13952_v12  ;;  %7763 = vmatpush1.bf16.msra.mxu1 %v10951_v41  ;;  %v15601_v9 = vld [vmem:[#allocation49_spill] sm:$0xff]  ;;  %v15604_v41 = vld [vmem:[#allocation52_spill] sm:$0xff] }
 0x445   :  { %v14390_v50 = vpack.c.bf16 %v6118_v52, %v6114_v44  ;;  %v4434_v6 = vpop.f32.mrb[88].mxu0  ;;  %7764 = vmatprep.subr.bf16.mxu1 %v11223_v38  ;;  %v3396_v48 = vadd.f32 %v15601_v9, %v13952_v12 }
 0x446   :  { %v9301_v45 = vadd.f32 %v4434_v6, %v3376_v60  ;;  %v4436_v20 = vpop.f32.mrb[89].mxu0  ;;  %v3398_v60 = vadd.f32 %v15602_v36, %v13962_v58  ;;  %v15613_v36 = vld [vmem:[#allocation60_spill] sm:$0xff] }
 0x447   :  { %v9303_v22 = vadd.f32 %v4436_v20, %v3378_v0  ;;  %v4438_v31 = vpop.f32.mrb[90].mxu0 }
 0x448   :  { %v9305_v27 = vadd.f32 %v4438_v31, %v3380_v40  ;;  %v4440_v37 = vpop.f32.mrb[91].mxu0  ;;  %v6121_v19 = vmax.f32 %v9301_v45, 0.0  ;;  %v3402_v45 = vadd.f32 %v15604_v41, %v13962_v58 }
 0x449   :  { %v9307_v46 = vadd.f32 %v4440_v37, %v3382_v18  ;;  %v6122_v59 = vmax.f32 %v9303_v22, 0.0  ;;  %v15605_v37 = vld [vmem:[#allocation53_spill] sm:$0xff] }
 0x44a   :  { %v6125_v21 = vmax.f32 %v9305_v27, 0.0  ;;  %5795 = vmatmul.mubr.bf16.gmra.mrb[132].mxu1 %v13809_v35  ;;  %6928 = vmatmul.mubr.bf16.gmra.mrb[196].mxu0 %v14301_v54  ;;  %v15599_v54 = vld [vmem:[#allocation47_spill] sm:$0xff] }
 0x44b   :  { %v6126_v28 = vmax.f32 %v9307_v46, 0.0  ;;  %6937 = vmatprep.mubr.bf16.mxu0 %v14332_v8  ;;  %5804 = vmatprep.mubr.bf16.mxu1 %v13811_v3  ;;  %v3390_v49 = vadd.f32 %v15599_v54, %v13952_v12  ;;  %v15600_v3 = vld [vmem:[#allocation48_spill] sm:$0xff]  ;;  %v3406_v46 = vadd.f32 %v15605_v37, %v13952_v12 }
 0x44c   :  { %v14406_v7 = vpack.c.bf16 %v6125_v21, %v6121_v19  ;;  %v3392_v33 = vadd.f32 %v15600_v3, %v13962_v58  ;;  %v15609_v3 = vld [vmem:[#allocation13_spill] sm:$0xff] }
 0x44d   :  { %v14410_v32 = vpack.c.bf16 %v6126_v28, %v6122_v59  ;;  %v4444_v61 = vpop.f32.mrb[92].mxu0  ;;  %v15606_v59 = vld [vmem:[#allocation54_spill] sm:$0xff] }
 0x44e   :  { %v9309_v35 = vadd.f32 %v4444_v61, %v3386_v34  ;;  %v4446_v56 = vpop.f32.mrb[93].mxu0  ;;  %v3408_v28 = vadd.f32 %v15606_v59, %v13962_v58 }
 0x44f   :  { %v9311_v51 = vadd.f32 %v4446_v56, %v3388_v62  ;;  %v4448_v8 = vpop.f32.mrb[94].mxu0 }
 0x450   :  { %v9313_v14 = vadd.f32 %v4448_v8, %v3390_v49  ;;  %v4450_v10 = vpop.f32.mrb[95].mxu0  ;;  %v6129_v25 = vmax.f32 %v9309_v35, 0.0 }
 0x451   :  { %v9315_v16 = vadd.f32 %v4450_v10, %v3392_v33  ;;  %v6130_v11 = vmax.f32 %v9311_v51, 0.0 }
 0x452   :  { %v6133_v30 = vmax.f32 %v9313_v14, 0.0  ;;  %5805 = vmatmul.mubr.bf16.gmra.mrb[136].mxu1 %v13823_v13  ;;  %6938 = vmatmul.mubr.bf16.gmra.mrb[200].mxu0 %v14328_v24  ;;  %v10952_v13 = vld [vmem:[%s15328_s5 + $0x18] sm:$0xff]  }
 0x453   :  { %v6134_v55 = vmax.f32 %v9315_v16, 0.0  ;;  %6947 = vmatprep.mubr.bf16.mxu0 %v14348_v5  ;;  %5814 = vmatprep.mubr.bf16.mxu1 %v13825_v23  ;;  %v15603_v5 = vld [vmem:[#allocation51_spill] sm:$0xff]  ;;  %v15610_v14 = vld [vmem:[#allocation57_spill] sm:$0xff] }
 0x454   :  { %v14422_v47 = vpack.c.bf16 %v6133_v30, %v6129_v25  ;;  %v3400_v23 = vadd.f32 %v15603_v5, %v13952_v12  ;;  %7765 = vmatpush1.bf16.msra.mxu1 %v10952_v13  ;;  %v3416_v10 = vadd.f32 %v15610_v14, %v13952_v12  ;;  %v15611_v30 = vld [vmem:[#allocation58_spill] sm:$0xff] }
 0x455   :  { %v14426_v44 = vpack.c.bf16 %v6134_v55, %v6130_v11  ;;  %v4454_v52 = vpop.f32.mrb[96].mxu0  ;;  %7766 = vmatprep.subr.bf16.mxu1 %v11223_v38  ;;  %v3418_v11 = vadd.f32 %v15611_v30, %v13962_v58 }
 0x456   :  { %v9317_v24 = vadd.f32 %v4454_v52, %v3396_v48  ;;  %v4456_v6 = vpop.f32.mrb[97].mxu0 }
 0x457   :  { %v9319_v26 = vadd.f32 %v4456_v6, %v3398_v60  ;;  %v4458_v0 = vpop.f32.mrb[98].mxu0  ;;  %v3422_v60 = vadd.f32 %v15613_v36, %v13962_v58 }
 0x458   :  { %v9321_v20 = vadd.f32 %v4458_v0, %v3400_v23  ;;  %v4460_v39 = vpop.f32.mrb[99].mxu0  ;;  %v6137_v22 = vmax.f32 %v9317_v24, 0.0 }
 0x459   :  { %v9323_v40 = vadd.f32 %v4460_v39, %v3402_v45  ;;  %v6138_v43 = vmax.f32 %v9319_v26, 0.0  ;;  %v15614_v26 = vld [vmem:[#allocation14_spill] sm:$0xff]  ;;  %v15616_v39 = vld [vmem:[#allocation61_spill] sm:$0xff] }
 0x45a   :  { %v6141_v31 = vmax.f32 %v9321_v20, 0.0  ;;  %5815 = vmatmul.mubr.bf16.gmra.mrb[140].mxu1 %v13837_v57  ;;  %6948 = vmatmul.mubr.bf16.gmra.mrb[204].mxu0 %v14344_v4  ;;  %v15607_v4 = vld [vmem:[#allocation55_spill] sm:$0xff]  ;;  %v15615_v45 = vld [vmem:[#allocation82_spill] sm:$0xff] }
 0x45b   :  { %v6142_v18 = vmax.f32 %v9323_v40, 0.0  ;;  %6957 = vmatprep.mubr.bf16.mxu0 %v14374_v17  ;;  %5824 = vmatprep.mubr.bf16.mxu1 %v13839_v1  ;;  %v3410_v34 = vadd.f32 %v15607_v4, %v13952_v12  ;;  %v15608_v1 = vld [vmem:[#allocation56_spill] sm:$0xff]  ;;  %v3426_v40 = vadd.f32 %v15616_v39, %v13952_v12 }
 0x45c   :  { %v14442_v27 = vpack.c.bf16 %v6141_v31, %v6137_v22  ;;  %v3412_v2 = vadd.f32 %v15608_v1, %v13962_v58  ;;  %v15620_v1 = vld [vmem:[#allocation83_spill] sm:$0xff] }
 0x45d   :  { %v14446_v19 = vpack.c.bf16 %v6142_v18, %v6138_v43  ;;  %v4464_v21 = vpop.f32.mrb[100].mxu0  ;;  %v15617_v43 = vld [vmem:[#allocation62_spill] sm:$0xff] }
 0x45e   :  { %v9325_v57 = vadd.f32 %v4464_v21, %v3406_v46  ;;  %v4466_v63 = vpop.f32.mrb[101].mxu0  ;;  %v3428_v18 = vadd.f32 %v15617_v43, %v13962_v58 }
 0x45f   :  { %v9327_v61 = vadd.f32 %v4466_v63, %v3408_v28  ;;  %v4468_v17 = vpop.f32.mrb[102].mxu0  ;;  %v15619_v28 = vld [vmem:[#allocation64_spill] sm:$0xff] }
 0x460   :  { %v9329_v62 = vadd.f32 %v4468_v17, %v3410_v34  ;;  %v4470_v35 = vpop.f32.mrb[103].mxu0  ;;  %v6145_v54 = vmax.f32 %v9325_v57, 0.0  ;;  %v3432_v57 = vadd.f32 %v15619_v28, %v13962_v58 }
 0x461   :  { %v9331_v56 = vadd.f32 %v4470_v35, %v3412_v2  ;;  %v6146_v51 = vmax.f32 %v9327_v61, 0.0  ;;  %v15621_v35 = vld [vmem:[#allocation84_spill] sm:$0xff] }
 0x462   :  { %v6149_v49 = vmax.f32 %v9329_v62, 0.0  ;;  %5825 = vmatmul.mubr.bf16.gmra.mrb[144].mxu1 %v13851_v29  ;;  %6958 = vmatmul.mubr.bf16.gmra.mrb[208].mxu0 %v14370_v15  ;;  %v10953_v29 = vld [vmem:[%s15328_s5 + $0x20] sm:$0xff]  }
 0x463   :  { %v6150_v8 = vmax.f32 %v9331_v56, 0.0  ;;  %6967 = vmatprep.mubr.bf16.mxu0 %v14390_v50  ;;  %5834 = vmatprep.mubr.bf16.mxu1 %v15609_v3  ;;  %v15612_v50 = vld [vmem:[#allocation59_spill] sm:$0xff]  ;;  %v15623_v3 = vld [vmem:[#allocation66_spill] sm:$0xff] }
 0x464   :  { %v14458_v33 = vpack.c.bf16 %v6149_v49, %v6145_v54  ;;  %v3420_v9 = vadd.f32 %v15612_v50, %v13952_v12  ;;  %7767 = vmatpush1.bf16.msra.mxu1 %v10953_v29  ;;  %v15622_v54 = vld [vmem:[#allocation65_spill] sm:$0xff]  ;;  %v3438_v14 = vadd.f32 %v15623_v3, %v13962_v58 }
 0x465   :  { %v14462_v16 = vpack.c.bf16 %v6150_v8, %v6146_v51  ;;  %v4474_v25 = vpop.f32.mrb[104].mxu0  ;;  %7768 = vmatprep.subr.bf16.mxu1 %v11223_v38  ;;  %v3436_v49 = vadd.f32 %v15622_v54, %v13952_v12 }
 0x466   :  { %v9333_v15 = vadd.f32 %v4474_v25, %v3416_v10  ;;  %v4476_v55 = vpop.f32.mrb[105].mxu0 }
 0x467   :  { %v9335_v48 = vadd.f32 %v4476_v55, %v3418_v11  ;;  %v4478_v52 = vpop.f32.mrb[106].mxu0 }
 0x468   :  { %v9337_v13 = vadd.f32 %v4478_v52, %v3420_v9  ;;  %v4480_v24 = vpop.f32.mrb[107].mxu0  ;;  %v6153_v5 = vmax.f32 %v9333_v15, 0.0  ;;  %v15625_v15 = vld [vmem:[#allocation68_spill] sm:$0xff] }
 0x469   :  { %v9339_v6 = vadd.f32 %v4480_v24, %v3422_v60  ;;  %v6154_v0 = vmax.f32 %v9335_v48, 0.0  ;;  %v3442_v55 = vadd.f32 %v15625_v15, %v13962_v58  ;;  %v15626_v60 = vld [vmem:[#allocation85_spill] sm:$0xff] }
 0x46a   :  { %v6157_v23 = vmax.f32 %v9337_v13, 0.0  ;;  %5835 = vmatmul.mubr.bf16.gmra.mrb[148].mxu1 %v15614_v26  ;;  %6968 = vmatmul.mubr.bf16.gmra.mrb[212].mxu0 %v14386_v42  ;;  %v15618_v42 = vld [vmem:[#allocation63_spill] sm:$0xff] }
 0x46b   :  { %v6158_v41 = vmax.f32 %v9339_v6, 0.0  ;;  %6977 = vmatprep.mubr.bf16.mxu0 %v14410_v32  ;;  %5844 = vmatprep.mubr.bf16.mxu1 %v15615_v45  ;;  %v3430_v21 = vadd.f32 %v15618_v42, %v13952_v12  ;;  %v15627_v6 = vld [vmem:[#allocation86_spill] sm:$0xff] }
 0x46c   :  { %v14478_v20 = vpack.c.bf16 %v6157_v23, %v6153_v5  ;;  %v15628_v23 = vld [vmem:[#allocation69_spill] sm:$0xff]  ;;  %v15629_v45 = vld [vmem:[#allocation70_spill] sm:$0xff] }
 0x46d   :  { %v14482_v22 = vpack.c.bf16 %v6158_v41, %v6154_v0  ;;  %v4484_v31 = vpop.f32.mrb[108].mxu0  ;;  %v3446_v26 = vadd.f32 %v15628_v23, %v13952_v12  ;;  %v3448_v39 = vadd.f32 %v15629_v45, %v13962_v58 }
 0x46e   :  { %v9341_v37 = vadd.f32 %v4484_v31, %v3426_v40  ;;  %v4486_v46 = vpop.f32.mrb[109].mxu0 }
 0x46f   :  { %v9343_v59 = vadd.f32 %v4486_v46, %v3428_v18  ;;  %v4488_v32 = vpop.f32.mrb[110].mxu0 }
 0x470   :  { %v9345_v63 = vadd.f32 %v4488_v32, %v3430_v21  ;;  %v4490_v4 = vpop.f32.mrb[111].mxu0  ;;  %v6161_v61 = vmax.f32 %v9341_v37, 0.0  ;;  %v15631_v37 = vld [vmem:[#allocation72_spill] sm:$0xff] }
 0x471   :  { %v9347_v34 = vadd.f32 %v4490_v4, %v3432_v57  ;;  %v6162_v2 = vmax.f32 %v9343_v59, 0.0  ;;  %v3452_v46 = vadd.f32 %v15631_v37, %v13962_v58  ;;  %v15632_v57 = vld [vmem:[#allocation87_spill] sm:$0xff] }
 0x472   :  { %v6165_v17 = vmax.f32 %v9345_v63, 0.0  ;;  %5845 = vmatmul.mubr.bf16.gmra.mrb[152].mxu1 %v15620_v1  ;;  %6978 = vmatmul.mubr.bf16.gmra.mrb[216].mxu0 %v14406_v7  ;;  %v10954_v7 = vld [vmem:[%s15328_s5 + $0x28] sm:$0xff]  }
 0x473   :  { %v6166_v62 = vmax.f32 %v9347_v34, 0.0  ;;  %6987 = vmatprep.mubr.bf16.mxu0 %v14426_v44  ;;  %5854 = vmatprep.mubr.bf16.mxu1 %v15621_v35  ;;  %v15624_v44 = vld [vmem:[#allocation67_spill] sm:$0xff]  ;;  %v15633_v34 = vld [vmem:[#allocation88_spill] sm:$0xff]  ;;  %v15635_v35 = vld [vmem:[#allocation74_spill] sm:$0xff] }
 0x474   :  { %v14494_v56 = vpack.c.bf16 %v6165_v17, %v6161_v61  ;;  %v3440_v30 = vadd.f32 %v15624_v44, %v13952_v12  ;;  %7769 = vmatpush1.bf16.msra.mxu1 %v10954_v7  ;;  %v15634_v17 = vld [vmem:[#allocation73_spill] sm:$0xff]  ;;  %v3458_v54 = vadd.f32 %v15635_v35, %v13962_v58 }
 0x475   :  { %v14498_v51 = vpack.c.bf16 %v6166_v62, %v6162_v2  ;;  %v4494_v8 = vpop.f32.mrb[112].mxu0  ;;  %7770 = vmatprep.subr.bf16.mxu1 %v11223_v38  ;;  %v3456_v1 = vadd.f32 %v15634_v17, %v13952_v12 }
 0x476   :  { %v9349_v10 = vadd.f32 %v4494_v8, %v3436_v49  ;;  %v4496_v25 = vpop.f32.mrb[113].mxu0 }
 0x477   :  { %v9351_v11 = vadd.f32 %v4496_v25, %v3438_v14  ;;  %v4498_v29 = vpop.f32.mrb[114].mxu0 }
 0x478   :  { %v9353_v50 = vadd.f32 %v4498_v29, %v3440_v30  ;;  %v4500_v9 = vpop.f32.mrb[115].mxu0  ;;  %v6169_v52 = vmax.f32 %v9349_v10, 0.0  ;;  %v15637_v10 = vld [vmem:[#allocation76_spill] sm:$0xff] }
 0x479   :  { %v9355_v48 = vadd.f32 %v4500_v9, %v3442_v55  ;;  %v6170_v13 = vmax.f32 %v9351_v11, 0.0  ;;  %v3462_v25 = vadd.f32 %v15637_v10, %v13962_v58  ;;  %v15638_v55 = vld [vmem:[#allocation89_spill] sm:$0xff]  ;;  %v15648_v10 = vld [vmem:[#allocation95_spill] sm:$0xff] }
 0x47a   :  { %v6173_v36 = vmax.f32 %v9353_v50, 0.0  ;;  %5855 = vmatmul.mubr.bf16.gmra.mrb[156].mxu1 %v15626_v60  ;;  %6988 = vmatmul.mubr.bf16.gmra.mrb[220].mxu0 %v14422_v47  ;;  %v15630_v47 = vld [vmem:[#allocation71_spill] sm:$0xff] }
 0x47b   :  { %v6174_v24 = vmax.f32 %v9355_v48, 0.0  ;;  %6997 = vmatprep.mubr.bf16.mxu0 %v14446_v19  ;;  %5864 = vmatprep.mubr.bf16.mxu1 %v15627_v6  ;;  %v3450_v43 = vadd.f32 %v15630_v47, %v13952_v12  ;;  %v15639_v48 = vld [vmem:[#allocation90_spill] sm:$0xff]  ;;  %v15644_v47 = vld [vmem:[#allocation80_spill] sm:$0xff] }
 0x47c   :  { %v14514_v5 = vpack.c.bf16 %v6173_v36, %v6169_v52  ;;  %v15640_v36 = vld [vmem:[#allocation77_spill] sm:$0xff]  ;;  %v15641_v6 = vld [vmem:[#allocation78_spill] sm:$0xff] }
 0x47d   :  { %v14518_v0 = vpack.c.bf16 %v6174_v24, %v6170_v13  ;;  %v4504_v41 = vpop.f32.mrb[116].mxu0  ;;  %v3466_v60 = vadd.f32 %v15640_v36, %v13952_v12  ;;  %v3468_v23 = vadd.f32 %v15641_v6, %v13962_v58  ;;  %v15649_v36 = vld [vmem:[#allocation15_spill] sm:$0xff]  ;;  %v15650_v6 = vld [vmem:[#allocation30_spill] sm:$0xff] }
 0x47e   :  { %v9357_v40 = vadd.f32 %v4504_v41, %v3446_v26  ;;  %v4506_v31 = vpop.f32.mrb[117].mxu0 }
 0x47f   :  { %v9359_v18 = vadd.f32 %v4506_v31, %v3448_v39  ;;  %v4508_v19 = vpop.f32.mrb[118].mxu0  ;;  %v15643_v39 = vld [vmem:[#allocation91_spill] sm:$0xff] }
 0x480   :  { %v9361_v42 = vadd.f32 %v4508_v19, %v3450_v43  ;;  %v4510_v21 = vpop.f32.mrb[119].mxu0  ;;  %v6177_v32 = vmax.f32 %v9357_v40, 0.0  ;;  %v3472_v43 = vadd.f32 %v15644_v47, %v13962_v58 }
 0x481   :  { %v9363_v59 = vadd.f32 %v4510_v21, %v3452_v46  ;;  %v6178_v63 = vmax.f32 %v9359_v18, 0.0  ;;  %v555_v18 = vsub.s32 3, %v15643_v39 }
 0x482   :  { %v6181_v28 = vmax.f32 %v9361_v42, 0.0  ;;  %5865 = vmatmul.mubr.bf16.gmra.mrb[160].mxu1 %v15632_v57  ;;  %6998 = vmatmul.mubr.bf16.gmra.mrb[224].mxu0 %v14442_v27  ;;  %v10955_v27 = vld [vmem:[%s15328_s5 + $0x30] sm:$0xff]  }
 0x483   :  { %v6182_v4 = vmax.f32 %v9363_v59, 0.0  ;;  %7007 = vmatprep.mubr.bf16.mxu0 %v14462_v16  ;;  %5874 = vmatprep.mubr.bf16.mxu1 %v15633_v34  ;;  %v15636_v16 = vld [vmem:[#allocation75_spill] sm:$0xff]  ;;  %v15645_v59 = vld [vmem:[#allocation92_spill] sm:$0xff] }
 0x484   :  { %v14530_v61 = vpack.c.bf16 %v6181_v28, %v6177_v32  ;;  %v3460_v3 = vadd.f32 %v15636_v16, %v13952_v12  ;;  %7771 = vmatpush1.bf16.msra.mxu1 %v10955_v27 }
 0x485   :  { %v14534_v2 = vpack.c.bf16 %v6182_v4, %v6178_v63  ;;  %v4514_v62 = vpop.f32.mrb[120].mxu0  ;;  %7772 = vmatprep.subr.bf16.mxu1 %v11223_v38  ;;  %v15646_v63 = vld [vmem:[#allocation93_spill] sm:$0xff] }
 0x486   :  { %v9365_v49 = vadd.f32 %v4514_v62, %v3456_v1  ;;  %v4516_v8 = vpop.f32.mrb[121].mxu0 }
 0x487   :  { %v9367_v14 = vadd.f32 %v4516_v8, %v3458_v54  ;;  %v4518_v7 = vpop.f32.mrb[122].mxu0 }
 0x488   :  { %v9369_v44 = vadd.f32 %v4518_v7, %v3460_v3  ;;  %v4520_v30 = vpop.f32.mrb[123].mxu0  ;;  %v6185_v29 = vmax.f32 %v9365_v49, 0.0  ;;  %v15647_v3 = vld [vmem:[#allocation94_spill] sm:$0xff] }
 0x489   :  { %v9371_v11 = vadd.f32 %v4520_v30, %v3462_v25  ;;  %v6186_v50 = vmax.f32 %v9367_v14, 0.0 }
 0x48a   :  { %v6189_v15 = vmax.f32 %v9369_v44, 0.0  ;;  %5875 = vmatmul.mubr.bf16.gmra.mrb[164].mxu1 %v15638_v55  ;;  %7008 = vmatmul.mubr.bf16.gmra.mrb[228].mxu0 %v14458_v33  ;;  %v15642_v33 = vld [vmem:[#allocation79_spill] sm:$0xff] }
 0x48b   :  { %v6190_v9 = vmax.f32 %v9371_v11, 0.0  ;;  %7017 = vmatprep.mubr.bf16.mxu0 %v14482_v22  ;;  %5884 = vmatprep.mubr.bf16.mxu1 %v15639_v48  ;;  %v3470_v45 = vadd.f32 %v15642_v33, %v13952_v12  ;;  %v551_v22 = vsub.s32 2, %v15643_v39  ;;  %v11221_v12 = vld [vmem:[%s15327_s2] sm:$0xf] }
 0x48c   :  { %v14550_v52 = vpack.c.bf16 %v6189_v15, %v6185_v29  ;;  %v14572_v58 = vrot.slane %v11221_v12, %v555_v18  ;;  %v10957_v33 = vld [vmem:[%s15328_s5 + $0x40] sm:$0xff]  }
 0x48d   :  { %v14554_v13 = vpack.c.bf16 %v6190_v9, %v6186_v50  ;;  %v4524_v24 = vpop.f32.mrb[124].mxu0  ;;  %v14569_v32 = vrot.slane %v11221_v12, %v551_v22 }
 0x48e   :  { %v9373_v26 = vadd.f32 %v4524_v24, %v3466_v60  ;;  %v4526_v41 = vpop.f32.mrb[125].mxu0 }
 0x48f   :  { %v9375_v40 = vadd.f32 %v4526_v41, %v3468_v23  ;;  %v4528_v31 = vpop.f32.mrb[126].mxu0 }
 0x490   :  { %v9377_v19 = vadd.f32 %v4528_v31, %v3470_v45  ;;  %v4530_v37 = vpop.f32.mrb[127].mxu0  ;;  %v6193_v42 = vmax.f32 %v9373_v26, 0.0 }
 0x491   :  { %v9379_v46 = vadd.f32 %v4530_v37, %v3472_v43  ;;  %v6194_v28 = vmax.f32 %v9375_v40, 0.0 }
 0x492   :  { %v6197_v21 = vmax.f32 %v9377_v19, 0.0  ;;  %5885 = vmatmul.mubr.bf16.gmra.mrb[168].mxu1 %v15645_v59  ;;  %7018 = vmatmul.mubr.bf16.gmra.mrb[232].mxu0 %v14478_v20  ;;  %v10956_v20 = vld [vmem:[%s15328_s5 + $0x38] sm:$0xff]   ;;  %v15651_v19 = vld [vmem:[#allocation2_spill] sm:$0xff] }
 0x493   :  { %v6198_v57 = vmax.f32 %v9379_v46, 0.0  ;;  %7027 = vmatprep.mubr.bf16.mxu0 %v14498_v51  ;;  %5894 = vmatprep.mubr.bf16.mxu1 %v15646_v63 }
 0x494   :  { %v14575_v4 = vpack.c.bf16 %v6197_v21, %v6193_v42  ;;  %7773 = vmatpush1.bf16.msra.mxu1 %v10956_v20  ;;  %v15652_v42 = vld [vmem:[#allocation81_spill] sm:$0xff] }
 0x495   :  { %v14577_v34 = vpack.c.bf16 %v6198_v57, %v6194_v28  ;;  %v5626_v17 = vpop.f32.mrb[64].mxu1  ;;  %7774 = vmatprep.subr.bf16.mxu1 %v11223_v38 }
 0x496   :  { %v9380_v1 = vadd.f32 %v5626_v17, %v14569_v32  ;;  %v5628_v62 = vpop.f32.mrb[65].mxu1 }
 0x497   :  { %v9381_v35 = vadd.f32 %v5628_v62, %v14572_v58  ;;  %v5630_v54 = vpop.f32.mrb[66].mxu1 }
 0x498   :  { %v9382_v51 = vadd.f32 %v5630_v54, %v14569_v32  ;;  %v5632_v27 = vpop.f32.mrb[67].mxu1  ;;  %v5947_v8 = vmax.f32 %v9380_v1, 0.0  ;;  %7775 = vmatpush1.bf16.msra.mxu1 %v10957_v33 }
 0x499   :  { %v9383_v49 = vadd.f32 %v5632_v27, %v14572_v58  ;;  %v5948_v14 = vmax.f32 %v9381_v35, 0.0  ;;  %7776 = vmatprep.subr.bf16.mxu1 %v11223_v38  ;;  %v15653_v35 = vld [vmem:[#allocation3_spill] sm:$0xff]  ;;  %v15654_v27 = vld [vmem:[#allocation4_spill] sm:$0xff] }
 0x49a   :  { %v5951_v16 = vmax.f32 %v9382_v51, 0.0  ;;  %5895 = vmatmul.mubr.bf16.gmra.mrb[172].mxu1 %v15647_v3  ;;  %7028 = vmatmul.mubr.bf16.gmra.mrb[236].mxu0 %v14494_v56  ;;  %v10958_v3 = vld [vmem:[%s15328_s5 + $0x48] sm:$0xff]  }
 0x49b   :  { %v5952_v7 = vmax.f32 %v9383_v49, 0.0  ;;  %7037 = vmatprep.mubr.bf16.mxu0 %v14518_v0  ;;  %5904 = vmatprep.mubr.bf16.mxu1 %v15648_v10 }
 0x49c   :  { %v14591_v25 = vpack.c.bf16 %v5951_v16, %v5947_v8  ;;  %7777 = vmatpush1.bf16.msra.mxu1 %v10958_v3 }
 0x49d   :  { %v14593_v44 = vpack.c.bf16 %v5952_v7, %v5948_v14  ;;  %v5636_v30 = vpop.f32.mrb[68].mxu1  ;;  %7778 = vmatprep.subr.bf16.mxu1 %v11223_v38 }
 0x49e   :  { %v9384_v11 = vadd.f32 %v5636_v30, %v14569_v32  ;;  %v5638_v29 = vpop.f32.mrb[69].mxu1 }
 0x49f   :  { %v9385_v15 = vadd.f32 %v5638_v29, %v14572_v58  ;;  %v5640_v55 = vpop.f32.mrb[70].mxu1 }
 0x4a0   :  { %v9386_v50 = vadd.f32 %v5640_v55, %v14569_v32  ;;  %v5642_v56 = vpop.f32.mrb[71].mxu1  ;;  %v5955_v48 = vmax.f32 %v9384_v11, 0.0 }
 0x4a1   :  { %v9387_v9 = vadd.f32 %v5642_v56, %v14572_v58  ;;  %v5956_v60 = vmax.f32 %v9385_v15, 0.0 }
 0x4a2   :  { %v5959_v0 = vmax.f32 %v9386_v50, 0.0  ;;  %5905 = vmatmul.mubr.bf16.gmra.mrb[176].mxu1 %v15649_v36  ;;  %7038 = vmatmul.mubr.bf16.gmra.mrb[240].mxu0 %v14514_v5 }
 0x4a3   :  { %v5960_v24 = vmax.f32 %v9387_v9, 0.0  ;;  %7047 = vmatprep.mubr.bf16.mxu0 %v14534_v2  ;;  %5914 = vmatprep.mubr.bf16.mxu1 %v15650_v6 }
 0x4a4   :  { %v14603_v23 = vpack.c.bf16 %v5959_v0, %v5955_v48 }
 0x4a5   :  { %v14605_v26 = vpack.c.bf16 %v5960_v24, %v5956_v60  ;;  %v5646_v41 = vpop.f32.mrb[72].mxu1 }
 0x4a6   :  { %v9388_v45 = vadd.f32 %v5646_v41, %v14569_v32  ;;  %v5648_v22 = vpop.f32.mrb[73].mxu1 }
 0x4a7   :  { %v9389_v5 = vadd.f32 %v5648_v22, %v14572_v58  ;;  %v5650_v40 = vpop.f32.mrb[74].mxu1 }
 0x4a8   :  { %v9390_v2 = vadd.f32 %v5650_v40, %v14569_v32  ;;  %v5652_v31 = vpop.f32.mrb[75].mxu1  ;;  %v5963_v43 = vmax.f32 %v9388_v45, 0.0 }
 0x4a9   :  { %v9391_v47 = vadd.f32 %v5652_v31, %v14572_v58  ;;  %v5964_v37 = vmax.f32 %v9389_v5, 0.0 }
 0x4aa   :  { %v5967_v18 = vmax.f32 %v9390_v2, 0.0  ;;  %5915 = vmatmul.mubr.bf16.gmra.mrb[180].mxu1 %v15651_v19  ;;  %7048 = vmatmul.mubr.bf16.gmra.mrb[244].mxu0 %v14530_v61  ;;  %v10959_v2 = vld [vmem:[%s15328_s5 + $0x50] sm:$0xff]  }
 0x4ab   :  { %v5968_v46 = vmax.f32 %v9391_v47, 0.0  ;;  %7057 = vmatprep.mubr.bf16.mxu0 %v14554_v13  ;;  %5924 = vmatprep.mubr.bf16.mxu1 %v15652_v42 }
 0x4ac   :  { %v14619_v21 = vpack.c.bf16 %v5967_v18, %v5963_v43  ;;  %7779 = vmatpush1.bf16.msra.mxu1 %v10959_v2 }
 0x4ad   :  { %v14621_v59 = vpack.c.bf16 %v5968_v46, %v5964_v37  ;;  %v5656_v12 = vpop.f32.mrb[76].mxu1  ;;  %7780 = vmatprep.subr.bf16.mxu1 %v11223_v38 }
 0x4ae   :  { %v9392_v28 = vadd.f32 %v5656_v12, %v14569_v32  ;;  %v5658_v57 = vpop.f32.mrb[77].mxu1 }
 0x4af   :  { %v9393_v63 = vadd.f32 %v5658_v57, %v14572_v58  ;;  %v5660_v17 = vpop.f32.mrb[78].mxu1 }
 0x4b0   :  { %v9394_v20 = vadd.f32 %v5660_v17, %v14569_v32  ;;  %v5662_v61 = vpop.f32.mrb[79].mxu1  ;;  %v5971_v62 = vmax.f32 %v9392_v28, 0.0 }
 0x4b1   :  { %v9395_v1 = vadd.f32 %v5662_v61, %v14572_v58  ;;  %v5972_v54 = vmax.f32 %v9393_v63, 0.0 }
 0x4b2   :  { %v5975_v13 = vmax.f32 %v9394_v20, 0.0  ;;  %5925 = vmatmul.mubr.bf16.gmra.mrb[184].mxu1 %v15653_v35  ;;  %7058 = vmatmul.mubr.bf16.gmra.mrb[248].mxu0 %v14550_v52 }
 0x4b3   :  { %v5976_v51 = vmax.f32 %v9395_v1, 0.0  ;;  %7067 = vmatprep.mubr.bf16.mxu0 %v14577_v34  ;;  %5934 = vmatprep.mubr.bf16.mxu1 %v15654_v27 }
 0x4b4   :  { %v14631_v49 = vpack.c.bf16 %v5975_v13, %v5971_v62 }
 0x4b5   :  { %v14633_v8 = vpack.c.bf16 %v5976_v51, %v5972_v54  ;;  %v5666_v16 = vpop.f32.mrb[80].mxu1 }
 0x4b6   :  { %v9396_v14 = vadd.f32 %v5666_v16, %v14569_v32  ;;  %v5668_v7 = vpop.f32.mrb[81].mxu1 }
 0x4b7   :  { %v9397_v52 = vadd.f32 %v5668_v7, %v14572_v58  ;;  %v5670_v10 = vpop.f32.mrb[82].mxu1 }
 0x4b8   :  { %v9398_v34 = vadd.f32 %v5670_v10, %v14569_v32  ;;  %v5672_v30 = vpop.f32.mrb[83].mxu1  ;;  %v5979_v29 = vmax.f32 %v9396_v14, 0.0  ;;  %v10960_v14 = vld [vmem:[%s15328_s5 + $0x58] sm:$0xff]  }
 0x4b9   :  { %v9399_v11 = vadd.f32 %v5672_v30, %v14572_v58  ;;  %v5980_v55 = vmax.f32 %v9397_v52, 0.0  ;;  %7781 = vmatpush1.bf16.msra.mxu1 %v10960_v14 }
 0x4ba   :  { %v5983_v15 = vmax.f32 %v9398_v34, 0.0  ;;  %5935 = vmatmul.mubr.bf16.gmra.mrb[188].mxu1 %v14047_v53  ;;  %7068 = vmatmul.mubr.bf16.gmra.mrb[252].mxu0 %v14575_v4 }
 0x4bb   :  { %v5984_v50 = vmax.f32 %v9399_v11, 0.0  ;;  %7110 = vmatprep.mubr.bf16.mxu0 %v14593_v44  ;;  %7782 = vmatprep.subr.bf16.mxu1 %v11223_v38 }
 0x4bc   :  { %v14646_v56 = vpack.c.bf16 %v5983_v15, %v5979_v29 }
 0x4bd   :  { %v14648_v9 = vpack.c.bf16 %v5984_v50, %v5980_v55  ;;  %v5676_v48 = vpop.f32.mrb[84].mxu1 }
 0x4be   :  { %v9400_v0 = vadd.f32 %v5676_v48, %v14569_v32  ;;  %v5678_v36 = vpop.f32.mrb[85].mxu1 }
 0x4bf   :  { %v9401_v60 = vadd.f32 %v5678_v36, %v14572_v58  ;;  %v5680_v24 = vpop.f32.mrb[86].mxu1 }
 0x4c0   :  { %v9402_v6 = vadd.f32 %v5680_v24, %v14569_v32  ;;  %v5682_v53 = vpop.f32.mrb[87].mxu1  ;;  %v5987_v41 = vmax.f32 %v9400_v0, 0.0 }
 0x4c1   :  { %v9403_v4 = vadd.f32 %v5682_v53, %v14572_v58  ;;  %v5988_v44 = vmax.f32 %v9401_v60, 0.0 }
 0x4c2   :  { %v5991_v33 = vmax.f32 %v9402_v6, 0.0  ;;  %7111 = vmatmul.mubr.bf16.vlgmr.msra.gmra.mrb[128].mxu0 %v14591_v25 }
 0x4c3   :  { %v5992_v45 = vmax.f32 %v9403_v4, 0.0  ;;  %7120 = vmatprep.mubr.bf16.mxu0 %v14605_v26 }
 0x4c4   :  { %v14656_v22 = vpack.c.bf16 %v5991_v33, %v5987_v41 }
 0x4c5   :  { %v14658_v5 = vpack.c.bf16 %v5992_v45, %v5988_v44  ;;  %v5686_v40 = vpop.f32.mrb[88].mxu1 }
 0x4c6   :  { %v9404_v31 = vadd.f32 %v5686_v40, %v14569_v32  ;;  %v5688_v47 = vpop.f32.mrb[89].mxu1 }
 0x4c7   :  { %v9405_v43 = vadd.f32 %v5688_v47, %v14572_v58  ;;  %v5690_v18 = vpop.f32.mrb[90].mxu1 }
 0x4c8   :  { %v9406_v25 = vadd.f32 %v5690_v18, %v14569_v32  ;;  %v5692_v19 = vpop.f32.mrb[91].mxu1  ;;  %v5995_v37 = vmax.f32 %v9404_v31, 0.0  ;;  %v10961_v31 = vld [vmem:[%s15328_s5 + $0x60] sm:$0xff]  }
 0x4c9   :  { %v9407_v26 = vadd.f32 %v5692_v19, %v14572_v58  ;;  %v5996_v42 = vmax.f32 %v9405_v43, 0.0  ;;  %7783 = vmatpush1.bf16.msra.mxu1 %v10961_v31 }
 0x4ca   :  { %v5999_v46 = vmax.f32 %v9406_v25, 0.0  ;;  %7121 = vmatmul.mubr.bf16.gmra.mrb[132].mxu0 %v14603_v23  ;;  %7784 = vmatprep.subr.bf16.mxu1 %v11223_v38 }
 0x4cb   :  { %v6000_v12 = vmax.f32 %v9407_v26, 0.0  ;;  %7130 = vmatprep.mubr.bf16.mxu0 %v14621_v59 }
 0x4cc   :  { %v14670_v28 = vpack.c.bf16 %v5999_v46, %v5995_v37 }
 0x4cd   :  { %v14672_v57 = vpack.c.bf16 %v6000_v12, %v5996_v42  ;;  %v5696_v63 = vpop.f32.mrb[92].mxu1 }
 0x4ce   :  { %v9408_v17 = vadd.f32 %v5696_v63, %v14569_v32  ;;  %v5698_v20 = vpop.f32.mrb[93].mxu1 }
 0x4cf   :  { %v9409_v61 = vadd.f32 %v5698_v20, %v14572_v58  ;;  %v5700_v1 = vpop.f32.mrb[94].mxu1 }
 0x4d0   :  { %v9410_v62 = vadd.f32 %v5700_v1, %v14569_v32  ;;  %v5702_v13 = vpop.f32.mrb[95].mxu1  ;;  %v6003_v35 = vmax.f32 %v9408_v17, 0.0 }
 0x4d1   :  { %v9411_v23 = vadd.f32 %v5702_v13, %v14572_v58  ;;  %v6004_v59 = vmax.f32 %v9409_v61, 0.0 }
 0x4d2   :  { %v6007_v54 = vmax.f32 %v9410_v62, 0.0  ;;  %7131 = vmatmul.mubr.bf16.gmra.mrb[136].mxu0 %v14619_v21 }
 0x4d3   :  { %v6008_v51 = vmax.f32 %v9411_v23, 0.0  ;;  %7140 = vmatprep.mubr.bf16.mxu0 %v14633_v8 }
 0x4d4   :  { %v14680_v27 = vpack.c.bf16 %v6007_v54, %v6003_v35 }
 0x4d5   :  { %v14682_v16 = vpack.c.bf16 %v6008_v51, %v6004_v59  ;;  %v5706_v3 = vpop.f32.mrb[96].mxu1 }
 0x4d6   :  { %v9412_v7 = vadd.f32 %v5706_v3, %v14569_v32  ;;  %v5708_v52 = vpop.f32.mrb[97].mxu1 }
 0x4d7   :  { %v9413_v10 = vadd.f32 %v5708_v52, %v14572_v58  ;;  %v5710_v34 = vpop.f32.mrb[98].mxu1 }
 0x4d8   :  { %v9414_v21 = vadd.f32 %v5710_v34, %v14569_v32  ;;  %v5712_v30 = vpop.f32.mrb[99].mxu1  ;;  %v6011_v11 = vmax.f32 %v9412_v7, 0.0  ;;  %v10962_v7 = vld [vmem:[%s15328_s5 + $0x68] sm:$0xff]  }
 0x4d9   :  { %v9415_v8 = vadd.f32 %v5712_v30, %v14572_v58  ;;  %v6012_v15 = vmax.f32 %v9413_v10, 0.0  ;;  %7785 = vmatpush1.bf16.msra.mxu1 %v10962_v7  ;;  %v10964_v7 = vld [vmem:[%s15328_s5 + $0x78] sm:$0xff]  }
 0x4da   :  { %v6015_v29 = vmax.f32 %v9414_v21, 0.0  ;;  %7141 = vmatmul.mubr.bf16.gmra.mrb[140].mxu0 %v14631_v49  ;;  %7786 = vmatprep.subr.bf16.mxu1 %v11223_v38 }
 0x4db   :  { %v6016_v55 = vmax.f32 %v9415_v8, 0.0  ;;  %7150 = vmatprep.mubr.bf16.mxu0 %v14648_v9 }
 0x4dc   :  { %v14694_v50 = vpack.c.bf16 %v6015_v29, %v6011_v11 }
 0x4dd   :  { %v14696_v48 = vpack.c.bf16 %v6016_v55, %v6012_v15  ;;  %v5716_v0 = vpop.f32.mrb[100].mxu1 }
 0x4de   :  { %v9416_v36 = vadd.f32 %v5716_v0, %v14569_v32  ;;  %v5718_v60 = vpop.f32.mrb[101].mxu1 }
 0x4df   :  { %v9417_v24 = vadd.f32 %v5718_v60, %v14572_v58  ;;  %v5720_v6 = vpop.f32.mrb[102].mxu1 }
 0x4e0   :  { %v9418_v53 = vadd.f32 %v5720_v6, %v14569_v32  ;;  %v5722_v4 = vpop.f32.mrb[103].mxu1  ;;  %v6019_v41 = vmax.f32 %v9416_v36, 0.0 }
 0x4e1   :  { %v9419_v49 = vadd.f32 %v5722_v4, %v14572_v58  ;;  %v6020_v9 = vmax.f32 %v9417_v24, 0.0 }
 0x4e2   :  { %v6023_v33 = vmax.f32 %v9418_v53, 0.0  ;;  %7151 = vmatmul.mubr.bf16.gmra.mrb[144].mxu0 %v14646_v56 }
 0x4e3   :  { %v6024_v44 = vmax.f32 %v9419_v49, 0.0  ;;  %7160 = vmatprep.mubr.bf16.mxu0 %v14658_v5 }
 0x4e4   :  { %v14704_v45 = vpack.c.bf16 %v6023_v33, %v6019_v41 }
 0x4e5   :  { %v14706_v40 = vpack.c.bf16 %v6024_v44, %v6020_v9  ;;  %v5726_v2 = vpop.f32.mrb[104].mxu1 }
 0x4e6   :  { %v9420_v47 = vadd.f32 %v5726_v2, %v14569_v32  ;;  %v5728_v43 = vpop.f32.mrb[105].mxu1 }
 0x4e7   :  { %v9421_v18 = vadd.f32 %v5728_v43, %v14572_v58  ;;  %v5730_v25 = vpop.f32.mrb[106].mxu1 }
 0x4e8   :  { %v9422_v56 = vadd.f32 %v5730_v25, %v14569_v32  ;;  %v5732_v19 = vpop.f32.mrb[107].mxu1  ;;  %v6027_v26 = vmax.f32 %v9420_v47, 0.0  ;;  %v10963_v47 = vld [vmem:[%s15328_s5 + $0x70] sm:$0xff]  }
 0x4e9   :  { %v9423_v5 = vadd.f32 %v5732_v19, %v14572_v58  ;;  %v6028_v46 = vmax.f32 %v9421_v18, 0.0  ;;  %7787 = vmatpush1.bf16.msra.mxu1 %v10963_v47 }
 0x4ea   :  { %v6031_v37 = vmax.f32 %v9422_v56, 0.0  ;;  %7161 = vmatmul.mubr.bf16.gmra.mrb[148].mxu0 %v14656_v22  ;;  %7788 = vmatprep.subr.bf16.mxu1 %v11223_v38 }
 0x4eb   :  { %v6032_v42 = vmax.f32 %v9423_v5, 0.0  ;;  %7170 = vmatprep.mubr.bf16.mxu0 %v14672_v57 }
 0x4ec   :  { %v14718_v12 = vpack.c.bf16 %v6031_v37, %v6027_v26 }
 0x4ed   :  { %v14720_v63 = vpack.c.bf16 %v6032_v42, %v6028_v46  ;;  %v5736_v17 = vpop.f32.mrb[108].mxu1  ;;  %7789 = vmatpush1.bf16.msra.mxu1 %v10964_v7 }
 0x4ee   :  { %v9424_v20 = vadd.f32 %v5736_v17, %v14569_v32  ;;  %v5738_v61 = vpop.f32.mrb[109].mxu1 }
 0x4ef   :  { %v9425_v1 = vadd.f32 %v5738_v61, %v14572_v58  ;;  %v5740_v62 = vpop.f32.mrb[110].mxu1 }
 0x4f0   :  { %v9426_v13 = vadd.f32 %v5740_v62, %v14569_v32  ;;  %v5742_v23 = vpop.f32.mrb[111].mxu1  ;;  %v6035_v35 = vmax.f32 %v9424_v20, 0.0 }
 0x4f1   :  { %v9427_v22 = vadd.f32 %v5742_v23, %v14572_v58  ;;  %v6036_v57 = vmax.f32 %v9425_v1, 0.0 }
 0x4f2   :  { %v6039_v54 = vmax.f32 %v9426_v13, 0.0  ;;  %7171 = vmatmul.mubr.bf16.gmra.mrb[152].mxu0 %v14670_v28 }
 0x4f3   :  { %v6040_v59 = vmax.f32 %v9427_v22, 0.0  ;;  %7180 = vmatprep.mubr.bf16.mxu0 %v14682_v16 }
 0x4f4   :  { %v14728_v51 = vpack.c.bf16 %v6039_v54, %v6035_v35 }
 0x4f5   :  { %v14730_v3 = vpack.c.bf16 %v6040_v59, %v6036_v57  ;;  %v5746_v14 = vpop.f32.mrb[112].mxu1 }
 0x4f6   :  { %v9428_v52 = vadd.f32 %v5746_v14, %v14569_v32  ;;  %v5748_v10 = vpop.f32.mrb[113].mxu1 }
 0x4f7   :  { %v9429_v34 = vadd.f32 %v5748_v10, %v14572_v58  ;;  %v5750_v21 = vpop.f32.mrb[114].mxu1 }
 0x4f8   :  { %v9430_v28 = vadd.f32 %v5750_v21, %v14569_v32  ;;  %v5752_v30 = vpop.f32.mrb[115].mxu1  ;;  %v6043_v8 = vmax.f32 %v9428_v52, 0.0 }
 0x4f9   :  { %v9431_v16 = vadd.f32 %v5752_v30, %v14572_v58  ;;  %v6044_v29 = vmax.f32 %v9429_v34, 0.0 }
 0x4fa   :  { %v6047_v11 = vmax.f32 %v9430_v28, 0.0  ;;  %7181 = vmatmul.mubr.bf16.gmra.mrb[156].mxu0 %v14680_v27 }
 0x4fb   :  { %v6048_v15 = vmax.f32 %v9431_v16, 0.0  ;;  %7190 = vmatprep.mubr.bf16.mxu0 %v14696_v48 }
 0x4fc   :  { %v14742_v55 = vpack.c.bf16 %v6047_v11, %v6043_v8 }
 0x4fd   :  { %v14744_v0 = vpack.c.bf16 %v6048_v15, %v6044_v29  ;;  %v5756_v36 = vpop.f32.mrb[116].mxu1 }
 0x4fe   :  { %v9432_v60 = vadd.f32 %v5756_v36, %v14569_v32  ;;  %v5758_v24 = vpop.f32.mrb[117].mxu1 }
 0x4ff   :  { %v9433_v6 = vadd.f32 %v5758_v24, %v14572_v58  ;;  %v5760_v53 = vpop.f32.mrb[118].mxu1 }
 0x500   :  { %v9434_v4 = vadd.f32 %v5760_v53, %v14569_v32  ;;  %v5762_v49 = vpop.f32.mrb[119].mxu1  ;;  %v6051_v41 = vmax.f32 %v9432_v60, 0.0 }
 0x501   :  { %v9435_v27 = vadd.f32 %v5762_v49, %v14572_v58  ;;  %v6052_v48 = vmax.f32 %v9433_v6, 0.0 }
 0x502   :  { %v6055_v33 = vmax.f32 %v9434_v4, 0.0  ;;  %7191 = vmatmul.mubr.bf16.gmra.mrb[160].mxu0 %v14694_v50 }
 0x503   :  { %v6056_v9 = vmax.f32 %v9435_v27, 0.0  ;;  %7200 = vmatprep.mubr.bf16.mxu0 %v14706_v40 }
 0x504   :  { %v14752_v44 = vpack.c.bf16 %v6055_v33, %v6051_v41 }
 0x505   :  { %v14754_v2 = vpack.c.bf16 %v6056_v9, %v6052_v48  ;;  %v5766_v31 = vpop.f32.mrb[120].mxu1 }
 0x506   :  { %v9436_v43 = vadd.f32 %v5766_v31, %v14569_v32  ;;  %v5768_v18 = vpop.f32.mrb[121].mxu1 }
 0x507   :  { %v9437_v25 = vadd.f32 %v5768_v18, %v14572_v58  ;;  %v5770_v56 = vpop.f32.mrb[122].mxu1 }
 0x508   :  { %v9438_v50 = vadd.f32 %v5770_v56, %v14569_v32  ;;  %v5772_v19 = vpop.f32.mrb[123].mxu1  ;;  %v6059_v5 = vmax.f32 %v9436_v43, 0.0 }
 0x509   :  { %v9439_v40 = vadd.f32 %v5772_v19, %v14572_v58  ;;  %v6060_v37 = vmax.f32 %v9437_v25, 0.0 }
 0x50a   :  { %v6063_v26 = vmax.f32 %v9438_v50, 0.0  ;;  %7201 = vmatmul.mubr.bf16.gmra.mrb[164].mxu0 %v14704_v45 }
 0x50b   :  { %v6064_v46 = vmax.f32 %v9439_v40, 0.0  ;;  %7210 = vmatprep.mubr.bf16.mxu0 %v14720_v63 }
 0x50c   :  { %v14766_v42 = vpack.c.bf16 %v6063_v26, %v6059_v5 }
 0x50d   :  { %v14768_v17 = vpack.c.bf16 %v6064_v46, %v6060_v37  ;;  %v5776_v20 = vpop.f32.mrb[124].mxu1 }
 0x50e   :  { %v9440_v61 = vadd.f32 %v5776_v20, %v14569_v32  ;;  %v5778_v1 = vpop.f32.mrb[125].mxu1 }
 0x50f   :  { %v9441_v38 = vadd.f32 %v5778_v1, %v14572_v58  ;;  %v5780_v62 = vpop.f32.mrb[126].mxu1 }
 0x510   :  { %v9442_v13 = vadd.f32 %v5780_v62, %v14569_v32  ;;  %v5782_v23 = vpop.f32.mrb[127].mxu1  ;;  %v6067_v22 = vmax.f32 %v9440_v61, 0.0 }
 0x511   :  { %v9443_v45 = vadd.f32 %v5782_v23, %v14572_v58  ;;  %v6068_v63 = vmax.f32 %v9441_v38, 0.0 }
 0x512   :  { %v6071_v35 = vmax.f32 %v9442_v13, 0.0  ;;  %7211 = vmatmul.mubr.bf16.gmra.mrb[168].mxu0 %v14718_v12 }
 0x513   :  { %v6072_v54 = vmax.f32 %v9443_v45, 0.0  ;;  %7220 = vmatprep.mubr.bf16.mxu0 %v14730_v3 }
 0x514   :  { %v14776_v57 = vpack.c.bf16 %v6071_v35, %v6067_v22 }
 0x515   :  { %v14778_v59 = vpack.c.bf16 %v6072_v54, %v6068_v63  ;;  %v5786_v14 = vpop.f32.mrb[128].mxu1 }
 0x516   :  { %v9444_v52 = vadd.f32 %v5786_v14, %v14569_v32  ;;  %v5788_v10 = vpop.f32.mrb[129].mxu1 }
 0x517   :  { %v9445_v34 = vadd.f32 %v5788_v10, %v14572_v58  ;;  %v5790_v21 = vpop.f32.mrb[130].mxu1 }
 0x518   :  { %v9446_v12 = vadd.f32 %v5790_v21, %v14569_v32  ;;  %v5792_v28 = vpop.f32.mrb[131].mxu1  ;;  %v6075_v30 = vmax.f32 %v9444_v52, 0.0 }
 0x519   :  { %v9447_v3 = vadd.f32 %v5792_v28, %v14572_v58  ;;  %v6076_v8 = vmax.f32 %v9445_v34, 0.0 }
 0x51a   :  { %v6079_v16 = vmax.f32 %v9446_v12, 0.0  ;;  %7221 = vmatmul.mubr.bf16.gmra.mrb[172].mxu0 %v14728_v51 }
 0x51b   :  { %v6080_v11 = vmax.f32 %v9447_v3, 0.0  ;;  %7230 = vmatprep.mubr.bf16.mxu0 %v14744_v0 }
 0x51c   :  { %v14789_v29 = vpack.c.bf16 %v6079_v16, %v6075_v30 }
 0x51d   :  { %v6268_v15 = vpack.c.bf16 %v6080_v11, %v6076_v8  ;;  %v5796_v36 = vpop.f32.mrb[132].mxu1 }
 0x51e   :  { %v9448_v60 = vadd.f32 %v5796_v36, %v14569_v32  ;;  %v5798_v24 = vpop.f32.mrb[133].mxu1 }
 0x51f   :  { %v9449_v6 = vadd.f32 %v5798_v24, %v14572_v58  ;;  %v5800_v53 = vpop.f32.mrb[134].mxu1 }
 0x520   :  { %v9450_v4 = vadd.f32 %v5800_v53, %v14569_v32  ;;  %v5802_v49 = vpop.f32.mrb[135].mxu1  ;;  %v6083_v51 = vmax.f32 %v9448_v60, 0.0 }
 0x521   :  { %v9451_v27 = vadd.f32 %v5802_v49, %v14572_v58  ;;  %v6084_v0 = vmax.f32 %v9449_v6, 0.0 }
 0x522   :  { %v6087_v41 = vmax.f32 %v9450_v4, 0.0  ;;  %7231 = vmatmul.mubr.bf16.gmra.mrb[176].mxu0 %v14742_v55 }
 0x523   :  { %v6088_v33 = vmax.f32 %v9451_v27, 0.0  ;;  %7240 = vmatprep.mubr.bf16.mxu0 %v14754_v2 }
 0x524   :  { %v14797_v48 = vpack.c.bf16 %v6087_v41, %v6083_v51 }
 0x525   :  { %v6272_v9 = vpack.c.bf16 %v6088_v33, %v6084_v0  ;;  %v5806_v31 = vpop.f32.mrb[136].mxu1 }
 0x526   :  { %v9452_v47 = vadd.f32 %v5806_v31, %v14569_v32  ;;  %v5808_v43 = vpop.f32.mrb[137].mxu1 }
 0x527   :  { %v9453_v18 = vadd.f32 %v5808_v43, %v14572_v58  ;;  %v5810_v25 = vpop.f32.mrb[138].mxu1 }
 0x528   :  { %v9454_v56 = vadd.f32 %v5810_v25, %v14569_v32  ;;  %v5812_v50 = vpop.f32.mrb[139].mxu1  ;;  %v6091_v55 = vmax.f32 %v9452_v47, 0.0 }
 0x529   :  { %v9455_v19 = vadd.f32 %v5812_v50, %v14572_v58  ;;  %v6092_v2 = vmax.f32 %v9453_v18, 0.0 }
 0x52a   :  { %v6095_v40 = vmax.f32 %v9454_v56, 0.0  ;;  %7241 = vmatmul.mubr.bf16.gmra.mrb[180].mxu0 %v14752_v44 }
 0x52b   :  { %v6096_v5 = vmax.f32 %v9455_v19, 0.0  ;;  %7250 = vmatprep.mubr.bf16.mxu0 %v14768_v17 }
 0x52c   :  { %v14805_v26 = vpack.c.bf16 %v6095_v40, %v6091_v55 }
 0x52d   :  { %v6276_v37 = vpack.c.bf16 %v6096_v5, %v6092_v2  ;;  %v5816_v46 = vpop.f32.mrb[140].mxu1 }
 0x52e   :  { %v9456_v20 = vadd.f32 %v5816_v46, %v14569_v32  ;;  %v5818_v61 = vpop.f32.mrb[141].mxu1 }
 0x52f   :  { %v9457_v1 = vadd.f32 %v5818_v61, %v14572_v58  ;;  %v5820_v38 = vpop.f32.mrb[142].mxu1 }
 0x530   :  { %v9458_v62 = vadd.f32 %v5820_v38, %v14569_v32  ;;  %v5822_v13 = vpop.f32.mrb[143].mxu1  ;;  %v6099_v44 = vmax.f32 %v9456_v20, 0.0 }
 0x531   :  { %v9459_v23 = vadd.f32 %v5822_v13, %v14572_v58  ;;  %v6100_v17 = vmax.f32 %v9457_v1, 0.0 }
 0x532   :  { %v6103_v45 = vmax.f32 %v9458_v62, 0.0  ;;  %7251 = vmatmul.mubr.bf16.gmra.mrb[184].mxu0 %v14766_v42 }
 0x533   :  { %v6104_v22 = vmax.f32 %v9459_v23, 0.0  ;;  %7260 = vmatprep.mubr.bf16.mxu0 %v14778_v59 }
 0x534   :  { %v14813_v35 = vpack.c.bf16 %v6103_v45, %v6099_v44 }
 0x535   :  { %v6280_v63 = vpack.c.bf16 %v6104_v22, %v6100_v17  ;;  %v5826_v54 = vpop.f32.mrb[144].mxu1 }
 0x536   :  { %v9460_v14 = vadd.f32 %v5826_v54, %v14569_v32  ;;  %v5828_v7 = vpop.f32.mrb[145].mxu1 }
 0x537   :  { %v9461_v52 = vadd.f32 %v5828_v7, %v14572_v58  ;;  %v5830_v10 = vpop.f32.mrb[146].mxu1 }
 0x538   :  { %v9462_v34 = vadd.f32 %v5830_v10, %v14569_v32  ;;  %v5832_v21 = vpop.f32.mrb[147].mxu1  ;;  %v6107_v42 = vmax.f32 %v9460_v14, 0.0 }
 0x539   :  { %v9463_v12 = vadd.f32 %v5832_v21, %v14572_v58  ;;  %v6108_v59 = vmax.f32 %v9461_v52, 0.0 }
 0x53a   :  { %v6111_v28 = vmax.f32 %v9462_v34, 0.0  ;;  %7261 = vmatmul.mubr.bf16.gmra.mrb[188].mxu0 %v14776_v57 }
 0x53b   :  { %v6112_v3 = vmax.f32 %v9463_v12, 0.0  ;;  %7270 = vmatprep.mubr.bf16.mxu0 %v6268_v15 }
 0x53c   :  { %v14820_v30 = vpack.c.bf16 %v6111_v28, %v6107_v42 }
 0x53d   :  { %v6284_v16 = vpack.c.bf16 %v6112_v3, %v6108_v59  ;;  %v5836_v8 = vpop.f32.mrb[148].mxu1 }
 0x53e   :  { %v9464_v11 = vadd.f32 %v5836_v8, %v14569_v32  ;;  %v5838_v36 = vpop.f32.mrb[149].mxu1 }
 0x53f   :  { %v9465_v60 = vadd.f32 %v5838_v36, %v14572_v58  ;;  %v5840_v24 = vpop.f32.mrb[150].mxu1 }
 0x540   :  { %v9466_v6 = vadd.f32 %v5840_v24, %v14569_v32  ;;  %v5842_v53 = vpop.f32.mrb[151].mxu1  ;;  %v6115_v49 = vmax.f32 %v9464_v11, 0.0 }
 0x541   :  { %v9467_v4 = vadd.f32 %v5842_v53, %v14572_v58  ;;  %v6116_v15 = vmax.f32 %v9465_v60, 0.0 }
 0x542   :  { %v6119_v57 = vmax.f32 %v9466_v6, 0.0  ;;  %7271 = vmatmul.mubr.bf16.gmra.mrb[192].mxu0 %v14789_v29 }
 0x543   :  { %v6120_v27 = vmax.f32 %v9467_v4, 0.0  ;;  %7280 = vmatprep.mubr.bf16.mxu0 %v6272_v9 }
 0x544   :  { %v14827_v51 = vpack.c.bf16 %v6119_v57, %v6115_v49 }
 0x545   :  { %v6288_v41 = vpack.c.bf16 %v6120_v27, %v6116_v15  ;;  %v5846_v0 = vpop.f32.mrb[152].mxu1 }
 0x546   :  { %v9468_v33 = vadd.f32 %v5846_v0, %v14569_v32  ;;  %v5848_v31 = vpop.f32.mrb[153].mxu1 }
 0x547   :  { %v9469_v47 = vadd.f32 %v5848_v31, %v14572_v58  ;;  %v5850_v43 = vpop.f32.mrb[154].mxu1 }
 0x548   :  { %v9470_v18 = vadd.f32 %v5850_v43, %v14569_v32  ;;  %v5852_v25 = vpop.f32.mrb[155].mxu1  ;;  %v6123_v50 = vmax.f32 %v9468_v33, 0.0 }
 0x549   :  { %v9471_v56 = vadd.f32 %v5852_v25, %v14572_v58  ;;  %v6124_v9 = vmax.f32 %v9469_v47, 0.0 }
 0x54a   :  { %v6127_v29 = vmax.f32 %v9470_v18, 0.0  ;;  %7281 = vmatmul.mubr.bf16.gmra.mrb[196].mxu0 %v14797_v48 }
 0x54b   :  { %v6128_v19 = vmax.f32 %v9471_v56, 0.0  ;;  %7290 = vmatprep.mubr.bf16.mxu0 %v6276_v37 }
 0x54c   :  { %v14834_v55 = vpack.c.bf16 %v6127_v29, %v6123_v50 }
 0x54d   :  { %v6292_v40 = vpack.c.bf16 %v6128_v19, %v6124_v9  ;;  %v5856_v2 = vpop.f32.mrb[156].mxu1 }
 0x54e   :  { %v9472_v5 = vadd.f32 %v5856_v2, %v14569_v32  ;;  %v5858_v46 = vpop.f32.mrb[157].mxu1 }
 0x54f   :  { %v9473_v20 = vadd.f32 %v5858_v46, %v14572_v58  ;;  %v5860_v61 = vpop.f32.mrb[158].mxu1 }
 0x550   :  { %v9474_v1 = vadd.f32 %v5860_v61, %v14569_v32  ;;  %v5862_v38 = vpop.f32.mrb[159].mxu1  ;;  %v6131_v13 = vmax.f32 %v9472_v5, 0.0 }
 0x551   :  { %v9475_v62 = vadd.f32 %v5862_v38, %v14572_v58  ;;  %v6132_v37 = vmax.f32 %v9473_v20, 0.0 }
 0x552   :  { %v6135_v48 = vmax.f32 %v9474_v1, 0.0  ;;  %7291 = vmatmul.mubr.bf16.gmra.mrb[200].mxu0 %v14805_v26 }
 0x553   :  { %v6136_v23 = vmax.f32 %v9475_v62, 0.0  ;;  %7300 = vmatprep.mubr.bf16.mxu0 %v6280_v63 }
 0x554   :  { %v14841_v44 = vpack.c.bf16 %v6135_v48, %v6131_v13 }
 0x555   :  { %v6296_v45 = vpack.c.bf16 %v6136_v23, %v6132_v37  ;;  %v5866_v17 = vpop.f32.mrb[160].mxu1 }
 0x556   :  { %v9476_v22 = vadd.f32 %v5866_v17, %v14569_v32  ;;  %v5868_v54 = vpop.f32.mrb[161].mxu1 }
 0x557   :  { %v9477_v14 = vadd.f32 %v5868_v54, %v14572_v58  ;;  %v5870_v7 = vpop.f32.mrb[162].mxu1 }
 0x558   :  { %v9478_v52 = vadd.f32 %v5870_v7, %v14569_v32  ;;  %v5872_v10 = vpop.f32.mrb[163].mxu1  ;;  %v6139_v21 = vmax.f32 %v9476_v22, 0.0 }
 0x559   :  { %v9479_v34 = vadd.f32 %v5872_v10, %v14572_v58  ;;  %v6140_v63 = vmax.f32 %v9477_v14, 0.0 }
 0x55a   :  { %v6143_v26 = vmax.f32 %v9478_v52, 0.0  ;;  %7301 = vmatmul.mubr.bf16.gmra.mrb[204].mxu0 %v14813_v35 }
 0x55b   :  { %v6144_v12 = vmax.f32 %v9479_v34, 0.0  ;;  %7310 = vmatprep.mubr.bf16.mxu0 %v6284_v16 }
 0x55c   :  { %v14848_v42 = vpack.c.bf16 %v6143_v26, %v6139_v21 }
 0x55d   :  { %v6300_v28 = vpack.c.bf16 %v6144_v12, %v6140_v63  ;;  %v5876_v59 = vpop.f32.mrb[164].mxu1 }
 0x55e   :  { %v9480_v3 = vadd.f32 %v5876_v59, %v14569_v32  ;;  %v5878_v8 = vpop.f32.mrb[165].mxu1 }
 0x55f   :  { %v9481_v11 = vadd.f32 %v5878_v8, %v14572_v58  ;;  %v5880_v36 = vpop.f32.mrb[166].mxu1 }
 0x560   :  { %v9482_v60 = vadd.f32 %v5880_v36, %v14569_v32  ;;  %v5882_v24 = vpop.f32.mrb[167].mxu1  ;;  %v6147_v53 = vmax.f32 %v9480_v3, 0.0 }
 0x561   :  { %v9483_v6 = vadd.f32 %v5882_v24, %v14572_v58  ;;  %v6148_v16 = vmax.f32 %v9481_v11, 0.0 }
 0x562   :  { %v6151_v35 = vmax.f32 %v9482_v60, 0.0  ;;  %7311 = vmatmul.mubr.bf16.gmra.mrb[208].mxu0 %v14820_v30 }
 0x563   :  { %v6152_v4 = vmax.f32 %v9483_v6, 0.0  ;;  %7320 = vmatprep.mubr.bf16.mxu0 %v6288_v41 }
 0x564   :  { %v14855_v49 = vpack.c.bf16 %v6151_v35, %v6147_v53 }
 0x565   :  { %v6304_v57 = vpack.c.bf16 %v6152_v4, %v6148_v16  ;;  %v5886_v15 = vpop.f32.mrb[168].mxu1 }
 0x566   :  { %v9484_v27 = vadd.f32 %v5886_v15, %v14569_v32  ;;  %v5888_v0 = vpop.f32.mrb[169].mxu1 }
 0x567   :  { %v9485_v33 = vadd.f32 %v5888_v0, %v14572_v58  ;;  %v5890_v31 = vpop.f32.mrb[170].mxu1 }
 0x568   :  { %v9486_v47 = vadd.f32 %v5890_v31, %v14569_v32  ;;  %v5892_v43 = vpop.f32.mrb[171].mxu1  ;;  %v6155_v25 = vmax.f32 %v9484_v27, 0.0 }
 0x569   :  { %v9487_v18 = vadd.f32 %v5892_v43, %v14572_v58  ;;  %v6156_v41 = vmax.f32 %v9485_v33, 0.0 }
 0x56a   :  { %v6159_v30 = vmax.f32 %v9486_v47, 0.0  ;;  %7321 = vmatmul.mubr.bf16.gmra.mrb[212].mxu0 %v14827_v51 }
 0x56b   :  { %v6160_v56 = vmax.f32 %v9487_v18, 0.0  ;;  %7330 = vmatprep.mubr.bf16.mxu0 %v6292_v40 }
 0x56c   :  { %v14862_v50 = vpack.c.bf16 %v6159_v30, %v6155_v25 }
 0x56d   :  { %v6308_v29 = vpack.c.bf16 %v6160_v56, %v6156_v41  ;;  %v5896_v9 = vpop.f32.mrb[172].mxu1 }
 0x56e   :  { %v9488_v19 = vadd.f32 %v5896_v9, %v14569_v32  ;;  %v5898_v2 = vpop.f32.mrb[173].mxu1 }
 0x56f   :  { %v9489_v5 = vadd.f32 %v5898_v2, %v14572_v58  ;;  %v5900_v46 = vpop.f32.mrb[174].mxu1 }
 0x570   :  { %v9490_v20 = vadd.f32 %v5900_v46, %v14569_v32  ;;  %v5902_v61 = vpop.f32.mrb[175].mxu1  ;;  %v6163_v38 = vmax.f32 %v9488_v19, 0.0 }
 0x571   :  { %v9491_v1 = vadd.f32 %v5902_v61, %v14572_v58  ;;  %v6164_v40 = vmax.f32 %v9489_v5, 0.0  ;;  %v6393_v5 = vld [vmem:[%s15329_s4] sm:$0x3] }
 0x572   :  { %v6167_v51 = vmax.f32 %v9490_v20, 0.0  ;;  %7331 = vmatmul.mubr.bf16.gmra.mrb[216].mxu0 %v14834_v55 }
 0x573   :  { %v6168_v62 = vmax.f32 %v9491_v1, 0.0  ;;  %7340 = vmatprep.mubr.bf16.mxu0 %v6296_v45  ;;  %v15655_v1 = vsub.s32 0, %v15643_v39 }
 0x574   :  { %v14869_v13 = vpack.c.bf16 %v6167_v51, %v6163_v38 }
 0x575   :  { %v14871_v48 = vpack.c.bf16 %v6168_v62, %v6164_v40  ;;  %v5906_v37 = vpop.f32.mrb[176].mxu1  ;;  %v14910_v38 = vrot.slane %v6393_v5, %v15655_v1  ;;  %v15656_v62 = vsub.s32 1, %v15643_v39 }
 0x576   :  { %v9492_v23 = vadd.f32 %v5906_v37, %v14569_v32  ;;  %v5908_v17 = vpop.f32.mrb[177].mxu1 }
 0x577   :  { %v9493_v22 = vadd.f32 %v5908_v17, %v14572_v58  ;;  %v5910_v54 = vpop.f32.mrb[178].mxu1  ;;  %v14915_v37 = vrot.slane %v6393_v5, %v15656_v62 }
 0x578   :  { %v9494_v14 = vadd.f32 %v5910_v54, %v14569_v32  ;;  %v5912_v7 = vpop.f32.mrb[179].mxu1  ;;  %v6171_v55 = vmax.f32 %v9492_v23, 0.0 }
 0x579   :  { %v9495_v52 = vadd.f32 %v5912_v7, %v14572_v58  ;;  %v6172_v45 = vmax.f32 %v9493_v22, 0.0 }
 0x57a   :  { %v6175_v10 = vmax.f32 %v9494_v14, 0.0  ;;  %7341 = vmatmul.mubr.bf16.gmra.mrb[220].mxu0 %v14841_v44 }
 0x57b   :  { %v6176_v34 = vmax.f32 %v9495_v52, 0.0  ;;  %7350 = vmatprep.mubr.bf16.mxu0 %v6300_v28 }
 0x57c   :  { %v14878_v21 = vpack.c.bf16 %v6175_v10, %v6171_v55 }
 0x57d   :  { %v14880_v26 = vpack.c.bf16 %v6176_v34, %v6172_v45  ;;  %v5916_v63 = vpop.f32.mrb[180].mxu1 }
 0x57e   :  { %v9496_v12 = vadd.f32 %v5916_v63, %v14569_v32  ;;  %v5918_v59 = vpop.f32.mrb[181].mxu1 }
 0x57f   :  { %v9497_v3 = vadd.f32 %v5918_v59, %v14572_v58  ;;  %v5920_v8 = vpop.f32.mrb[182].mxu1 }
 0x580   :  { %v9498_v11 = vadd.f32 %v5920_v8, %v14569_v32  ;;  %v5922_v36 = vpop.f32.mrb[183].mxu1  ;;  %v6179_v44 = vmax.f32 %v9496_v12, 0.0 }
 0x581   :  { %v9499_v60 = vadd.f32 %v5922_v36, %v14572_v58  ;;  %v6180_v28 = vmax.f32 %v9497_v3, 0.0 }
 0x582   :  { %v6183_v24 = vmax.f32 %v9498_v11, 0.0  ;;  %7351 = vmatmul.mubr.bf16.gmra.mrb[224].mxu0 %v14848_v42 }
 0x583   :  { %v6184_v6 = vmax.f32 %v9499_v60, 0.0  ;;  %7360 = vmatprep.mubr.bf16.mxu0 %v6304_v57 }
 0x584   :  { %v14887_v53 = vpack.c.bf16 %v6183_v24, %v6179_v44 }
 0x585   :  { %v14889_v35 = vpack.c.bf16 %v6184_v6, %v6180_v28  ;;  %v5926_v16 = vpop.f32.mrb[184].mxu1 }
 0x586   :  { %v9500_v4 = vadd.f32 %v5926_v16, %v14569_v32  ;;  %v5928_v15 = vpop.f32.mrb[185].mxu1 }
 0x587   :  { %v9501_v27 = vadd.f32 %v5928_v15, %v14572_v58  ;;  %v5930_v0 = vpop.f32.mrb[186].mxu1 }
 0x588   :  { %v9502_v33 = vadd.f32 %v5930_v0, %v14569_v32  ;;  %v5932_v31 = vpop.f32.mrb[187].mxu1  ;;  %v6187_v42 = vmax.f32 %v9500_v4, 0.0 }
 0x589   :  { %v9503_v47 = vadd.f32 %v5932_v31, %v14572_v58  ;;  %v6188_v57 = vmax.f32 %v9501_v27, 0.0 }
 0x58a   :  { %v6191_v43 = vmax.f32 %v9502_v33, 0.0  ;;  %7361 = vmatmul.mubr.bf16.gmra.mrb[228].mxu0 %v14855_v49 }
 0x58b   :  { %v6192_v18 = vmax.f32 %v9503_v47, 0.0  ;;  %7370 = vmatprep.mubr.bf16.mxu0 %v6308_v29 }
 0x58c   :  { %v14896_v25 = vpack.c.bf16 %v6191_v43, %v6187_v42 }
 0x58d   :  { %v14898_v30 = vpack.c.bf16 %v6192_v18, %v6188_v57  ;;  %v5936_v41 = vpop.f32.mrb[188].mxu1 }
 0x58e   :  { %v9504_v56 = vadd.f32 %v5936_v41, %v14569_v32  ;;  %v5938_v9 = vpop.f32.mrb[189].mxu1 }
 0x58f   :  { %v9505_v19 = vadd.f32 %v5938_v9, %v14572_v58  ;;  %v5940_v2 = vpop.f32.mrb[190].mxu1 }
 0x590   :  { %v9506_v49 = vadd.f32 %v5940_v2, %v14569_v32  ;;  %v5942_v46 = vpop.f32.mrb[191].mxu1  ;;  %v6195_v20 = vmax.f32 %v9504_v56, 0.0 }
 0x591   :  { %v9507_v29 = vadd.f32 %v5942_v46, %v14572_v58  ;;  %v6196_v51 = vmax.f32 %v9505_v19, 0.0 }
 0x592   :  { %v6199_v61 = vmax.f32 %v9506_v49, 0.0  ;;  %7371 = vmatmul.mubr.bf16.gmra.mrb[232].mxu0 %v14862_v50 }
 0x593   :  { %v6200_v40 = vmax.f32 %v9507_v29, 0.0  ;;  %7380 = vmatprep.mubr.bf16.mxu0 %v14871_v48 }
 0x594   :  { %v14917_v32 = vpack.c.bf16 %v6199_v61, %v6195_v20 }
 0x595   :  { %v14919_v23 = vpack.c.bf16 %v6200_v40, %v6196_v51  ;;  %v7112_v58 = vpop.f32.mrb[128].mxu0 }
 0x596   :  { %v9508_v17 = vadd.f32 %v7112_v58, %v14910_v38  ;;  %v7114_v50 = vpop.f32.mrb[129].mxu0 }
 0x597   :  { %v9509_v22 = vadd.f32 %v7114_v50, %v14915_v37  ;;  %v7116_v54 = vpop.f32.mrb[130].mxu0 }
 0x598   :  { %v9510_v14 = vadd.f32 %v7116_v54, %v14910_v38  ;;  %v7118_v7 = vpop.f32.mrb[131].mxu0  ;;  %v7431_v52 = vmax.f32 %v9508_v17, 0.0 }
 0x599   :  { %v9511_v48 = vadd.f32 %v7118_v7, %v14915_v37  ;;  %v7432_v55 = vmax.f32 %v9509_v22, 0.0 }
 0x59a   :  { %v7433_v39 = vmax.f32 %v9510_v14, 0.0  ;;  %7381 = vmatmul.mubr.bf16.gmra.mrb[236].mxu0 %v14869_v13 }
 0x59b   :  { %v7434_v10 = vmax.f32 %v9511_v48, 0.0  ;;  %7390 = vmatprep.mubr.bf16.mxu0 %v14880_v26 }
 0x59c   :  { %v7559_v45 = vpack.c.bf16 %v7433_v39, %v7431_v52 }
 0x59d   :  { %v7560_v34 = vpack.c.bf16 %v7434_v10, %v7432_v55  ;;  %v7122_v63 = vpop.f32.mrb[132].mxu0 }
 0x59e   :  { %v9512_v12 = vadd.f32 %v7122_v63, %v14910_v38  ;;  %v7124_v59 = vpop.f32.mrb[133].mxu0 }
 0x59f   :  { %v9513_v3 = vadd.f32 %v7124_v59, %v14915_v37  ;;  %v7126_v8 = vpop.f32.mrb[134].mxu0  ;;  %7790 = vmatprep.mubr.bf16.mxu1 %v7560_v34 }
 0x5a0   :  { %v9514_v11 = vadd.f32 %v7126_v8, %v14910_v38  ;;  %v7128_v36 = vpop.f32.mrb[135].mxu0  ;;  %7791 = vmatmul.mubr.bf16.vlgmr.msra.gmra.mrb[192].mxu1 %v7559_v45  ;;  %v7435_v60 = vmax.f32 %v9512_v12, 0.0 }
 0x5a1   :  { %v9515_v13 = vadd.f32 %v7128_v36, %v14915_v37  ;;  %v7436_v26 = vmax.f32 %v9513_v3, 0.0 }
 0x5a2   :  { %v7437_v44 = vmax.f32 %v9514_v11, 0.0  ;;  %7391 = vmatmul.mubr.bf16.gmra.mrb[240].mxu0 %v14878_v21 }
 0x5a3   :  { %v7438_v24 = vmax.f32 %v9515_v13, 0.0  ;;  %7400 = vmatprep.mubr.bf16.mxu0 %v14889_v35 }
 0x5a4   :  { %v7561_v28 = vpack.c.bf16 %v7437_v44, %v7435_v60 }
 0x5a5   :  { %v7562_v6 = vpack.c.bf16 %v7438_v24, %v7436_v26  ;;  %v7132_v16 = vpop.f32.mrb[136].mxu0 }
 0x5a6   :  { %v9516_v4 = vadd.f32 %v7132_v16, %v14910_v38  ;;  %v7134_v15 = vpop.f32.mrb[137].mxu0 }
 0x5a7   :  { %v9517_v27 = vadd.f32 %v7134_v15, %v14915_v37  ;;  %v7136_v0 = vpop.f32.mrb[138].mxu0  ;;  %7798 = vmatprep.mubr.bf16.mxu1 %v7562_v6 }
 0x5a8   :  { %v9518_v33 = vadd.f32 %v7136_v0, %v14910_v38  ;;  %v7138_v31 = vpop.f32.mrb[139].mxu0  ;;  %7799 = vmatmul.mubr.bf16.gmra.mrb[196].mxu1 %v7561_v28  ;;  %v7439_v47 = vmax.f32 %v9516_v4, 0.0 }
 0x5a9   :  { %v9519_v21 = vadd.f32 %v7138_v31, %v14915_v37  ;;  %v7440_v35 = vmax.f32 %v9517_v27, 0.0 }
 0x5aa   :  { %v7441_v42 = vmax.f32 %v9518_v33, 0.0  ;;  %7401 = vmatmul.mubr.bf16.gmra.mrb[244].mxu0 %v14887_v53 }
 0x5ab   :  { %v7442_v43 = vmax.f32 %v9519_v21, 0.0  ;;  %7410 = vmatprep.mubr.bf16.mxu0 %v14898_v30 }
 0x5ac   :  { %v7563_v57 = vpack.c.bf16 %v7441_v42, %v7439_v47 }
 0x5ad   :  { %v7564_v18 = vpack.c.bf16 %v7442_v43, %v7440_v35  ;;  %v7142_v41 = vpop.f32.mrb[140].mxu0 }
 0x5ae   :  { %v9520_v56 = vadd.f32 %v7142_v41, %v14910_v38  ;;  %v7144_v9 = vpop.f32.mrb[141].mxu0 }
 0x5af   :  { %v9521_v19 = vadd.f32 %v7144_v9, %v14915_v37  ;;  %v7146_v2 = vpop.f32.mrb[142].mxu0  ;;  %7806 = vmatprep.mubr.bf16.mxu1 %v7564_v18 }
 0x5b0   :  { %v9522_v5 = vadd.f32 %v7146_v2, %v14910_v38  ;;  %v7148_v49 = vpop.f32.mrb[143].mxu0  ;;  %7807 = vmatmul.mubr.bf16.gmra.mrb[200].mxu1 %v7563_v57  ;;  %v7443_v46 = vmax.f32 %v9520_v56, 0.0 }
 0x5b1   :  { %v9523_v53 = vadd.f32 %v7148_v49, %v14915_v37  ;;  %v7444_v30 = vmax.f32 %v9521_v19, 0.0 }
 0x5b2   :  { %v7445_v29 = vmax.f32 %v9522_v5, 0.0  ;;  %7411 = vmatmul.mubr.bf16.gmra.mrb[248].mxu0 %v14896_v25 }
 0x5b3   :  { %v7446_v20 = vmax.f32 %v9523_v53, 0.0  ;;  %7420 = vmatprep.mubr.bf16.mxu0 %v14919_v23 }
 0x5b4   :  { %v7565_v61 = vpack.c.bf16 %v7445_v29, %v7443_v46 }
 0x5b5   :  { %v7566_v1 = vpack.c.bf16 %v7446_v20, %v7444_v30  ;;  %v7152_v51 = vpop.f32.mrb[144].mxu0 }
 0x5b6   :  { %v9524_v40 = vadd.f32 %v7152_v51, %v14910_v38  ;;  %v7154_v62 = vpop.f32.mrb[145].mxu0 }
 0x5b7   :  { %v9525_v58 = vadd.f32 %v7154_v62, %v14915_v37  ;;  %v7156_v17 = vpop.f32.mrb[146].mxu0  ;;  %7814 = vmatprep.mubr.bf16.mxu1 %v7566_v1 }
 0x5b8   :  { %v9526_v50 = vadd.f32 %v7156_v17, %v14910_v38  ;;  %v7158_v22 = vpop.f32.mrb[147].mxu0  ;;  %7815 = vmatmul.mubr.bf16.gmra.mrb[204].mxu1 %v7565_v61  ;;  %v7447_v54 = vmax.f32 %v9524_v40, 0.0 }
 0x5b9   :  { %v9527_v25 = vadd.f32 %v7158_v22, %v14915_v37  ;;  %v7448_v23 = vmax.f32 %v9525_v58, 0.0 }
 0x5ba   :  { %v7449_v14 = vmax.f32 %v9526_v50, 0.0  ;;  %7421 = vmatmul.mubr.bf16.gmra.mrb[252].mxu0 %v14917_v32 }
 0x5bb   :  { %v7450_v7 = vmax.f32 %v9527_v25, 0.0 }
 0x5bc   :  { %v7567_v48 = vpack.c.bf16 %v7449_v14, %v7447_v54 }
 0x5bd   :  { %v7568_v52 = vpack.c.bf16 %v7450_v7, %v7448_v23  ;;  %v7162_v39 = vpop.f32.mrb[148].mxu0 }
 0x5be   :  { %v9528_v55 = vadd.f32 %v7162_v39, %v14910_v38  ;;  %v7164_v10 = vpop.f32.mrb[149].mxu0 }
 0x5bf   :  { %v9529_v45 = vadd.f32 %v7164_v10, %v14915_v37  ;;  %v7166_v34 = vpop.f32.mrb[150].mxu0  ;;  %7822 = vmatprep.mubr.bf16.mxu1 %v7568_v52 }
 0x5c0   :  { %v9530_v63 = vadd.f32 %v7166_v34, %v14910_v38  ;;  %v7168_v12 = vpop.f32.mrb[151].mxu0  ;;  %7823 = vmatmul.mubr.bf16.gmra.mrb[208].mxu1 %v7567_v48  ;;  %v7451_v3 = vmax.f32 %v9528_v55, 0.0 }
 0x5c1   :  { %v9531_v59 = vadd.f32 %v7168_v12, %v14915_v37  ;;  %v7452_v8 = vmax.f32 %v9529_v45, 0.0 }
 0x5c2   :  { %v7453_v32 = vmax.f32 %v9530_v63, 0.0 }
 0x5c3   :  { %v7454_v11 = vmax.f32 %v9531_v59, 0.0 }
 0x5c4   :  { %v7569_v36 = vpack.c.bf16 %v7453_v32, %v7451_v3 }
 0x5c5   :  { %v7570_v13 = vpack.c.bf16 %v7454_v11, %v7452_v8  ;;  %v7172_v60 = vpop.f32.mrb[152].mxu0 }
 0x5c6   :  { %v9532_v44 = vadd.f32 %v7172_v60, %v14910_v38  ;;  %v7174_v26 = vpop.f32.mrb[153].mxu0 }
 0x5c7   :  { %v9533_v24 = vadd.f32 %v7174_v26, %v14915_v37  ;;  %v7176_v28 = vpop.f32.mrb[154].mxu0  ;;  %7830 = vmatprep.mubr.bf16.mxu1 %v7570_v13 }
 0x5c8   :  { %v9534_v6 = vadd.f32 %v7176_v28, %v14910_v38  ;;  %v7178_v16 = vpop.f32.mrb[155].mxu0  ;;  %7831 = vmatmul.mubr.bf16.gmra.mrb[212].mxu1 %v7569_v36  ;;  %v7455_v15 = vmax.f32 %v9532_v44, 0.0 }
 0x5c9   :  { %v9535_v4 = vadd.f32 %v7178_v16, %v14915_v37  ;;  %v7456_v0 = vmax.f32 %v9533_v24, 0.0 }
 0x5ca   :  { %v7457_v27 = vmax.f32 %v9534_v6, 0.0 }
 0x5cb   :  { %v7458_v33 = vmax.f32 %v9535_v4, 0.0 }
 0x5cc   :  { %v7571_v31 = vpack.c.bf16 %v7457_v27, %v7455_v15 }
 0x5cd   :  { %v7572_v21 = vpack.c.bf16 %v7458_v33, %v7456_v0  ;;  %v7182_v47 = vpop.f32.mrb[156].mxu0 }
 0x5ce   :  { %v9536_v42 = vadd.f32 %v7182_v47, %v14910_v38  ;;  %v7184_v35 = vpop.f32.mrb[157].mxu0 }
 0x5cf   :  { %v9537_v43 = vadd.f32 %v7184_v35, %v14915_v37  ;;  %v7186_v57 = vpop.f32.mrb[158].mxu0  ;;  %7838 = vmatprep.mubr.bf16.mxu1 %v7572_v21 }
 0x5d0   :  { %v9538_v18 = vadd.f32 %v7186_v57, %v14910_v38  ;;  %v7188_v41 = vpop.f32.mrb[159].mxu0  ;;  %7839 = vmatmul.mubr.bf16.gmra.mrb[216].mxu1 %v7571_v31  ;;  %v7459_v9 = vmax.f32 %v9536_v42, 0.0 }
 0x5d1   :  { %v9539_v56 = vadd.f32 %v7188_v41, %v14915_v37  ;;  %v7460_v2 = vmax.f32 %v9537_v43, 0.0 }
 0x5d2   :  { %v7461_v19 = vmax.f32 %v9538_v18, 0.0 }
 0x5d3   :  { %v7462_v5 = vmax.f32 %v9539_v56, 0.0 }
 0x5d4   :  { %v7573_v49 = vpack.c.bf16 %v7461_v19, %v7459_v9 }
 0x5d5   :  { %v7574_v53 = vpack.c.bf16 %v7462_v5, %v7460_v2  ;;  %v7192_v46 = vpop.f32.mrb[160].mxu0 }
 0x5d6   :  { %v9540_v29 = vadd.f32 %v7192_v46, %v14910_v38  ;;  %v7194_v30 = vpop.f32.mrb[161].mxu0 }
 0x5d7   :  { %v9541_v20 = vadd.f32 %v7194_v30, %v14915_v37  ;;  %v7196_v61 = vpop.f32.mrb[162].mxu0  ;;  %7846 = vmatprep.mubr.bf16.mxu1 %v7574_v53 }
 0x5d8   :  { %v9542_v1 = vadd.f32 %v7196_v61, %v14910_v38  ;;  %v7198_v51 = vpop.f32.mrb[163].mxu0  ;;  %7847 = vmatmul.mubr.bf16.gmra.mrb[220].mxu1 %v7573_v49  ;;  %v7463_v62 = vmax.f32 %v9540_v29, 0.0 }
 0x5d9   :  { %v9543_v40 = vadd.f32 %v7198_v51, %v14915_v37  ;;  %v7464_v17 = vmax.f32 %v9541_v20, 0.0 }
 0x5da   :  { %v7465_v58 = vmax.f32 %v9542_v1, 0.0 }
 0x5db   :  { %v7466_v50 = vmax.f32 %v9543_v40, 0.0 }
 0x5dc   :  { %v7575_v22 = vpack.c.bf16 %v7465_v58, %v7463_v62 }
 0x5dd   :  { %v7576_v25 = vpack.c.bf16 %v7466_v50, %v7464_v17  ;;  %v7202_v54 = vpop.f32.mrb[164].mxu0 }
 0x5de   :  { %v9544_v14 = vadd.f32 %v7202_v54, %v14910_v38  ;;  %v7204_v23 = vpop.f32.mrb[165].mxu0 }
 0x5df   :  { %v9545_v7 = vadd.f32 %v7204_v23, %v14915_v37  ;;  %v7206_v48 = vpop.f32.mrb[166].mxu0  ;;  %7854 = vmatprep.mubr.bf16.mxu1 %v7576_v25 }
 0x5e0   :  { %v9546_v52 = vadd.f32 %v7206_v48, %v14910_v38  ;;  %v7208_v39 = vpop.f32.mrb[167].mxu0  ;;  %7855 = vmatmul.mubr.bf16.gmra.mrb[224].mxu1 %v7575_v22  ;;  %v7467_v10 = vmax.f32 %v9544_v14, 0.0 }
 0x5e1   :  { %v9547_v55 = vadd.f32 %v7208_v39, %v14915_v37  ;;  %v7468_v34 = vmax.f32 %v9545_v7, 0.0 }
 0x5e2   :  { %v7469_v45 = vmax.f32 %v9546_v52, 0.0 }
 0x5e3   :  { %v7470_v63 = vmax.f32 %v9547_v55, 0.0 }
 0x5e4   :  { %v7577_v12 = vpack.c.bf16 %v7469_v45, %v7467_v10 }
 0x5e5   :  { %v7578_v59 = vpack.c.bf16 %v7470_v63, %v7468_v34  ;;  %v7212_v3 = vpop.f32.mrb[168].mxu0 }
 0x5e6   :  { %v9548_v32 = vadd.f32 %v7212_v3, %v14910_v38  ;;  %v7214_v8 = vpop.f32.mrb[169].mxu0 }
 0x5e7   :  { %v9549_v11 = vadd.f32 %v7214_v8, %v14915_v37  ;;  %v7216_v36 = vpop.f32.mrb[170].mxu0  ;;  %7862 = vmatprep.mubr.bf16.mxu1 %v7578_v59 }
 0x5e8   :  { %v9550_v13 = vadd.f32 %v7216_v36, %v14910_v38  ;;  %v7218_v60 = vpop.f32.mrb[171].mxu0  ;;  %7863 = vmatmul.mubr.bf16.gmra.mrb[228].mxu1 %v7577_v12  ;;  %v7471_v26 = vmax.f32 %v9548_v32, 0.0 }
 0x5e9   :  { %v9551_v44 = vadd.f32 %v7218_v60, %v14915_v37  ;;  %v7472_v28 = vmax.f32 %v9549_v11, 0.0 }
 0x5ea   :  { %v7473_v24 = vmax.f32 %v9550_v13, 0.0 }
 0x5eb   :  { %v7474_v6 = vmax.f32 %v9551_v44, 0.0 }
 0x5ec   :  { %v7579_v16 = vpack.c.bf16 %v7473_v24, %v7471_v26 }
 0x5ed   :  { %v7580_v4 = vpack.c.bf16 %v7474_v6, %v7472_v28  ;;  %v7222_v15 = vpop.f32.mrb[172].mxu0 }
 0x5ee   :  { %v9552_v27 = vadd.f32 %v7222_v15, %v14910_v38  ;;  %v7224_v0 = vpop.f32.mrb[173].mxu0 }
 0x5ef   :  { %v9553_v33 = vadd.f32 %v7224_v0, %v14915_v37  ;;  %v7226_v31 = vpop.f32.mrb[174].mxu0  ;;  %7870 = vmatprep.mubr.bf16.mxu1 %v7580_v4 }
 0x5f0   :  { %v9554_v21 = vadd.f32 %v7226_v31, %v14910_v38  ;;  %v7228_v47 = vpop.f32.mrb[175].mxu0  ;;  %7871 = vmatmul.mubr.bf16.gmra.mrb[232].mxu1 %v7579_v16  ;;  %v7475_v35 = vmax.f32 %v9552_v27, 0.0 }
 0x5f1   :  { %v9555_v42 = vadd.f32 %v7228_v47, %v14915_v37  ;;  %v7476_v57 = vmax.f32 %v9553_v33, 0.0 }
 0x5f2   :  { %v7477_v43 = vmax.f32 %v9554_v21, 0.0 }
 0x5f3   :  { %v7478_v18 = vmax.f32 %v9555_v42, 0.0 }
 0x5f4   :  { %v7581_v41 = vpack.c.bf16 %v7477_v43, %v7475_v35 }
 0x5f5   :  { %v7582_v56 = vpack.c.bf16 %v7478_v18, %v7476_v57  ;;  %v7232_v9 = vpop.f32.mrb[176].mxu0 }
 0x5f6   :  { %v9556_v19 = vadd.f32 %v7232_v9, %v14910_v38  ;;  %v7234_v2 = vpop.f32.mrb[177].mxu0 }
 0x5f7   :  { %v9557_v5 = vadd.f32 %v7234_v2, %v14915_v37  ;;  %v7236_v49 = vpop.f32.mrb[178].mxu0  ;;  %7878 = vmatprep.mubr.bf16.mxu1 %v7582_v56 }
 0x5f8   :  { %v9558_v53 = vadd.f32 %v7236_v49, %v14910_v38  ;;  %v7238_v46 = vpop.f32.mrb[179].mxu0  ;;  %7879 = vmatmul.mubr.bf16.gmra.mrb[236].mxu1 %v7581_v41  ;;  %v7479_v30 = vmax.f32 %v9556_v19, 0.0 }
 0x5f9   :  { %v9559_v29 = vadd.f32 %v7238_v46, %v14915_v37  ;;  %v7480_v61 = vmax.f32 %v9557_v5, 0.0 }
 0x5fa   :  { %v7481_v20 = vmax.f32 %v9558_v53, 0.0 }
 0x5fb   :  { %v7482_v1 = vmax.f32 %v9559_v29, 0.0 }
 0x5fc   :  { %v7583_v51 = vpack.c.bf16 %v7481_v20, %v7479_v30 }
 0x5fd   :  { %v7584_v40 = vpack.c.bf16 %v7482_v1, %v7480_v61  ;;  %v7242_v62 = vpop.f32.mrb[180].mxu0 }
 0x5fe   :  { %v9560_v58 = vadd.f32 %v7242_v62, %v14910_v38  ;;  %v7244_v17 = vpop.f32.mrb[181].mxu0 }
 0x5ff   :  { %v9561_v50 = vadd.f32 %v7244_v17, %v14915_v37  ;;  %v7246_v22 = vpop.f32.mrb[182].mxu0  ;;  %7886 = vmatprep.mubr.bf16.mxu1 %v7584_v40 }
 0x600   :  { %v9562_v25 = vadd.f32 %v7246_v22, %v14910_v38  ;;  %v7248_v54 = vpop.f32.mrb[183].mxu0  ;;  %7887 = vmatmul.mubr.bf16.gmra.mrb[240].mxu1 %v7583_v51  ;;  %v7483_v23 = vmax.f32 %v9560_v58, 0.0 }
 0x601   :  { %v9563_v14 = vadd.f32 %v7248_v54, %v14915_v37  ;;  %v7484_v48 = vmax.f32 %v9561_v50, 0.0 }
 0x602   :  { %v7485_v7 = vmax.f32 %v9562_v25, 0.0 }
 0x603   :  { %v7486_v52 = vmax.f32 %v9563_v14, 0.0 }
 0x604   :  { %v7585_v39 = vpack.c.bf16 %v7485_v7, %v7483_v23 }
 0x605   :  { %v7586_v55 = vpack.c.bf16 %v7486_v52, %v7484_v48  ;;  %v7252_v10 = vpop.f32.mrb[184].mxu0 }
 0x606   :  { %v9564_v45 = vadd.f32 %v7252_v10, %v14910_v38  ;;  %v7254_v34 = vpop.f32.mrb[185].mxu0 }
 0x607   :  { %v9565_v63 = vadd.f32 %v7254_v34, %v14915_v37  ;;  %v7256_v12 = vpop.f32.mrb[186].mxu0  ;;  %7894 = vmatprep.mubr.bf16.mxu1 %v7586_v55 }
 0x608   :  { %v9566_v59 = vadd.f32 %v7256_v12, %v14910_v38  ;;  %v7258_v3 = vpop.f32.mrb[187].mxu0  ;;  %7895 = vmatmul.mubr.bf16.gmra.mrb[244].mxu1 %v7585_v39  ;;  %v7487_v8 = vmax.f32 %v9564_v45, 0.0 }
 0x609   :  { %v9567_v32 = vadd.f32 %v7258_v3, %v14915_v37  ;;  %v7488_v36 = vmax.f32 %v9565_v63, 0.0 }
 0x60a   :  { %v7489_v11 = vmax.f32 %v9566_v59, 0.0 }
 0x60b   :  { %v7490_v13 = vmax.f32 %v9567_v32, 0.0 }
 0x60c   :  { %v7587_v60 = vpack.c.bf16 %v7489_v11, %v7487_v8 }
 0x60d   :  { %v7588_v44 = vpack.c.bf16 %v7490_v13, %v7488_v36  ;;  %v7262_v26 = vpop.f32.mrb[188].mxu0 }
 0x60e   :  { %v9568_v24 = vadd.f32 %v7262_v26, %v14910_v38  ;;  %v7264_v28 = vpop.f32.mrb[189].mxu0 }
 0x60f   :  { %v9569_v6 = vadd.f32 %v7264_v28, %v14915_v37  ;;  %v7266_v16 = vpop.f32.mrb[190].mxu0  ;;  %7902 = vmatprep.mubr.bf16.mxu1 %v7588_v44 }
 0x610   :  { %v9570_v4 = vadd.f32 %v7266_v16, %v14910_v38  ;;  %v7268_v15 = vpop.f32.mrb[191].mxu0  ;;  %7903 = vmatmul.mubr.bf16.gmra.mrb[248].mxu1 %v7587_v60  ;;  %v7491_v0 = vmax.f32 %v9568_v24, 0.0 }
 0x611   :  { %v9571_v27 = vadd.f32 %v7268_v15, %v14915_v37  ;;  %v7492_v31 = vmax.f32 %v9569_v6, 0.0 }
 0x612   :  { %v7493_v33 = vmax.f32 %v9570_v4, 0.0 }
 0x613   :  { %v7494_v21 = vmax.f32 %v9571_v27, 0.0 }
 0x614   :  { %v7589_v47 = vpack.c.bf16 %v7493_v33, %v7491_v0 }
 0x615   :  { %v7590_v42 = vpack.c.bf16 %v7494_v21, %v7492_v31  ;;  %v7272_v35 = vpop.f32.mrb[192].mxu0 }
 0x616   :  { %v9572_v43 = vadd.f32 %v7272_v35, %v14910_v38  ;;  %v7274_v57 = vpop.f32.mrb[193].mxu0 }
 0x617   :  { %v9573_v18 = vadd.f32 %v7274_v57, %v14915_v37  ;;  %v7276_v41 = vpop.f32.mrb[194].mxu0  ;;  %7910 = vmatprep.mubr.bf16.mxu1 %v7590_v42 }
 0x618   :  { %v9574_v56 = vadd.f32 %v7276_v41, %v14910_v38  ;;  %v7278_v9 = vpop.f32.mrb[195].mxu0  ;;  %7911 = vmatmul.mubr.bf16.gmra.mrb[252].mxu1 %v7589_v47  ;;  %v7495_v2 = vmax.f32 %v9572_v43, 0.0 }
 0x619   :  { %v9575_v19 = vadd.f32 %v7278_v9, %v14915_v37  ;;  %v7496_v49 = vmax.f32 %v9573_v18, 0.0 }
 0x61a   :  { %v7497_v5 = vmax.f32 %v9574_v56, 0.0 }
 0x61b   :  { %v7498_v53 = vmax.f32 %v9575_v19, 0.0 }
 0x61c   :  { %v7591_v46 = vpack.c.bf16 %v7497_v5, %v7495_v2 }
 0x61d   :  { %v7592_v29 = vpack.c.bf16 %v7498_v53, %v7496_v49  ;;  %v7282_v30 = vpop.f32.mrb[196].mxu0 }
 0x61e   :  { %v9576_v20 = vadd.f32 %v7282_v30, %v14910_v38  ;;  %v7284_v61 = vpop.f32.mrb[197].mxu0 }
 0x61f   :  { %v9577_v1 = vadd.f32 %v7284_v61, %v14915_v37  ;;  %v7286_v51 = vpop.f32.mrb[198].mxu0  ;;  %7918 = vmatprep.mubr.bf16.mxu1 %v7592_v29 }
 0x620   :  { %v9578_v40 = vadd.f32 %v7286_v51, %v14910_v38  ;;  %v7288_v62 = vpop.f32.mrb[199].mxu0  ;;  %7919 = vmatmul.mubr.bf16.gmra.mrb[0].mxu1 %v7591_v46  ;;  %v7499_v17 = vmax.f32 %v9576_v20, 0.0 }
 0x621   :  { %v9579_v58 = vadd.f32 %v7288_v62, %v14915_v37  ;;  %v7500_v22 = vmax.f32 %v9577_v1, 0.0 }
 0x622   :  { %v7501_v50 = vmax.f32 %v9578_v40, 0.0 }
 0x623   :  { %v7502_v25 = vmax.f32 %v9579_v58, 0.0 }
 0x624   :  { %v7593_v54 = vpack.c.bf16 %v7501_v50, %v7499_v17 }
 0x625   :  { %v7594_v14 = vpack.c.bf16 %v7502_v25, %v7500_v22  ;;  %v7292_v23 = vpop.f32.mrb[200].mxu0 }
 0x626   :  { %v9580_v7 = vadd.f32 %v7292_v23, %v14910_v38  ;;  %v7294_v48 = vpop.f32.mrb[201].mxu0 }
 0x627   :  { %v9581_v52 = vadd.f32 %v7294_v48, %v14915_v37  ;;  %v7296_v39 = vpop.f32.mrb[202].mxu0  ;;  %7926 = vmatprep.mubr.bf16.mxu1 %v7594_v14 }
 0x628   :  { %v9582_v55 = vadd.f32 %v7296_v39, %v14910_v38  ;;  %v7298_v10 = vpop.f32.mrb[203].mxu0  ;;  %7927 = vmatmul.mubr.bf16.gmra.mrb[4].mxu1 %v7593_v54  ;;  %v7503_v34 = vmax.f32 %v9580_v7, 0.0 }
 0x629   :  { %v9583_v45 = vadd.f32 %v7298_v10, %v14915_v37  ;;  %v7504_v12 = vmax.f32 %v9581_v52, 0.0 }
 0x62a   :  { %v7505_v63 = vmax.f32 %v9582_v55, 0.0 }
 0x62b   :  { %v7506_v59 = vmax.f32 %v9583_v45, 0.0 }
 0x62c   :  { %v7595_v3 = vpack.c.bf16 %v7505_v63, %v7503_v34 }
 0x62d   :  { %v7596_v32 = vpack.c.bf16 %v7506_v59, %v7504_v12  ;;  %v7302_v8 = vpop.f32.mrb[204].mxu0 }
 0x62e   :  { %v9584_v11 = vadd.f32 %v7302_v8, %v14910_v38  ;;  %v7304_v36 = vpop.f32.mrb[205].mxu0 }
 0x62f   :  { %v9585_v13 = vadd.f32 %v7304_v36, %v14915_v37  ;;  %v7306_v60 = vpop.f32.mrb[206].mxu0  ;;  %7934 = vmatprep.mubr.bf16.mxu1 %v7596_v32 }
 0x630   :  { %v9586_v44 = vadd.f32 %v7306_v60, %v14910_v38  ;;  %v7308_v26 = vpop.f32.mrb[207].mxu0  ;;  %7935 = vmatmul.mubr.bf16.gmra.mrb[8].mxu1 %v7595_v3  ;;  %v7507_v28 = vmax.f32 %v9584_v11, 0.0 }
 0x631   :  { %v9587_v24 = vadd.f32 %v7308_v26, %v14915_v37  ;;  %v7508_v16 = vmax.f32 %v9585_v13, 0.0 }
 0x632   :  { %v7509_v6 = vmax.f32 %v9586_v44, 0.0 }
 0x633   :  { %v7510_v4 = vmax.f32 %v9587_v24, 0.0 }
 0x634   :  { %v7597_v15 = vpack.c.bf16 %v7509_v6, %v7507_v28 }
 0x635   :  { %v7598_v27 = vpack.c.bf16 %v7510_v4, %v7508_v16  ;;  %v7312_v0 = vpop.f32.mrb[208].mxu0 }
 0x636   :  { %v9588_v33 = vadd.f32 %v7312_v0, %v14910_v38  ;;  %v7314_v31 = vpop.f32.mrb[209].mxu0 }
 0x637   :  { %v9589_v21 = vadd.f32 %v7314_v31, %v14915_v37  ;;  %v7316_v47 = vpop.f32.mrb[210].mxu0  ;;  %7942 = vmatprep.mubr.bf16.mxu1 %v7598_v27 }
 0x638   :  { %v9590_v42 = vadd.f32 %v7316_v47, %v14910_v38  ;;  %v7318_v35 = vpop.f32.mrb[211].mxu0  ;;  %7943 = vmatmul.mubr.bf16.gmra.mrb[12].mxu1 %v7597_v15  ;;  %v7511_v57 = vmax.f32 %v9588_v33, 0.0 }
 0x639   :  { %v9591_v43 = vadd.f32 %v7318_v35, %v14915_v37  ;;  %v7512_v41 = vmax.f32 %v9589_v21, 0.0 }
 0x63a   :  { %v7513_v18 = vmax.f32 %v9590_v42, 0.0 }
 0x63b   :  { %v7514_v56 = vmax.f32 %v9591_v43, 0.0 }
 0x63c   :  { %v7599_v9 = vpack.c.bf16 %v7513_v18, %v7511_v57 }
 0x63d   :  { %v7600_v19 = vpack.c.bf16 %v7514_v56, %v7512_v41  ;;  %v7322_v2 = vpop.f32.mrb[212].mxu0 }
 0x63e   :  { %v9592_v5 = vadd.f32 %v7322_v2, %v14910_v38  ;;  %v7324_v49 = vpop.f32.mrb[213].mxu0 }
 0x63f   :  { %v9593_v53 = vadd.f32 %v7324_v49, %v14915_v37  ;;  %v7326_v46 = vpop.f32.mrb[214].mxu0  ;;  %7950 = vmatprep.mubr.bf16.mxu1 %v7600_v19 }
 0x640   :  { %v9594_v29 = vadd.f32 %v7326_v46, %v14910_v38  ;;  %v7328_v30 = vpop.f32.mrb[215].mxu0  ;;  %7951 = vmatmul.mubr.bf16.gmra.mrb[16].mxu1 %v7599_v9  ;;  %v7515_v61 = vmax.f32 %v9592_v5, 0.0 }
 0x641   :  { %v9595_v20 = vadd.f32 %v7328_v30, %v14915_v37  ;;  %v7516_v51 = vmax.f32 %v9593_v53, 0.0 }
 0x642   :  { %v7517_v1 = vmax.f32 %v9594_v29, 0.0 }
 0x643   :  { %v7518_v40 = vmax.f32 %v9595_v20, 0.0 }
 0x644   :  { %v7601_v62 = vpack.c.bf16 %v7517_v1, %v7515_v61 }
 0x645   :  { %v7602_v58 = vpack.c.bf16 %v7518_v40, %v7516_v51  ;;  %v7332_v17 = vpop.f32.mrb[216].mxu0 }
 0x646   :  { %v9596_v50 = vadd.f32 %v7332_v17, %v14910_v38  ;;  %v7334_v22 = vpop.f32.mrb[217].mxu0 }
 0x647   :  { %v9597_v25 = vadd.f32 %v7334_v22, %v14915_v37  ;;  %v7336_v54 = vpop.f32.mrb[218].mxu0  ;;  %7958 = vmatprep.mubr.bf16.mxu1 %v7602_v58 }
 0x648   :  { %v9598_v14 = vadd.f32 %v7336_v54, %v14910_v38  ;;  %v7338_v23 = vpop.f32.mrb[219].mxu0  ;;  %7959 = vmatmul.mubr.bf16.gmra.mrb[20].mxu1 %v7601_v62  ;;  %v7519_v48 = vmax.f32 %v9596_v50, 0.0 }
 0x649   :  { %v9599_v7 = vadd.f32 %v7338_v23, %v14915_v37  ;;  %v7520_v39 = vmax.f32 %v9597_v25, 0.0 }
 0x64a   :  { %v7521_v52 = vmax.f32 %v9598_v14, 0.0 }
 0x64b   :  { %v7522_v55 = vmax.f32 %v9599_v7, 0.0 }
 0x64c   :  { %v7603_v10 = vpack.c.bf16 %v7521_v52, %v7519_v48 }
 0x64d   :  { %v7604_v45 = vpack.c.bf16 %v7522_v55, %v7520_v39  ;;  %v7342_v34 = vpop.f32.mrb[220].mxu0 }
 0x64e   :  { %v9600_v63 = vadd.f32 %v7342_v34, %v14910_v38  ;;  %v7344_v12 = vpop.f32.mrb[221].mxu0 }
 0x64f   :  { %v9601_v59 = vadd.f32 %v7344_v12, %v14915_v37  ;;  %v7346_v3 = vpop.f32.mrb[222].mxu0  ;;  %7966 = vmatprep.mubr.bf16.mxu1 %v7604_v45  ;;  %v15045_v12 = vld [vmem:[%s15330_s6] ss:$0 sm:$0xff] }
 0x650   :  { %v9602_v32 = vadd.f32 %v7346_v3, %v14910_v38  ;;  %v7348_v8 = vpop.f32.mrb[223].mxu0  ;;  %7967 = vmatmul.mubr.bf16.gmra.mrb[24].mxu1 %v7603_v10  ;;  %v7523_v36 = vmax.f32 %v9600_v63, 0.0 }
 0x651   :  { %v9603_v11 = vadd.f32 %v7348_v8, %v14915_v37  ;;  %v7524_v60 = vmax.f32 %v9601_v59, 0.0 }
 0x652   :  { %v7525_v13 = vmax.f32 %v9602_v32, 0.0 }
 0x653   :  { %v7526_v44 = vmax.f32 %v9603_v11, 0.0 }
 0x654   :  { %v7605_v26 = vpack.c.bf16 %v7525_v13, %v7523_v36 }
 0x655   :  { %v7606_v24 = vpack.c.bf16 %v7526_v44, %v7524_v60  ;;  %v7352_v28 = vpop.f32.mrb[224].mxu0 }
 0x656   :  { %v9604_v6 = vadd.f32 %v7352_v28, %v14910_v38  ;;  %v7354_v16 = vpop.f32.mrb[225].mxu0 }
 0x657   :  { %v9605_v4 = vadd.f32 %v7354_v16, %v14915_v37  ;;  %v7356_v15 = vpop.f32.mrb[226].mxu0  ;;  %7974 = vmatprep.mubr.bf16.mxu1 %v7606_v24 }
 0x658   :  { %v9606_v27 = vadd.f32 %v7356_v15, %v14910_v38  ;;  %v7358_v0 = vpop.f32.mrb[227].mxu0  ;;  %7975 = vmatmul.mubr.bf16.gmra.mrb[28].mxu1 %v7605_v26  ;;  %v7527_v31 = vmax.f32 %v9604_v6, 0.0 }
 0x659   :  { %v9607_v33 = vadd.f32 %v7358_v0, %v14915_v37  ;;  %v7528_v47 = vmax.f32 %v9605_v4, 0.0 }
 0x65a   :  { %v7529_v21 = vmax.f32 %v9606_v27, 0.0 }
 0x65b   :  { %v7530_v42 = vmax.f32 %v9607_v33, 0.0 }
 0x65c   :  { %v7607_v35 = vpack.c.bf16 %v7529_v21, %v7527_v31 }
 0x65d   :  { %v7608_v43 = vpack.c.bf16 %v7530_v42, %v7528_v47  ;;  %v7362_v57 = vpop.f32.mrb[228].mxu0 }
 0x65e   :  { %v9608_v18 = vadd.f32 %v7362_v57, %v14910_v38  ;;  %v7364_v41 = vpop.f32.mrb[229].mxu0 }
 0x65f   :  { %v9609_v56 = vadd.f32 %v7364_v41, %v14915_v37  ;;  %v7366_v9 = vpop.f32.mrb[230].mxu0  ;;  %7982 = vmatprep.mubr.bf16.mxu1 %v7608_v43 }
 0x660   :  { %v9610_v19 = vadd.f32 %v7366_v9, %v14910_v38  ;;  %v7368_v2 = vpop.f32.mrb[231].mxu0  ;;  %7983 = vmatmul.mubr.bf16.gmra.mrb[32].mxu1 %v7607_v35  ;;  %v7531_v49 = vmax.f32 %v9608_v18, 0.0 }
 0x661   :  { %v9611_v5 = vadd.f32 %v7368_v2, %v14915_v37  ;;  %v7532_v46 = vmax.f32 %v9609_v56, 0.0 }
 0x662   :  { %v7533_v53 = vmax.f32 %v9610_v19, 0.0 }
 0x663   :  { %v7534_v29 = vmax.f32 %v9611_v5, 0.0 }
 0x664   :  { %v7609_v30 = vpack.c.bf16 %v7533_v53, %v7531_v49 }
 0x665   :  { %v7610_v20 = vpack.c.bf16 %v7534_v29, %v7532_v46  ;;  %v7372_v61 = vpop.f32.mrb[232].mxu0 }
 0x666   :  { %v9612_v1 = vadd.f32 %v7372_v61, %v14910_v38  ;;  %v7374_v51 = vpop.f32.mrb[233].mxu0 }
 0x667   :  { %v9613_v40 = vadd.f32 %v7374_v51, %v14915_v37  ;;  %v7376_v62 = vpop.f32.mrb[234].mxu0  ;;  %7990 = vmatprep.mubr.bf16.mxu1 %v7610_v20 }
 0x668   :  { %v9614_v58 = vadd.f32 %v7376_v62, %v14910_v38  ;;  %v7378_v17 = vpop.f32.mrb[235].mxu0  ;;  %7991 = vmatmul.mubr.bf16.gmra.mrb[36].mxu1 %v7609_v30  ;;  %v7535_v22 = vmax.f32 %v9612_v1, 0.0 }
 0x669   :  { %v9615_v50 = vadd.f32 %v7378_v17, %v14915_v37  ;;  %v7536_v54 = vmax.f32 %v9613_v40, 0.0 }
 0x66a   :  { %v7537_v25 = vmax.f32 %v9614_v58, 0.0 }
 0x66b   :  { %v7538_v14 = vmax.f32 %v9615_v50, 0.0 }
 0x66c   :  { %v7611_v23 = vpack.c.bf16 %v7537_v25, %v7535_v22 }
 0x66d   :  { %v7612_v7 = vpack.c.bf16 %v7538_v14, %v7536_v54  ;;  %v7382_v48 = vpop.f32.mrb[236].mxu0 }
 0x66e   :  { %v9616_v52 = vadd.f32 %v7382_v48, %v14910_v38  ;;  %v7384_v39 = vpop.f32.mrb[237].mxu0 }
 0x66f   :  { %v9617_v55 = vadd.f32 %v7384_v39, %v14915_v37  ;;  %v7386_v10 = vpop.f32.mrb[238].mxu0  ;;  %7998 = vmatprep.mubr.bf16.mxu1 %v7612_v7 }
 0x670   :  { %v9618_v45 = vadd.f32 %v7386_v10, %v14910_v38  ;;  %v7388_v34 = vpop.f32.mrb[239].mxu0  ;;  %7999 = vmatmul.mubr.bf16.gmra.mrb[40].mxu1 %v7611_v23  ;;  %v7539_v59 = vmax.f32 %v9616_v52, 0.0 }
 0x671   :  { %v9619_v63 = vadd.f32 %v7388_v34, %v14915_v37  ;;  %v7540_v32 = vmax.f32 %v9617_v55, 0.0 }
 0x672   :  { %v7541_v3 = vmax.f32 %v9618_v45, 0.0 }
 0x673   :  { %v7542_v8 = vmax.f32 %v9619_v63, 0.0  ;;  %v7792_v11 = vpop.f32.mrb[192].mxu1 }
 0x674   :  { %v7613_v36 = vpack.c.bf16 %v7541_v3, %v7539_v59  ;;  %v7793_v13 = vadd.f32 %v15045_v12, %v7792_v11  ;;  %v7794_v60 = vpop.f32.mrb[193].mxu1 }
 0x675   :  { %v7614_v44 = vpack.c.bf16 %v7542_v8, %v7540_v32  ;;  %v7392_v26 = vpop.f32.mrb[240].mxu0  ;;  %v7795_v24 = vpop.f32.mrb[194].mxu1 }
 0x676   :  { %v9092_v28 = vmul.f32 -1.442695, %v7793_v13  ;;  %v9620_v6 = vadd.f32 %v7392_v26, %v14910_v38  ;;  %v7796_v16 = vadd.f32 %v15045_v12, %v7795_v24  ;;  %v7394_v4 = vpop.f32.mrb[241].mxu0  ;;  %v7797_v15 = vpop.f32.mrb[195].mxu1 }
 0x677   :  { %v9621_v27 = vadd.f32 %v7394_v4, %v14915_v37  ;;  %v7396_v0 = vpop.f32.mrb[242].mxu0  ;;  %8006 = vmatprep.mubr.bf16.mxu1 %v7614_v44 }
 0x678   :  { %10965 = vpow2.f32 %v9092_v28  ;;  %v9093_v33 = vmul.f32 -1.442695, %v7796_v16  ;;  %v9622_v31 = vadd.f32 %v7396_v0, %v14910_v38  ;;  %v7398_v21 = vpop.f32.mrb[243].mxu0  ;;  %8007 = vmatmul.mubr.bf16.gmra.mrb[44].mxu1 %v7613_v36  ;;  %v7543_v42 = vmax.f32 %v9620_v6, 0.0 }
 0x679   :  { %v9623_v47 = vadd.f32 %v7398_v21, %v14915_v37  ;;  %v7544_v43 = vmax.f32 %v9621_v27, 0.0 }
 0x67a   :  { %10967 = vpow2.f32 %v9093_v33  ;;  %v7545_v35 = vmax.f32 %v9622_v31, 0.0 }
 0x67b   :  { %v7546_v57 = vmax.f32 %v9623_v47, 0.0  ;;  %v7800_v18 = vpop.f32.mrb[196].mxu1 }
 0x67c   :  { %v7615_v41 = vpack.c.bf16 %v7545_v35, %v7543_v42  ;;  %v7801_v56 = vadd.f32 %v15045_v12, %v7800_v18  ;;  %v7802_v9 = vpop.f32.mrb[197].mxu1 }
 0x67d   :  { %v7616_v19 = vpack.c.bf16 %v7546_v57, %v7544_v43  ;;  %v7402_v2 = vpop.f32.mrb[244].mxu0  ;;  %v7803_v5 = vpop.f32.mrb[198].mxu1 }
 0x67e   :  { %v9094_v49 = vmul.f32 -1.442695, %v7801_v56  ;;  %v9624_v53 = vadd.f32 %v7402_v2, %v14910_v38  ;;  %v7804_v46 = vadd.f32 %v15045_v12, %v7803_v5  ;;  %v7404_v29 = vpop.f32.mrb[245].mxu0  ;;  %v7805_v30 = vpop.f32.mrb[199].mxu1 }
 0x67f   :  { %v9625_v20 = vadd.f32 %v7404_v29, %v14915_v37  ;;  %v7406_v61 = vpop.f32.mrb[246].mxu0  ;;  %8014 = vmatprep.mubr.bf16.mxu1 %v7616_v19 }
 0x680   :  { %10969 = vpow2.f32 %v9094_v49  ;;  %v9095_v1 = vmul.f32 -1.442695, %v7804_v46  ;;  %v9626_v51 = vadd.f32 %v7406_v61, %v14910_v38  ;;  %v7408_v40 = vpop.f32.mrb[247].mxu0  ;;  %8015 = vmatmul.mubr.bf16.gmra.mrb[48].mxu1 %v7615_v41  ;;  %v7547_v17 = vmax.f32 %v9624_v53, 0.0 }
 0x681   :  { %v9627_v62 = vadd.f32 %v7408_v40, %v14915_v37  ;;  %v7548_v25 = vmax.f32 %v9625_v20, 0.0 }
 0x682   :  { %v10966_v58 = vpop.eup %10965  ;;  %10971 = vpow2.f32 %v9095_v1  ;;  %v7549_v50 = vmax.f32 %v9626_v51, 0.0 }
 0x683   :  { %v8239_v22 = vadd.f32 1.0, %v10966_v58  ;;  %v7550_v54 = vmax.f32 %v9627_v62, 0.0  ;;  %v7808_v14 = vpop.f32.mrb[200].mxu1 }
 0x684   :  { %v10968_v23 = vpop.eup %10967  ;;  %v7617_v7 = vpack.c.bf16 %v7549_v50, %v7547_v17  ;;  %v7809_v48 = vadd.f32 %v15045_v12, %v7808_v14  ;;  %v7810_v52 = vpop.f32.mrb[201].mxu1 }
 0x685   :  { %10973 = vrcp.f32 %v8239_v22  ;;  %v8240_v39 = vadd.f32 1.0, %v10968_v23  ;;  %v7618_v55 = vpack.c.bf16 %v7550_v54, %v7548_v25  ;;  %v7412_v10 = vpop.f32.mrb[248].mxu0  ;;  %v7811_v45 = vpop.f32.mrb[202].mxu1 }
 0x686   :  { %v9096_v34 = vmul.f32 -1.442695, %v7809_v48  ;;  %v9628_v63 = vadd.f32 %v7412_v10, %v14910_v38  ;;  %v7812_v59 = vadd.f32 %v15045_v12, %v7811_v45  ;;  %v7414_v3 = vpop.f32.mrb[249].mxu0  ;;  %v7813_v32 = vpop.f32.mrb[203].mxu1 }
 0x687   :  { %10975 = vrcp.f32 %v8240_v39  ;;  %v9629_v8 = vadd.f32 %v7414_v3, %v14915_v37  ;;  %v7416_v11 = vpop.f32.mrb[250].mxu0  ;;  %8022 = vmatprep.mubr.bf16.mxu1 %v7618_v55 }
 0x688   :  { %10977 = vpow2.f32 %v9096_v34  ;;  %v9097_v36 = vmul.f32 -1.442695, %v7812_v59  ;;  %v9630_v13 = vadd.f32 %v7416_v11, %v14910_v38  ;;  %v7418_v60 = vpop.f32.mrb[251].mxu0  ;;  %8023 = vmatmul.mubr.bf16.gmra.mrb[52].mxu1 %v7617_v7  ;;  %v7551_v24 = vmax.f32 %v9628_v63, 0.0 }
 0x689   :  { %v9631_v44 = vadd.f32 %v7418_v60, %v14915_v37  ;;  %v7552_v16 = vmax.f32 %v9629_v8, 0.0 }
 0x68a   :  { %v10970_v26 = vpop.eup %10969  ;;  %10979 = vpow2.f32 %v9097_v36  ;;  %v7553_v28 = vmax.f32 %v9630_v13, 0.0 }
 0x68b   :  { %v8241_v6 = vadd.f32 1.0, %v10970_v26  ;;  %v7554_v4 = vmax.f32 %v9631_v44, 0.0  ;;  %v7816_v15 = vpop.f32.mrb[204].mxu1 }
 0x68c   :  { %v10972_v27 = vpop.eup %10971  ;;  %v7619_v0 = vpack.c.bf16 %v7553_v28, %v7551_v24  ;;  %v7817_v33 = vadd.f32 %v15045_v12, %v7816_v15  ;;  %v7818_v31 = vpop.f32.mrb[205].mxu1 }
 0x68d   :  { %10981 = vrcp.f32 %v8241_v6  ;;  %v8242_v21 = vadd.f32 1.0, %v10972_v27  ;;  %v7620_v47 = vpack.c.bf16 %v7554_v4, %v7552_v16  ;;  %v7422_v42 = vpop.f32.mrb[252].mxu0  ;;  %v7819_v35 = vpop.f32.mrb[206].mxu1 }
 0x68e   :  { %v9098_v43 = vmul.f32 -1.442695, %v7817_v33  ;;  %v9632_v57 = vadd.f32 %v7422_v42, %v14910_v38  ;;  %v7820_v18 = vadd.f32 %v15045_v12, %v7819_v35  ;;  %v7424_v41 = vpop.f32.mrb[253].mxu0  ;;  %v7821_v56 = vpop.f32.mrb[207].mxu1 }
 0x68f   :  { %v10974_v9 = vpop.eup %10973  ;;  %10983 = vrcp.f32 %v8242_v21  ;;  %v9633_v19 = vadd.f32 %v7424_v41, %v14915_v37  ;;  %v7426_v2 = vpop.f32.mrb[254].mxu0  ;;  %8030 = vmatprep.mubr.bf16.mxu1 %v7620_v47 }
 0x690   :  { %8431 = vst [vmem:[%s15331_s7] sm:$0xff] %v10974_v9  ;;  %10985 = vpow2.f32 %v9098_v43  ;;  %v9099_v5 = vmul.f32 -1.442695, %v7820_v18  ;;  %v9634_v49 = vadd.f32 %v7426_v2, %v14910_v38  ;;  %v7428_v53 = vpop.f32.mrb[255].mxu0  ;;  %8031 = vmatmul.mubr.bf16.gmra.mrb[56].mxu1 %v7619_v0  ;;  %v7555_v20 = vmax.f32 %v9632_v57, 0.0 }
 0x691   :  { %v10976_v46 = vpop.eup %10975  ;;  %v9635_v29 = vadd.f32 %v7428_v53, %v14915_v37  ;;  %v7556_v51 = vmax.f32 %v9633_v19, 0.0 }
 0x692   :  { %v10978_v30 = vpop.eup %10977  ;;  %8432 = vst [vmem:[%s15331_s7 + $0x8] sm:$0xff] %v10976_v46  ;;  %10987 = vpow2.f32 %v9099_v5  ;;  %v7557_v61 = vmax.f32 %v9634_v49, 0.0 }
 0x693   :  { %v8243_v1 = vadd.f32 1.0, %v10978_v30  ;;  %v7558_v40 = vmax.f32 %v9635_v29, 0.0  ;;  %v7824_v62 = vpop.f32.mrb[208].mxu1 }
 0x694   :  { %v10980_v58 = vpop.eup %10979  ;;  %v7621_v17 = vpack.c.bf16 %v7557_v61, %v7555_v20  ;;  %v7825_v38 = vadd.f32 %v15045_v12, %v7824_v62  ;;  %v7826_v50 = vpop.f32.mrb[209].mxu1 }
 0x695   :  { %10989 = vrcp.f32 %v8243_v1  ;;  %v8244_v22 = vadd.f32 1.0, %v10980_v58  ;;  %v7622_v37 = vpack.c.bf16 %v7558_v40, %v7556_v51  ;;  %v7827_v25 = vpop.f32.mrb[210].mxu1 }
 0x696   :  { %v9100_v54 = vmul.f32 -1.442695, %v7825_v38  ;;  %v7828_v14 = vadd.f32 %v15045_v12, %v7827_v25  ;;  %v7829_v23 = vpop.f32.mrb[211].mxu1 }
 0x697   :  { %v10982_v7 = vpop.eup %10981  ;;  %10991 = vrcp.f32 %v8244_v22  ;;  %8038 = vmatprep.mubr.bf16.mxu1 %v7622_v37 }
 0x698   :  { %8433 = vst [vmem:[%s15331_s7 + $0x10] sm:$0xff] %v10982_v7  ;;  %10993 = vpow2.f32 %v9100_v54  ;;  %v9101_v48 = vmul.f32 -1.442695, %v7828_v14  ;;  %8039 = vmatmul.mubr.bf16.gmra.mrb[60].mxu1 %v7621_v17 }
 0x699   :  { %v10984_v52 = vpop.eup %10983 }
 0x69a   :  { %v10986_v39 = vpop.eup %10985  ;;  %8434 = vst [vmem:[%s15331_s7 + $0x18] sm:$0xff] %v10984_v52  ;;  %10995 = vpow2.f32 %v9101_v48 }
 0x69b   :  { %v8245_v55 = vadd.f32 1.0, %v10986_v39  ;;  %v7832_v10 = vpop.f32.mrb[212].mxu1 }
 0x69c   :  { %v10988_v45 = vpop.eup %10987  ;;  %v7833_v34 = vadd.f32 %v15045_v12, %v7832_v10  ;;  %v7834_v63 = vpop.f32.mrb[213].mxu1 }
 0x69d   :  { %10997 = vrcp.f32 %v8245_v55  ;;  %v8246_v59 = vadd.f32 1.0, %v10988_v45  ;;  %v7835_v3 = vpop.f32.mrb[214].mxu1 }
 0x69e   :  { %v9102_v32 = vmul.f32 -1.442695, %v7833_v34  ;;  %v7836_v8 = vadd.f32 %v15045_v12, %v7835_v3  ;;  %v7837_v11 = vpop.f32.mrb[215].mxu1 }
 0x69f   :  { %v10990_v36 = vpop.eup %10989  ;;  %10999 = vrcp.f32 %v8246_v59 }
 0x6a0   :  { %8435 = vst [vmem:[%s15331_s7 + $0x20] sm:$0xff] %v10990_v36  ;;  %11001 = vpow2.f32 %v9102_v32  ;;  %v9103_v13 = vmul.f32 -1.442695, %v7836_v8 }
 0x6a1   :  { %v10992_v60 = vpop.eup %10991 }
 0x6a2   :  { %v10994_v44 = vpop.eup %10993  ;;  %8436 = vst [vmem:[%s15331_s7 + $0x28] sm:$0xff] %v10992_v60  ;;  %11003 = vpow2.f32 %v9103_v13 }
 0x6a3   :  { %v8247_v26 = vadd.f32 1.0, %v10994_v44  ;;  %v7840_v24 = vpop.f32.mrb[216].mxu1 }
 0x6a4   :  { %v10996_v28 = vpop.eup %10995  ;;  %v7841_v6 = vadd.f32 %v15045_v12, %v7840_v24  ;;  %v7842_v16 = vpop.f32.mrb[217].mxu1 }
 0x6a5   :  { %11005 = vrcp.f32 %v8247_v26  ;;  %v8248_v4 = vadd.f32 1.0, %v10996_v28  ;;  %v7843_v15 = vpop.f32.mrb[218].mxu1 }
 0x6a6   :  { %v9104_v27 = vmul.f32 -1.442695, %v7841_v6  ;;  %v7844_v0 = vadd.f32 %v15045_v12, %v7843_v15  ;;  %v7845_v33 = vpop.f32.mrb[219].mxu1 }
 0x6a7   :  { %v10998_v31 = vpop.eup %10997  ;;  %11007 = vrcp.f32 %v8248_v4 }
 0x6a8   :  { %8437 = vst [vmem:[%s15331_s7 + $0x30] sm:$0xff] %v10998_v31  ;;  %11009 = vpow2.f32 %v9104_v27  ;;  %v9105_v21 = vmul.f32 -1.442695, %v7844_v0 }
 0x6a9   :  { %v11000_v47 = vpop.eup %10999 }
 0x6aa   :  { %v11002_v42 = vpop.eup %11001  ;;  %8438 = vst [vmem:[%s15331_s7 + $0x38] sm:$0xff] %v11000_v47  ;;  %11011 = vpow2.f32 %v9105_v21 }
 0x6ab   :  { %v8249_v35 = vadd.f32 1.0, %v11002_v42  ;;  %v7848_v43 = vpop.f32.mrb[220].mxu1 }
 0x6ac   :  { %v11004_v57 = vpop.eup %11003  ;;  %v7849_v18 = vadd.f32 %v15045_v12, %v7848_v43  ;;  %v7850_v41 = vpop.f32.mrb[221].mxu1 }
 0x6ad   :  { %11013 = vrcp.f32 %v8249_v35  ;;  %v8250_v56 = vadd.f32 1.0, %v11004_v57  ;;  %v7851_v9 = vpop.f32.mrb[222].mxu1 }
 0x6ae   :  { %v9106_v19 = vmul.f32 -1.442695, %v7849_v18  ;;  %v7852_v2 = vadd.f32 %v15045_v12, %v7851_v9  ;;  %v7853_v5 = vpop.f32.mrb[223].mxu1 }
 0x6af   :  { %v11006_v49 = vpop.eup %11005  ;;  %11015 = vrcp.f32 %v8250_v56 }
 0x6b0   :  { %8439 = vst [vmem:[%s15331_s7 + $0x40] sm:$0xff] %v11006_v49  ;;  %11017 = vpow2.f32 %v9106_v19  ;;  %v9107_v53 = vmul.f32 -1.442695, %v7852_v2 }
 0x6b1   :  { %v11008_v46 = vpop.eup %11007 }
 0x6b2   :  { %v11010_v29 = vpop.eup %11009  ;;  %8440 = vst [vmem:[%s15331_s7 + $0x48] sm:$0xff] %v11008_v46  ;;  %11019 = vpow2.f32 %v9107_v53 }
 0x6b3   :  { %v8251_v30 = vadd.f32 1.0, %v11010_v29  ;;  %v7856_v20 = vpop.f32.mrb[224].mxu1 }
 0x6b4   :  { %v11012_v61 = vpop.eup %11011  ;;  %v7857_v1 = vadd.f32 %v15045_v12, %v7856_v20  ;;  %v7858_v51 = vpop.f32.mrb[225].mxu1 }
 0x6b5   :  { %11021 = vrcp.f32 %v8251_v30  ;;  %v8252_v40 = vadd.f32 1.0, %v11012_v61  ;;  %v7859_v62 = vpop.f32.mrb[226].mxu1 }
 0x6b6   :  { %v9108_v58 = vmul.f32 -1.442695, %v7857_v1  ;;  %v7860_v17 = vadd.f32 %v15045_v12, %v7859_v62  ;;  %v7861_v38 = vpop.f32.mrb[227].mxu1 }
 0x6b7   :  { %v11014_v50 = vpop.eup %11013  ;;  %11023 = vrcp.f32 %v8252_v40 }
 0x6b8   :  { %8441 = vst [vmem:[%s15331_s7 + $0x50] sm:$0xff] %v11014_v50  ;;  %11025 = vpow2.f32 %v9108_v58  ;;  %v9109_v22 = vmul.f32 -1.442695, %v7860_v17 }
 0x6b9   :  { %v11016_v37 = vpop.eup %11015 }
 0x6ba   :  { %v11018_v25 = vpop.eup %11017  ;;  %8442 = vst [vmem:[%s15331_s7 + $0x58] sm:$0xff] %v11016_v37  ;;  %11027 = vpow2.f32 %v9109_v22 }
 0x6bb   :  { %v8253_v54 = vadd.f32 1.0, %v11018_v25  ;;  %v7864_v14 = vpop.f32.mrb[228].mxu1 }
 0x6bc   :  { %v11020_v23 = vpop.eup %11019  ;;  %v7865_v7 = vadd.f32 %v15045_v12, %v7864_v14  ;;  %v7866_v48 = vpop.f32.mrb[229].mxu1 }
 0x6bd   :  { %11029 = vrcp.f32 %v8253_v54  ;;  %v8254_v52 = vadd.f32 1.0, %v11020_v23  ;;  %v7867_v39 = vpop.f32.mrb[230].mxu1 }
 0x6be   :  { %v9110_v55 = vmul.f32 -1.442695, %v7865_v7  ;;  %v7868_v10 = vadd.f32 %v15045_v12, %v7867_v39  ;;  %v7869_v45 = vpop.f32.mrb[231].mxu1 }
 0x6bf   :  { %v11022_v34 = vpop.eup %11021  ;;  %11031 = vrcp.f32 %v8254_v52 }
 0x6c0   :  { %8443 = vst [vmem:[%s15331_s7 + $0x60] sm:$0xff] %v11022_v34  ;;  %11033 = vpow2.f32 %v9110_v55  ;;  %v9111_v63 = vmul.f32 -1.442695, %v7868_v10 }
 0x6c1   :  { %v11024_v59 = vpop.eup %11023 }
 0x6c2   :  { %v11026_v3 = vpop.eup %11025  ;;  %8444 = vst [vmem:[%s15331_s7 + $0x68] sm:$0xff] %v11024_v59  ;;  %11035 = vpow2.f32 %v9111_v63 }
 0x6c3   :  { %v8255_v32 = vadd.f32 1.0, %v11026_v3  ;;  %v7872_v8 = vpop.f32.mrb[232].mxu1 }
 0x6c4   :  { %v11028_v11 = vpop.eup %11027  ;;  %v7873_v36 = vadd.f32 %v15045_v12, %v7872_v8  ;;  %v7874_v13 = vpop.f32.mrb[233].mxu1 }
 0x6c5   :  { %11037 = vrcp.f32 %v8255_v32  ;;  %v8256_v60 = vadd.f32 1.0, %v11028_v11  ;;  %v7875_v44 = vpop.f32.mrb[234].mxu1 }
 0x6c6   :  { %v9112_v26 = vmul.f32 -1.442695, %v7873_v36  ;;  %v7876_v24 = vadd.f32 %v15045_v12, %v7875_v44  ;;  %v7877_v28 = vpop.f32.mrb[235].mxu1 }
 0x6c7   :  { %v11030_v6 = vpop.eup %11029  ;;  %11039 = vrcp.f32 %v8256_v60 }
 0x6c8   :  { %8445 = vst [vmem:[%s15331_s7 + $0x70] sm:$0xff] %v11030_v6  ;;  %11041 = vpow2.f32 %v9112_v26  ;;  %v9113_v16 = vmul.f32 -1.442695, %v7876_v24 }
 0x6c9   :  { %v11032_v4 = vpop.eup %11031 }
 0x6ca   :  { %v11034_v15 = vpop.eup %11033  ;;  %8446 = vst [vmem:[%s15331_s7 + $0x78] sm:$0xff] %v11032_v4  ;;  %11043 = vpow2.f32 %v9113_v16 }
 0x6cb   :  { %v8257_v27 = vadd.f32 1.0, %v11034_v15  ;;  %v7880_v0 = vpop.f32.mrb[236].mxu1 }
 0x6cc   :  { %v11036_v33 = vpop.eup %11035  ;;  %v7881_v31 = vadd.f32 %v15045_v12, %v7880_v0  ;;  %v7882_v21 = vpop.f32.mrb[237].mxu1 }
 0x6cd   :  { %11045 = vrcp.f32 %v8257_v27  ;;  %v8258_v47 = vadd.f32 1.0, %v11036_v33  ;;  %v7883_v42 = vpop.f32.mrb[238].mxu1 }
 0x6ce   :  { %v9114_v35 = vmul.f32 -1.442695, %v7881_v31  ;;  %v7884_v43 = vadd.f32 %v15045_v12, %v7883_v42  ;;  %v7885_v57 = vpop.f32.mrb[239].mxu1 }
 0x6cf   :  { %v11038_v18 = vpop.eup %11037  ;;  %11047 = vrcp.f32 %v8258_v47 }
 0x6d0   :  { %8447 = vst [vmem:[%s15331_s7 + $0x80] sm:$0xff] %v11038_v18  ;;  %11049 = vpow2.f32 %v9114_v35  ;;  %v9115_v41 = vmul.f32 -1.442695, %v7884_v43 }
 0x6d1   :  { %v11040_v56 = vpop.eup %11039 }
 0x6d2   :  { %v11042_v9 = vpop.eup %11041  ;;  %8448 = vst [vmem:[%s15331_s7 + $0x88] sm:$0xff] %v11040_v56  ;;  %11051 = vpow2.f32 %v9115_v41 }
 0x6d3   :  { %v8259_v19 = vadd.f32 1.0, %v11042_v9  ;;  %v7888_v2 = vpop.f32.mrb[240].mxu1 }
 0x6d4   :  { %v11044_v5 = vpop.eup %11043  ;;  %v7889_v49 = vadd.f32 %v15045_v12, %v7888_v2  ;;  %v7890_v53 = vpop.f32.mrb[241].mxu1 }
 0x6d5   :  { %11053 = vrcp.f32 %v8259_v19  ;;  %v8260_v46 = vadd.f32 1.0, %v11044_v5  ;;  %v7891_v29 = vpop.f32.mrb[242].mxu1 }
 0x6d6   :  { %v9116_v30 = vmul.f32 -1.442695, %v7889_v49  ;;  %v7892_v20 = vadd.f32 %v15045_v12, %v7891_v29  ;;  %v7893_v61 = vpop.f32.mrb[243].mxu1 }
 0x6d7   :  { %v11046_v1 = vpop.eup %11045  ;;  %11055 = vrcp.f32 %v8260_v46 }
 0x6d8   :  { %8449 = vst [vmem:[%s15331_s7 + $0x90] sm:$0xff] %v11046_v1  ;;  %11057 = vpow2.f32 %v9116_v30  ;;  %v9117_v51 = vmul.f32 -1.442695, %v7892_v20 }
 0x6d9   :  { %v11048_v40 = vpop.eup %11047 }
 0x6da   :  { %v11050_v62 = vpop.eup %11049  ;;  %8450 = vst [vmem:[%s15331_s7 + $0x98] sm:$0xff] %v11048_v40  ;;  %11059 = vpow2.f32 %v9117_v51 }
 0x6db   :  { %v8261_v58 = vadd.f32 1.0, %v11050_v62  ;;  %v7896_v17 = vpop.f32.mrb[244].mxu1 }
 0x6dc   :  { %v11052_v38 = vpop.eup %11051  ;;  %v7897_v50 = vadd.f32 %v15045_v12, %v7896_v17  ;;  %v7898_v22 = vpop.f32.mrb[245].mxu1 }
 0x6dd   :  { %11061 = vrcp.f32 %v8261_v58  ;;  %v8262_v37 = vadd.f32 1.0, %v11052_v38  ;;  %v7899_v25 = vpop.f32.mrb[246].mxu1 }
 0x6de   :  { %v9118_v54 = vmul.f32 -1.442695, %v7897_v50  ;;  %v7900_v14 = vadd.f32 %v15045_v12, %v7899_v25  ;;  %v7901_v23 = vpop.f32.mrb[247].mxu1 }
 0x6df   :  { %v11054_v7 = vpop.eup %11053  ;;  %11063 = vrcp.f32 %v8262_v37 }
 0x6e0   :  { %8451 = vst [vmem:[%s15331_s7 + $0xa0] sm:$0xff] %v11054_v7  ;;  %11065 = vpow2.f32 %v9118_v54  ;;  %v9119_v48 = vmul.f32 -1.442695, %v7900_v14 }
 0x6e1   :  { %v11056_v52 = vpop.eup %11055 }
 0x6e2   :  { %v11058_v39 = vpop.eup %11057  ;;  %8452 = vst [vmem:[%s15331_s7 + $0xa8] sm:$0xff] %v11056_v52  ;;  %11067 = vpow2.f32 %v9119_v48 }
 0x6e3   :  { %v8263_v55 = vadd.f32 1.0, %v11058_v39  ;;  %v7904_v10 = vpop.f32.mrb[248].mxu1 }
 0x6e4   :  { %v11060_v45 = vpop.eup %11059  ;;  %v7905_v34 = vadd.f32 %v15045_v12, %v7904_v10  ;;  %v7906_v63 = vpop.f32.mrb[249].mxu1 }
 0x6e5   :  { %11069 = vrcp.f32 %v8263_v55  ;;  %v8264_v59 = vadd.f32 1.0, %v11060_v45  ;;  %v7907_v3 = vpop.f32.mrb[250].mxu1 }
 0x6e6   :  { %v9120_v32 = vmul.f32 -1.442695, %v7905_v34  ;;  %v7908_v8 = vadd.f32 %v15045_v12, %v7907_v3  ;;  %v7909_v11 = vpop.f32.mrb[251].mxu1 }
 0x6e7   :  { %v11062_v36 = vpop.eup %11061  ;;  %11071 = vrcp.f32 %v8264_v59 }
 0x6e8   :  { %8453 = vst [vmem:[%s15331_s7 + $0xb0] sm:$0xff] %v11062_v36  ;;  %11073 = vpow2.f32 %v9120_v32  ;;  %v9121_v13 = vmul.f32 -1.442695, %v7908_v8 }
 0x6e9   :  { %v11064_v60 = vpop.eup %11063 }
 0x6ea   :  { %v11066_v44 = vpop.eup %11065  ;;  %8454 = vst [vmem:[%s15331_s7 + $0xb8] sm:$0xff] %v11064_v60  ;;  %11075 = vpow2.f32 %v9121_v13 }
 0x6eb   :  { %v8265_v26 = vadd.f32 1.0, %v11066_v44  ;;  %v7912_v24 = vpop.f32.mrb[252].mxu1 }
 0x6ec   :  { %v11068_v28 = vpop.eup %11067  ;;  %v7913_v6 = vadd.f32 %v15045_v12, %v7912_v24  ;;  %v7914_v16 = vpop.f32.mrb[253].mxu1 }
 0x6ed   :  { %11077 = vrcp.f32 %v8265_v26  ;;  %v8266_v4 = vadd.f32 1.0, %v11068_v28  ;;  %v7915_v15 = vpop.f32.mrb[254].mxu1 }
 0x6ee   :  { %v9122_v27 = vmul.f32 -1.442695, %v7913_v6  ;;  %v7916_v0 = vadd.f32 %v15045_v12, %v7915_v15  ;;  %v7917_v33 = vpop.f32.mrb[255].mxu1 }
 0x6ef   :  { %v11070_v31 = vpop.eup %11069  ;;  %11079 = vrcp.f32 %v8266_v4 }
 0x6f0   :  { %8455 = vst [vmem:[%s15331_s7 + $0xc0] sm:$0xff] %v11070_v31  ;;  %11081 = vpow2.f32 %v9122_v27  ;;  %v9123_v21 = vmul.f32 -1.442695, %v7916_v0 }
 0x6f1   :  { %v11072_v47 = vpop.eup %11071 }
 0x6f2   :  { %v11074_v42 = vpop.eup %11073  ;;  %8456 = vst [vmem:[%s15331_s7 + $0xc8] sm:$0xff] %v11072_v47  ;;  %11083 = vpow2.f32 %v9123_v21 }
 0x6f3   :  { %v8267_v35 = vadd.f32 1.0, %v11074_v42  ;;  %v7920_v43 = vpop.f32.mrb[0].mxu1 }
 0x6f4   :  { %v11076_v57 = vpop.eup %11075  ;;  %v7921_v18 = vadd.f32 %v15045_v12, %v7920_v43  ;;  %v7922_v41 = vpop.f32.mrb[1].mxu1 }
 0x6f5   :  { %11085 = vrcp.f32 %v8267_v35  ;;  %v8268_v56 = vadd.f32 1.0, %v11076_v57  ;;  %v7923_v9 = vpop.f32.mrb[2].mxu1 }
 0x6f6   :  { %v9124_v19 = vmul.f32 -1.442695, %v7921_v18  ;;  %v7924_v2 = vadd.f32 %v15045_v12, %v7923_v9  ;;  %v7925_v5 = vpop.f32.mrb[3].mxu1 }
 0x6f7   :  { %v11078_v49 = vpop.eup %11077  ;;  %11087 = vrcp.f32 %v8268_v56 }
 0x6f8   :  { %8457 = vst [vmem:[%s15331_s7 + $0xd0] sm:$0xff] %v11078_v49  ;;  %11089 = vpow2.f32 %v9124_v19  ;;  %v9125_v53 = vmul.f32 -1.442695, %v7924_v2 }
 0x6f9   :  { %v11080_v46 = vpop.eup %11079 }
 0x6fa   :  { %v11082_v29 = vpop.eup %11081  ;;  %8458 = vst [vmem:[%s15331_s7 + $0xd8] sm:$0xff] %v11080_v46  ;;  %11091 = vpow2.f32 %v9125_v53 }
 0x6fb   :  { %v8269_v30 = vadd.f32 1.0, %v11082_v29  ;;  %v7928_v20 = vpop.f32.mrb[4].mxu1 }
 0x6fc   :  { %v11084_v61 = vpop.eup %11083  ;;  %v7929_v1 = vadd.f32 %v15045_v12, %v7928_v20  ;;  %v7930_v51 = vpop.f32.mrb[5].mxu1 }
 0x6fd   :  { %11093 = vrcp.f32 %v8269_v30  ;;  %v8270_v40 = vadd.f32 1.0, %v11084_v61  ;;  %v7931_v62 = vpop.f32.mrb[6].mxu1 }
 0x6fe   :  { %v9126_v58 = vmul.f32 -1.442695, %v7929_v1  ;;  %v7932_v17 = vadd.f32 %v15045_v12, %v7931_v62  ;;  %v7933_v38 = vpop.f32.mrb[7].mxu1 }
 0x6ff   :  { %v11086_v50 = vpop.eup %11085  ;;  %11095 = vrcp.f32 %v8270_v40 }
 0x700   :  { %8459 = vst [vmem:[%s15331_s7 + $0xe0] sm:$0xff] %v11086_v50  ;;  %11097 = vpow2.f32 %v9126_v58  ;;  %v9127_v22 = vmul.f32 -1.442695, %v7932_v17 }
 0x701   :  { %v11088_v37 = vpop.eup %11087 }
 0x702   :  { %v11090_v25 = vpop.eup %11089  ;;  %8460 = vst [vmem:[%s15331_s7 + $0xe8] sm:$0xff] %v11088_v37  ;;  %11099 = vpow2.f32 %v9127_v22 }
 0x703   :  { %v8271_v54 = vadd.f32 1.0, %v11090_v25  ;;  %v7936_v14 = vpop.f32.mrb[8].mxu1 }
 0x704   :  { %v11092_v23 = vpop.eup %11091  ;;  %v7937_v7 = vadd.f32 %v15045_v12, %v7936_v14  ;;  %v7938_v48 = vpop.f32.mrb[9].mxu1 }
 0x705   :  { %11101 = vrcp.f32 %v8271_v54  ;;  %v8272_v52 = vadd.f32 1.0, %v11092_v23  ;;  %v7939_v39 = vpop.f32.mrb[10].mxu1 }
 0x706   :  { %v9128_v55 = vmul.f32 -1.442695, %v7937_v7  ;;  %v7940_v10 = vadd.f32 %v15045_v12, %v7939_v39  ;;  %v7941_v45 = vpop.f32.mrb[11].mxu1 }
 0x707   :  { %v11094_v34 = vpop.eup %11093  ;;  %11103 = vrcp.f32 %v8272_v52 }
 0x708   :  { %8461 = vst [vmem:[%s15331_s7 + $0xf0] sm:$0xff] %v11094_v34  ;;  %11105 = vpow2.f32 %v9128_v55  ;;  %v9129_v63 = vmul.f32 -1.442695, %v7940_v10 }
 0x709   :  { %v11096_v59 = vpop.eup %11095 }
 0x70a   :  { %v11098_v3 = vpop.eup %11097  ;;  %8462 = vst [vmem:[%s15331_s7 + $0xf8] sm:$0xff] %v11096_v59  ;;  %11107 = vpow2.f32 %v9129_v63 }
 0x70b   :  { %v8273_v32 = vadd.f32 1.0, %v11098_v3  ;;  %v7944_v8 = vpop.f32.mrb[12].mxu1 }
 0x70c   :  { %v11100_v11 = vpop.eup %11099  ;;  %v7945_v36 = vadd.f32 %v15045_v12, %v7944_v8  ;;  %v7946_v13 = vpop.f32.mrb[13].mxu1 }
 0x70d   :  { %11109 = vrcp.f32 %v8273_v32  ;;  %v8274_v60 = vadd.f32 1.0, %v11100_v11  ;;  %v7947_v44 = vpop.f32.mrb[14].mxu1 }
 0x70e   :  { %v9130_v26 = vmul.f32 -1.442695, %v7945_v36  ;;  %v7948_v24 = vadd.f32 %v15045_v12, %v7947_v44  ;;  %v7949_v28 = vpop.f32.mrb[15].mxu1 }
 0x70f   :  { %v11102_v6 = vpop.eup %11101  ;;  %11111 = vrcp.f32 %v8274_v60 }
 0x710   :  { %8463 = vst [vmem:[%s15331_s7 + $0x100] sm:$0xff] %v11102_v6  ;;  %11113 = vpow2.f32 %v9130_v26  ;;  %v9131_v16 = vmul.f32 -1.442695, %v7948_v24 }
 0x711   :  { %v11104_v4 = vpop.eup %11103 }
 0x712   :  { %v11106_v15 = vpop.eup %11105  ;;  %8464 = vst [vmem:[%s15331_s7 + $0x108] sm:$0xff] %v11104_v4  ;;  %11115 = vpow2.f32 %v9131_v16 }
 0x713   :  { %v8275_v27 = vadd.f32 1.0, %v11106_v15  ;;  %v7952_v0 = vpop.f32.mrb[16].mxu1 }
 0x714   :  { %v11108_v33 = vpop.eup %11107  ;;  %v7953_v31 = vadd.f32 %v15045_v12, %v7952_v0  ;;  %v7954_v21 = vpop.f32.mrb[17].mxu1 }
 0x715   :  { %11117 = vrcp.f32 %v8275_v27  ;;  %v8276_v47 = vadd.f32 1.0, %v11108_v33  ;;  %v7955_v42 = vpop.f32.mrb[18].mxu1 }
 0x716   :  { %v9132_v35 = vmul.f32 -1.442695, %v7953_v31  ;;  %v7956_v43 = vadd.f32 %v15045_v12, %v7955_v42  ;;  %v7957_v57 = vpop.f32.mrb[19].mxu1 }
 0x717   :  { %v11110_v18 = vpop.eup %11109  ;;  %11119 = vrcp.f32 %v8276_v47 }
 0x718   :  { %8465 = vst [vmem:[%s15331_s7 + $0x110] sm:$0xff] %v11110_v18  ;;  %11121 = vpow2.f32 %v9132_v35  ;;  %v9133_v41 = vmul.f32 -1.442695, %v7956_v43 }
 0x719   :  { %v11112_v56 = vpop.eup %11111 }
 0x71a   :  { %v11114_v9 = vpop.eup %11113  ;;  %8466 = vst [vmem:[%s15331_s7 + $0x118] sm:$0xff] %v11112_v56  ;;  %11123 = vpow2.f32 %v9133_v41 }
 0x71b   :  { %v8277_v19 = vadd.f32 1.0, %v11114_v9  ;;  %v7960_v2 = vpop.f32.mrb[20].mxu1 }
 0x71c   :  { %v11116_v5 = vpop.eup %11115  ;;  %v7961_v49 = vadd.f32 %v15045_v12, %v7960_v2  ;;  %v7962_v53 = vpop.f32.mrb[21].mxu1 }
 0x71d   :  { %11125 = vrcp.f32 %v8277_v19  ;;  %v8278_v46 = vadd.f32 1.0, %v11116_v5  ;;  %v7963_v29 = vpop.f32.mrb[22].mxu1 }
 0x71e   :  { %v9134_v30 = vmul.f32 -1.442695, %v7961_v49  ;;  %v7964_v20 = vadd.f32 %v15045_v12, %v7963_v29  ;;  %v7965_v61 = vpop.f32.mrb[23].mxu1 }
 0x71f   :  { %v11118_v1 = vpop.eup %11117  ;;  %11127 = vrcp.f32 %v8278_v46 }
 0x720   :  { %8467 = vst [vmem:[%s15331_s7 + $0x120] sm:$0xff] %v11118_v1  ;;  %11129 = vpow2.f32 %v9134_v30  ;;  %v9135_v51 = vmul.f32 -1.442695, %v7964_v20 }
 0x721   :  { %v11120_v40 = vpop.eup %11119 }
 0x722   :  { %v11122_v62 = vpop.eup %11121  ;;  %8468 = vst [vmem:[%s15331_s7 + $0x128] sm:$0xff] %v11120_v40  ;;  %11131 = vpow2.f32 %v9135_v51 }
 0x723   :  { %v8279_v58 = vadd.f32 1.0, %v11122_v62  ;;  %v7968_v17 = vpop.f32.mrb[24].mxu1 }
 0x724   :  { %v11124_v38 = vpop.eup %11123  ;;  %v7969_v50 = vadd.f32 %v15045_v12, %v7968_v17  ;;  %v7970_v22 = vpop.f32.mrb[25].mxu1 }
 0x725   :  { %11133 = vrcp.f32 %v8279_v58  ;;  %v8280_v37 = vadd.f32 1.0, %v11124_v38  ;;  %v7971_v25 = vpop.f32.mrb[26].mxu1 }
 0x726   :  { %v9136_v54 = vmul.f32 -1.442695, %v7969_v50  ;;  %v7972_v14 = vadd.f32 %v15045_v12, %v7971_v25  ;;  %v7973_v23 = vpop.f32.mrb[27].mxu1  ;;  %v15232_v12 = vld [vmem:[%s15330_s6] ss:$0 sm:$0xff] }
 0x727   :  { %v11126_v7 = vpop.eup %11125  ;;  %11135 = vrcp.f32 %v8280_v37 }
 0x728   :  { %8469 = vst [vmem:[%s15331_s7 + $0x130] sm:$0xff] %v11126_v7  ;;  %11137 = vpow2.f32 %v9136_v54  ;;  %v9137_v48 = vmul.f32 -1.442695, %v7972_v14 }
 0x729   :  { %v11128_v52 = vpop.eup %11127 }
 0x72a   :  { %v11130_v39 = vpop.eup %11129  ;;  %8470 = vst [vmem:[%s15331_s7 + $0x138] sm:$0xff] %v11128_v52  ;;  %11139 = vpow2.f32 %v9137_v48 }
 0x72b   :  { %v8281_v55 = vadd.f32 1.0, %v11130_v39  ;;  %v7976_v10 = vpop.f32.mrb[28].mxu1 }
 0x72c   :  { %v11132_v45 = vpop.eup %11131  ;;  %v7977_v34 = vadd.f32 %v15232_v12, %v7976_v10  ;;  %v7978_v63 = vpop.f32.mrb[29].mxu1 }
 0x72d   :  { %11141 = vrcp.f32 %v8281_v55  ;;  %v8282_v59 = vadd.f32 1.0, %v11132_v45  ;;  %v7979_v3 = vpop.f32.mrb[30].mxu1 }
 0x72e   :  { %v9138_v32 = vmul.f32 -1.442695, %v7977_v34  ;;  %v7980_v8 = vadd.f32 %v15232_v12, %v7979_v3  ;;  %v7981_v11 = vpop.f32.mrb[31].mxu1 }
 0x72f   :  { %v11134_v36 = vpop.eup %11133  ;;  %11143 = vrcp.f32 %v8282_v59 }
 0x730   :  { %8471 = vst [vmem:[%s15331_s7 + $0x140] sm:$0xff] %v11134_v36  ;;  %11145 = vpow2.f32 %v9138_v32  ;;  %v9139_v13 = vmul.f32 -1.442695, %v7980_v8 }
 0x731   :  { %v11136_v60 = vpop.eup %11135 }
 0x732   :  { %v11138_v44 = vpop.eup %11137  ;;  %8472 = vst [vmem:[%s15331_s7 + $0x148] sm:$0xff] %v11136_v60  ;;  %11147 = vpow2.f32 %v9139_v13 }
 0x733   :  { %v8283_v26 = vadd.f32 1.0, %v11138_v44  ;;  %v7984_v24 = vpop.f32.mrb[32].mxu1 }
 0x734   :  { %v11140_v28 = vpop.eup %11139  ;;  %v7985_v6 = vadd.f32 %v15232_v12, %v7984_v24  ;;  %v7986_v16 = vpop.f32.mrb[33].mxu1 }
 0x735   :  { %11149 = vrcp.f32 %v8283_v26  ;;  %v8284_v4 = vadd.f32 1.0, %v11140_v28  ;;  %v7987_v15 = vpop.f32.mrb[34].mxu1 }
 0x736   :  { %v9140_v27 = vmul.f32 -1.442695, %v7985_v6  ;;  %v7988_v0 = vadd.f32 %v15232_v12, %v7987_v15  ;;  %v7989_v33 = vpop.f32.mrb[35].mxu1 }
 0x737   :  { %v11142_v31 = vpop.eup %11141  ;;  %11151 = vrcp.f32 %v8284_v4 }
 0x738   :  { %8473 = vst [vmem:[%s15331_s7 + $0x150] sm:$0xff] %v11142_v31  ;;  %11153 = vpow2.f32 %v9140_v27  ;;  %v9141_v21 = vmul.f32 -1.442695, %v7988_v0 }
 0x739   :  { %v11144_v47 = vpop.eup %11143 }
 0x73a   :  { %v11146_v42 = vpop.eup %11145  ;;  %8474 = vst [vmem:[%s15331_s7 + $0x158] sm:$0xff] %v11144_v47  ;;  %11155 = vpow2.f32 %v9141_v21 }
 0x73b   :  { %v8285_v35 = vadd.f32 1.0, %v11146_v42  ;;  %v7992_v43 = vpop.f32.mrb[36].mxu1 }
 0x73c   :  { %v11148_v57 = vpop.eup %11147  ;;  %v7993_v18 = vadd.f32 %v15232_v12, %v7992_v43  ;;  %v7994_v41 = vpop.f32.mrb[37].mxu1 }
 0x73d   :  { %11157 = vrcp.f32 %v8285_v35  ;;  %v8286_v56 = vadd.f32 1.0, %v11148_v57  ;;  %v7995_v9 = vpop.f32.mrb[38].mxu1 }
 0x73e   :  { %v9142_v19 = vmul.f32 -1.442695, %v7993_v18  ;;  %v7996_v2 = vadd.f32 %v15232_v12, %v7995_v9  ;;  %v7997_v5 = vpop.f32.mrb[39].mxu1 }
 0x73f   :  { %v11150_v49 = vpop.eup %11149  ;;  %11159 = vrcp.f32 %v8286_v56 }
 0x740   :  { %8475 = vst [vmem:[%s15331_s7 + $0x160] sm:$0xff] %v11150_v49  ;;  %11161 = vpow2.f32 %v9142_v19  ;;  %v9143_v53 = vmul.f32 -1.442695, %v7996_v2 }
 0x741   :  { %v11152_v46 = vpop.eup %11151 }
 0x742   :  { %v11154_v29 = vpop.eup %11153  ;;  %8476 = vst [vmem:[%s15331_s7 + $0x168] sm:$0xff] %v11152_v46  ;;  %11163 = vpow2.f32 %v9143_v53 }
 0x743   :  { %v8287_v30 = vadd.f32 1.0, %v11154_v29  ;;  %v8000_v20 = vpop.f32.mrb[40].mxu1 }
 0x744   :  { %v11156_v61 = vpop.eup %11155  ;;  %v8001_v1 = vadd.f32 %v15232_v12, %v8000_v20  ;;  %v8002_v51 = vpop.f32.mrb[41].mxu1 }
 0x745   :  { %11165 = vrcp.f32 %v8287_v30  ;;  %v8288_v40 = vadd.f32 1.0, %v11156_v61  ;;  %v8003_v62 = vpop.f32.mrb[42].mxu1 }
 0x746   :  { %v9144_v58 = vmul.f32 -1.442695, %v8001_v1  ;;  %v8004_v17 = vadd.f32 %v15232_v12, %v8003_v62  ;;  %v8005_v38 = vpop.f32.mrb[43].mxu1 }
 0x747   :  { %v11158_v50 = vpop.eup %11157  ;;  %11167 = vrcp.f32 %v8288_v40 }
 0x748   :  { %8477 = vst [vmem:[%s15331_s7 + $0x170] sm:$0xff] %v11158_v50  ;;  %11169 = vpow2.f32 %v9144_v58  ;;  %v9145_v22 = vmul.f32 -1.442695, %v8004_v17 }
 0x749   :  { %v11160_v37 = vpop.eup %11159 }
 0x74a   :  { %v11162_v25 = vpop.eup %11161  ;;  %8478 = vst [vmem:[%s15331_s7 + $0x178] sm:$0xff] %v11160_v37  ;;  %11171 = vpow2.f32 %v9145_v22 }
 0x74b   :  { %v8289_v54 = vadd.f32 1.0, %v11162_v25  ;;  %v8008_v14 = vpop.f32.mrb[44].mxu1 }
 0x74c   :  { %v11164_v23 = vpop.eup %11163  ;;  %v8009_v7 = vadd.f32 %v15232_v12, %v8008_v14  ;;  %v8010_v48 = vpop.f32.mrb[45].mxu1 }
 0x74d   :  { %11173 = vrcp.f32 %v8289_v54  ;;  %v8290_v52 = vadd.f32 1.0, %v11164_v23  ;;  %v8011_v39 = vpop.f32.mrb[46].mxu1 }
 0x74e   :  { %v9146_v55 = vmul.f32 -1.442695, %v8009_v7  ;;  %v8012_v10 = vadd.f32 %v15232_v12, %v8011_v39  ;;  %v8013_v45 = vpop.f32.mrb[47].mxu1 }
 0x74f   :  { %v11166_v34 = vpop.eup %11165  ;;  %11175 = vrcp.f32 %v8290_v52 }
 0x750   :  { %8479 = vst [vmem:[%s15331_s7 + $0x180] sm:$0xff] %v11166_v34  ;;  %11177 = vpow2.f32 %v9146_v55  ;;  %v9147_v63 = vmul.f32 -1.442695, %v8012_v10 }
 0x751   :  { %v11168_v59 = vpop.eup %11167 }
 0x752   :  { %v11170_v3 = vpop.eup %11169  ;;  %8480 = vst [vmem:[%s15331_s7 + $0x188] sm:$0xff] %v11168_v59  ;;  %11179 = vpow2.f32 %v9147_v63 }
 0x753   :  { %v8291_v32 = vadd.f32 1.0, %v11170_v3  ;;  %v8016_v8 = vpop.f32.mrb[48].mxu1 }
 0x754   :  { %v11172_v11 = vpop.eup %11171  ;;  %v8017_v36 = vadd.f32 %v15232_v12, %v8016_v8  ;;  %v8018_v13 = vpop.f32.mrb[49].mxu1 }
 0x755   :  { %11181 = vrcp.f32 %v8291_v32  ;;  %v8292_v60 = vadd.f32 1.0, %v11172_v11  ;;  %v8019_v44 = vpop.f32.mrb[50].mxu1 }
 0x756   :  { %v9148_v26 = vmul.f32 -1.442695, %v8017_v36  ;;  %v8020_v24 = vadd.f32 %v15232_v12, %v8019_v44  ;;  %v8021_v28 = vpop.f32.mrb[51].mxu1 }
 0x757   :  { %v11174_v6 = vpop.eup %11173  ;;  %11183 = vrcp.f32 %v8292_v60 }
 0x758   :  { %8481 = vst [vmem:[%s15331_s7 + $0x190] sm:$0xff] %v11174_v6  ;;  %11185 = vpow2.f32 %v9148_v26  ;;  %v9149_v16 = vmul.f32 -1.442695, %v8020_v24 }
 0x759   :  { %v11176_v4 = vpop.eup %11175 }
 0x75a   :  { %v11178_v15 = vpop.eup %11177  ;;  %8482 = vst [vmem:[%s15331_s7 + $0x198] sm:$0xff] %v11176_v4  ;;  %11187 = vpow2.f32 %v9149_v16 }
 0x75b   :  { %v8293_v27 = vadd.f32 1.0, %v11178_v15  ;;  %v8024_v0 = vpop.f32.mrb[52].mxu1 }
 0x75c   :  { %v11180_v33 = vpop.eup %11179  ;;  %v8025_v31 = vadd.f32 %v15232_v12, %v8024_v0  ;;  %v8026_v21 = vpop.f32.mrb[53].mxu1 }
 0x75d   :  { %11189 = vrcp.f32 %v8293_v27  ;;  %v8294_v47 = vadd.f32 1.0, %v11180_v33  ;;  %v8027_v42 = vpop.f32.mrb[54].mxu1 }
 0x75e   :  { %v9150_v35 = vmul.f32 -1.442695, %v8025_v31  ;;  %v8028_v43 = vadd.f32 %v15232_v12, %v8027_v42  ;;  %v8029_v57 = vpop.f32.mrb[55].mxu1 }
 0x75f   :  { %v11182_v18 = vpop.eup %11181  ;;  %11191 = vrcp.f32 %v8294_v47 }
 0x760   :  { %8483 = vst [vmem:[%s15331_s7 + $0x1a0] sm:$0xff] %v11182_v18  ;;  %11193 = vpow2.f32 %v9150_v35  ;;  %v9151_v41 = vmul.f32 -1.442695, %v8028_v43 }
 0x761   :  { %v11184_v56 = vpop.eup %11183 }
 0x762   :  { %v11186_v9 = vpop.eup %11185  ;;  %8484 = vst [vmem:[%s15331_s7 + $0x1a8] sm:$0xff] %v11184_v56  ;;  %11195 = vpow2.f32 %v9151_v41 }
 0x763   :  { %v8295_v19 = vadd.f32 1.0, %v11186_v9  ;;  %v8032_v2 = vpop.f32.mrb[56].mxu1 }
 0x764   :  { %v11188_v5 = vpop.eup %11187  ;;  %v8033_v49 = vadd.f32 %v15232_v12, %v8032_v2  ;;  %v8034_v53 = vpop.f32.mrb[57].mxu1 }
 0x765   :  { %11197 = vrcp.f32 %v8295_v19  ;;  %v8296_v46 = vadd.f32 1.0, %v11188_v5  ;;  %v8035_v29 = vpop.f32.mrb[58].mxu1 }
 0x766   :  { %v9152_v30 = vmul.f32 -1.442695, %v8033_v49  ;;  %v8036_v20 = vadd.f32 %v15232_v12, %v8035_v29  ;;  %v8037_v61 = vpop.f32.mrb[59].mxu1 }
 0x767   :  { %v11190_v1 = vpop.eup %11189  ;;  %11199 = vrcp.f32 %v8296_v46 }
 0x768   :  { %8485 = vst [vmem:[%s15331_s7 + $0x1b0] sm:$0xff] %v11190_v1  ;;  %11201 = vpow2.f32 %v9152_v30  ;;  %v9153_v51 = vmul.f32 -1.442695, %v8036_v20 }
 0x769   :  { %v11192_v40 = vpop.eup %11191 }
 0x76a   :  { %v11194_v62 = vpop.eup %11193  ;;  %8486 = vst [vmem:[%s15331_s7 + $0x1b8] sm:$0xff] %v11192_v40  ;;  %11203 = vpow2.f32 %v9153_v51 }
 0x76b   :  { %v8297_v58 = vadd.f32 1.0, %v11194_v62  ;;  %v8040_v17 = vpop.f32.mrb[60].mxu1 }
 0x76c   :  { %v11196_v38 = vpop.eup %11195  ;;  %v8041_v50 = vadd.f32 %v15232_v12, %v8040_v17  ;;  %v8042_v22 = vpop.f32.mrb[61].mxu1 }
 0x76d   :  { %11205 = vrcp.f32 %v8297_v58  ;;  %v8298_v37 = vadd.f32 1.0, %v11196_v38  ;;  %v8043_v25 = vpop.f32.mrb[62].mxu1 }
 0x76e   :  { %v9154_v54 = vmul.f32 -1.442695, %v8041_v50  ;;  %v8044_v14 = vadd.f32 %v15232_v12, %v8043_v25  ;;  %v8045_v23 = vpop.f32.mrb[63].mxu1 }
 0x76f   :  { %v11198_v7 = vpop.eup %11197  ;;  %11207 = vrcp.f32 %v8298_v37 }
 0x770   :  { %8487 = vst [vmem:[%s15331_s7 + $0x1c0] sm:$0xff] %v11198_v7  ;;  %11209 = vpow2.f32 %v9154_v54  ;;  %v9155_v48 = vmul.f32 -1.442695, %v8044_v14 }
 0x771   :  { %v11200_v52 = vpop.eup %11199 }
 0x772   :  { %v11202_v39 = vpop.eup %11201  ;;  %8488 = vst [vmem:[%s15331_s7 + $0x1c8] sm:$0xff] %v11200_v52  ;;  %11211 = vpow2.f32 %v9155_v48 }
 0x773   :  { %v8299_v55 = vadd.f32 1.0, %v11202_v39 }
 0x774   :  { %v11204_v10 = vpop.eup %11203 }
 0x775   :  { %11213 = vrcp.f32 %v8299_v55  ;;  %v8300_v12 = vadd.f32 1.0, %v11204_v10 }
 0x777   :  { %v11206_v45 = vpop.eup %11205  ;;  %11215 = vrcp.f32 %v8300_v12 }
 0x778   :  { %8489 = vst [vmem:[%s15331_s7 + $0x1d0] sm:$0xff] %v11206_v45 }
 0x779   :  { %v11208_v34 = vpop.eup %11207 }
 0x77a   :  { %v11210_v63 = vpop.eup %11209  ;;  %8490 = vst [vmem:[%s15331_s7 + $0x1d8] sm:$0xff] %v11208_v34 }
 0x77b   :  { %v8301_v59 = vadd.f32 1.0, %v11210_v63 }
 0x77c   :  { %v11212_v3 = vpop.eup %11211 }
 0x77d   :  { %11217 = vrcp.f32 %v8301_v59  ;;  %v8302_v32 = vadd.f32 1.0, %v11212_v3 }
 0x77f   :  { %v11214_v8 = vpop.eup %11213  ;;  %11219 = vrcp.f32 %v8302_v32 }
 0x780   :  { %8491 = vst [vmem:[%s15331_s7 + $0x1e0] sm:$0xff] %v11214_v8 }
 0x781   :  { %v11216_v11 = vpop.eup %11215 }
 0x782   :  { %8492 = vst [vmem:[%s15331_s7 + $0x1e8] sm:$0xff] %v11216_v11 }
 0x787   :  { %v11218_v36 = vpop.eup %11217 }
 0x788   :  { %8493 = vst [vmem:[%s15331_s7 + $0x1f0] sm:$0xff] %v11218_v36 }
 0x789   :  { %v11220_v13 = vpop.eup %11219 }
 0x78a   :  { %8494 = vst [vmem:[%s15331_s7 + $0x1f8] sm:$0xff] %v11220_v13 }

</bundles_post_ra>
